<compile_context>
chip_gen: v7x
topology: tpu7x:2x2x1
jax: 0.10.0
libtpu: 0.0.40
codegen_flags: <defaults>
</compile_context>

<pallas_src>
import numpy as np

import jax
import jax.numpy as jnp
from jax.experimental import pallas as pl
from jax.experimental.pallas import tpu as pltpu


S_PER_STEP = 8  # samples per grid step


# ----------------------------------------------------------------------------
# Fused LeNet kernel: one grid step == S samples.
# ----------------------------------------------------------------------------
def _make_kernel(S):
    f32, bf16 = jnp.float32, jnp.bfloat16

    def kernel(x_ref, lbl_ref,                              # (S,30,30) f32 / (S,1) i32
               bd1_ref, bd2_ref,                            # (5,30,156)/(5,90,176) bf16
               re1p_ref, ro1p_ref, ce1p_ref, co1p_ref,      # pool1(+pad) selectors bf16
               re2_ref, ro2_ref, ce2_ref, co2_ref,          # pool2 selectors bf16
               b1t_ref, b2p_ref,                            # (1,156)/(1,80) f32 biases
               fc1w_ref, fc1b_ref,                          # (400,120) bf16 / (1,120) f32
               fc2w_ref, fc2b_ref,                          # (120,84) bf16 / (1,84) f32
               fc3w_ref, fc3b_ref,                          # (84,10) bf16 / (1,10) f32
               out_ref,                                     # (S,2) f32
               feat_ref):                                   # (S,400) f32 VMEM scratch
        # ---- convs + pools, per sample (weights stay VMEM-resident) ----------
        for s in range(S):
            xp = x_ref[s].astype(bf16)                      # (30,30), zero-padded

            # conv1 (5x5, pad=1): 5 banded matmuls, kw folded into the RHS.
            y1 = jnp.zeros((26, 156), f32)                  # lanes = ow*6 + cout
            for kh in range(5):
                y1 = y1 + jnp.dot(xp[kh:kh + 26, :], bd1_ref[kh],
                                  preferred_element_type=f32)
            y1 = jnp.maximum(y1 + b1t_ref[...], 0.0).astype(bf16)

            # maxpool 2x2/2 + zero-pad(1) for conv2, via bf16 selection matmuls.
            rm1 = jnp.maximum(
                jnp.dot(re1p_ref[...], y1, preferred_element_type=f32),
                jnp.dot(ro1p_ref[...], y1, preferred_element_type=f32)).astype(bf16)   # (15,156)
            p1 = jnp.maximum(
                jnp.dot(rm1, ce1p_ref[...], preferred_element_type=f32),
                jnp.dot(rm1, co1p_ref[...], preferred_element_type=f32)).astype(bf16)  # (15,90)
            # p1[1+a, 6 + b*6 + ci] = pooled relu(conv1); border rows/lanes exact zeros.

            # conv2 (5x5, pad=1): 5 banded matmuls.
            y2 = jnp.zeros((11, 176), f32)                  # lanes = ow*16 + cout
            for kh in range(5):
                y2 = y2 + jnp.dot(p1[kh:kh + 11, :], bd2_ref[kh],
                                  preferred_element_type=f32)
            y2 = y2.astype(bf16)

            # maxpool 2x2/2 (floor), then bias + ReLU (commute with max-pool).
            rm2 = jnp.maximum(
                jnp.dot(re2_ref[...], y2, preferred_element_type=f32),
                jnp.dot(ro2_ref[...], y2, preferred_element_type=f32)).astype(bf16)    # (5,176)
            p2 = jnp.maximum(
                jnp.dot(rm2, ce2_ref[...], preferred_element_type=f32),
                jnp.dot(rm2, co2_ref[...], preferred_element_type=f32))                # (5,80)
            p2 = jnp.maximum(p2 + b2p_ref[...], 0.0)

            # Flatten into torch's x.view(N,-1) order (fc1 weight host-permuted to match).
            for a in range(5):
                feat_ref[pl.ds(s, 1), pl.ds(a * 80, 80)] = p2[a:a + 1, :]

        # ---- fc1 -> fc2 -> fc3, batched over the S samples of this step -------
        feat = feat_ref[...].astype(bf16)                                    # (S,400)
        h = jnp.dot(feat, fc1w_ref[...], preferred_element_type=f32) + fc1b_ref[...]
        h = jnp.maximum(h, 0.0).astype(bf16)
        h = jnp.dot(h, fc2w_ref[...], preferred_element_type=f32) + fc2b_ref[...]
        h = jnp.maximum(h, 0.0).astype(bf16)
        logits = jnp.dot(h, fc3w_ref[...], preferred_element_type=f32) + fc3b_ref[...]  # (S,10)

        # ---- per-sample cross-entropy + top-1 correctness, one (S,2) block ----
        labels = lbl_ref[...]                                                # (S,1) int32
        m = jnp.max(logits, axis=1, keepdims=True)
        lse = m + jnp.log(jnp.sum(jnp.exp(logits - m), axis=1, keepdims=True))
        col = jax.lax.broadcasted_iota(jnp.int32, (S, 10), 1)
        picked = jnp.sum(jnp.where(col == labels, logits, 0.0), axis=1, keepdims=True)
        pred = jnp.min(jnp.where(logits == m, col, 10), axis=1, keepdims=True)  # first max
        out_ref[...] = jnp.concatenate(
            [lse - picked, (pred == labels).astype(f32)], axis=1)            # (S,2)

    return kernel


# ----------------------------------------------------------------------------
# One-time host-side repacking of parameters into kernel operand layouts.
# ----------------------------------------------------------------------------
def _pool_selectors(conv_size, pooled, cout):
    """bf16 0/1 matrices implementing 2x2 stride-2 max pooling via matmul + max."""
    a = np.arange(pooled)
    re = np.zeros((pooled, conv_size), np.float32); re[a, 2 * a] = 1.0
    ro = np.zeros((pooled, conv_size), np.float32); ro[a, 2 * a + 1] = 1.0
    we = np.zeros((conv_size, pooled), np.float32); we[2 * a, a] = 1.0
    wo = np.zeros((conv_size, pooled), np.float32); wo[2 * a + 1, a] = 1.0
    ce = np.kron(we, np.eye(cout, dtype=np.float32))
    co = np.kron(wo, np.eye(cout, dtype=np.float32))
    b = lambda m: jnp.asarray(m, dtype=jnp.bfloat16)
    return b(re), b(ro), b(ce), b(co)


def _pool_pad_selectors_conv1():
    """Pool1 selectors that also place the result into a zero-padded (15,90) map
    (pad=1 border for conv2), so no in-kernel padding/scatter is needed."""
    a = np.arange(13)
    re = np.zeros((15, 26), np.float32); re[a + 1, 2 * a] = 1.0
    ro = np.zeros((15, 26), np.float32); ro[a + 1, 2 * a + 1] = 1.0
    we = np.zeros((26, 13), np.float32); we[2 * a, a] = 1.0
    wo = np.zeros((26, 13), np.float32); wo[2 * a + 1, a] = 1.0
    z6 = np.zeros((156, 6), np.float32)
    ce = np.concatenate([z6, np.kron(we, np.eye(6, dtype=np.float32)), z6], axis=1)
    co = np.concatenate([z6, np.kron(wo, np.eye(6, dtype=np.float32)), z6], axis=1)
    b = lambda m: jnp.asarray(m, dtype=jnp.bfloat16)
    return b(re), b(ro), b(ce), b(co)


def prepare_operands(params):
    """Repack PyTorch-layout LeNet params once (outside the per-step forward)."""
    bf16 = jnp.bfloat16

    # conv1 banded per-kh RHS: B1[kh, iw, ow*6+co] = w1[co, 0, kh, iw-ow].
    c1 = np.asarray(params["c1_w"], np.float32)                       # (6,1,5,5)
    b1 = np.zeros((5, 30, 26, 6), np.float32)
    for kh in range(5):
        for kw in range(5):
            for ow in range(26):
                b1[kh, ow + kw, ow, :] = c1[:, 0, kh, kw]
    bd1 = jnp.asarray(b1.reshape(5, 30, 156), dtype=bf16)

    # conv2 banded per-kh RHS: B2[kh, iw*6+ci, ow*16+co] = w2[co, ci, kh, iw-ow].
    c2 = np.asarray(params["c2_w"], np.float32)                       # (16,6,5,5)
    b2 = np.zeros((5, 15, 6, 11, 16), np.float32)
    for kh in range(5):
        for kw in range(5):
            for ow in range(11):
                b2[kh, ow + kw, :, ow, :] = c2[:, :, kh, kw].T        # [ci, co]
    bd2 = jnp.asarray(b2.reshape(5, 90, 176), dtype=bf16)

    # biases tiled over the channel-minor lane layouts (kept f32).
    b1t = jnp.asarray(np.tile(np.asarray(params["c1_b"], np.float32), 26).reshape(1, 156))
    b2p = jnp.asarray(np.tile(np.asarray(params["c2_b"], np.float32), 5).reshape(1, 80))

    re1p, ro1p, ce1p, co1p = _pool_pad_selectors_conv1()
    re2, ro2, ce2, co2 = _pool_selectors(11, 5, 16)

    # fc1 permuted so the (a, b*16+co) flatten order matches torch's NCHW view.
    w1 = np.asarray(params["fc1_w"], np.float32).reshape(120, 16, 5, 5)
    fc1w = jnp.asarray(np.transpose(w1, (2, 3, 1, 0)).reshape(400, 120), dtype=bf16)
    fc1b = jnp.asarray(np.asarray(params["fc1_b"], np.float32).reshape(1, 120))
    fc2w = jnp.asarray(np.asarray(params["fc2_w"], np.float32).T, dtype=bf16)
    fc2b = jnp.asarray(np.asarray(params["fc2_b"], np.float32).reshape(1, 84))
    fc3w = jnp.asarray(np.asarray(params["fc3_w"], np.float32).T, dtype=bf16)
    fc3b = jnp.asarray(np.asarray(params["fc3_b"], np.float32).reshape(1, 10))

    return dict(bd1=bd1, bd2=bd2,
                re1p=re1p, ro1p=ro1p, ce1p=ce1p, co1p=co1p,
                re2=re2, ro2=ro2, ce2=ce2, co2=co2,
                b1t=b1t, b2p=b2p,
                fc1w=fc1w, fc1b=fc1b, fc2w=fc2w, fc2b=fc2b, fc3w=fc3w, fc3b=fc3b)


# ----------------------------------------------------------------------------
# Forward pass: one fused pallas_call over the (padded) batch.
# ----------------------------------------------------------------------------
@jax.jit
def lenet_forward(ops, x_nchw, labels):
    S = S_PER_STEP
    n = x_nchw.shape[0]
    n_pad = ((n + S - 1) // S) * S

    # Host glue: squeeze Cin=1, 1-pixel zero pad for conv1, pad batch to a multiple of S.
    x = jnp.pad(x_nchw[:, 0].astype(jnp.float32),
                ((0, n_pad - n), (1, 1), (1, 1)))                       # (n_pad, 30, 30)
    lbl = jnp.pad(labels.astype(jnp.int32), ((0, n_pad - n),)).reshape(n_pad, 1)

    w_ops = (ops["bd1"], ops["bd2"],
             ops["re1p"], ops["ro1p"], ops["ce1p"], ops["co1p"],
             ops["re2"], ops["ro2"], ops["ce2"], ops["co2"],
             ops["b1t"], ops["b2p"],
             ops["fc1w"], ops["fc1b"], ops["fc2w"], ops["fc2b"],
             ops["fc3w"], ops["fc3b"])

    def const_spec(arr):
        nd = arr.ndim
        return pl.BlockSpec(arr.shape, lambda i, _nd=nd: (0,) * _nd)

    grid_spec = pltpu.PrefetchScalarGridSpec(
        num_scalar_prefetch=0,
        grid=(n_pad // S,),
        in_specs=[pl.BlockSpec((S, 30, 30), lambda i: (i, 0, 0)),
                  pl.BlockSpec((S, 1), lambda i: (i, 0))]
                + [const_spec(a) for a in w_ops],
        out_specs=pl.BlockSpec((S, 2), lambda i: (i, 0)),
        scratch_shapes=[pltpu.VMEM((S, 400), jnp.float32)],
    )

    out = pl.pallas_call(
        _make_kernel(S),
        out_shape=jax.ShapeDtypeStruct((n_pad, 2), jnp.float32),
        grid_spec=grid_spec,
        compiler_params=pltpu.CompilerParams(
            dimension_semantics=("parallel",),
            vmem_limit_bytes=32 * 1024 * 1024),
    )(x, lbl, *w_ops)

    # Batch means over the real (unpadded) samples only (tiny host-glue reduction).
    loss = jnp.mean(out[:n, 0])
    acc = jnp.mean(out[:n, 1])
    return loss, acc


# ----------------------------------------------------------------------------
# Param init (PyTorch layouts) and driver.
# ----------------------------------------------------------------------------
def init_params(key):
    ks = jax.random.split(key, 10)

    def w(k, shape, fan_in):
        return (jax.random.normal(k, shape, jnp.float32) / jnp.sqrt(fan_in)).astype(jnp.float32)

    return {
        "c1_w": w(ks[0], (6, 1, 5, 5), 25),    "c1_b": 0.01 * jax.random.normal(ks[1], (6,), jnp.float32),
        "c2_w": w(ks[2], (16, 6, 5, 5), 150),  "c2_b": 0.01 * jax.random.normal(ks[3], (16,), jnp.float32),
        "fc1_w": w(ks[4], (120, 400), 400),    "fc1_b": 0.01 * jax.random.normal(ks[5], (120,), jnp.float32),
        "fc2_w": w(ks[6], (84, 120), 120),     "fc2_b": 0.01 * jax.random.normal(ks[7], (84,), jnp.float32),
        "fc3_w": w(ks[8], (10, 84), 84),       "fc3_b": 0.01 * jax.random.normal(ks[9], (10,), jnp.float32),
    }


if __name__ == "__main__":
    key = jax.random.PRNGKey(0)
    k_params, k_x, k_lbl = jax.random.split(key, 3)

    params = init_params(k_params)
    ops = prepare_operands(params)          # one-time weight repacking (host glue)

    batch = 2
    # Spatial size 28 is forced by the fc1 input of 16*5*5 = 400.
    x = jax.random.normal(k_x, (batch, 1, 28, 28), jnp.float32)   # NCHW, like PyTorch
    labels = jax.random.randint(k_lbl, (batch,), 0, 10, jnp.int32)

    loss, acc = lenet_forward(ops, x, labels)
    jax.block_until_ready((loss, acc))

    assert bool(jnp.isfinite(loss)) and bool(jnp.isfinite(acc))
    print("KERNEL_OK")
</pallas_src>

<mosaic_0001>
module attributes {stable_mosaic.version = 11 : i64} {
  func.func @kernel(%arg0: i32, %arg1: memref<8x30x30xf32, #tpu.memory_space<vmem>>, %arg2: memref<8x1xi32, #tpu.memory_space<vmem>>, %arg3: memref<5x30x156xbf16, #tpu.memory_space<vmem>>, %arg4: memref<5x90x176xbf16, #tpu.memory_space<vmem>>, %arg5: memref<15x26xbf16, #tpu.memory_space<vmem>>, %arg6: memref<15x26xbf16, #tpu.memory_space<vmem>>, %arg7: memref<156x90xbf16, #tpu.memory_space<vmem>>, %arg8: memref<156x90xbf16, #tpu.memory_space<vmem>>, %arg9: memref<5x11xbf16, #tpu.memory_space<vmem>>, %arg10: memref<5x11xbf16, #tpu.memory_space<vmem>>, %arg11: memref<176x80xbf16, #tpu.memory_space<vmem>>, %arg12: memref<176x80xbf16, #tpu.memory_space<vmem>>, %arg13: memref<1x156xf32, #tpu.memory_space<vmem>>, %arg14: memref<1x80xf32, #tpu.memory_space<vmem>>, %arg15: memref<400x120xbf16, #tpu.memory_space<vmem>>, %arg16: memref<1x120xf32, #tpu.memory_space<vmem>>, %arg17: memref<120x84xbf16, #tpu.memory_space<vmem>>, %arg18: memref<1x84xf32, #tpu.memory_space<vmem>>, %arg19: memref<84x10xbf16, #tpu.memory_space<vmem>>, %arg20: memref<1x10xf32, #tpu.memory_space<vmem>>, %arg21: memref<8x2xf32, #tpu.memory_space<vmem>>, %arg22: memref<8x400xf32, #tpu.memory_space<vmem>>) attributes {dimension_semantics = [#tpu.dimension_semantics<parallel>], iteration_bounds = array<i64: 1>, scalar_prefetch = 0 : i64, scratch_operands = 1 : i64, tpu.core_type = #tpu.core_type<tc>, window_params = [{transform_indices = @transform_0, window_bounds = array<i64: 8, 30, 30>}, {transform_indices = @transform_1, window_bounds = array<i64: 8, 1>}, {pipeline_mode = #tpu.pipeline_mode<synchronous>, transform_indices = @transform_2, window_bounds = array<i64: 5, 30, 156>}, {pipeline_mode = #tpu.pipeline_mode<synchronous>, transform_indices = @transform_3, window_bounds = array<i64: 5, 90, 176>}, {pipeline_mode = #tpu.pipeline_mode<synchronous>, transform_indices = @transform_4, window_bounds = array<i64: 15, 26>}, {pipeline_mode = #tpu.pipeline_mode<synchronous>, transform_indices = @transform_5, window_bounds = array<i64: 15, 26>}, {pipeline_mode = #tpu.pipeline_mode<synchronous>, transform_indices = @transform_6, window_bounds = array<i64: 156, 90>}, {pipeline_mode = #tpu.pipeline_mode<synchronous>, transform_indices = @transform_7, window_bounds = array<i64: 156, 90>}, {pipeline_mode = #tpu.pipeline_mode<synchronous>, transform_indices = @transform_8, window_bounds = array<i64: 5, 11>}, {pipeline_mode = #tpu.pipeline_mode<synchronous>, transform_indices = @transform_9, window_bounds = array<i64: 5, 11>}, {pipeline_mode = #tpu.pipeline_mode<synchronous>, transform_indices = @transform_10, window_bounds = array<i64: 176, 80>}, {pipeline_mode = #tpu.pipeline_mode<synchronous>, transform_indices = @transform_11, window_bounds = array<i64: 176, 80>}, {pipeline_mode = #tpu.pipeline_mode<synchronous>, transform_indices = @transform_12, window_bounds = array<i64: 1, 156>}, {pipeline_mode = #tpu.pipeline_mode<synchronous>, transform_indices = @transform_13, window_bounds = array<i64: 1, 80>}, {pipeline_mode = #tpu.pipeline_mode<synchronous>, transform_indices = @transform_14, window_bounds = array<i64: 400, 120>}, {pipeline_mode = #tpu.pipeline_mode<synchronous>, transform_indices = @transform_15, window_bounds = array<i64: 1, 120>}, {pipeline_mode = #tpu.pipeline_mode<synchronous>, transform_indices = @transform_16, window_bounds = array<i64: 120, 84>}, {pipeline_mode = #tpu.pipeline_mode<synchronous>, transform_indices = @transform_17, window_bounds = array<i64: 1, 84>}, {pipeline_mode = #tpu.pipeline_mode<synchronous>, transform_indices = @transform_18, window_bounds = array<i64: 84, 10>}, {pipeline_mode = #tpu.pipeline_mode<synchronous>, transform_indices = @transform_19, window_bounds = array<i64: 1, 10>}, {transform_indices = @transform_20, window_bounds = array<i64: 8, 2>}]} {
    %c0 = arith.constant 0 : index
    %c0_0 = arith.constant 0 : index
    %c0_1 = arith.constant 0 : index
    %0 = vector.load %arg1[%c0, %c0_0, %c0_1] : memref<8x30x30xf32, #tpu.memory_space<vmem>>, vector<1x30x30xf32>
    %1 = vector.shape_cast %0 : vector<1x30x30xf32> to vector<30x30xf32>
    %2 = arith.truncf %1 : vector<30x30xf32> to vector<30x30xbf16>
    %cst = arith.constant 0.000000e+00 : f32
    %3 = vector.broadcast %cst : f32 to vector<26x156xf32>
    %4 = vector.extract_strided_slice %2 {offsets = [0, 0], sizes = [26, 30], strides = [1, 1]} : vector<30x30xbf16> to vector<26x30xbf16>
    %c0_2 = arith.constant 0 : index
    %c0_3 = arith.constant 0 : index
    %c0_4 = arith.constant 0 : index
    %5 = vector.load %arg3[%c0_2, %c0_3, %c0_4] : memref<5x30x156xbf16, #tpu.memory_space<vmem>>, vector<1x30x156xbf16>
    %6 = vector.shape_cast %5 : vector<1x30x156xbf16> to vector<30x156xbf16>
    %cst_5 = arith.constant dense<0.000000e+00> : vector<26x156xf32>
    %7 = tpu.matmul %4, %6, %cst_5 {dimension_numbers = #tpu.dot_dimension_numbers<[1], [0], [0], [1], [0, 0, 1, 1], [], []>} : vector<26x30xbf16>, vector<30x156xbf16>, vector<26x156xf32> -> vector<26x156xf32>
    %8 = arith.addf %3, %7 : vector<26x156xf32>
    %9 = vector.extract_strided_slice %2 {offsets = [1, 0], sizes = [26, 30], strides = [1, 1]} : vector<30x30xbf16> to vector<26x30xbf16>
    %c1 = arith.constant 1 : index
    %c0_6 = arith.constant 0 : index
    %c0_7 = arith.constant 0 : index
    %10 = vector.load %arg3[%c1, %c0_6, %c0_7] : memref<5x30x156xbf16, #tpu.memory_space<vmem>>, vector<1x30x156xbf16>
    %11 = vector.shape_cast %10 : vector<1x30x156xbf16> to vector<30x156xbf16>
    %cst_8 = arith.constant dense<0.000000e+00> : vector<26x156xf32>
    %12 = tpu.matmul %9, %11, %cst_8 {dimension_numbers = #tpu.dot_dimension_numbers<[1], [0], [0], [1], [0, 0, 1, 1], [], []>} : vector<26x30xbf16>, vector<30x156xbf16>, vector<26x156xf32> -> vector<26x156xf32>
    %13 = arith.addf %8, %12 : vector<26x156xf32>
    %14 = vector.extract_strided_slice %2 {offsets = [2, 0], sizes = [26, 30], strides = [1, 1]} : vector<30x30xbf16> to vector<26x30xbf16>
    %c2 = arith.constant 2 : index
    %c0_9 = arith.constant 0 : index
    %c0_10 = arith.constant 0 : index
    %15 = vector.load %arg3[%c2, %c0_9, %c0_10] : memref<5x30x156xbf16, #tpu.memory_space<vmem>>, vector<1x30x156xbf16>
    %16 = vector.shape_cast %15 : vector<1x30x156xbf16> to vector<30x156xbf16>
    %cst_11 = arith.constant dense<0.000000e+00> : vector<26x156xf32>
    %17 = tpu.matmul %14, %16, %cst_11 {dimension_numbers = #tpu.dot_dimension_numbers<[1], [0], [0], [1], [0, 0, 1, 1], [], []>} : vector<26x30xbf16>, vector<30x156xbf16>, vector<26x156xf32> -> vector<26x156xf32>
    %18 = arith.addf %13, %17 : vector<26x156xf32>
    %19 = vector.extract_strided_slice %2 {offsets = [3, 0], sizes = [26, 30], strides = [1, 1]} : vector<30x30xbf16> to vector<26x30xbf16>
    %c3 = arith.constant 3 : index
    %c0_12 = arith.constant 0 : index
    %c0_13 = arith.constant 0 : index
    %20 = vector.load %arg3[%c3, %c0_12, %c0_13] : memref<5x30x156xbf16, #tpu.memory_space<vmem>>, vector<1x30x156xbf16>
    %21 = vector.shape_cast %20 : vector<1x30x156xbf16> to vector<30x156xbf16>
    %cst_14 = arith.constant dense<0.000000e+00> : vector<26x156xf32>
    %22 = tpu.matmul %19, %21, %cst_14 {dimension_numbers = #tpu.dot_dimension_numbers<[1], [0], [0], [1], [0, 0, 1, 1], [], []>} : vector<26x30xbf16>, vector<30x156xbf16>, vector<26x156xf32> -> vector<26x156xf32>
    %23 = arith.addf %18, %22 : vector<26x156xf32>
    %24 = vector.extract_strided_slice %2 {offsets = [4, 0], sizes = [26, 30], strides = [1, 1]} : vector<30x30xbf16> to vector<26x30xbf16>
    %c4 = arith.constant 4 : index
    %c0_15 = arith.constant 0 : index
    %c0_16 = arith.constant 0 : index
    %25 = vector.load %arg3[%c4, %c0_15, %c0_16] : memref<5x30x156xbf16, #tpu.memory_space<vmem>>, vector<1x30x156xbf16>
    %26 = vector.shape_cast %25 : vector<1x30x156xbf16> to vector<30x156xbf16>
    %cst_17 = arith.constant dense<0.000000e+00> : vector<26x156xf32>
    %27 = tpu.matmul %24, %26, %cst_17 {dimension_numbers = #tpu.dot_dimension_numbers<[1], [0], [0], [1], [0, 0, 1, 1], [], []>} : vector<26x30xbf16>, vector<30x156xbf16>, vector<26x156xf32> -> vector<26x156xf32>
    %28 = arith.addf %23, %27 : vector<26x156xf32>
    %c0_18 = arith.constant 0 : index
    %c0_19 = arith.constant 0 : index
    %29 = vector.load %arg13[%c0_18, %c0_19] : memref<1x156xf32, #tpu.memory_space<vmem>>, vector<1x156xf32>
    %30 = vector.broadcast %29 : vector<1x156xf32> to vector<26x156xf32>
    %31 = arith.addf %28, %30 : vector<26x156xf32>
    %cst_20 = arith.constant 0.000000e+00 : f32
    %32 = vector.broadcast %cst_20 : f32 to vector<26x156xf32>
    %33 = arith.maximumf %31, %32 : vector<26x156xf32>
    %34 = arith.truncf %33 : vector<26x156xf32> to vector<26x156xbf16>
    %c0_21 = arith.constant 0 : index
    %c0_22 = arith.constant 0 : index
    %35 = vector.load %arg5[%c0_21, %c0_22] : memref<15x26xbf16, #tpu.memory_space<vmem>>, vector<15x26xbf16>
    %cst_23 = arith.constant dense<0.000000e+00> : vector<15x156xf32>
    %36 = tpu.matmul %35, %34, %cst_23 {dimension_numbers = #tpu.dot_dimension_numbers<[1], [0], [0], [1], [0, 0, 1, 1], [], []>} : vector<15x26xbf16>, vector<26x156xbf16>, vector<15x156xf32> -> vector<15x156xf32>
    %c0_24 = arith.constant 0 : index
    %c0_25 = arith.constant 0 : index
    %37 = vector.load %arg6[%c0_24, %c0_25] : memref<15x26xbf16, #tpu.memory_space<vmem>>, vector<15x26xbf16>
    %cst_26 = arith.constant dense<0.000000e+00> : vector<15x156xf32>
    %38 = tpu.matmul %37, %34, %cst_26 {dimension_numbers = #tpu.dot_dimension_numbers<[1], [0], [0], [1], [0, 0, 1, 1], [], []>} : vector<15x26xbf16>, vector<26x156xbf16>, vector<15x156xf32> -> vector<15x156xf32>
    %39 = arith.maximumf %36, %38 : vector<15x156xf32>
    %40 = arith.truncf %39 : vector<15x156xf32> to vector<15x156xbf16>
    %c0_27 = arith.constant 0 : index
    %c0_28 = arith.constant 0 : index
    %41 = vector.load %arg7[%c0_27, %c0_28] : memref<156x90xbf16, #tpu.memory_space<vmem>>, vector<156x90xbf16>
    %cst_29 = arith.constant dense<0.000000e+00> : vector<15x90xf32>
    %42 = tpu.matmul %40, %41, %cst_29 {dimension_numbers = #tpu.dot_dimension_numbers<[1], [0], [0], [1], [0, 0, 1, 1], [], []>} : vector<15x156xbf16>, vector<156x90xbf16>, vector<15x90xf32> -> vector<15x90xf32>
    %c0_30 = arith.constant 0 : index
    %c0_31 = arith.constant 0 : index
    %43 = vector.load %arg8[%c0_30, %c0_31] : memref<156x90xbf16, #tpu.memory_space<vmem>>, vector<156x90xbf16>
    %cst_32 = arith.constant dense<0.000000e+00> : vector<15x90xf32>
    %44 = tpu.matmul %40, %43, %cst_32 {dimension_numbers = #tpu.dot_dimension_numbers<[1], [0], [0], [1], [0, 0, 1, 1], [], []>} : vector<15x156xbf16>, vector<156x90xbf16>, vector<15x90xf32> -> vector<15x90xf32>
    %45 = arith.maximumf %42, %44 : vector<15x90xf32>
    %46 = arith.truncf %45 : vector<15x90xf32> to vector<15x90xbf16>
    %cst_33 = arith.constant 0.000000e+00 : f32
    %47 = vector.broadcast %cst_33 : f32 to vector<11x176xf32>
    %48 = vector.extract_strided_slice %46 {offsets = [0, 0], sizes = [11, 90], strides = [1, 1]} : vector<15x90xbf16> to vector<11x90xbf16>
    %c0_34 = arith.constant 0 : index
    %c0_35 = arith.constant 0 : index
    %c0_36 = arith.constant 0 : index
    %49 = vector.load %arg4[%c0_34, %c0_35, %c0_36] : memref<5x90x176xbf16, #tpu.memory_space<vmem>>, vector<1x90x176xbf16>
    %50 = vector.shape_cast %49 : vector<1x90x176xbf16> to vector<90x176xbf16>
    %cst_37 = arith.constant dense<0.000000e+00> : vector<11x176xf32>
    %51 = tpu.matmul %48, %50, %cst_37 {dimension_numbers = #tpu.dot_dimension_numbers<[1], [0], [0], [1], [0, 0, 1, 1], [], []>} : vector<11x90xbf16>, vector<90x176xbf16>, vector<11x176xf32> -> vector<11x176xf32>
    %52 = arith.addf %47, %51 : vector<11x176xf32>
    %53 = vector.extract_strided_slice %46 {offsets = [1, 0], sizes = [11, 90], strides = [1, 1]} : vector<15x90xbf16> to vector<11x90xbf16>
    %c1_38 = arith.constant 1 : index
    %c0_39 = arith.constant 0 : index
    %c0_40 = arith.constant 0 : index
    %54 = vector.load %arg4[%c1_38, %c0_39, %c0_40] : memref<5x90x176xbf16, #tpu.memory_space<vmem>>, vector<1x90x176xbf16>
    %55 = vector.shape_cast %54 : vector<1x90x176xbf16> to vector<90x176xbf16>
    %cst_41 = arith.constant dense<0.000000e+00> : vector<11x176xf32>
    %56 = tpu.matmul %53, %55, %cst_41 {dimension_numbers = #tpu.dot_dimension_numbers<[1], [0], [0], [1], [0, 0, 1, 1], [], []>} : vector<11x90xbf16>, vector<90x176xbf16>, vector<11x176xf32> -> vector<11x176xf32>
    %57 = arith.addf %52, %56 : vector<11x176xf32>
    %58 = vector.extract_strided_slice %46 {offsets = [2, 0], sizes = [11, 90], strides = [1, 1]} : vector<15x90xbf16> to vector<11x90xbf16>
    %c2_42 = arith.constant 2 : index
    %c0_43 = arith.constant 0 : index
    %c0_44 = arith.constant 0 : index
    %59 = vector.load %arg4[%c2_42, %c0_43, %c0_44] : memref<5x90x176xbf16, #tpu.memory_space<vmem>>, vector<1x90x176xbf16>
    %60 = vector.shape_cast %59 : vector<1x90x176xbf16> to vector<90x176xbf16>
    %cst_45 = arith.constant dense<0.000000e+00> : vector<11x176xf32>
    %61 = tpu.matmul %58, %60, %cst_45 {dimension_numbers = #tpu.dot_dimension_numbers<[1], [0], [0], [1], [0, 0, 1, 1], [], []>} : vector<11x90xbf16>, vector<90x176xbf16>, vector<11x176xf32> -> vector<11x176xf32>
    %62 = arith.addf %57, %61 : vector<11x176xf32>
    %63 = vector.extract_strided_slice %46 {offsets = [3, 0], sizes = [11, 90], strides = [1, 1]} : vector<15x90xbf16> to vector<11x90xbf16>
    %c3_46 = arith.constant 3 : index
    %c0_47 = arith.constant 0 : index
    %c0_48 = arith.constant 0 : index
    %64 = vector.load %arg4[%c3_46, %c0_47, %c0_48] : memref<5x90x176xbf16, #tpu.memory_space<vmem>>, vector<1x90x176xbf16>
    %65 = vector.shape_cast %64 : vector<1x90x176xbf16> to vector<90x176xbf16>
    %cst_49 = arith.constant dense<0.000000e+00> : vector<11x176xf32>
    %66 = tpu.matmul %63, %65, %cst_49 {dimension_numbers = #tpu.dot_dimension_numbers<[1], [0], [0], [1], [0, 0, 1, 1], [], []>} : vector<11x90xbf16>, vector<90x176xbf16>, vector<11x176xf32> -> vector<11x176xf32>
    %67 = arith.addf %62, %66 : vector<11x176xf32>
    %68 = vector.extract_strided_slice %46 {offsets = [4, 0], sizes = [11, 90], strides = [1, 1]} : vector<15x90xbf16> to vector<11x90xbf16>
    %c4_50 = arith.constant 4 : index
    %c0_51 = arith.constant 0 : index
    %c0_52 = arith.constant 0 : index
    %69 = vector.load %arg4[%c4_50, %c0_51, %c0_52] : memref<5x90x176xbf16, #tpu.memory_space<vmem>>, vector<1x90x176xbf16>
    %70 = vector.shape_cast %69 : vector<1x90x176xbf16> to vector<90x176xbf16>
    %cst_53 = arith.constant dense<0.000000e+00> : vector<11x176xf32>
    %71 = tpu.matmul %68, %70, %cst_53 {dimension_numbers = #tpu.dot_dimension_numbers<[1], [0], [0], [1], [0, 0, 1, 1], [], []>} : vector<11x90xbf16>, vector<90x176xbf16>, vector<11x176xf32> -> vector<11x176xf32>
    %72 = arith.addf %67, %71 : vector<11x176xf32>
    %73 = arith.truncf %72 : vector<11x176xf32> to vector<11x176xbf16>
    %c0_54 = arith.constant 0 : index
    %c0_55 = arith.constant 0 : index
    %74 = vector.load %arg9[%c0_54, %c0_55] : memref<5x11xbf16, #tpu.memory_space<vmem>>, vector<5x11xbf16>
    %cst_56 = arith.constant dense<0.000000e+00> : vector<5x176xf32>
    %75 = tpu.matmul %74, %73, %cst_56 {dimension_numbers = #tpu.dot_dimension_numbers<[1], [0], [0], [1], [0, 0, 1, 1], [], []>} : vector<5x11xbf16>, vector<11x176xbf16>, vector<5x176xf32> -> vector<5x176xf32>
    %c0_57 = arith.constant 0 : index
    %c0_58 = arith.constant 0 : index
    %76 = vector.load %arg10[%c0_57, %c0_58] : memref<5x11xbf16, #tpu.memory_space<vmem>>, vector<5x11xbf16>
    %cst_59 = arith.constant dense<0.000000e+00> : vector<5x176xf32>
    %77 = tpu.matmul %76, %73, %cst_59 {dimension_numbers = #tpu.dot_dimension_numbers<[1], [0], [0], [1], [0, 0, 1, 1], [], []>} : vector<5x11xbf16>, vector<11x176xbf16>, vector<5x176xf32> -> vector<5x176xf32>
    %78 = arith.maximumf %75, %77 : vector<5x176xf32>
    %79 = arith.truncf %78 : vector<5x176xf32> to vector<5x176xbf16>
    %c0_60 = arith.constant 0 : index
    %c0_61 = arith.constant 0 : index
    %80 = vector.load %arg11[%c0_60, %c0_61] : memref<176x80xbf16, #tpu.memory_space<vmem>>, vector<176x80xbf16>
    %cst_62 = arith.constant dense<0.000000e+00> : vector<5x80xf32>
    %81 = tpu.matmul %79, %80, %cst_62 {dimension_numbers = #tpu.dot_dimension_numbers<[1], [0], [0], [1], [0, 0, 1, 1], [], []>} : vector<5x176xbf16>, vector<176x80xbf16>, vector<5x80xf32> -> vector<5x80xf32>
    %c0_63 = arith.constant 0 : index
    %c0_64 = arith.constant 0 : index
    %82 = vector.load %arg12[%c0_63, %c0_64] : memref<176x80xbf16, #tpu.memory_space<vmem>>, vector<176x80xbf16>
    %cst_65 = arith.constant dense<0.000000e+00> : vector<5x80xf32>
    %83 = tpu.matmul %79, %82, %cst_65 {dimension_numbers = #tpu.dot_dimension_numbers<[1], [0], [0], [1], [0, 0, 1, 1], [], []>} : vector<5x176xbf16>, vector<176x80xbf16>, vector<5x80xf32> -> vector<5x80xf32>
    %84 = arith.maximumf %81, %83 : vector<5x80xf32>
    %c0_66 = arith.constant 0 : index
    %c0_67 = arith.constant 0 : index
    %85 = vector.load %arg14[%c0_66, %c0_67] : memref<1x80xf32, #tpu.memory_space<vmem>>, vector<1x80xf32>
    %86 = vector.broadcast %85 : vector<1x80xf32> to vector<5x80xf32>
    %87 = arith.addf %84, %86 : vector<5x80xf32>
    %cst_68 = arith.constant 0.000000e+00 : f32
    %88 = vector.broadcast %cst_68 : f32 to vector<5x80xf32>
    %89 = arith.maximumf %87, %88 : vector<5x80xf32>
    %90 = vector.extract_strided_slice %89 {offsets = [0, 0], sizes = [1, 80], strides = [1, 1]} : vector<5x80xf32> to vector<1x80xf32>
    %c0_69 = arith.constant 0 : index
    %c0_70 = arith.constant 0 : index
    %91 = vector.load %arg22[%c0_69, %c0_70] : memref<8x400xf32, #tpu.memory_space<vmem>>, vector<1x80xf32>
    tpu.vector_store %arg22[%c0_69, %c0_70], %90 {strides = array<i32>} : memref<8x400xf32, #tpu.memory_space<vmem>>, vector<1x80xf32>,
    %92 = vector.extract_strided_slice %89 {offsets = [1, 0], sizes = [1, 80], strides = [1, 1]} : vector<5x80xf32> to vector<1x80xf32>
    %c0_71 = arith.constant 0 : index
    %c80 = arith.constant 80 : index
    %93 = vector.load %arg22[%c0_71, %c80] : memref<8x400xf32, #tpu.memory_space<vmem>>, vector<1x80xf32>
    tpu.vector_store %arg22[%c0_71, %c80], %92 {strides = array<i32>} : memref<8x400xf32, #tpu.memory_space<vmem>>, vector<1x80xf32>,
    %94 = vector.extract_strided_slice %89 {offsets = [2, 0], sizes = [1, 80], strides = [1, 1]} : vector<5x80xf32> to vector<1x80xf32>
    %c0_72 = arith.constant 0 : index
    %c160 = arith.constant 160 : index
    %95 = vector.load %arg22[%c0_72, %c160] : memref<8x400xf32, #tpu.memory_space<vmem>>, vector<1x80xf32>
    tpu.vector_store %arg22[%c0_72, %c160], %94 {strides = array<i32>} : memref<8x400xf32, #tpu.memory_space<vmem>>, vector<1x80xf32>,
    %96 = vector.extract_strided_slice %89 {offsets = [3, 0], sizes = [1, 80], strides = [1, 1]} : vector<5x80xf32> to vector<1x80xf32>
    %c0_73 = arith.constant 0 : index
    %c240 = arith.constant 240 : index
    %97 = vector.load %arg22[%c0_73, %c240] : memref<8x400xf32, #tpu.memory_space<vmem>>, vector<1x80xf32>
    tpu.vector_store %arg22[%c0_73, %c240], %96 {strides = array<i32>} : memref<8x400xf32, #tpu.memory_space<vmem>>, vector<1x80xf32>,
    %98 = vector.extract_strided_slice %89 {offsets = [4, 0], sizes = [1, 80], strides = [1, 1]} : vector<5x80xf32> to vector<1x80xf32>
    %c0_74 = arith.constant 0 : index
    %c320 = arith.constant 320 : index
    %99 = vector.load %arg22[%c0_74, %c320] : memref<8x400xf32, #tpu.memory_space<vmem>>, vector<1x80xf32>
    tpu.vector_store %arg22[%c0_74, %c320], %98 {strides = array<i32>} : memref<8x400xf32, #tpu.memory_space<vmem>>, vector<1x80xf32>,
    %c1_75 = arith.constant 1 : index
    %c0_76 = arith.constant 0 : index
    %c0_77 = arith.constant 0 : index
    %100 = vector.load %arg1[%c1_75, %c0_76, %c0_77] : memref<8x30x30xf32, #tpu.memory_space<vmem>>, vector<1x30x30xf32>
    %101 = vector.shape_cast %100 : vector<1x30x30xf32> to vector<30x30xf32>
    %102 = arith.truncf %101 : vector<30x30xf32> to vector<30x30xbf16>
    %cst_78 = arith.constant 0.000000e+00 : f32
    %103 = vector.broadcast %cst_78 : f32 to vector<26x156xf32>
    %104 = vector.extract_strided_slice %102 {offsets = [0, 0], sizes = [26, 30], strides = [1, 1]} : vector<30x30xbf16> to vector<26x30xbf16>
    %c0_79 = arith.constant 0 : index
    %c0_80 = arith.constant 0 : index
    %c0_81 = arith.constant 0 : index
    %105 = vector.load %arg3[%c0_79, %c0_80, %c0_81] : memref<5x30x156xbf16, #tpu.memory_space<vmem>>, vector<1x30x156xbf16>
    %106 = vector.shape_cast %105 : vector<1x30x156xbf16> to vector<30x156xbf16>
    %cst_82 = arith.constant dense<0.000000e+00> : vector<26x156xf32>
    %107 = tpu.matmul %104, %106, %cst_82 {dimension_numbers = #tpu.dot_dimension_numbers<[1], [0], [0], [1], [0, 0, 1, 1], [], []>} : vector<26x30xbf16>, vector<30x156xbf16>, vector<26x156xf32> -> vector<26x156xf32>
    %108 = arith.addf %103, %107 : vector<26x156xf32>
    %109 = vector.extract_strided_slice %102 {offsets = [1, 0], sizes = [26, 30], strides = [1, 1]} : vector<30x30xbf16> to vector<26x30xbf16>
    %c1_83 = arith.constant 1 : index
    %c0_84 = arith.constant 0 : index
    %c0_85 = arith.constant 0 : index
    %110 = vector.load %arg3[%c1_83, %c0_84, %c0_85] : memref<5x30x156xbf16, #tpu.memory_space<vmem>>, vector<1x30x156xbf16>
    %111 = vector.shape_cast %110 : vector<1x30x156xbf16> to vector<30x156xbf16>
    %cst_86 = arith.constant dense<0.000000e+00> : vector<26x156xf32>
    %112 = tpu.matmul %109, %111, %cst_86 {dimension_numbers = #tpu.dot_dimension_numbers<[1], [0], [0], [1], [0, 0, 1, 1], [], []>} : vector<26x30xbf16>, vector<30x156xbf16>, vector<26x156xf32> -> vector<26x156xf32>
    %113 = arith.addf %108, %112 : vector<26x156xf32>
    %114 = vector.extract_strided_slice %102 {offsets = [2, 0], sizes = [26, 30], strides = [1, 1]} : vector<30x30xbf16> to vector<26x30xbf16>
    %c2_87 = arith.constant 2 : index
    %c0_88 = arith.constant 0 : index
    %c0_89 = arith.constant 0 : index
    %115 = vector.load %arg3[%c2_87, %c0_88, %c0_89] : memref<5x30x156xbf16, #tpu.memory_space<vmem>>, vector<1x30x156xbf16>
    %116 = vector.shape_cast %115 : vector<1x30x156xbf16> to vector<30x156xbf16>
    %cst_90 = arith.constant dense<0.000000e+00> : vector<26x156xf32>
    %117 = tpu.matmul %114, %116, %cst_90 {dimension_numbers = #tpu.dot_dimension_numbers<[1], [0], [0], [1], [0, 0, 1, 1], [], []>} : vector<26x30xbf16>, vector<30x156xbf16>, vector<26x156xf32> -> vector<26x156xf32>
    %118 = arith.addf %113, %117 : vector<26x156xf32>
    %119 = vector.extract_strided_slice %102 {offsets = [3, 0], sizes = [26, 30], strides = [1, 1]} : vector<30x30xbf16> to vector<26x30xbf16>
    %c3_91 = arith.constant 3 : index
    %c0_92 = arith.constant 0 : index
    %c0_93 = arith.constant 0 : index
    %120 = vector.load %arg3[%c3_91, %c0_92, %c0_93] : memref<5x30x156xbf16, #tpu.memory_space<vmem>>, vector<1x30x156xbf16>
    %121 = vector.shape_cast %120 : vector<1x30x156xbf16> to vector<30x156xbf16>
    %cst_94 = arith.constant dense<0.000000e+00> : vector<26x156xf32>
    %122 = tpu.matmul %119, %121, %cst_94 {dimension_numbers = #tpu.dot_dimension_numbers<[1], [0], [0], [1], [0, 0, 1, 1], [], []>} : vector<26x30xbf16>, vector<30x156xbf16>, vector<26x156xf32> -> vector<26x156xf32>
    %123 = arith.addf %118, %122 : vector<26x156xf32>
    %124 = vector.extract_strided_slice %102 {offsets = [4, 0], sizes = [26, 30], strides = [1, 1]} : vector<30x30xbf16> to vector<26x30xbf16>
    %c4_95 = arith.constant 4 : index
    %c0_96 = arith.constant 0 : index
    %c0_97 = arith.constant 0 : index
    %125 = vector.load %arg3[%c4_95, %c0_96, %c0_97] : memref<5x30x156xbf16, #tpu.memory_space<vmem>>, vector<1x30x156xbf16>
    %126 = vector.shape_cast %125 : vector<1x30x156xbf16> to vector<30x156xbf16>
    %cst_98 = arith.constant dense<0.000000e+00> : vector<26x156xf32>
    %127 = tpu.matmul %124, %126, %cst_98 {dimension_numbers = #tpu.dot_dimension_numbers<[1], [0], [0], [1], [0, 0, 1, 1], [], []>} : vector<26x30xbf16>, vector<30x156xbf16>, vector<26x156xf32> -> vector<26x156xf32>
    %128 = arith.addf %123, %127 : vector<26x156xf32>
    %c0_99 = arith.constant 0 : index
    %c0_100 = arith.constant 0 : index
    %129 = vector.load %arg13[%c0_99, %c0_100] : memref<1x156xf32, #tpu.memory_space<vmem>>, vector<1x156xf32>
    %130 = vector.broadcast %129 : vector<1x156xf32> to vector<26x156xf32>
    %131 = arith.addf %128, %130 : vector<26x156xf32>
    %cst_101 = arith.constant 0.000000e+00 : f32
    %132 = vector.broadcast %cst_101 : f32 to vector<26x156xf32>
    %133 = arith.maximumf %131, %132 : vector<26x156xf32>
    %134 = arith.truncf %133 : vector<26x156xf32> to vector<26x156xbf16>
    %c0_102 = arith.constant 0 : index
    %c0_103 = arith.constant 0 : index
    %135 = vector.load %arg5[%c0_102, %c0_103] : memref<15x26xbf16, #tpu.memory_space<vmem>>, vector<15x26xbf16>
    %cst_104 = arith.constant dense<0.000000e+00> : vector<15x156xf32>
    %136 = tpu.matmul %135, %134, %cst_104 {dimension_numbers = #tpu.dot_dimension_numbers<[1], [0], [0], [1], [0, 0, 1, 1], [], []>} : vector<15x26xbf16>, vector<26x156xbf16>, vector<15x156xf32> -> vector<15x156xf32>
    %c0_105 = arith.constant 0 : index
    %c0_106 = arith.constant 0 : index
    %137 = vector.load %arg6[%c0_105, %c0_106] : memref<15x26xbf16, #tpu.memory_space<vmem>>, vector<15x26xbf16>
    %cst_107 = arith.constant dense<0.000000e+00> : vector<15x156xf32>
    %138 = tpu.matmul %137, %134, %cst_107 {dimension_numbers = #tpu.dot_dimension_numbers<[1], [0], [0], [1], [0, 0, 1, 1], [], []>} : vector<15x26xbf16>, vector<26x156xbf16>, vector<15x156xf32> -> vector<15x156xf32>
    %139 = arith.maximumf %136, %138 : vector<15x156xf32>
    %140 = arith.truncf %139 : vector<15x156xf32> to vector<15x156xbf16>
    %c0_108 = arith.constant 0 : index
    %c0_109 = arith.constant 0 : index
    %141 = vector.load %arg7[%c0_108, %c0_109] : memref<156x90xbf16, #tpu.memory_space<vmem>>, vector<156x90xbf16>
    %cst_110 = arith.constant dense<0.000000e+00> : vector<15x90xf32>
    %142 = tpu.matmul %140, %141, %cst_110 {dimension_numbers = #tpu.dot_dimension_numbers<[1], [0], [0], [1], [0, 0, 1, 1], [], []>} : vector<15x156xbf16>, vector<156x90xbf16>, vector<15x90xf32> -> vector<15x90xf32>
    %c0_111 = arith.constant 0 : index
    %c0_112 = arith.constant 0 : index
    %143 = vector.load %arg8[%c0_111, %c0_112] : memref<156x90xbf16, #tpu.memory_space<vmem>>, vector<156x90xbf16>
    %cst_113 = arith.constant dense<0.000000e+00> : vector<15x90xf32>
    %144 = tpu.matmul %140, %143, %cst_113 {dimension_numbers = #tpu.dot_dimension_numbers<[1], [0], [0], [1], [0, 0, 1, 1], [], []>} : vector<15x156xbf16>, vector<156x90xbf16>, vector<15x90xf32> -> vector<15x90xf32>
    %145 = arith.maximumf %142, %144 : vector<15x90xf32>
    %146 = arith.truncf %145 : vector<15x90xf32> to vector<15x90xbf16>
    %cst_114 = arith.constant 0.000000e+00 : f32
    %147 = vector.broadcast %cst_114 : f32 to vector<11x176xf32>
    %148 = vector.extract_strided_slice %146 {offsets = [0, 0], sizes = [11, 90], strides = [1, 1]} : vector<15x90xbf16> to vector<11x90xbf16>
    %c0_115 = arith.constant 0 : index
    %c0_116 = arith.constant 0 : index
    %c0_117 = arith.constant 0 : index
    %149 = vector.load %arg4[%c0_115, %c0_116, %c0_117] : memref<5x90x176xbf16, #tpu.memory_space<vmem>>, vector<1x90x176xbf16>
    %150 = vector.shape_cast %149 : vector<1x90x176xbf16> to vector<90x176xbf16>
    %cst_118 = arith.constant dense<0.000000e+00> : vector<11x176xf32>
    %151 = tpu.matmul %148, %150, %cst_118 {dimension_numbers = #tpu.dot_dimension_numbers<[1], [0], [0], [1], [0, 0, 1, 1], [], []>} : vector<11x90xbf16>, vector<90x176xbf16>, vector<11x176xf32> -> vector<11x176xf32>
    %152 = arith.addf %147, %151 : vector<11x176xf32>
    %153 = vector.extract_strided_slice %146 {offsets = [1, 0], sizes = [11, 90], strides = [1, 1]} : vector<15x90xbf16> to vector<11x90xbf16>
    %c1_119 = arith.constant 1 : index
    %c0_120 = arith.constant 0 : index
    %c0_121 = arith.constant 0 : index
    %154 = vector.load %arg4[%c1_119, %c0_120, %c0_121] : memref<5x90x176xbf16, #tpu.memory_space<vmem>>, vector<1x90x176xbf16>
    %155 = vector.shape_cast %154 : vector<1x90x176xbf16> to vector<90x176xbf16>
    %cst_122 = arith.constant dense<0.000000e+00> : vector<11x176xf32>
    %156 = tpu.matmul %153, %155, %cst_122 {dimension_numbers = #tpu.dot_dimension_numbers<[1], [0], [0], [1], [0, 0, 1, 1], [], []>} : vector<11x90xbf16>, vector<90x176xbf16>, vector<11x176xf32> -> vector<11x176xf32>
    %157 = arith.addf %152, %156 : vector<11x176xf32>
    %158 = vector.extract_strided_slice %146 {offsets = [2, 0], sizes = [11, 90], strides = [1, 1]} : vector<15x90xbf16> to vector<11x90xbf16>
    %c2_123 = arith.constant 2 : index
    %c0_124 = arith.constant 0 : index
    %c0_125 = arith.constant 0 : index
    %159 = vector.load %arg4[%c2_123, %c0_124, %c0_125] : memref<5x90x176xbf16, #tpu.memory_space<vmem>>, vector<1x90x176xbf16>
    %160 = vector.shape_cast %159 : vector<1x90x176xbf16> to vector<90x176xbf16>
    %cst_126 = arith.constant dense<0.000000e+00> : vector<11x176xf32>
    %161 = tpu.matmul %158, %160, %cst_126 {dimension_numbers = #tpu.dot_dimension_numbers<[1], [0], [0], [1], [0, 0, 1, 1], [], []>} : vector<11x90xbf16>, vector<90x176xbf16>, vector<11x176xf32> -> vector<11x176xf32>
    %162 = arith.addf %157, %161 : vector<11x176xf32>
    %163 = vector.extract_strided_slice %146 {offsets = [3, 0], sizes = [11, 90], strides = [1, 1]} : vector<15x90xbf16> to vector<11x90xbf16>
    %c3_127 = arith.constant 3 : index
    %c0_128 = arith.constant 0 : index
    %c0_129 = arith.constant 0 : index
    %164 = vector.load %arg4[%c3_127, %c0_128, %c0_129] : memref<5x90x176xbf16, #tpu.memory_space<vmem>>, vector<1x90x176xbf16>
    %165 = vector.shape_cast %164 : vector<1x90x176xbf16> to vector<90x176xbf16>
    %cst_130 = arith.constant dense<0.000000e+00> : vector<11x176xf32>
    %166 = tpu.matmul %163, %165, %cst_130 {dimension_numbers = #tpu.dot_dimension_numbers<[1], [0], [0], [1], [0, 0, 1, 1], [], []>} : vector<11x90xbf16>, vector<90x176xbf16>, vector<11x176xf32> -> vector<11x176xf32>
    %167 = arith.addf %162, %166 : vector<11x176xf32>
    %168 = vector.extract_strided_slice %146 {offsets = [4, 0], sizes = [11, 90], strides = [1, 1]} : vector<15x90xbf16> to vector<11x90xbf16>
    %c4_131 = arith.constant 4 : index
    %c0_132 = arith.constant 0 : index
    %c0_133 = arith.constant 0 : index
    %169 = vector.load %arg4[%c4_131, %c0_132, %c0_133] : memref<5x90x176xbf16, #tpu.memory_space<vmem>>, vector<1x90x176xbf16>
    %170 = vector.shape_cast %169 : vector<1x90x176xbf16> to vector<90x176xbf16>
    %cst_134 = arith.constant dense<0.000000e+00> : vector<11x176xf32>
    %171 = tpu.matmul %168, %170, %cst_134 {dimension_numbers = #tpu.dot_dimension_numbers<[1], [0], [0], [1], [0, 0, 1, 1], [], []>} : vector<11x90xbf16>, vector<90x176xbf16>, vector<11x176xf32> -> vector<11x176xf32>
    %172 = arith.addf %167, %171 : vector<11x176xf32>
    %173 = arith.truncf %172 : vector<11x176xf32> to vector<11x176xbf16>
    %c0_135 = arith.constant 0 : index
    %c0_136 = arith.constant 0 : index
    %174 = vector.load %arg9[%c0_135, %c0_136] : memref<5x11xbf16, #tpu.memory_space<vmem>>, vector<5x11xbf16>
    %cst_137 = arith.constant dense<0.000000e+00> : vector<5x176xf32>
    %175 = tpu.matmul %174, %173, %cst_137 {dimension_numbers = #tpu.dot_dimension_numbers<[1], [0], [0], [1], [0, 0, 1, 1], [], []>} : vector<5x11xbf16>, vector<11x176xbf16>, vector<5x176xf32> -> vector<5x176xf32>
    %c0_138 = arith.constant 0 : index
    %c0_139 = arith.constant 0 : index
    %176 = vector.load %arg10[%c0_138, %c0_139] : memref<5x11xbf16, #tpu.memory_space<vmem>>, vector<5x11xbf16>
    %cst_140 = arith.constant dense<0.000000e+00> : vector<5x176xf32>
    %177 = tpu.matmul %176, %173, %cst_140 {dimension_numbers = #tpu.dot_dimension_numbers<[1], [0], [0], [1], [0, 0, 1, 1], [], []>} : vector<5x11xbf16>, vector<11x176xbf16>, vector<5x176xf32> -> vector<5x176xf32>
    %178 = arith.maximumf %175, %177 : vector<5x176xf32>
    %179 = arith.truncf %178 : vector<5x176xf32> to vector<5x176xbf16>
    %c0_141 = arith.constant 0 : index
    %c0_142 = arith.constant 0 : index
    %180 = vector.load %arg11[%c0_141, %c0_142] : memref<176x80xbf16, #tpu.memory_space<vmem>>, vector<176x80xbf16>
    %cst_143 = arith.constant dense<0.000000e+00> : vector<5x80xf32>
    %181 = tpu.matmul %179, %180, %cst_143 {dimension_numbers = #tpu.dot_dimension_numbers<[1], [0], [0], [1], [0, 0, 1, 1], [], []>} : vector<5x176xbf16>, vector<176x80xbf16>, vector<5x80xf32> -> vector<5x80xf32>
    %c0_144 = arith.constant 0 : index
    %c0_145 = arith.constant 0 : index
    %182 = vector.load %arg12[%c0_144, %c0_145] : memref<176x80xbf16, #tpu.memory_space<vmem>>, vector<176x80xbf16>
    %cst_146 = arith.constant dense<0.000000e+00> : vector<5x80xf32>
    %183 = tpu.matmul %179, %182, %cst_146 {dimension_numbers = #tpu.dot_dimension_numbers<[1], [0], [0], [1], [0, 0, 1, 1], [], []>} : vector<5x176xbf16>, vector<176x80xbf16>, vector<5x80xf32> -> vector<5x80xf32>
    %184 = arith.maximumf %181, %183 : vector<5x80xf32>
    %c0_147 = arith.constant 0 : index
    %c0_148 = arith.constant 0 : index
    %185 = vector.load %arg14[%c0_147, %c0_148] : memref<1x80xf32, #tpu.memory_space<vmem>>, vector<1x80xf32>
    %186 = vector.broadcast %185 : vector<1x80xf32> to vector<5x80xf32>
    %187 = arith.addf %184, %186 : vector<5x80xf32>
    %cst_149 = arith.constant 0.000000e+00 : f32
    %188 = vector.broadcast %cst_149 : f32 to vector<5x80xf32>
    %189 = arith.maximumf %187, %188 : vector<5x80xf32>
    %190 = vector.extract_strided_slice %189 {offsets = [0, 0], sizes = [1, 80], strides = [1, 1]} : vector<5x80xf32> to vector<1x80xf32>
    %c1_150 = arith.constant 1 : index
    %c0_151 = arith.constant 0 : index
    %191 = vector.load %arg22[%c1_150, %c0_151] : memref<8x400xf32, #tpu.memory_space<vmem>>, vector<1x80xf32>
    tpu.vector_store %arg22[%c1_150, %c0_151], %190 {strides = array<i32>} : memref<8x400xf32, #tpu.memory_space<vmem>>, vector<1x80xf32>,
    %192 = vector.extract_strided_slice %189 {offsets = [1, 0], sizes = [1, 80], strides = [1, 1]} : vector<5x80xf32> to vector<1x80xf32>
    %c1_152 = arith.constant 1 : index
    %c80_153 = arith.constant 80 : index
    %193 = vector.load %arg22[%c1_152, %c80_153] : memref<8x400xf32, #tpu.memory_space<vmem>>, vector<1x80xf32>
    tpu.vector_store %arg22[%c1_152, %c80_153], %192 {strides = array<i32>} : memref<8x400xf32, #tpu.memory_space<vmem>>, vector<1x80xf32>,
    %194 = vector.extract_strided_slice %189 {offsets = [2, 0], sizes = [1, 80], strides = [1, 1]} : vector<5x80xf32> to vector<1x80xf32>
    %c1_154 = arith.constant 1 : index
    %c160_155 = arith.constant 160 : index
    %195 = vector.load %arg22[%c1_154, %c160_155] : memref<8x400xf32, #tpu.memory_space<vmem>>, vector<1x80xf32>
    tpu.vector_store %arg22[%c1_154, %c160_155], %194 {strides = array<i32>} : memref<8x400xf32, #tpu.memory_space<vmem>>, vector<1x80xf32>,
    %196 = vector.extract_strided_slice %189 {offsets = [3, 0], sizes = [1, 80], strides = [1, 1]} : vector<5x80xf32> to vector<1x80xf32>
    %c1_156 = arith.constant 1 : index
    %c240_157 = arith.constant 240 : index
    %197 = vector.load %arg22[%c1_156, %c240_157] : memref<8x400xf32, #tpu.memory_space<vmem>>, vector<1x80xf32>
    tpu.vector_store %arg22[%c1_156, %c240_157], %196 {strides = array<i32>} : memref<8x400xf32, #tpu.memory_space<vmem>>, vector<1x80xf32>,
    %198 = vector.extract_strided_slice %189 {offsets = [4, 0], sizes = [1, 80], strides = [1, 1]} : vector<5x80xf32> to vector<1x80xf32>
    %c1_158 = arith.constant 1 : index
    %c320_159 = arith.constant 320 : index
    %199 = vector.load %arg22[%c1_158, %c320_159] : memref<8x400xf32, #tpu.memory_space<vmem>>, vector<1x80xf32>
    tpu.vector_store %arg22[%c1_158, %c320_159], %198 {strides = array<i32>} : memref<8x400xf32, #tpu.memory_space<vmem>>, vector<1x80xf32>,
    %c2_160 = arith.constant 2 : index
    %c0_161 = arith.constant 0 : index
    %c0_162 = arith.constant 0 : index
    %200 = vector.load %arg1[%c2_160, %c0_161, %c0_162] : memref<8x30x30xf32, #tpu.memory_space<vmem>>, vector<1x30x30xf32>
    %201 = vector.shape_cast %200 : vector<1x30x30xf32> to vector<30x30xf32>
    %202 = arith.truncf %201 : vector<30x30xf32> to vector<30x30xbf16>
    %cst_163 = arith.constant 0.000000e+00 : f32
    %203 = vector.broadcast %cst_163 : f32 to vector<26x156xf32>
    %204 = vector.extract_strided_slice %202 {offsets = [0, 0], sizes = [26, 30], strides = [1, 1]} : vector<30x30xbf16> to vector<26x30xbf16>
    %c0_164 = arith.constant 0 : index
    %c0_165 = arith.constant 0 : index
    %c0_166 = arith.constant 0 : index
    %205 = vector.load %arg3[%c0_164, %c0_165, %c0_166] : memref<5x30x156xbf16, #tpu.memory_space<vmem>>, vector<1x30x156xbf16>
    %206 = vector.shape_cast %205 : vector<1x30x156xbf16> to vector<30x156xbf16>
    %cst_167 = arith.constant dense<0.000000e+00> : vector<26x156xf32>
    %207 = tpu.matmul %204, %206, %cst_167 {dimension_numbers = #tpu.dot_dimension_numbers<[1], [0], [0], [1], [0, 0, 1, 1], [], []>} : vector<26x30xbf16>, vector<30x156xbf16>, vector<26x156xf32> -> vector<26x156xf32>
    %208 = arith.addf %203, %207 : vector<26x156xf32>
    %209 = vector.extract_strided_slice %202 {offsets = [1, 0], sizes = [26, 30], strides = [1, 1]} : vector<30x30xbf16> to vector<26x30xbf16>
    %c1_168 = arith.constant 1 : index
    %c0_169 = arith.constant 0 : index
    %c0_170 = arith.constant 0 : index
    %210 = vector.load %arg3[%c1_168, %c0_169, %c0_170] : memref<5x30x156xbf16, #tpu.memory_space<vmem>>, vector<1x30x156xbf16>
    %211 = vector.shape_cast %210 : vector<1x30x156xbf16> to vector<30x156xbf16>
    %cst_171 = arith.constant dense<0.000000e+00> : vector<26x156xf32>
    %212 = tpu.matmul %209, %211, %cst_171 {dimension_numbers = #tpu.dot_dimension_numbers<[1], [0], [0], [1], [0, 0, 1, 1], [], []>} : vector<26x30xbf16>, vector<30x156xbf16>, vector<26x156xf32> -> vector<26x156xf32>
    %213 = arith.addf %208, %212 : vector<26x156xf32>
    %214 = vector.extract_strided_slice %202 {offsets = [2, 0], sizes = [26, 30], strides = [1, 1]} : vector<30x30xbf16> to vector<26x30xbf16>
    %c2_172 = arith.constant 2 : index
    %c0_173 = arith.constant 0 : index
    %c0_174 = arith.constant 0 : index
    %215 = vector.load %arg3[%c2_172, %c0_173, %c0_174] : memref<5x30x156xbf16, #tpu.memory_space<vmem>>, vector<1x30x156xbf16>
    %216 = vector.shape_cast %215 : vector<1x30x156xbf16> to vector<30x156xbf16>
    %cst_175 = arith.constant dense<0.000000e+00> : vector<26x156xf32>
    %217 = tpu.matmul %214, %216, %cst_175 {dimension_numbers = #tpu.dot_dimension_numbers<[1], [0], [0], [1], [0, 0, 1, 1], [], []>} : vector<26x30xbf16>, vector<30x156xbf16>, vector<26x156xf32> -> vector<26x156xf32>
    %218 = arith.addf %213, %217 : vector<26x156xf32>
    %219 = vector.extract_strided_slice %202 {offsets = [3, 0], sizes = [26, 30], strides = [1, 1]} : vector<30x30xbf16> to vector<26x30xbf16>
    %c3_176 = arith.constant 3 : index
    %c0_177 = arith.constant 0 : index
    %c0_178 = arith.constant 0 : index
    %220 = vector.load %arg3[%c3_176, %c0_177, %c0_178] : memref<5x30x156xbf16, #tpu.memory_space<vmem>>, vector<1x30x156xbf16>
    %221 = vector.shape_cast %220 : vector<1x30x156xbf16> to vector<30x156xbf16>
    %cst_179 = arith.constant dense<0.000000e+00> : vector<26x156xf32>
    %222 = tpu.matmul %219, %221, %cst_179 {dimension_numbers = #tpu.dot_dimension_numbers<[1], [0], [0], [1], [0, 0, 1, 1], [], []>} : vector<26x30xbf16>, vector<30x156xbf16>, vector<26x156xf32> -> vector<26x156xf32>
    %223 = arith.addf %218, %222 : vector<26x156xf32>
    %224 = vector.extract_strided_slice %202 {offsets = [4, 0], sizes = [26, 30], strides = [1, 1]} : vector<30x30xbf16> to vector<26x30xbf16>
    %c4_180 = arith.constant 4 : index
    %c0_181 = arith.constant 0 : index
    %c0_182 = arith.constant 0 : index
    %225 = vector.load %arg3[%c4_180, %c0_181, %c0_182] : memref<5x30x156xbf16, #tpu.memory_space<vmem>>, vector<1x30x156xbf16>
    %226 = vector.shape_cast %225 : vector<1x30x156xbf16> to vector<30x156xbf16>
    %cst_183 = arith.constant dense<0.000000e+00> : vector<26x156xf32>
    %227 = tpu.matmul %224, %226, %cst_183 {dimension_numbers = #tpu.dot_dimension_numbers<[1], [0], [0], [1], [0, 0, 1, 1], [], []>} : vector<26x30xbf16>, vector<30x156xbf16>, vector<26x156xf32> -> vector<26x156xf32>
    %228 = arith.addf %223, %227 : vector<26x156xf32>
    %c0_184 = arith.constant 0 : index
    %c0_185 = arith.constant 0 : index
    %229 = vector.load %arg13[%c0_184, %c0_185] : memref<1x156xf32, #tpu.memory_space<vmem>>, vector<1x156xf32>
    %230 = vector.broadcast %229 : vector<1x156xf32> to vector<26x156xf32>
    %231 = arith.addf %228, %230 : vector<26x156xf32>
    %cst_186 = arith.constant 0.000000e+00 : f32
    %232 = vector.broadcast %cst_186 : f32 to vector<26x156xf32>
    %233 = arith.maximumf %231, %232 : vector<26x156xf32>
    %234 = arith.truncf %233 : vector<26x156xf32> to vector<26x156xbf16>
    %c0_187 = arith.constant 0 : index
    %c0_188 = arith.constant 0 : index
    %235 = vector.load %arg5[%c0_187, %c0_188] : memref<15x26xbf16, #tpu.memory_space<vmem>>, vector<15x26xbf16>
    %cst_189 = arith.constant dense<0.000000e+00> : vector<15x156xf32>
    %236 = tpu.matmul %235, %234, %cst_189 {dimension_numbers = #tpu.dot_dimension_numbers<[1], [0], [0], [1], [0, 0, 1, 1], [], []>} : vector<15x26xbf16>, vector<26x156xbf16>, vector<15x156xf32> -> vector<15x156xf32>
    %c0_190 = arith.constant 0 : index
    %c0_191 = arith.constant 0 : index
    %237 = vector.load %arg6[%c0_190, %c0_191] : memref<15x26xbf16, #tpu.memory_space<vmem>>, vector<15x26xbf16>
    %cst_192 = arith.constant dense<0.000000e+00> : vector<15x156xf32>
    %238 = tpu.matmul %237, %234, %cst_192 {dimension_numbers = #tpu.dot_dimension_numbers<[1], [0], [0], [1], [0, 0, 1, 1], [], []>} : vector<15x26xbf16>, vector<26x156xbf16>, vector<15x156xf32> -> vector<15x156xf32>
    %239 = arith.maximumf %236, %238 : vector<15x156xf32>
    %240 = arith.truncf %239 : vector<15x156xf32> to vector<15x156xbf16>
    %c0_193 = arith.constant 0 : index
    %c0_194 = arith.constant 0 : index
    %241 = vector.load %arg7[%c0_193, %c0_194] : memref<156x90xbf16, #tpu.memory_space<vmem>>, vector<156x90xbf16>
    %cst_195 = arith.constant dense<0.000000e+00> : vector<15x90xf32>
    %242 = tpu.matmul %240, %241, %cst_195 {dimension_numbers = #tpu.dot_dimension_numbers<[1], [0], [0], [1], [0, 0, 1, 1], [], []>} : vector<15x156xbf16>, vector<156x90xbf16>, vector<15x90xf32> -> vector<15x90xf32>
    %c0_196 = arith.constant 0 : index
    %c0_197 = arith.constant 0 : index
    %243 = vector.load %arg8[%c0_196, %c0_197] : memref<156x90xbf16, #tpu.memory_space<vmem>>, vector<156x90xbf16>
    %cst_198 = arith.constant dense<0.000000e+00> : vector<15x90xf32>
    %244 = tpu.matmul %240, %243, %cst_198 {dimension_numbers = #tpu.dot_dimension_numbers<[1], [0], [0], [1], [0, 0, 1, 1], [], []>} : vector<15x156xbf16>, vector<156x90xbf16>, vector<15x90xf32> -> vector<15x90xf32>
    %245 = arith.maximumf %242, %244 : vector<15x90xf32>
    %246 = arith.truncf %245 : vector<15x90xf32> to vector<15x90xbf16>
    %cst_199 = arith.constant 0.000000e+00 : f32
    %247 = vector.broadcast %cst_199 : f32 to vector<11x176xf32>
    %248 = vector.extract_strided_slice %246 {offsets = [0, 0], sizes = [11, 90], strides = [1, 1]} : vector<15x90xbf16> to vector<11x90xbf16>
    %c0_200 = arith.constant 0 : index
    %c0_201 = arith.constant 0 : index
    %c0_202 = arith.constant 0 : index
    %249 = vector.load %arg4[%c0_200, %c0_201, %c0_202] : memref<5x90x176xbf16, #tpu.memory_space<vmem>>, vector<1x90x176xbf16>
    %250 = vector.shape_cast %249 : vector<1x90x176xbf16> to vector<90x176xbf16>
    %cst_203 = arith.constant dense<0.000000e+00> : vector<11x176xf32>
    %251 = tpu.matmul %248, %250, %cst_203 {dimension_numbers = #tpu.dot_dimension_numbers<[1], [0], [0], [1], [0, 0, 1, 1], [], []>} : vector<11x90xbf16>, vector<90x176xbf16>, vector<11x176xf32> -> vector<11x176xf32>
    %252 = arith.addf %247, %251 : vector<11x176xf32>
    %253 = vector.extract_strided_slice %246 {offsets = [1, 0], sizes = [11, 90], strides = [1, 1]} : vector<15x90xbf16> to vector<11x90xbf16>
    %c1_204 = arith.constant 1 : index
    %c0_205 = arith.constant 0 : index
    %c0_206 = arith.constant 0 : index
    %254 = vector.load %arg4[%c1_204, %c0_205, %c0_206] : memref<5x90x176xbf16, #tpu.memory_space<vmem>>, vector<1x90x176xbf16>
    %255 = vector.shape_cast %254 : vector<1x90x176xbf16> to vector<90x176xbf16>
    %cst_207 = arith.constant dense<0.000000e+00> : vector<11x176xf32>
    %256 = tpu.matmul %253, %255, %cst_207 {dimension_numbers = #tpu.dot_dimension_numbers<[1], [0], [0], [1], [0, 0, 1, 1], [], []>} : vector<11x90xbf16>, vector<90x176xbf16>, vector<11x176xf32> -> vector<11x176xf32>
    %257 = arith.addf %252, %256 : vector<11x176xf32>
    %258 = vector.extract_strided_slice %246 {offsets = [2, 0], sizes = [11, 90], strides = [1, 1]} : vector<15x90xbf16> to vector<11x90xbf16>
    %c2_208 = arith.constant 2 : index
    %c0_209 = arith.constant 0 : index
    %c0_210 = arith.constant 0 : index
    %259 = vector.load %arg4[%c2_208, %c0_209, %c0_210] : memref<5x90x176xbf16, #tpu.memory_space<vmem>>, vector<1x90x176xbf16>
    %260 = vector.shape_cast %259 : vector<1x90x176xbf16> to vector<90x176xbf16>
    %cst_211 = arith.constant dense<0.000000e+00> : vector<11x176xf32>
    %261 = tpu.matmul %258, %260, %cst_211 {dimension_numbers = #tpu.dot_dimension_numbers<[1], [0], [0], [1], [0, 0, 1, 1], [], []>} : vector<11x90xbf16>, vector<90x176xbf16>, vector<11x176xf32> -> vector<11x176xf32>
    %262 = arith.addf %257, %261 : vector<11x176xf32>
    %263 = vector.extract_strided_slice %246 {offsets = [3, 0], sizes = [11, 90], strides = [1, 1]} : vector<15x90xbf16> to vector<11x90xbf16>
    %c3_212 = arith.constant 3 : index
    %c0_213 = arith.constant 0 : index
    %c0_214 = arith.constant 0 : index
    %264 = vector.load %arg4[%c3_212, %c0_213, %c0_214] : memref<5x90x176xbf16, #tpu.memory_space<vmem>>, vector<1x90x176xbf16>
    %265 = vector.shape_cast %264 : vector<1x90x176xbf16> to vector<90x176xbf16>
    %cst_215 = arith.constant dense<0.000000e+00> : vector<11x176xf32>
    %266 = tpu.matmul %263, %265, %cst_215 {dimension_numbers = #tpu.dot_dimension_numbers<[1], [0], [0], [1], [0, 0, 1, 1], [], []>} : vector<11x90xbf16>, vector<90x176xbf16>, vector<11x176xf32> -> vector<11x176xf32>
    %267 = arith.addf %262, %266 : vector<11x176xf32>
    %268 = vector.extract_strided_slice %246 {offsets = [4, 0], sizes = [11, 90], strides = [1, 1]} : vector<15x90xbf16> to vector<11x90xbf16>
    %c4_216 = arith.constant 4 : index
    %c0_217 = arith.constant 0 : index
    %c0_218 = arith.constant 0 : index
    %269 = vector.load %arg4[%c4_216, %c0_217, %c0_218] : memref<5x90x176xbf16, #tpu.memory_space<vmem>>, vector<1x90x176xbf16>
    %270 = vector.shape_cast %269 : vector<1x90x176xbf16> to vector<90x176xbf16>
    %cst_219 = arith.constant dense<0.000000e+00> : vector<11x176xf32>
    %271 = tpu.matmul %268, %270, %cst_219 {dimension_numbers = #tpu.dot_dimension_numbers<[1], [0], [0], [1], [0, 0, 1, 1], [], []>} : vector<11x90xbf16>, vector<90x176xbf16>, vector<11x176xf32> -> vector<11x176xf32>
    %272 = arith.addf %267, %271 : vector<11x176xf32>
    %273 = arith.truncf %272 : vector<11x176xf32> to vector<11x176xbf16>
    %c0_220 = arith.constant 0 : index
    %c0_221 = arith.constant 0 : index
    %274 = vector.load %arg9[%c0_220, %c0_221] : memref<5x11xbf16, #tpu.memory_space<vmem>>, vector<5x11xbf16>
    %cst_222 = arith.constant dense<0.000000e+00> : vector<5x176xf32>
    %275 = tpu.matmul %274, %273, %cst_222 {dimension_numbers = #tpu.dot_dimension_numbers<[1], [0], [0], [1], [0, 0, 1, 1], [], []>} : vector<5x11xbf16>, vector<11x176xbf16>, vector<5x176xf32> -> vector<5x176xf32>
    %c0_223 = arith.constant 0 : index
    %c0_224 = arith.constant 0 : index
    %276 = vector.load %arg10[%c0_223, %c0_224] : memref<5x11xbf16, #tpu.memory_space<vmem>>, vector<5x11xbf16>
    %cst_225 = arith.constant dense<0.000000e+00> : vector<5x176xf32>
    %277 = tpu.matmul %276, %273, %cst_225 {dimension_numbers = #tpu.dot_dimension_numbers<[1], [0], [0], [1], [0, 0, 1, 1], [], []>} : vector<5x11xbf16>, vector<11x176xbf16>, vector<5x176xf32> -> vector<5x176xf32>
    %278 = arith.maximumf %275, %277 : vector<5x176xf32>
    %279 = arith.truncf %278 : vector<5x176xf32> to vector<5x176xbf16>
    %c0_226 = arith.constant 0 : index
    %c0_227 = arith.constant 0 : index
    %280 = vector.load %arg11[%c0_226, %c0_227] : memref<176x80xbf16, #tpu.memory_space<vmem>>, vector<176x80xbf16>
    %cst_228 = arith.constant dense<0.000000e+00> : vector<5x80xf32>
    %281 = tpu.matmul %279, %280, %cst_228 {dimension_numbers = #tpu.dot_dimension_numbers<[1], [0], [0], [1], [0, 0, 1, 1], [], []>} : vector<5x176xbf16>, vector<176x80xbf16>, vector<5x80xf32> -> vector<5x80xf32>
    %c0_229 = arith.constant 0 : index
    %c0_230 = arith.constant 0 : index
    %282 = vector.load %arg12[%c0_229, %c0_230] : memref<176x80xbf16, #tpu.memory_space<vmem>>, vector<176x80xbf16>
    %cst_231 = arith.constant dense<0.000000e+00> : vector<5x80xf32>
    %283 = tpu.matmul %279, %282, %cst_231 {dimension_numbers = #tpu.dot_dimension_numbers<[1], [0], [0], [1], [0, 0, 1, 1], [], []>} : vector<5x176xbf16>, vector<176x80xbf16>, vector<5x80xf32> -> vector<5x80xf32>
    %284 = arith.maximumf %281, %283 : vector<5x80xf32>
    %c0_232 = arith.constant 0 : index
    %c0_233 = arith.constant 0 : index
    %285 = vector.load %arg14[%c0_232, %c0_233] : memref<1x80xf32, #tpu.memory_space<vmem>>, vector<1x80xf32>
    %286 = vector.broadcast %285 : vector<1x80xf32> to vector<5x80xf32>
    %287 = arith.addf %284, %286 : vector<5x80xf32>
    %cst_234 = arith.constant 0.000000e+00 : f32
    %288 = vector.broadcast %cst_234 : f32 to vector<5x80xf32>
    %289 = arith.maximumf %287, %288 : vector<5x80xf32>
    %290 = vector.extract_strided_slice %289 {offsets = [0, 0], sizes = [1, 80], strides = [1, 1]} : vector<5x80xf32> to vector<1x80xf32>
    %c2_235 = arith.constant 2 : index
    %c0_236 = arith.constant 0 : index
    %291 = vector.load %arg22[%c2_235, %c0_236] : memref<8x400xf32, #tpu.memory_space<vmem>>, vector<1x80xf32>
    tpu.vector_store %arg22[%c2_235, %c0_236], %290 {strides = array<i32>} : memref<8x400xf32, #tpu.memory_space<vmem>>, vector<1x80xf32>,
    %292 = vector.extract_strided_slice %289 {offsets = [1, 0], sizes = [1, 80], strides = [1, 1]} : vector<5x80xf32> to vector<1x80xf32>
    %c2_237 = arith.constant 2 : index
    %c80_238 = arith.constant 80 : index
    %293 = vector.load %arg22[%c2_237, %c80_238] : memref<8x400xf32, #tpu.memory_space<vmem>>, vector<1x80xf32>
    tpu.vector_store %arg22[%c2_237, %c80_238], %292 {strides = array<i32>} : memref<8x400xf32, #tpu.memory_space<vmem>>, vector<1x80xf32>,
    %294 = vector.extract_strided_slice %289 {offsets = [2, 0], sizes = [1, 80], strides = [1, 1]} : vector<5x80xf32> to vector<1x80xf32>
    %c2_239 = arith.constant 2 : index
    %c160_240 = arith.constant 160 : index
    %295 = vector.load %arg22[%c2_239, %c160_240] : memref<8x400xf32, #tpu.memory_space<vmem>>, vector<1x80xf32>
    tpu.vector_store %arg22[%c2_239, %c160_240], %294 {strides = array<i32>} : memref<8x400xf32, #tpu.memory_space<vmem>>, vector<1x80xf32>,
    %296 = vector.extract_strided_slice %289 {offsets = [3, 0], sizes = [1, 80], strides = [1, 1]} : vector<5x80xf32> to vector<1x80xf32>
    %c2_241 = arith.constant 2 : index
    %c240_242 = arith.constant 240 : index
    %297 = vector.load %arg22[%c2_241, %c240_242] : memref<8x400xf32, #tpu.memory_space<vmem>>, vector<1x80xf32>
    tpu.vector_store %arg22[%c2_241, %c240_242], %296 {strides = array<i32>} : memref<8x400xf32, #tpu.memory_space<vmem>>, vector<1x80xf32>,
    %298 = vector.extract_strided_slice %289 {offsets = [4, 0], sizes = [1, 80], strides = [1, 1]} : vector<5x80xf32> to vector<1x80xf32>
    %c2_243 = arith.constant 2 : index
    %c320_244 = arith.constant 320 : index
    %299 = vector.load %arg22[%c2_243, %c320_244] : memref<8x400xf32, #tpu.memory_space<vmem>>, vector<1x80xf32>
    tpu.vector_store %arg22[%c2_243, %c320_244], %298 {strides = array<i32>} : memref<8x400xf32, #tpu.memory_space<vmem>>, vector<1x80xf32>,
    %c3_245 = arith.constant 3 : index
    %c0_246 = arith.constant 0 : index
    %c0_247 = arith.constant 0 : index
    %300 = vector.load %arg1[%c3_245, %c0_246, %c0_247] : memref<8x30x30xf32, #tpu.memory_space<vmem>>, vector<1x30x30xf32>
    %301 = vector.shape_cast %300 : vector<1x30x30xf32> to vector<30x30xf32>
    %302 = arith.truncf %301 : vector<30x30xf32> to vector<30x30xbf16>
    %cst_248 = arith.constant 0.000000e+00 : f32
    %303 = vector.broadcast %cst_248 : f32 to vector<26x156xf32>
    %304 = vector.extract_strided_slice %302 {offsets = [0, 0], sizes = [26, 30], strides = [1, 1]} : vector<30x30xbf16> to vector<26x30xbf16>
    %c0_249 = arith.constant 0 : index
    %c0_250 = arith.constant 0 : index
    %c0_251 = arith.constant 0 : index
    %305 = vector.load %arg3[%c0_249, %c0_250, %c0_251] : memref<5x30x156xbf16, #tpu.memory_space<vmem>>, vector<1x30x156xbf16>
    %306 = vector.shape_cast %305 : vector<1x30x156xbf16> to vector<30x156xbf16>
    %cst_252 = arith.constant dense<0.000000e+00> : vector<26x156xf32>
    %307 = tpu.matmul %304, %306, %cst_252 {dimension_numbers = #tpu.dot_dimension_numbers<[1], [0], [0], [1], [0, 0, 1, 1], [], []>} : vector<26x30xbf16>, vector<30x156xbf16>, vector<26x156xf32> -> vector<26x156xf32>
    %308 = arith.addf %303, %307 : vector<26x156xf32>
    %309 = vector.extract_strided_slice %302 {offsets = [1, 0], sizes = [26, 30], strides = [1, 1]} : vector<30x30xbf16> to vector<26x30xbf16>
    %c1_253 = arith.constant 1 : index
    %c0_254 = arith.constant 0 : index
    %c0_255 = arith.constant 0 : index
    %310 = vector.load %arg3[%c1_253, %c0_254, %c0_255] : memref<5x30x156xbf16, #tpu.memory_space<vmem>>, vector<1x30x156xbf16>
    %311 = vector.shape_cast %310 : vector<1x30x156xbf16> to vector<30x156xbf16>
    %cst_256 = arith.constant dense<0.000000e+00> : vector<26x156xf32>
    %312 = tpu.matmul %309, %311, %cst_256 {dimension_numbers = #tpu.dot_dimension_numbers<[1], [0], [0], [1], [0, 0, 1, 1], [], []>} : vector<26x30xbf16>, vector<30x156xbf16>, vector<26x156xf32> -> vector<26x156xf32>
    %313 = arith.addf %308, %312 : vector<26x156xf32>
    %314 = vector.extract_strided_slice %302 {offsets = [2, 0], sizes = [26, 30], strides = [1, 1]} : vector<30x30xbf16> to vector<26x30xbf16>
    %c2_257 = arith.constant 2 : index
    %c0_258 = arith.constant 0 : index
    %c0_259 = arith.constant 0 : index
    %315 = vector.load %arg3[%c2_257, %c0_258, %c0_259] : memref<5x30x156xbf16, #tpu.memory_space<vmem>>, vector<1x30x156xbf16>
    %316 = vector.shape_cast %315 : vector<1x30x156xbf16> to vector<30x156xbf16>
    %cst_260 = arith.constant dense<0.000000e+00> : vector<26x156xf32>
    %317 = tpu.matmul %314, %316, %cst_260 {dimension_numbers = #tpu.dot_dimension_numbers<[1], [0], [0], [1], [0, 0, 1, 1], [], []>} : vector<26x30xbf16>, vector<30x156xbf16>, vector<26x156xf32> -> vector<26x156xf32>
    %318 = arith.addf %313, %317 : vector<26x156xf32>
    %319 = vector.extract_strided_slice %302 {offsets = [3, 0], sizes = [26, 30], strides = [1, 1]} : vector<30x30xbf16> to vector<26x30xbf16>
    %c3_261 = arith.constant 3 : index
    %c0_262 = arith.constant 0 : index
    %c0_263 = arith.constant 0 : index
    %320 = vector.load %arg3[%c3_261, %c0_262, %c0_263] : memref<5x30x156xbf16, #tpu.memory_space<vmem>>, vector<1x30x156xbf16>
    %321 = vector.shape_cast %320 : vector<1x30x156xbf16> to vector<30x156xbf16>
    %cst_264 = arith.constant dense<0.000000e+00> : vector<26x156xf32>
    %322 = tpu.matmul %319, %321, %cst_264 {dimension_numbers = #tpu.dot_dimension_numbers<[1], [0], [0], [1], [0, 0, 1, 1], [], []>} : vector<26x30xbf16>, vector<30x156xbf16>, vector<26x156xf32> -> vector<26x156xf32>
    %323 = arith.addf %318, %322 : vector<26x156xf32>
    %324 = vector.extract_strided_slice %302 {offsets = [4, 0], sizes = [26, 30], strides = [1, 1]} : vector<30x30xbf16> to vector<26x30xbf16>
    %c4_265 = arith.constant 4 : index
    %c0_266 = arith.constant 0 : index
    %c0_267 = arith.constant 0 : index
    %325 = vector.load %arg3[%c4_265, %c0_266, %c0_267] : memref<5x30x156xbf16, #tpu.memory_space<vmem>>, vector<1x30x156xbf16>
    %326 = vector.shape_cast %325 : vector<1x30x156xbf16> to vector<30x156xbf16>
    %cst_268 = arith.constant dense<0.000000e+00> : vector<26x156xf32>
    %327 = tpu.matmul %324, %326, %cst_268 {dimension_numbers = #tpu.dot_dimension_numbers<[1], [0], [0], [1], [0, 0, 1, 1], [], []>} : vector<26x30xbf16>, vector<30x156xbf16>, vector<26x156xf32> -> vector<26x156xf32>
    %328 = arith.addf %323, %327 : vector<26x156xf32>
    %c0_269 = arith.constant 0 : index
    %c0_270 = arith.constant 0 : index
    %329 = vector.load %arg13[%c0_269, %c0_270] : memref<1x156xf32, #tpu.memory_space<vmem>>, vector<1x156xf32>
    %330 = vector.broadcast %329 : vector<1x156xf32> to vector<26x156xf32>
    %331 = arith.addf %328, %330 : vector<26x156xf32>
    %cst_271 = arith.constant 0.000000e+00 : f32
    %332 = vector.broadcast %cst_271 : f32 to vector<26x156xf32>
    %333 = arith.maximumf %331, %332 : vector<26x156xf32>
    %334 = arith.truncf %333 : vector<26x156xf32> to vector<26x156xbf16>
    %c0_272 = arith.constant 0 : index
    %c0_273 = arith.constant 0 : index
    %335 = vector.load %arg5[%c0_272, %c0_273] : memref<15x26xbf16, #tpu.memory_space<vmem>>, vector<15x26xbf16>
    %cst_274 = arith.constant dense<0.000000e+00> : vector<15x156xf32>
    %336 = tpu.matmul %335, %334, %cst_274 {dimension_numbers = #tpu.dot_dimension_numbers<[1], [0], [0], [1], [0, 0, 1, 1], [], []>} : vector<15x26xbf16>, vector<26x156xbf16>, vector<15x156xf32> -> vector<15x156xf32>
    %c0_275 = arith.constant 0 : index
    %c0_276 = arith.constant 0 : index
    %337 = vector.load %arg6[%c0_275, %c0_276] : memref<15x26xbf16, #tpu.memory_space<vmem>>, vector<15x26xbf16>
    %cst_277 = arith.constant dense<0.000000e+00> : vector<15x156xf32>
    %338 = tpu.matmul %337, %334, %cst_277 {dimension_numbers = #tpu.dot_dimension_numbers<[1], [0], [0], [1], [0, 0, 1, 1], [], []>} : vector<15x26xbf16>, vector<26x156xbf16>, vector<15x156xf32> -> vector<15x156xf32>
    %339 = arith.maximumf %336, %338 : vector<15x156xf32>
    %340 = arith.truncf %339 : vector<15x156xf32> to vector<15x156xbf16>
    %c0_278 = arith.constant 0 : index
    %c0_279 = arith.constant 0 : index
    %341 = vector.load %arg7[%c0_278, %c0_279] : memref<156x90xbf16, #tpu.memory_space<vmem>>, vector<156x90xbf16>
    %cst_280 = arith.constant dense<0.000000e+00> : vector<15x90xf32>
    %342 = tpu.matmul %340, %341, %cst_280 {dimension_numbers = #tpu.dot_dimension_numbers<[1], [0], [0], [1], [0, 0, 1, 1], [], []>} : vector<15x156xbf16>, vector<156x90xbf16>, vector<15x90xf32> -> vector<15x90xf32>
    %c0_281 = arith.constant 0 : index
    %c0_282 = arith.constant 0 : index
    %343 = vector.load %arg8[%c0_281, %c0_282] : memref<156x90xbf16, #tpu.memory_space<vmem>>, vector<156x90xbf16>
    %cst_283 = arith.constant dense<0.000000e+00> : vector<15x90xf32>
    %344 = tpu.matmul %340, %343, %cst_283 {dimension_numbers = #tpu.dot_dimension_numbers<[1], [0], [0], [1], [0, 0, 1, 1], [], []>} : vector<15x156xbf16>, vector<156x90xbf16>, vector<15x90xf32> -> vector<15x90xf32>
    %345 = arith.maximumf %342, %344 : vector<15x90xf32>
    %346 = arith.truncf %345 : vector<15x90xf32> to vector<15x90xbf16>
    %cst_284 = arith.constant 0.000000e+00 : f32
    %347 = vector.broadcast %cst_284 : f32 to vector<11x176xf32>
    %348 = vector.extract_strided_slice %346 {offsets = [0, 0], sizes = [11, 90], strides = [1, 1]} : vector<15x90xbf16> to vector<11x90xbf16>
    %c0_285 = arith.constant 0 : index
    %c0_286 = arith.constant 0 : index
    %c0_287 = arith.constant 0 : index
    %349 = vector.load %arg4[%c0_285, %c0_286, %c0_287] : memref<5x90x176xbf16, #tpu.memory_space<vmem>>, vector<1x90x176xbf16>
    %350 = vector.shape_cast %349 : vector<1x90x176xbf16> to vector<90x176xbf16>
    %cst_288 = arith.constant dense<0.000000e+00> : vector<11x176xf32>
    %351 = tpu.matmul %348, %350, %cst_288 {dimension_numbers = #tpu.dot_dimension_numbers<[1], [0], [0], [1], [0, 0, 1, 1], [], []>} : vector<11x90xbf16>, vector<90x176xbf16>, vector<11x176xf32> -> vector<11x176xf32>
    %352 = arith.addf %347, %351 : vector<11x176xf32>
    %353 = vector.extract_strided_slice %346 {offsets = [1, 0], sizes = [11, 90], strides = [1, 1]} : vector<15x90xbf16> to vector<11x90xbf16>
    %c1_289 = arith.constant 1 : index
    %c0_290 = arith.constant 0 : index
    %c0_291 = arith.constant 0 : index
    %354 = vector.load %arg4[%c1_289, %c0_290, %c0_291] : memref<5x90x176xbf16, #tpu.memory_space<vmem>>, vector<1x90x176xbf16>
    %355 = vector.shape_cast %354 : vector<1x90x176xbf16> to vector<90x176xbf16>
    %cst_292 = arith.constant dense<0.000000e+00> : vector<11x176xf32>
    %356 = tpu.matmul %353, %355, %cst_292 {dimension_numbers = #tpu.dot_dimension_numbers<[1], [0], [0], [1], [0, 0, 1, 1], [], []>} : vector<11x90xbf16>, vector<90x176xbf16>, vector<11x176xf32> -> vector<11x176xf32>
    %357 = arith.addf %352, %356 : vector<11x176xf32>
    %358 = vector.extract_strided_slice %346 {offsets = [2, 0], sizes = [11, 90], strides = [1, 1]} : vector<15x90xbf16> to vector<11x90xbf16>
    %c2_293 = arith.constant 2 : index
    %c0_294 = arith.constant 0 : index
    %c0_295 = arith.constant 0 : index
    %359 = vector.load %arg4[%c2_293, %c0_294, %c0_295] : memref<5x90x176xbf16, #tpu.memory_space<vmem>>, vector<1x90x176xbf16>
    %360 = vector.shape_cast %359 : vector<1x90x176xbf16> to vector<90x176xbf16>
    %cst_296 = arith.constant dense<0.000000e+00> : vector<11x176xf32>
    %361 = tpu.matmul %358, %360, %cst_296 {dimension_numbers = #tpu.dot_dimension_numbers<[1], [0], [0], [1], [0, 0, 1, 1], [], []>} : vector<11x90xbf16>, vector<90x176xbf16>, vector<11x176xf32> -> vector<11x176xf32>
    %362 = arith.addf %357, %361 : vector<11x176xf32>
    %363 = vector.extract_strided_slice %346 {offsets = [3, 0], sizes = [11, 90], strides = [1, 1]} : vector<15x90xbf16> to vector<11x90xbf16>
    %c3_297 = arith.constant 3 : index
    %c0_298 = arith.constant 0 : index
    %c0_299 = arith.constant 0 : index
    %364 = vector.load %arg4[%c3_297, %c0_298, %c0_299] : memref<5x90x176xbf16, #tpu.memory_space<vmem>>, vector<1x90x176xbf16>
    %365 = vector.shape_cast %364 : vector<1x90x176xbf16> to vector<90x176xbf16>
    %cst_300 = arith.constant dense<0.000000e+00> : vector<11x176xf32>
    %366 = tpu.matmul %363, %365, %cst_300 {dimension_numbers = #tpu.dot_dimension_numbers<[1], [0], [0], [1], [0, 0, 1, 1], [], []>} : vector<11x90xbf16>, vector<90x176xbf16>, vector<11x176xf32> -> vector<11x176xf32>
    %367 = arith.addf %362, %366 : vector<11x176xf32>
    %368 = vector.extract_strided_slice %346 {offsets = [4, 0], sizes = [11, 90], strides = [1, 1]} : vector<15x90xbf16> to vector<11x90xbf16>
    %c4_301 = arith.constant 4 : index
    %c0_302 = arith.constant 0 : index
    %c0_303 = arith.constant 0 : index
    %369 = vector.load %arg4[%c4_301, %c0_302, %c0_303] : memref<5x90x176xbf16, #tpu.memory_space<vmem>>, vector<1x90x176xbf16>
    %370 = vector.shape_cast %369 : vector<1x90x176xbf16> to vector<90x176xbf16>
    %cst_304 = arith.constant dense<0.000000e+00> : vector<11x176xf32>
    %371 = tpu.matmul %368, %370, %cst_304 {dimension_numbers = #tpu.dot_dimension_numbers<[1], [0], [0], [1], [0, 0, 1, 1], [], []>} : vector<11x90xbf16>, vector<90x176xbf16>, vector<11x176xf32> -> vector<11x176xf32>
    %372 = arith.addf %367, %371 : vector<11x176xf32>
    %373 = arith.truncf %372 : vector<11x176xf32> to vector<11x176xbf16>
    %c0_305 = arith.constant 0 : index
    %c0_306 = arith.constant 0 : index
    %374 = vector.load %arg9[%c0_305, %c0_306] : memref<5x11xbf16, #tpu.memory_space<vmem>>, vector<5x11xbf16>
    %cst_307 = arith.constant dense<0.000000e+00> : vector<5x176xf32>
    %375 = tpu.matmul %374, %373, %cst_307 {dimension_numbers = #tpu.dot_dimension_numbers<[1], [0], [0], [1], [0, 0, 1, 1], [], []>} : vector<5x11xbf16>, vector<11x176xbf16>, vector<5x176xf32> -> vector<5x176xf32>
    %c0_308 = arith.constant 0 : index
    %c0_309 = arith.constant 0 : index
    %376 = vector.load %arg10[%c0_308, %c0_309] : memref<5x11xbf16, #tpu.memory_space<vmem>>, vector<5x11xbf16>
    %cst_310 = arith.constant dense<0.000000e+00> : vector<5x176xf32>
    %377 = tpu.matmul %376, %373, %cst_310 {dimension_numbers = #tpu.dot_dimension_numbers<[1], [0], [0], [1], [0, 0, 1, 1], [], []>} : vector<5x11xbf16>, vector<11x176xbf16>, vector<5x176xf32> -> vector<5x176xf32>
    %378 = arith.maximumf %375, %377 : vector<5x176xf32>
    %379 = arith.truncf %378 : vector<5x176xf32> to vector<5x176xbf16>
    %c0_311 = arith.constant 0 : index
    %c0_312 = arith.constant 0 : index
    %380 = vector.load %arg11[%c0_311, %c0_312] : memref<176x80xbf16, #tpu.memory_space<vmem>>, vector<176x80xbf16>
    %cst_313 = arith.constant dense<0.000000e+00> : vector<5x80xf32>
    %381 = tpu.matmul %379, %380, %cst_313 {dimension_numbers = #tpu.dot_dimension_numbers<[1], [0], [0], [1], [0, 0, 1, 1], [], []>} : vector<5x176xbf16>, vector<176x80xbf16>, vector<5x80xf32> -> vector<5x80xf32>
    %c0_314 = arith.constant 0 : index
    %c0_315 = arith.constant 0 : index
    %382 = vector.load %arg12[%c0_314, %c0_315] : memref<176x80xbf16, #tpu.memory_space<vmem>>, vector<176x80xbf16>
    %cst_316 = arith.constant dense<0.000000e+00> : vector<5x80xf32>
    %383 = tpu.matmul %379, %382, %cst_316 {dimension_numbers = #tpu.dot_dimension_numbers<[1], [0], [0], [1], [0, 0, 1, 1], [], []>} : vector<5x176xbf16>, vector<176x80xbf16>, vector<5x80xf32> -> vector<5x80xf32>
    %384 = arith.maximumf %381, %383 : vector<5x80xf32>
    %c0_317 = arith.constant 0 : index
    %c0_318 = arith.constant 0 : index
    %385 = vector.load %arg14[%c0_317, %c0_318] : memref<1x80xf32, #tpu.memory_space<vmem>>, vector<1x80xf32>
    %386 = vector.broadcast %385 : vector<1x80xf32> to vector<5x80xf32>
    %387 = arith.addf %384, %386 : vector<5x80xf32>
    %cst_319 = arith.constant 0.000000e+00 : f32
    %388 = vector.broadcast %cst_319 : f32 to vector<5x80xf32>
    %389 = arith.maximumf %387, %388 : vector<5x80xf32>
    %390 = vector.extract_strided_slice %389 {offsets = [0, 0], sizes = [1, 80], strides = [1, 1]} : vector<5x80xf32> to vector<1x80xf32>
    %c3_320 = arith.constant 3 : index
    %c0_321 = arith.constant 0 : index
    %391 = vector.load %arg22[%c3_320, %c0_321] : memref<8x400xf32, #tpu.memory_space<vmem>>, vector<1x80xf32>
    tpu.vector_store %arg22[%c3_320, %c0_321], %390 {strides = array<i32>} : memref<8x400xf32, #tpu.memory_space<vmem>>, vector<1x80xf32>,
    %392 = vector.extract_strided_slice %389 {offsets = [1, 0], sizes = [1, 80], strides = [1, 1]} : vector<5x80xf32> to vector<1x80xf32>
    %c3_322 = arith.constant 3 : index
    %c80_323 = arith.constant 80 : index
    %393 = vector.load %arg22[%c3_322, %c80_323] : memref<8x400xf32, #tpu.memory_space<vmem>>, vector<1x80xf32>
    tpu.vector_store %arg22[%c3_322, %c80_323], %392 {strides = array<i32>} : memref<8x400xf32, #tpu.memory_space<vmem>>, vector<1x80xf32>,
    %394 = vector.extract_strided_slice %389 {offsets = [2, 0], sizes = [1, 80], strides = [1, 1]} : vector<5x80xf32> to vector<1x80xf32>
    %c3_324 = arith.constant 3 : index
    %c160_325 = arith.constant 160 : index
    %395 = vector.load %arg22[%c3_324, %c160_325] : memref<8x400xf32, #tpu.memory_space<vmem>>, vector<1x80xf32>
    tpu.vector_store %arg22[%c3_324, %c160_325], %394 {strides = array<i32>} : memref<8x400xf32, #tpu.memory_space<vmem>>, vector<1x80xf32>,
    %396 = vector.extract_strided_slice %389 {offsets = [3, 0], sizes = [1, 80], strides = [1, 1]} : vector<5x80xf32> to vector<1x80xf32>
    %c3_326 = arith.constant 3 : index
    %c240_327 = arith.constant 240 : index
    %397 = vector.load %arg22[%c3_326, %c240_327] : memref<8x400xf32, #tpu.memory_space<vmem>>, vector<1x80xf32>
    tpu.vector_store %arg22[%c3_326, %c240_327], %396 {strides = array<i32>} : memref<8x400xf32, #tpu.memory_space<vmem>>, vector<1x80xf32>,
    %398 = vector.extract_strided_slice %389 {offsets = [4, 0], sizes = [1, 80], strides = [1, 1]} : vector<5x80xf32> to vector<1x80xf32>
    %c3_328 = arith.constant 3 : index
    %c320_329 = arith.constant 320 : index
    %399 = vector.load %arg22[%c3_328, %c320_329] : memref<8x400xf32, #tpu.memory_space<vmem>>, vector<1x80xf32>
    tpu.vector_store %arg22[%c3_328, %c320_329], %398 {strides = array<i32>} : memref<8x400xf32, #tpu.memory_space<vmem>>, vector<1x80xf32>,
    %c4_330 = arith.constant 4 : index
    %c0_331 = arith.constant 0 : index
    %c0_332 = arith.constant 0 : index
    %400 = vector.load %arg1[%c4_330, %c0_331, %c0_332] : memref<8x30x30xf32, #tpu.memory_space<vmem>>, vector<1x30x30xf32>
    %401 = vector.shape_cast %400 : vector<1x30x30xf32> to vector<30x30xf32>
    %402 = arith.truncf %401 : vector<30x30xf32> to vector<30x30xbf16>
    %cst_333 = arith.constant 0.000000e+00 : f32
    %403 = vector.broadcast %cst_333 : f32 to vector<26x156xf32>
    %404 = vector.extract_strided_slice %402 {offsets = [0, 0], sizes = [26, 30], strides = [1, 1]} : vector<30x30xbf16> to vector<26x30xbf16>
    %c0_334 = arith.constant 0 : index
    %c0_335 = arith.constant 0 : index
    %c0_336 = arith.constant 0 : index
    %405 = vector.load %arg3[%c0_334, %c0_335, %c0_336] : memref<5x30x156xbf16, #tpu.memory_space<vmem>>, vector<1x30x156xbf16>
    %406 = vector.shape_cast %405 : vector<1x30x156xbf16> to vector<30x156xbf16>
    %cst_337 = arith.constant dense<0.000000e+00> : vector<26x156xf32>
    %407 = tpu.matmul %404, %406, %cst_337 {dimension_numbers = #tpu.dot_dimension_numbers<[1], [0], [0], [1], [0, 0, 1, 1], [], []>} : vector<26x30xbf16>, vector<30x156xbf16>, vector<26x156xf32> -> vector<26x156xf32>
    %408 = arith.addf %403, %407 : vector<26x156xf32>
    %409 = vector.extract_strided_slice %402 {offsets = [1, 0], sizes = [26, 30], strides = [1, 1]} : vector<30x30xbf16> to vector<26x30xbf16>
    %c1_338 = arith.constant 1 : index
    %c0_339 = arith.constant 0 : index
    %c0_340 = arith.constant 0 : index
    %410 = vector.load %arg3[%c1_338, %c0_339, %c0_340] : memref<5x30x156xbf16, #tpu.memory_space<vmem>>, vector<1x30x156xbf16>
    %411 = vector.shape_cast %410 : vector<1x30x156xbf16> to vector<30x156xbf16>
    %cst_341 = arith.constant dense<0.000000e+00> : vector<26x156xf32>
    %412 = tpu.matmul %409, %411, %cst_341 {dimension_numbers = #tpu.dot_dimension_numbers<[1], [0], [0], [1], [0, 0, 1, 1], [], []>} : vector<26x30xbf16>, vector<30x156xbf16>, vector<26x156xf32> -> vector<26x156xf32>
    %413 = arith.addf %408, %412 : vector<26x156xf32>
    %414 = vector.extract_strided_slice %402 {offsets = [2, 0], sizes = [26, 30], strides = [1, 1]} : vector<30x30xbf16> to vector<26x30xbf16>
    %c2_342 = arith.constant 2 : index
    %c0_343 = arith.constant 0 : index
    %c0_344 = arith.constant 0 : index
    %415 = vector.load %arg3[%c2_342, %c0_343, %c0_344] : memref<5x30x156xbf16, #tpu.memory_space<vmem>>, vector<1x30x156xbf16>
    %416 = vector.shape_cast %415 : vector<1x30x156xbf16> to vector<30x156xbf16>
    %cst_345 = arith.constant dense<0.000000e+00> : vector<26x156xf32>
    %417 = tpu.matmul %414, %416, %cst_345 {dimension_numbers = #tpu.dot_dimension_numbers<[1], [0], [0], [1], [0, 0, 1, 1], [], []>} : vector<26x30xbf16>, vector<30x156xbf16>, vector<26x156xf32> -> vector<26x156xf32>
    %418 = arith.addf %413, %417 : vector<26x156xf32>
    %419 = vector.extract_strided_slice %402 {offsets = [3, 0], sizes = [26, 30], strides = [1, 1]} : vector<30x30xbf16> to vector<26x30xbf16>
    %c3_346 = arith.constant 3 : index
    %c0_347 = arith.constant 0 : index
    %c0_348 = arith.constant 0 : index
    %420 = vector.load %arg3[%c3_346, %c0_347, %c0_348] : memref<5x30x156xbf16, #tpu.memory_space<vmem>>, vector<1x30x156xbf16>
    %421 = vector.shape_cast %420 : vector<1x30x156xbf16> to vector<30x156xbf16>
    %cst_349 = arith.constant dense<0.000000e+00> : vector<26x156xf32>
    %422 = tpu.matmul %419, %421, %cst_349 {dimension_numbers = #tpu.dot_dimension_numbers<[1], [0], [0], [1], [0, 0, 1, 1], [], []>} : vector<26x30xbf16>, vector<30x156xbf16>, vector<26x156xf32> -> vector<26x156xf32>
    %423 = arith.addf %418, %422 : vector<26x156xf32>
    %424 = vector.extract_strided_slice %402 {offsets = [4, 0], sizes = [26, 30], strides = [1, 1]} : vector<30x30xbf16> to vector<26x30xbf16>
    %c4_350 = arith.constant 4 : index
    %c0_351 = arith.constant 0 : index
    %c0_352 = arith.constant 0 : index
    %425 = vector.load %arg3[%c4_350, %c0_351, %c0_352] : memref<5x30x156xbf16, #tpu.memory_space<vmem>>, vector<1x30x156xbf16>
    %426 = vector.shape_cast %425 : vector<1x30x156xbf16> to vector<30x156xbf16>
    %cst_353 = arith.constant dense<0.000000e+00> : vector<26x156xf32>
    %427 = tpu.matmul %424, %426, %cst_353 {dimension_numbers = #tpu.dot_dimension_numbers<[1], [0], [0], [1], [0, 0, 1, 1], [], []>} : vector<26x30xbf16>, vector<30x156xbf16>, vector<26x156xf32> -> vector<26x156xf32>
    %428 = arith.addf %423, %427 : vector<26x156xf32>
    %c0_354 = arith.constant 0 : index
    %c0_355 = arith.constant 0 : index
    %429 = vector.load %arg13[%c0_354, %c0_355] : memref<1x156xf32, #tpu.memory_space<vmem>>, vector<1x156xf32>
    %430 = vector.broadcast %429 : vector<1x156xf32> to vector<26x156xf32>
    %431 = arith.addf %428, %430 : vector<26x156xf32>
    %cst_356 = arith.constant 0.000000e+00 : f32
    %432 = vector.broadcast %cst_356 : f32 to vector<26x156xf32>
    %433 = arith.maximumf %431, %432 : vector<26x156xf32>
    %434 = arith.truncf %433 : vector<26x156xf32> to vector<26x156xbf16>
    %c0_357 = arith.constant 0 : index
    %c0_358 = arith.constant 0 : index
    %435 = vector.load %arg5[%c0_357, %c0_358] : memref<15x26xbf16, #tpu.memory_space<vmem>>, vector<15x26xbf16>
    %cst_359 = arith.constant dense<0.000000e+00> : vector<15x156xf32>
    %436 = tpu.matmul %435, %434, %cst_359 {dimension_numbers = #tpu.dot_dimension_numbers<[1], [0], [0], [1], [0, 0, 1, 1], [], []>} : vector<15x26xbf16>, vector<26x156xbf16>, vector<15x156xf32> -> vector<15x156xf32>
    %c0_360 = arith.constant 0 : index
    %c0_361 = arith.constant 0 : index
    %437 = vector.load %arg6[%c0_360, %c0_361] : memref<15x26xbf16, #tpu.memory_space<vmem>>, vector<15x26xbf16>
    %cst_362 = arith.constant dense<0.000000e+00> : vector<15x156xf32>
    %438 = tpu.matmul %437, %434, %cst_362 {dimension_numbers = #tpu.dot_dimension_numbers<[1], [0], [0], [1], [0, 0, 1, 1], [], []>} : vector<15x26xbf16>, vector<26x156xbf16>, vector<15x156xf32> -> vector<15x156xf32>
    %439 = arith.maximumf %436, %438 : vector<15x156xf32>
    %440 = arith.truncf %439 : vector<15x156xf32> to vector<15x156xbf16>
    %c0_363 = arith.constant 0 : index
    %c0_364 = arith.constant 0 : index
    %441 = vector.load %arg7[%c0_363, %c0_364] : memref<156x90xbf16, #tpu.memory_space<vmem>>, vector<156x90xbf16>
    %cst_365 = arith.constant dense<0.000000e+00> : vector<15x90xf32>
    %442 = tpu.matmul %440, %441, %cst_365 {dimension_numbers = #tpu.dot_dimension_numbers<[1], [0], [0], [1], [0, 0, 1, 1], [], []>} : vector<15x156xbf16>, vector<156x90xbf16>, vector<15x90xf32> -> vector<15x90xf32>
    %c0_366 = arith.constant 0 : index
    %c0_367 = arith.constant 0 : index
    %443 = vector.load %arg8[%c0_366, %c0_367] : memref<156x90xbf16, #tpu.memory_space<vmem>>, vector<156x90xbf16>
    %cst_368 = arith.constant dense<0.000000e+00> : vector<15x90xf32>
    %444 = tpu.matmul %440, %443, %cst_368 {dimension_numbers = #tpu.dot_dimension_numbers<[1], [0], [0], [1], [0, 0, 1, 1], [], []>} : vector<15x156xbf16>, vector<156x90xbf16>, vector<15x90xf32> -> vector<15x90xf32>
    %445 = arith.maximumf %442, %444 : vector<15x90xf32>
    %446 = arith.truncf %445 : vector<15x90xf32> to vector<15x90xbf16>
    %cst_369 = arith.constant 0.000000e+00 : f32
    %447 = vector.broadcast %cst_369 : f32 to vector<11x176xf32>
    %448 = vector.extract_strided_slice %446 {offsets = [0, 0], sizes = [11, 90], strides = [1, 1]} : vector<15x90xbf16> to vector<11x90xbf16>
    %c0_370 = arith.constant 0 : index
    %c0_371 = arith.constant 0 : index
    %c0_372 = arith.constant 0 : index
    %449 = vector.load %arg4[%c0_370, %c0_371, %c0_372] : memref<5x90x176xbf16, #tpu.memory_space<vmem>>, vector<1x90x176xbf16>
    %450 = vector.shape_cast %449 : vector<1x90x176xbf16> to vector<90x176xbf16>
    %cst_373 = arith.constant dense<0.000000e+00> : vector<11x176xf32>
    %451 = tpu.matmul %448, %450, %cst_373 {dimension_numbers = #tpu.dot_dimension_numbers<[1], [0], [0], [1], [0, 0, 1, 1], [], []>} : vector<11x90xbf16>, vector<90x176xbf16>, vector<11x176xf32> -> vector<11x176xf32>
    %452 = arith.addf %447, %451 : vector<11x176xf32>
    %453 = vector.extract_strided_slice %446 {offsets = [1, 0], sizes = [11, 90], strides = [1, 1]} : vector<15x90xbf16> to vector<11x90xbf16>
    %c1_374 = arith.constant 1 : index
    %c0_375 = arith.constant 0 : index
    %c0_376 = arith.constant 0 : index
    %454 = vector.load %arg4[%c1_374, %c0_375, %c0_376] : memref<5x90x176xbf16, #tpu.memory_space<vmem>>, vector<1x90x176xbf16>
    %455 = vector.shape_cast %454 : vector<1x90x176xbf16> to vector<90x176xbf16>
    %cst_377 = arith.constant dense<0.000000e+00> : vector<11x176xf32>
    %456 = tpu.matmul %453, %455, %cst_377 {dimension_numbers = #tpu.dot_dimension_numbers<[1], [0], [0], [1], [0, 0, 1, 1], [], []>} : vector<11x90xbf16>, vector<90x176xbf16>, vector<11x176xf32> -> vector<11x176xf32>
    %457 = arith.addf %452, %456 : vector<11x176xf32>
    %458 = vector.extract_strided_slice %446 {offsets = [2, 0], sizes = [11, 90], strides = [1, 1]} : vector<15x90xbf16> to vector<11x90xbf16>
    %c2_378 = arith.constant 2 : index
    %c0_379 = arith.constant 0 : index
    %c0_380 = arith.constant 0 : index
    %459 = vector.load %arg4[%c2_378, %c0_379, %c0_380] : memref<5x90x176xbf16, #tpu.memory_space<vmem>>, vector<1x90x176xbf16>
    %460 = vector.shape_cast %459 : vector<1x90x176xbf16> to vector<90x176xbf16>
    %cst_381 = arith.constant dense<0.000000e+00> : vector<11x176xf32>
    %461 = tpu.matmul %458, %460, %cst_381 {dimension_numbers = #tpu.dot_dimension_numbers<[1], [0], [0], [1], [0, 0, 1, 1], [], []>} : vector<11x90xbf16>, vector<90x176xbf16>, vector<11x176xf32> -> vector<11x176xf32>
    %462 = arith.addf %457, %461 : vector<11x176xf32>
    %463 = vector.extract_strided_slice %446 {offsets = [3, 0], sizes = [11, 90], strides = [1, 1]} : vector<15x90xbf16> to vector<11x90xbf16>
    %c3_382 = arith.constant 3 : index
    %c0_383 = arith.constant 0 : index
    %c0_384 = arith.constant 0 : index
    %464 = vector.load %arg4[%c3_382, %c0_383, %c0_384] : memref<5x90x176xbf16, #tpu.memory_space<vmem>>, vector<1x90x176xbf16>
    %465 = vector.shape_cast %464 : vector<1x90x176xbf16> to vector<90x176xbf16>
    %cst_385 = arith.constant dense<0.000000e+00> : vector<11x176xf32>
    %466 = tpu.matmul %463, %465, %cst_385 {dimension_numbers = #tpu.dot_dimension_numbers<[1], [0], [0], [1], [0, 0, 1, 1], [], []>} : vector<11x90xbf16>, vector<90x176xbf16>, vector<11x176xf32> -> vector<11x176xf32>
    %467 = arith.addf %462, %466 : vector<11x176xf32>
    %468 = vector.extract_strided_slice %446 {offsets = [4, 0], sizes = [11, 90], strides = [1, 1]} : vector<15x90xbf16> to vector<11x90xbf16>
    %c4_386 = arith.constant 4 : index
    %c0_387 = arith.constant 0 : index
    %c0_388 = arith.constant 0 : index
    %469 = vector.load %arg4[%c4_386, %c0_387, %c0_388] : memref<5x90x176xbf16, #tpu.memory_space<vmem>>, vector<1x90x176xbf16>
    %470 = vector.shape_cast %469 : vector<1x90x176xbf16> to vector<90x176xbf16>
    %cst_389 = arith.constant dense<0.000000e+00> : vector<11x176xf32>
    %471 = tpu.matmul %468, %470, %cst_389 {dimension_numbers = #tpu.dot_dimension_numbers<[1], [0], [0], [1], [0, 0, 1, 1], [], []>} : vector<11x90xbf16>, vector<90x176xbf16>, vector<11x176xf32> -> vector<11x176xf32>
    %472 = arith.addf %467, %471 : vector<11x176xf32>
    %473 = arith.truncf %472 : vector<11x176xf32> to vector<11x176xbf16>
    %c0_390 = arith.constant 0 : index
    %c0_391 = arith.constant 0 : index
    %474 = vector.load %arg9[%c0_390, %c0_391] : memref<5x11xbf16, #tpu.memory_space<vmem>>, vector<5x11xbf16>
    %cst_392 = arith.constant dense<0.000000e+00> : vector<5x176xf32>
    %475 = tpu.matmul %474, %473, %cst_392 {dimension_numbers = #tpu.dot_dimension_numbers<[1], [0], [0], [1], [0, 0, 1, 1], [], []>} : vector<5x11xbf16>, vector<11x176xbf16>, vector<5x176xf32> -> vector<5x176xf32>
    %c0_393 = arith.constant 0 : index
    %c0_394 = arith.constant 0 : index
    %476 = vector.load %arg10[%c0_393, %c0_394] : memref<5x11xbf16, #tpu.memory_space<vmem>>, vector<5x11xbf16>
    %cst_395 = arith.constant dense<0.000000e+00> : vector<5x176xf32>
    %477 = tpu.matmul %476, %473, %cst_395 {dimension_numbers = #tpu.dot_dimension_numbers<[1], [0], [0], [1], [0, 0, 1, 1], [], []>} : vector<5x11xbf16>, vector<11x176xbf16>, vector<5x176xf32> -> vector<5x176xf32>
    %478 = arith.maximumf %475, %477 : vector<5x176xf32>
    %479 = arith.truncf %478 : vector<5x176xf32> to vector<5x176xbf16>
    %c0_396 = arith.constant 0 : index
    %c0_397 = arith.constant 0 : index
    %480 = vector.load %arg11[%c0_396, %c0_397] : memref<176x80xbf16, #tpu.memory_space<vmem>>, vector<176x80xbf16>
    %cst_398 = arith.constant dense<0.000000e+00> : vector<5x80xf32>
    %481 = tpu.matmul %479, %480, %cst_398 {dimension_numbers = #tpu.dot_dimension_numbers<[1], [0], [0], [1], [0, 0, 1, 1], [], []>} : vector<5x176xbf16>, vector<176x80xbf16>, vector<5x80xf32> -> vector<5x80xf32>
    %c0_399 = arith.constant 0 : index
    %c0_400 = arith.constant 0 : index
    %482 = vector.load %arg12[%c0_399, %c0_400] : memref<176x80xbf16, #tpu.memory_space<vmem>>, vector<176x80xbf16>
    %cst_401 = arith.constant dense<0.000000e+00> : vector<5x80xf32>
    %483 = tpu.matmul %479, %482, %cst_401 {dimension_numbers = #tpu.dot_dimension_numbers<[1], [0], [0], [1], [0, 0, 1, 1], [], []>} : vector<5x176xbf16>, vector<176x80xbf16>, vector<5x80xf32> -> vector<5x80xf32>
    %484 = arith.maximumf %481, %483 : vector<5x80xf32>
    %c0_402 = arith.constant 0 : index
    %c0_403 = arith.constant 0 : index
    %485 = vector.load %arg14[%c0_402, %c0_403] : memref<1x80xf32, #tpu.memory_space<vmem>>, vector<1x80xf32>
    %486 = vector.broadcast %485 : vector<1x80xf32> to vector<5x80xf32>
    %487 = arith.addf %484, %486 : vector<5x80xf32>
    %cst_404 = arith.constant 0.000000e+00 : f32
    %488 = vector.broadcast %cst_404 : f32 to vector<5x80xf32>
    %489 = arith.maximumf %487, %488 : vector<5x80xf32>
    %490 = vector.extract_strided_slice %489 {offsets = [0, 0], sizes = [1, 80], strides = [1, 1]} : vector<5x80xf32> to vector<1x80xf32>
    %c4_405 = arith.constant 4 : index
    %c0_406 = arith.constant 0 : index
    %491 = vector.load %arg22[%c4_405, %c0_406] : memref<8x400xf32, #tpu.memory_space<vmem>>, vector<1x80xf32>
    tpu.vector_store %arg22[%c4_405, %c0_406], %490 {strides = array<i32>} : memref<8x400xf32, #tpu.memory_space<vmem>>, vector<1x80xf32>,
    %492 = vector.extract_strided_slice %489 {offsets = [1, 0], sizes = [1, 80], strides = [1, 1]} : vector<5x80xf32> to vector<1x80xf32>
    %c4_407 = arith.constant 4 : index
    %c80_408 = arith.constant 80 : index
    %493 = vector.load %arg22[%c4_407, %c80_408] : memref<8x400xf32, #tpu.memory_space<vmem>>, vector<1x80xf32>
    tpu.vector_store %arg22[%c4_407, %c80_408], %492 {strides = array<i32>} : memref<8x400xf32, #tpu.memory_space<vmem>>, vector<1x80xf32>,
    %494 = vector.extract_strided_slice %489 {offsets = [2, 0], sizes = [1, 80], strides = [1, 1]} : vector<5x80xf32> to vector<1x80xf32>
    %c4_409 = arith.constant 4 : index
    %c160_410 = arith.constant 160 : index
    %495 = vector.load %arg22[%c4_409, %c160_410] : memref<8x400xf32, #tpu.memory_space<vmem>>, vector<1x80xf32>
    tpu.vector_store %arg22[%c4_409, %c160_410], %494 {strides = array<i32>} : memref<8x400xf32, #tpu.memory_space<vmem>>, vector<1x80xf32>,
    %496 = vector.extract_strided_slice %489 {offsets = [3, 0], sizes = [1, 80], strides = [1, 1]} : vector<5x80xf32> to vector<1x80xf32>
    %c4_411 = arith.constant 4 : index
    %c240_412 = arith.constant 240 : index
    %497 = vector.load %arg22[%c4_411, %c240_412] : memref<8x400xf32, #tpu.memory_space<vmem>>, vector<1x80xf32>
    tpu.vector_store %arg22[%c4_411, %c240_412], %496 {strides = array<i32>} : memref<8x400xf32, #tpu.memory_space<vmem>>, vector<1x80xf32>,
    %498 = vector.extract_strided_slice %489 {offsets = [4, 0], sizes = [1, 80], strides = [1, 1]} : vector<5x80xf32> to vector<1x80xf32>
    %c4_413 = arith.constant 4 : index
    %c320_414 = arith.constant 320 : index
    %499 = vector.load %arg22[%c4_413, %c320_414] : memref<8x400xf32, #tpu.memory_space<vmem>>, vector<1x80xf32>
    tpu.vector_store %arg22[%c4_413, %c320_414], %498 {strides = array<i32>} : memref<8x400xf32, #tpu.memory_space<vmem>>, vector<1x80xf32>,
    %c5 = arith.constant 5 : index
    %c0_415 = arith.constant 0 : index
    %c0_416 = arith.constant 0 : index
    %500 = vector.load %arg1[%c5, %c0_415, %c0_416] : memref<8x30x30xf32, #tpu.memory_space<vmem>>, vector<1x30x30xf32>
    %501 = vector.shape_cast %500 : vector<1x30x30xf32> to vector<30x30xf32>
    %502 = arith.truncf %501 : vector<30x30xf32> to vector<30x30xbf16>
    %cst_417 = arith.constant 0.000000e+00 : f32
    %503 = vector.broadcast %cst_417 : f32 to vector<26x156xf32>
    %504 = vector.extract_strided_slice %502 {offsets = [0, 0], sizes = [26, 30], strides = [1, 1]} : vector<30x30xbf16> to vector<26x30xbf16>
    %c0_418 = arith.constant 0 : index
    %c0_419 = arith.constant 0 : index
    %c0_420 = arith.constant 0 : index
    %505 = vector.load %arg3[%c0_418, %c0_419, %c0_420] : memref<5x30x156xbf16, #tpu.memory_space<vmem>>, vector<1x30x156xbf16>
    %506 = vector.shape_cast %505 : vector<1x30x156xbf16> to vector<30x156xbf16>
    %cst_421 = arith.constant dense<0.000000e+00> : vector<26x156xf32>
    %507 = tpu.matmul %504, %506, %cst_421 {dimension_numbers = #tpu.dot_dimension_numbers<[1], [0], [0], [1], [0, 0, 1, 1], [], []>} : vector<26x30xbf16>, vector<30x156xbf16>, vector<26x156xf32> -> vector<26x156xf32>
    %508 = arith.addf %503, %507 : vector<26x156xf32>
    %509 = vector.extract_strided_slice %502 {offsets = [1, 0], sizes = [26, 30], strides = [1, 1]} : vector<30x30xbf16> to vector<26x30xbf16>
    %c1_422 = arith.constant 1 : index
    %c0_423 = arith.constant 0 : index
    %c0_424 = arith.constant 0 : index
    %510 = vector.load %arg3[%c1_422, %c0_423, %c0_424] : memref<5x30x156xbf16, #tpu.memory_space<vmem>>, vector<1x30x156xbf16>
    %511 = vector.shape_cast %510 : vector<1x30x156xbf16> to vector<30x156xbf16>
    %cst_425 = arith.constant dense<0.000000e+00> : vector<26x156xf32>
    %512 = tpu.matmul %509, %511, %cst_425 {dimension_numbers = #tpu.dot_dimension_numbers<[1], [0], [0], [1], [0, 0, 1, 1], [], []>} : vector<26x30xbf16>, vector<30x156xbf16>, vector<26x156xf32> -> vector<26x156xf32>
    %513 = arith.addf %508, %512 : vector<26x156xf32>
    %514 = vector.extract_strided_slice %502 {offsets = [2, 0], sizes = [26, 30], strides = [1, 1]} : vector<30x30xbf16> to vector<26x30xbf16>
    %c2_426 = arith.constant 2 : index
    %c0_427 = arith.constant 0 : index
    %c0_428 = arith.constant 0 : index
    %515 = vector.load %arg3[%c2_426, %c0_427, %c0_428] : memref<5x30x156xbf16, #tpu.memory_space<vmem>>, vector<1x30x156xbf16>
    %516 = vector.shape_cast %515 : vector<1x30x156xbf16> to vector<30x156xbf16>
    %cst_429 = arith.constant dense<0.000000e+00> : vector<26x156xf32>
    %517 = tpu.matmul %514, %516, %cst_429 {dimension_numbers = #tpu.dot_dimension_numbers<[1], [0], [0], [1], [0, 0, 1, 1], [], []>} : vector<26x30xbf16>, vector<30x156xbf16>, vector<26x156xf32> -> vector<26x156xf32>
    %518 = arith.addf %513, %517 : vector<26x156xf32>
    %519 = vector.extract_strided_slice %502 {offsets = [3, 0], sizes = [26, 30], strides = [1, 1]} : vector<30x30xbf16> to vector<26x30xbf16>
    %c3_430 = arith.constant 3 : index
    %c0_431 = arith.constant 0 : index
    %c0_432 = arith.constant 0 : index
    %520 = vector.load %arg3[%c3_430, %c0_431, %c0_432] : memref<5x30x156xbf16, #tpu.memory_space<vmem>>, vector<1x30x156xbf16>
    %521 = vector.shape_cast %520 : vector<1x30x156xbf16> to vector<30x156xbf16>
    %cst_433 = arith.constant dense<0.000000e+00> : vector<26x156xf32>
    %522 = tpu.matmul %519, %521, %cst_433 {dimension_numbers = #tpu.dot_dimension_numbers<[1], [0], [0], [1], [0, 0, 1, 1], [], []>} : vector<26x30xbf16>, vector<30x156xbf16>, vector<26x156xf32> -> vector<26x156xf32>
    %523 = arith.addf %518, %522 : vector<26x156xf32>
    %524 = vector.extract_strided_slice %502 {offsets = [4, 0], sizes = [26, 30], strides = [1, 1]} : vector<30x30xbf16> to vector<26x30xbf16>
    %c4_434 = arith.constant 4 : index
    %c0_435 = arith.constant 0 : index
    %c0_436 = arith.constant 0 : index
    %525 = vector.load %arg3[%c4_434, %c0_435, %c0_436] : memref<5x30x156xbf16, #tpu.memory_space<vmem>>, vector<1x30x156xbf16>
    %526 = vector.shape_cast %525 : vector<1x30x156xbf16> to vector<30x156xbf16>
    %cst_437 = arith.constant dense<0.000000e+00> : vector<26x156xf32>
    %527 = tpu.matmul %524, %526, %cst_437 {dimension_numbers = #tpu.dot_dimension_numbers<[1], [0], [0], [1], [0, 0, 1, 1], [], []>} : vector<26x30xbf16>, vector<30x156xbf16>, vector<26x156xf32> -> vector<26x156xf32>
    %528 = arith.addf %523, %527 : vector<26x156xf32>
    %c0_438 = arith.constant 0 : index
    %c0_439 = arith.constant 0 : index
    %529 = vector.load %arg13[%c0_438, %c0_439] : memref<1x156xf32, #tpu.memory_space<vmem>>, vector<1x156xf32>
    %530 = vector.broadcast %529 : vector<1x156xf32> to vector<26x156xf32>
    %531 = arith.addf %528, %530 : vector<26x156xf32>
    %cst_440 = arith.constant 0.000000e+00 : f32
    %532 = vector.broadcast %cst_440 : f32 to vector<26x156xf32>
    %533 = arith.maximumf %531, %532 : vector<26x156xf32>
    %534 = arith.truncf %533 : vector<26x156xf32> to vector<26x156xbf16>
    %c0_441 = arith.constant 0 : index
    %c0_442 = arith.constant 0 : index
    %535 = vector.load %arg5[%c0_441, %c0_442] : memref<15x26xbf16, #tpu.memory_space<vmem>>, vector<15x26xbf16>
    %cst_443 = arith.constant dense<0.000000e+00> : vector<15x156xf32>
    %536 = tpu.matmul %535, %534, %cst_443 {dimension_numbers = #tpu.dot_dimension_numbers<[1], [0], [0], [1], [0, 0, 1, 1], [], []>} : vector<15x26xbf16>, vector<26x156xbf16>, vector<15x156xf32> -> vector<15x156xf32>
    %c0_444 = arith.constant 0 : index
    %c0_445 = arith.constant 0 : index
    %537 = vector.load %arg6[%c0_444, %c0_445] : memref<15x26xbf16, #tpu.memory_space<vmem>>, vector<15x26xbf16>
    %cst_446 = arith.constant dense<0.000000e+00> : vector<15x156xf32>
    %538 = tpu.matmul %537, %534, %cst_446 {dimension_numbers = #tpu.dot_dimension_numbers<[1], [0], [0], [1], [0, 0, 1, 1], [], []>} : vector<15x26xbf16>, vector<26x156xbf16>, vector<15x156xf32> -> vector<15x156xf32>
    %539 = arith.maximumf %536, %538 : vector<15x156xf32>
    %540 = arith.truncf %539 : vector<15x156xf32> to vector<15x156xbf16>
    %c0_447 = arith.constant 0 : index
    %c0_448 = arith.constant 0 : index
    %541 = vector.load %arg7[%c0_447, %c0_448] : memref<156x90xbf16, #tpu.memory_space<vmem>>, vector<156x90xbf16>
    %cst_449 = arith.constant dense<0.000000e+00> : vector<15x90xf32>
    %542 = tpu.matmul %540, %541, %cst_449 {dimension_numbers = #tpu.dot_dimension_numbers<[1], [0], [0], [1], [0, 0, 1, 1], [], []>} : vector<15x156xbf16>, vector<156x90xbf16>, vector<15x90xf32> -> vector<15x90xf32>
    %c0_450 = arith.constant 0 : index
    %c0_451 = arith.constant 0 : index
    %543 = vector.load %arg8[%c0_450, %c0_451] : memref<156x90xbf16, #tpu.memory_space<vmem>>, vector<156x90xbf16>
    %cst_452 = arith.constant dense<0.000000e+00> : vector<15x90xf32>
    %544 = tpu.matmul %540, %543, %cst_452 {dimension_numbers = #tpu.dot_dimension_numbers<[1], [0], [0], [1], [0, 0, 1, 1], [], []>} : vector<15x156xbf16>, vector<156x90xbf16>, vector<15x90xf32> -> vector<15x90xf32>
    %545 = arith.maximumf %542, %544 : vector<15x90xf32>
    %546 = arith.truncf %545 : vector<15x90xf32> to vector<15x90xbf16>
    %cst_453 = arith.constant 0.000000e+00 : f32
    %547 = vector.broadcast %cst_453 : f32 to vector<11x176xf32>
    %548 = vector.extract_strided_slice %546 {offsets = [0, 0], sizes = [11, 90], strides = [1, 1]} : vector<15x90xbf16> to vector<11x90xbf16>
    %c0_454 = arith.constant 0 : index
    %c0_455 = arith.constant 0 : index
    %c0_456 = arith.constant 0 : index
    %549 = vector.load %arg4[%c0_454, %c0_455, %c0_456] : memref<5x90x176xbf16, #tpu.memory_space<vmem>>, vector<1x90x176xbf16>
    %550 = vector.shape_cast %549 : vector<1x90x176xbf16> to vector<90x176xbf16>
    %cst_457 = arith.constant dense<0.000000e+00> : vector<11x176xf32>
    %551 = tpu.matmul %548, %550, %cst_457 {dimension_numbers = #tpu.dot_dimension_numbers<[1], [0], [0], [1], [0, 0, 1, 1], [], []>} : vector<11x90xbf16>, vector<90x176xbf16>, vector<11x176xf32> -> vector<11x176xf32>
    %552 = arith.addf %547, %551 : vector<11x176xf32>
    %553 = vector.extract_strided_slice %546 {offsets = [1, 0], sizes = [11, 90], strides = [1, 1]} : vector<15x90xbf16> to vector<11x90xbf16>
    %c1_458 = arith.constant 1 : index
    %c0_459 = arith.constant 0 : index
    %c0_460 = arith.constant 0 : index
    %554 = vector.load %arg4[%c1_458, %c0_459, %c0_460] : memref<5x90x176xbf16, #tpu.memory_space<vmem>>, vector<1x90x176xbf16>
    %555 = vector.shape_cast %554 : vector<1x90x176xbf16> to vector<90x176xbf16>
    %cst_461 = arith.constant dense<0.000000e+00> : vector<11x176xf32>
    %556 = tpu.matmul %553, %555, %cst_461 {dimension_numbers = #tpu.dot_dimension_numbers<[1], [0], [0], [1], [0, 0, 1, 1], [], []>} : vector<11x90xbf16>, vector<90x176xbf16>, vector<11x176xf32> -> vector<11x176xf32>
    %557 = arith.addf %552, %556 : vector<11x176xf32>
    %558 = vector.extract_strided_slice %546 {offsets = [2, 0], sizes = [11, 90], strides = [1, 1]} : vector<15x90xbf16> to vector<11x90xbf16>
    %c2_462 = arith.constant 2 : index
    %c0_463 = arith.constant 0 : index
    %c0_464 = arith.constant 0 : index
    %559 = vector.load %arg4[%c2_462, %c0_463, %c0_464] : memref<5x90x176xbf16, #tpu.memory_space<vmem>>, vector<1x90x176xbf16>
    %560 = vector.shape_cast %559 : vector<1x90x176xbf16> to vector<90x176xbf16>
    %cst_465 = arith.constant dense<0.000000e+00> : vector<11x176xf32>
    %561 = tpu.matmul %558, %560, %cst_465 {dimension_numbers = #tpu.dot_dimension_numbers<[1], [0], [0], [1], [0, 0, 1, 1], [], []>} : vector<11x90xbf16>, vector<90x176xbf16>, vector<11x176xf32> -> vector<11x176xf32>
    %562 = arith.addf %557, %561 : vector<11x176xf32>
    %563 = vector.extract_strided_slice %546 {offsets = [3, 0], sizes = [11, 90], strides = [1, 1]} : vector<15x90xbf16> to vector<11x90xbf16>
    %c3_466 = arith.constant 3 : index
    %c0_467 = arith.constant 0 : index
    %c0_468 = arith.constant 0 : index
    %564 = vector.load %arg4[%c3_466, %c0_467, %c0_468] : memref<5x90x176xbf16, #tpu.memory_space<vmem>>, vector<1x90x176xbf16>
    %565 = vector.shape_cast %564 : vector<1x90x176xbf16> to vector<90x176xbf16>
    %cst_469 = arith.constant dense<0.000000e+00> : vector<11x176xf32>
    %566 = tpu.matmul %563, %565, %cst_469 {dimension_numbers = #tpu.dot_dimension_numbers<[1], [0], [0], [1], [0, 0, 1, 1], [], []>} : vector<11x90xbf16>, vector<90x176xbf16>, vector<11x176xf32> -> vector<11x176xf32>
    %567 = arith.addf %562, %566 : vector<11x176xf32>
    %568 = vector.extract_strided_slice %546 {offsets = [4, 0], sizes = [11, 90], strides = [1, 1]} : vector<15x90xbf16> to vector<11x90xbf16>
    %c4_470 = arith.constant 4 : index
    %c0_471 = arith.constant 0 : index
    %c0_472 = arith.constant 0 : index
    %569 = vector.load %arg4[%c4_470, %c0_471, %c0_472] : memref<5x90x176xbf16, #tpu.memory_space<vmem>>, vector<1x90x176xbf16>
    %570 = vector.shape_cast %569 : vector<1x90x176xbf16> to vector<90x176xbf16>
    %cst_473 = arith.constant dense<0.000000e+00> : vector<11x176xf32>
    %571 = tpu.matmul %568, %570, %cst_473 {dimension_numbers = #tpu.dot_dimension_numbers<[1], [0], [0], [1], [0, 0, 1, 1], [], []>} : vector<11x90xbf16>, vector<90x176xbf16>, vector<11x176xf32> -> vector<11x176xf32>
    %572 = arith.addf %567, %571 : vector<11x176xf32>
    %573 = arith.truncf %572 : vector<11x176xf32> to vector<11x176xbf16>
    %c0_474 = arith.constant 0 : index
    %c0_475 = arith.constant 0 : index
    %574 = vector.load %arg9[%c0_474, %c0_475] : memref<5x11xbf16, #tpu.memory_space<vmem>>, vector<5x11xbf16>
    %cst_476 = arith.constant dense<0.000000e+00> : vector<5x176xf32>
    %575 = tpu.matmul %574, %573, %cst_476 {dimension_numbers = #tpu.dot_dimension_numbers<[1], [0], [0], [1], [0, 0, 1, 1], [], []>} : vector<5x11xbf16>, vector<11x176xbf16>, vector<5x176xf32> -> vector<5x176xf32>
    %c0_477 = arith.constant 0 : index
    %c0_478 = arith.constant 0 : index
    %576 = vector.load %arg10[%c0_477, %c0_478] : memref<5x11xbf16, #tpu.memory_space<vmem>>, vector<5x11xbf16>
    %cst_479 = arith.constant dense<0.000000e+00> : vector<5x176xf32>
    %577 = tpu.matmul %576, %573, %cst_479 {dimension_numbers = #tpu.dot_dimension_numbers<[1], [0], [0], [1], [0, 0, 1, 1], [], []>} : vector<5x11xbf16>, vector<11x176xbf16>, vector<5x176xf32> -> vector<5x176xf32>
    %578 = arith.maximumf %575, %577 : vector<5x176xf32>
    %579 = arith.truncf %578 : vector<5x176xf32> to vector<5x176xbf16>
    %c0_480 = arith.constant 0 : index
    %c0_481 = arith.constant 0 : index
    %580 = vector.load %arg11[%c0_480, %c0_481] : memref<176x80xbf16, #tpu.memory_space<vmem>>, vector<176x80xbf16>
    %cst_482 = arith.constant dense<0.000000e+00> : vector<5x80xf32>
    %581 = tpu.matmul %579, %580, %cst_482 {dimension_numbers = #tpu.dot_dimension_numbers<[1], [0], [0], [1], [0, 0, 1, 1], [], []>} : vector<5x176xbf16>, vector<176x80xbf16>, vector<5x80xf32> -> vector<5x80xf32>
    %c0_483 = arith.constant 0 : index
    %c0_484 = arith.constant 0 : index
    %582 = vector.load %arg12[%c0_483, %c0_484] : memref<176x80xbf16, #tpu.memory_space<vmem>>, vector<176x80xbf16>
    %cst_485 = arith.constant dense<0.000000e+00> : vector<5x80xf32>
    %583 = tpu.matmul %579, %582, %cst_485 {dimension_numbers = #tpu.dot_dimension_numbers<[1], [0], [0], [1], [0, 0, 1, 1], [], []>} : vector<5x176xbf16>, vector<176x80xbf16>, vector<5x80xf32> -> vector<5x80xf32>
    %584 = arith.maximumf %581, %583 : vector<5x80xf32>
    %c0_486 = arith.constant 0 : index
    %c0_487 = arith.constant 0 : index
    %585 = vector.load %arg14[%c0_486, %c0_487] : memref<1x80xf32, #tpu.memory_space<vmem>>, vector<1x80xf32>
    %586 = vector.broadcast %585 : vector<1x80xf32> to vector<5x80xf32>
    %587 = arith.addf %584, %586 : vector<5x80xf32>
    %cst_488 = arith.constant 0.000000e+00 : f32
    %588 = vector.broadcast %cst_488 : f32 to vector<5x80xf32>
    %589 = arith.maximumf %587, %588 : vector<5x80xf32>
    %590 = vector.extract_strided_slice %589 {offsets = [0, 0], sizes = [1, 80], strides = [1, 1]} : vector<5x80xf32> to vector<1x80xf32>
    %c5_489 = arith.constant 5 : index
    %c0_490 = arith.constant 0 : index
    %591 = vector.load %arg22[%c5_489, %c0_490] : memref<8x400xf32, #tpu.memory_space<vmem>>, vector<1x80xf32>
    tpu.vector_store %arg22[%c5_489, %c0_490], %590 {strides = array<i32>} : memref<8x400xf32, #tpu.memory_space<vmem>>, vector<1x80xf32>,
    %592 = vector.extract_strided_slice %589 {offsets = [1, 0], sizes = [1, 80], strides = [1, 1]} : vector<5x80xf32> to vector<1x80xf32>
    %c5_491 = arith.constant 5 : index
    %c80_492 = arith.constant 80 : index
    %593 = vector.load %arg22[%c5_491, %c80_492] : memref<8x400xf32, #tpu.memory_space<vmem>>, vector<1x80xf32>
    tpu.vector_store %arg22[%c5_491, %c80_492], %592 {strides = array<i32>} : memref<8x400xf32, #tpu.memory_space<vmem>>, vector<1x80xf32>,
    %594 = vector.extract_strided_slice %589 {offsets = [2, 0], sizes = [1, 80], strides = [1, 1]} : vector<5x80xf32> to vector<1x80xf32>
    %c5_493 = arith.constant 5 : index
    %c160_494 = arith.constant 160 : index
    %595 = vector.load %arg22[%c5_493, %c160_494] : memref<8x400xf32, #tpu.memory_space<vmem>>, vector<1x80xf32>
    tpu.vector_store %arg22[%c5_493, %c160_494], %594 {strides = array<i32>} : memref<8x400xf32, #tpu.memory_space<vmem>>, vector<1x80xf32>,
    %596 = vector.extract_strided_slice %589 {offsets = [3, 0], sizes = [1, 80], strides = [1, 1]} : vector<5x80xf32> to vector<1x80xf32>
    %c5_495 = arith.constant 5 : index
    %c240_496 = arith.constant 240 : index
    %597 = vector.load %arg22[%c5_495, %c240_496] : memref<8x400xf32, #tpu.memory_space<vmem>>, vector<1x80xf32>
    tpu.vector_store %arg22[%c5_495, %c240_496], %596 {strides = array<i32>} : memref<8x400xf32, #tpu.memory_space<vmem>>, vector<1x80xf32>,
    %598 = vector.extract_strided_slice %589 {offsets = [4, 0], sizes = [1, 80], strides = [1, 1]} : vector<5x80xf32> to vector<1x80xf32>
    %c5_497 = arith.constant 5 : index
    %c320_498 = arith.constant 320 : index
    %599 = vector.load %arg22[%c5_497, %c320_498] : memref<8x400xf32, #tpu.memory_space<vmem>>, vector<1x80xf32>
    tpu.vector_store %arg22[%c5_497, %c320_498], %598 {strides = array<i32>} : memref<8x400xf32, #tpu.memory_space<vmem>>, vector<1x80xf32>,
    %c6 = arith.constant 6 : index
    %c0_499 = arith.constant 0 : index
    %c0_500 = arith.constant 0 : index
    %600 = vector.load %arg1[%c6, %c0_499, %c0_500] : memref<8x30x30xf32, #tpu.memory_space<vmem>>, vector<1x30x30xf32>
    %601 = vector.shape_cast %600 : vector<1x30x30xf32> to vector<30x30xf32>
    %602 = arith.truncf %601 : vector<30x30xf32> to vector<30x30xbf16>
    %cst_501 = arith.constant 0.000000e+00 : f32
    %603 = vector.broadcast %cst_501 : f32 to vector<26x156xf32>
    %604 = vector.extract_strided_slice %602 {offsets = [0, 0], sizes = [26, 30], strides = [1, 1]} : vector<30x30xbf16> to vector<26x30xbf16>
    %c0_502 = arith.constant 0 : index
    %c0_503 = arith.constant 0 : index
    %c0_504 = arith.constant 0 : index
    %605 = vector.load %arg3[%c0_502, %c0_503, %c0_504] : memref<5x30x156xbf16, #tpu.memory_space<vmem>>, vector<1x30x156xbf16>
    %606 = vector.shape_cast %605 : vector<1x30x156xbf16> to vector<30x156xbf16>
    %cst_505 = arith.constant dense<0.000000e+00> : vector<26x156xf32>
    %607 = tpu.matmul %604, %606, %cst_505 {dimension_numbers = #tpu.dot_dimension_numbers<[1], [0], [0], [1], [0, 0, 1, 1], [], []>} : vector<26x30xbf16>, vector<30x156xbf16>, vector<26x156xf32> -> vector<26x156xf32>
    %608 = arith.addf %603, %607 : vector<26x156xf32>
    %609 = vector.extract_strided_slice %602 {offsets = [1, 0], sizes = [26, 30], strides = [1, 1]} : vector<30x30xbf16> to vector<26x30xbf16>
    %c1_506 = arith.constant 1 : index
    %c0_507 = arith.constant 0 : index
    %c0_508 = arith.constant 0 : index
    %610 = vector.load %arg3[%c1_506, %c0_507, %c0_508] : memref<5x30x156xbf16, #tpu.memory_space<vmem>>, vector<1x30x156xbf16>
    %611 = vector.shape_cast %610 : vector<1x30x156xbf16> to vector<30x156xbf16>
    %cst_509 = arith.constant dense<0.000000e+00> : vector<26x156xf32>
    %612 = tpu.matmul %609, %611, %cst_509 {dimension_numbers = #tpu.dot_dimension_numbers<[1], [0], [0], [1], [0, 0, 1, 1], [], []>} : vector<26x30xbf16>, vector<30x156xbf16>, vector<26x156xf32> -> vector<26x156xf32>
    %613 = arith.addf %608, %612 : vector<26x156xf32>
    %614 = vector.extract_strided_slice %602 {offsets = [2, 0], sizes = [26, 30], strides = [1, 1]} : vector<30x30xbf16> to vector<26x30xbf16>
    %c2_510 = arith.constant 2 : index
    %c0_511 = arith.constant 0 : index
    %c0_512 = arith.constant 0 : index
    %615 = vector.load %arg3[%c2_510, %c0_511, %c0_512] : memref<5x30x156xbf16, #tpu.memory_space<vmem>>, vector<1x30x156xbf16>
    %616 = vector.shape_cast %615 : vector<1x30x156xbf16> to vector<30x156xbf16>
    %cst_513 = arith.constant dense<0.000000e+00> : vector<26x156xf32>
    %617 = tpu.matmul %614, %616, %cst_513 {dimension_numbers = #tpu.dot_dimension_numbers<[1], [0], [0], [1], [0, 0, 1, 1], [], []>} : vector<26x30xbf16>, vector<30x156xbf16>, vector<26x156xf32> -> vector<26x156xf32>
    %618 = arith.addf %613, %617 : vector<26x156xf32>
    %619 = vector.extract_strided_slice %602 {offsets = [3, 0], sizes = [26, 30], strides = [1, 1]} : vector<30x30xbf16> to vector<26x30xbf16>
    %c3_514 = arith.constant 3 : index
    %c0_515 = arith.constant 0 : index
    %c0_516 = arith.constant 0 : index
    %620 = vector.load %arg3[%c3_514, %c0_515, %c0_516] : memref<5x30x156xbf16, #tpu.memory_space<vmem>>, vector<1x30x156xbf16>
    %621 = vector.shape_cast %620 : vector<1x30x156xbf16> to vector<30x156xbf16>
    %cst_517 = arith.constant dense<0.000000e+00> : vector<26x156xf32>
    %622 = tpu.matmul %619, %621, %cst_517 {dimension_numbers = #tpu.dot_dimension_numbers<[1], [0], [0], [1], [0, 0, 1, 1], [], []>} : vector<26x30xbf16>, vector<30x156xbf16>, vector<26x156xf32> -> vector<26x156xf32>
    %623 = arith.addf %618, %622 : vector<26x156xf32>
    %624 = vector.extract_strided_slice %602 {offsets = [4, 0], sizes = [26, 30], strides = [1, 1]} : vector<30x30xbf16> to vector<26x30xbf16>
    %c4_518 = arith.constant 4 : index
    %c0_519 = arith.constant 0 : index
    %c0_520 = arith.constant 0 : index
    %625 = vector.load %arg3[%c4_518, %c0_519, %c0_520] : memref<5x30x156xbf16, #tpu.memory_space<vmem>>, vector<1x30x156xbf16>
    %626 = vector.shape_cast %625 : vector<1x30x156xbf16> to vector<30x156xbf16>
    %cst_521 = arith.constant dense<0.000000e+00> : vector<26x156xf32>
    %627 = tpu.matmul %624, %626, %cst_521 {dimension_numbers = #tpu.dot_dimension_numbers<[1], [0], [0], [1], [0, 0, 1, 1], [], []>} : vector<26x30xbf16>, vector<30x156xbf16>, vector<26x156xf32> -> vector<26x156xf32>
    %628 = arith.addf %623, %627 : vector<26x156xf32>
    %c0_522 = arith.constant 0 : index
    %c0_523 = arith.constant 0 : index
    %629 = vector.load %arg13[%c0_522, %c0_523] : memref<1x156xf32, #tpu.memory_space<vmem>>, vector<1x156xf32>
    %630 = vector.broadcast %629 : vector<1x156xf32> to vector<26x156xf32>
    %631 = arith.addf %628, %630 : vector<26x156xf32>
    %cst_524 = arith.constant 0.000000e+00 : f32
    %632 = vector.broadcast %cst_524 : f32 to vector<26x156xf32>
    %633 = arith.maximumf %631, %632 : vector<26x156xf32>
    %634 = arith.truncf %633 : vector<26x156xf32> to vector<26x156xbf16>
    %c0_525 = arith.constant 0 : index
    %c0_526 = arith.constant 0 : index
    %635 = vector.load %arg5[%c0_525, %c0_526] : memref<15x26xbf16, #tpu.memory_space<vmem>>, vector<15x26xbf16>
    %cst_527 = arith.constant dense<0.000000e+00> : vector<15x156xf32>
    %636 = tpu.matmul %635, %634, %cst_527 {dimension_numbers = #tpu.dot_dimension_numbers<[1], [0], [0], [1], [0, 0, 1, 1], [], []>} : vector<15x26xbf16>, vector<26x156xbf16>, vector<15x156xf32> -> vector<15x156xf32>
    %c0_528 = arith.constant 0 : index
    %c0_529 = arith.constant 0 : index
    %637 = vector.load %arg6[%c0_528, %c0_529] : memref<15x26xbf16, #tpu.memory_space<vmem>>, vector<15x26xbf16>
    %cst_530 = arith.constant dense<0.000000e+00> : vector<15x156xf32>
    %638 = tpu.matmul %637, %634, %cst_530 {dimension_numbers = #tpu.dot_dimension_numbers<[1], [0], [0], [1], [0, 0, 1, 1], [], []>} : vector<15x26xbf16>, vector<26x156xbf16>, vector<15x156xf32> -> vector<15x156xf32>
    %639 = arith.maximumf %636, %638 : vector<15x156xf32>
    %640 = arith.truncf %639 : vector<15x156xf32> to vector<15x156xbf16>
    %c0_531 = arith.constant 0 : index
    %c0_532 = arith.constant 0 : index
    %641 = vector.load %arg7[%c0_531, %c0_532] : memref<156x90xbf16, #tpu.memory_space<vmem>>, vector<156x90xbf16>
    %cst_533 = arith.constant dense<0.000000e+00> : vector<15x90xf32>
    %642 = tpu.matmul %640, %641, %cst_533 {dimension_numbers = #tpu.dot_dimension_numbers<[1], [0], [0], [1], [0, 0, 1, 1], [], []>} : vector<15x156xbf16>, vector<156x90xbf16>, vector<15x90xf32> -> vector<15x90xf32>
    %c0_534 = arith.constant 0 : index
    %c0_535 = arith.constant 0 : index
    %643 = vector.load %arg8[%c0_534, %c0_535] : memref<156x90xbf16, #tpu.memory_space<vmem>>, vector<156x90xbf16>
    %cst_536 = arith.constant dense<0.000000e+00> : vector<15x90xf32>
    %644 = tpu.matmul %640, %643, %cst_536 {dimension_numbers = #tpu.dot_dimension_numbers<[1], [0], [0], [1], [0, 0, 1, 1], [], []>} : vector<15x156xbf16>, vector<156x90xbf16>, vector<15x90xf32> -> vector<15x90xf32>
    %645 = arith.maximumf %642, %644 : vector<15x90xf32>
    %646 = arith.truncf %645 : vector<15x90xf32> to vector<15x90xbf16>
    %cst_537 = arith.constant 0.000000e+00 : f32
    %647 = vector.broadcast %cst_537 : f32 to vector<11x176xf32>
    %648 = vector.extract_strided_slice %646 {offsets = [0, 0], sizes = [11, 90], strides = [1, 1]} : vector<15x90xbf16> to vector<11x90xbf16>
    %c0_538 = arith.constant 0 : index
    %c0_539 = arith.constant 0 : index
    %c0_540 = arith.constant 0 : index
    %649 = vector.load %arg4[%c0_538, %c0_539, %c0_540] : memref<5x90x176xbf16, #tpu.memory_space<vmem>>, vector<1x90x176xbf16>
    %650 = vector.shape_cast %649 : vector<1x90x176xbf16> to vector<90x176xbf16>
    %cst_541 = arith.constant dense<0.000000e+00> : vector<11x176xf32>
    %651 = tpu.matmul %648, %650, %cst_541 {dimension_numbers = #tpu.dot_dimension_numbers<[1], [0], [0], [1], [0, 0, 1, 1], [], []>} : vector<11x90xbf16>, vector<90x176xbf16>, vector<11x176xf32> -> vector<11x176xf32>
    %652 = arith.addf %647, %651 : vector<11x176xf32>
    %653 = vector.extract_strided_slice %646 {offsets = [1, 0], sizes = [11, 90], strides = [1, 1]} : vector<15x90xbf16> to vector<11x90xbf16>
    %c1_542 = arith.constant 1 : index
    %c0_543 = arith.constant 0 : index
    %c0_544 = arith.constant 0 : index
    %654 = vector.load %arg4[%c1_542, %c0_543, %c0_544] : memref<5x90x176xbf16, #tpu.memory_space<vmem>>, vector<1x90x176xbf16>
    %655 = vector.shape_cast %654 : vector<1x90x176xbf16> to vector<90x176xbf16>
    %cst_545 = arith.constant dense<0.000000e+00> : vector<11x176xf32>
    %656 = tpu.matmul %653, %655, %cst_545 {dimension_numbers = #tpu.dot_dimension_numbers<[1], [0], [0], [1], [0, 0, 1, 1], [], []>} : vector<11x90xbf16>, vector<90x176xbf16>, vector<11x176xf32> -> vector<11x176xf32>
    %657 = arith.addf %652, %656 : vector<11x176xf32>
    %658 = vector.extract_strided_slice %646 {offsets = [2, 0], sizes = [11, 90], strides = [1, 1]} : vector<15x90xbf16> to vector<11x90xbf16>
    %c2_546 = arith.constant 2 : index
    %c0_547 = arith.constant 0 : index
    %c0_548 = arith.constant 0 : index
    %659 = vector.load %arg4[%c2_546, %c0_547, %c0_548] : memref<5x90x176xbf16, #tpu.memory_space<vmem>>, vector<1x90x176xbf16>
    %660 = vector.shape_cast %659 : vector<1x90x176xbf16> to vector<90x176xbf16>
    %cst_549 = arith.constant dense<0.000000e+00> : vector<11x176xf32>
    %661 = tpu.matmul %658, %660, %cst_549 {dimension_numbers = #tpu.dot_dimension_numbers<[1], [0], [0], [1], [0, 0, 1, 1], [], []>} : vector<11x90xbf16>, vector<90x176xbf16>, vector<11x176xf32> -> vector<11x176xf32>
    %662 = arith.addf %657, %661 : vector<11x176xf32>
    %663 = vector.extract_strided_slice %646 {offsets = [3, 0], sizes = [11, 90], strides = [1, 1]} : vector<15x90xbf16> to vector<11x90xbf16>
    %c3_550 = arith.constant 3 : index
    %c0_551 = arith.constant 0 : index
    %c0_552 = arith.constant 0 : index
    %664 = vector.load %arg4[%c3_550, %c0_551, %c0_552] : memref<5x90x176xbf16, #tpu.memory_space<vmem>>, vector<1x90x176xbf16>
    %665 = vector.shape_cast %664 : vector<1x90x176xbf16> to vector<90x176xbf16>
    %cst_553 = arith.constant dense<0.000000e+00> : vector<11x176xf32>
    %666 = tpu.matmul %663, %665, %cst_553 {dimension_numbers = #tpu.dot_dimension_numbers<[1], [0], [0], [1], [0, 0, 1, 1], [], []>} : vector<11x90xbf16>, vector<90x176xbf16>, vector<11x176xf32> -> vector<11x176xf32>
    %667 = arith.addf %662, %666 : vector<11x176xf32>
    %668 = vector.extract_strided_slice %646 {offsets = [4, 0], sizes = [11, 90], strides = [1, 1]} : vector<15x90xbf16> to vector<11x90xbf16>
    %c4_554 = arith.constant 4 : index
    %c0_555 = arith.constant 0 : index
    %c0_556 = arith.constant 0 : index
    %669 = vector.load %arg4[%c4_554, %c0_555, %c0_556] : memref<5x90x176xbf16, #tpu.memory_space<vmem>>, vector<1x90x176xbf16>
    %670 = vector.shape_cast %669 : vector<1x90x176xbf16> to vector<90x176xbf16>
    %cst_557 = arith.constant dense<0.000000e+00> : vector<11x176xf32>
    %671 = tpu.matmul %668, %670, %cst_557 {dimension_numbers = #tpu.dot_dimension_numbers<[1], [0], [0], [1], [0, 0, 1, 1], [], []>} : vector<11x90xbf16>, vector<90x176xbf16>, vector<11x176xf32> -> vector<11x176xf32>
    %672 = arith.addf %667, %671 : vector<11x176xf32>
    %673 = arith.truncf %672 : vector<11x176xf32> to vector<11x176xbf16>
    %c0_558 = arith.constant 0 : index
    %c0_559 = arith.constant 0 : index
    %674 = vector.load %arg9[%c0_558, %c0_559] : memref<5x11xbf16, #tpu.memory_space<vmem>>, vector<5x11xbf16>
    %cst_560 = arith.constant dense<0.000000e+00> : vector<5x176xf32>
    %675 = tpu.matmul %674, %673, %cst_560 {dimension_numbers = #tpu.dot_dimension_numbers<[1], [0], [0], [1], [0, 0, 1, 1], [], []>} : vector<5x11xbf16>, vector<11x176xbf16>, vector<5x176xf32> -> vector<5x176xf32>
    %c0_561 = arith.constant 0 : index
    %c0_562 = arith.constant 0 : index
    %676 = vector.load %arg10[%c0_561, %c0_562] : memref<5x11xbf16, #tpu.memory_space<vmem>>, vector<5x11xbf16>
    %cst_563 = arith.constant dense<0.000000e+00> : vector<5x176xf32>
    %677 = tpu.matmul %676, %673, %cst_563 {dimension_numbers = #tpu.dot_dimension_numbers<[1], [0], [0], [1], [0, 0, 1, 1], [], []>} : vector<5x11xbf16>, vector<11x176xbf16>, vector<5x176xf32> -> vector<5x176xf32>
    %678 = arith.maximumf %675, %677 : vector<5x176xf32>
    %679 = arith.truncf %678 : vector<5x176xf32> to vector<5x176xbf16>
    %c0_564 = arith.constant 0 : index
    %c0_565 = arith.constant 0 : index
    %680 = vector.load %arg11[%c0_564, %c0_565] : memref<176x80xbf16, #tpu.memory_space<vmem>>, vector<176x80xbf16>
    %cst_566 = arith.constant dense<0.000000e+00> : vector<5x80xf32>
    %681 = tpu.matmul %679, %680, %cst_566 {dimension_numbers = #tpu.dot_dimension_numbers<[1], [0], [0], [1], [0, 0, 1, 1], [], []>} : vector<5x176xbf16>, vector<176x80xbf16>, vector<5x80xf32> -> vector<5x80xf32>
    %c0_567 = arith.constant 0 : index
    %c0_568 = arith.constant 0 : index
    %682 = vector.load %arg12[%c0_567, %c0_568] : memref<176x80xbf16, #tpu.memory_space<vmem>>, vector<176x80xbf16>
    %cst_569 = arith.constant dense<0.000000e+00> : vector<5x80xf32>
    %683 = tpu.matmul %679, %682, %cst_569 {dimension_numbers = #tpu.dot_dimension_numbers<[1], [0], [0], [1], [0, 0, 1, 1], [], []>} : vector<5x176xbf16>, vector<176x80xbf16>, vector<5x80xf32> -> vector<5x80xf32>
    %684 = arith.maximumf %681, %683 : vector<5x80xf32>
    %c0_570 = arith.constant 0 : index
    %c0_571 = arith.constant 0 : index
    %685 = vector.load %arg14[%c0_570, %c0_571] : memref<1x80xf32, #tpu.memory_space<vmem>>, vector<1x80xf32>
    %686 = vector.broadcast %685 : vector<1x80xf32> to vector<5x80xf32>
    %687 = arith.addf %684, %686 : vector<5x80xf32>
    %cst_572 = arith.constant 0.000000e+00 : f32
    %688 = vector.broadcast %cst_572 : f32 to vector<5x80xf32>
    %689 = arith.maximumf %687, %688 : vector<5x80xf32>
    %690 = vector.extract_strided_slice %689 {offsets = [0, 0], sizes = [1, 80], strides = [1, 1]} : vector<5x80xf32> to vector<1x80xf32>
    %c6_573 = arith.constant 6 : index
    %c0_574 = arith.constant 0 : index
    %691 = vector.load %arg22[%c6_573, %c0_574] : memref<8x400xf32, #tpu.memory_space<vmem>>, vector<1x80xf32>
    tpu.vector_store %arg22[%c6_573, %c0_574], %690 {strides = array<i32>} : memref<8x400xf32, #tpu.memory_space<vmem>>, vector<1x80xf32>,
    %692 = vector.extract_strided_slice %689 {offsets = [1, 0], sizes = [1, 80], strides = [1, 1]} : vector<5x80xf32> to vector<1x80xf32>
    %c6_575 = arith.constant 6 : index
    %c80_576 = arith.constant 80 : index
    %693 = vector.load %arg22[%c6_575, %c80_576] : memref<8x400xf32, #tpu.memory_space<vmem>>, vector<1x80xf32>
    tpu.vector_store %arg22[%c6_575, %c80_576], %692 {strides = array<i32>} : memref<8x400xf32, #tpu.memory_space<vmem>>, vector<1x80xf32>,
    %694 = vector.extract_strided_slice %689 {offsets = [2, 0], sizes = [1, 80], strides = [1, 1]} : vector<5x80xf32> to vector<1x80xf32>
    %c6_577 = arith.constant 6 : index
    %c160_578 = arith.constant 160 : index
    %695 = vector.load %arg22[%c6_577, %c160_578] : memref<8x400xf32, #tpu.memory_space<vmem>>, vector<1x80xf32>
    tpu.vector_store %arg22[%c6_577, %c160_578], %694 {strides = array<i32>} : memref<8x400xf32, #tpu.memory_space<vmem>>, vector<1x80xf32>,
    %696 = vector.extract_strided_slice %689 {offsets = [3, 0], sizes = [1, 80], strides = [1, 1]} : vector<5x80xf32> to vector<1x80xf32>
    %c6_579 = arith.constant 6 : index
    %c240_580 = arith.constant 240 : index
    %697 = vector.load %arg22[%c6_579, %c240_580] : memref<8x400xf32, #tpu.memory_space<vmem>>, vector<1x80xf32>
    tpu.vector_store %arg22[%c6_579, %c240_580], %696 {strides = array<i32>} : memref<8x400xf32, #tpu.memory_space<vmem>>, vector<1x80xf32>,
    %698 = vector.extract_strided_slice %689 {offsets = [4, 0], sizes = [1, 80], strides = [1, 1]} : vector<5x80xf32> to vector<1x80xf32>
    %c6_581 = arith.constant 6 : index
    %c320_582 = arith.constant 320 : index
    %699 = vector.load %arg22[%c6_581, %c320_582] : memref<8x400xf32, #tpu.memory_space<vmem>>, vector<1x80xf32>
    tpu.vector_store %arg22[%c6_581, %c320_582], %698 {strides = array<i32>} : memref<8x400xf32, #tpu.memory_space<vmem>>, vector<1x80xf32>,
    %c7 = arith.constant 7 : index
    %c0_583 = arith.constant 0 : index
    %c0_584 = arith.constant 0 : index
    %700 = vector.load %arg1[%c7, %c0_583, %c0_584] : memref<8x30x30xf32, #tpu.memory_space<vmem>>, vector<1x30x30xf32>
    %701 = vector.shape_cast %700 : vector<1x30x30xf32> to vector<30x30xf32>
    %702 = arith.truncf %701 : vector<30x30xf32> to vector<30x30xbf16>
    %cst_585 = arith.constant 0.000000e+00 : f32
    %703 = vector.broadcast %cst_585 : f32 to vector<26x156xf32>
    %704 = vector.extract_strided_slice %702 {offsets = [0, 0], sizes = [26, 30], strides = [1, 1]} : vector<30x30xbf16> to vector<26x30xbf16>
    %c0_586 = arith.constant 0 : index
    %c0_587 = arith.constant 0 : index
    %c0_588 = arith.constant 0 : index
    %705 = vector.load %arg3[%c0_586, %c0_587, %c0_588] : memref<5x30x156xbf16, #tpu.memory_space<vmem>>, vector<1x30x156xbf16>
    %706 = vector.shape_cast %705 : vector<1x30x156xbf16> to vector<30x156xbf16>
    %cst_589 = arith.constant dense<0.000000e+00> : vector<26x156xf32>
    %707 = tpu.matmul %704, %706, %cst_589 {dimension_numbers = #tpu.dot_dimension_numbers<[1], [0], [0], [1], [0, 0, 1, 1], [], []>} : vector<26x30xbf16>, vector<30x156xbf16>, vector<26x156xf32> -> vector<26x156xf32>
    %708 = arith.addf %703, %707 : vector<26x156xf32>
    %709 = vector.extract_strided_slice %702 {offsets = [1, 0], sizes = [26, 30], strides = [1, 1]} : vector<30x30xbf16> to vector<26x30xbf16>
    %c1_590 = arith.constant 1 : index
    %c0_591 = arith.constant 0 : index
    %c0_592 = arith.constant 0 : index
    %710 = vector.load %arg3[%c1_590, %c0_591, %c0_592] : memref<5x30x156xbf16, #tpu.memory_space<vmem>>, vector<1x30x156xbf16>
    %711 = vector.shape_cast %710 : vector<1x30x156xbf16> to vector<30x156xbf16>
    %cst_593 = arith.constant dense<0.000000e+00> : vector<26x156xf32>
    %712 = tpu.matmul %709, %711, %cst_593 {dimension_numbers = #tpu.dot_dimension_numbers<[1], [0], [0], [1], [0, 0, 1, 1], [], []>} : vector<26x30xbf16>, vector<30x156xbf16>, vector<26x156xf32> -> vector<26x156xf32>
    %713 = arith.addf %708, %712 : vector<26x156xf32>
    %714 = vector.extract_strided_slice %702 {offsets = [2, 0], sizes = [26, 30], strides = [1, 1]} : vector<30x30xbf16> to vector<26x30xbf16>
    %c2_594 = arith.constant 2 : index
    %c0_595 = arith.constant 0 : index
    %c0_596 = arith.constant 0 : index
    %715 = vector.load %arg3[%c2_594, %c0_595, %c0_596] : memref<5x30x156xbf16, #tpu.memory_space<vmem>>, vector<1x30x156xbf16>
    %716 = vector.shape_cast %715 : vector<1x30x156xbf16> to vector<30x156xbf16>
    %cst_597 = arith.constant dense<0.000000e+00> : vector<26x156xf32>
    %717 = tpu.matmul %714, %716, %cst_597 {dimension_numbers = #tpu.dot_dimension_numbers<[1], [0], [0], [1], [0, 0, 1, 1], [], []>} : vector<26x30xbf16>, vector<30x156xbf16>, vector<26x156xf32> -> vector<26x156xf32>
    %718 = arith.addf %713, %717 : vector<26x156xf32>
    %719 = vector.extract_strided_slice %702 {offsets = [3, 0], sizes = [26, 30], strides = [1, 1]} : vector<30x30xbf16> to vector<26x30xbf16>
    %c3_598 = arith.constant 3 : index
    %c0_599 = arith.constant 0 : index
    %c0_600 = arith.constant 0 : index
    %720 = vector.load %arg3[%c3_598, %c0_599, %c0_600] : memref<5x30x156xbf16, #tpu.memory_space<vmem>>, vector<1x30x156xbf16>
    %721 = vector.shape_cast %720 : vector<1x30x156xbf16> to vector<30x156xbf16>
    %cst_601 = arith.constant dense<0.000000e+00> : vector<26x156xf32>
    %722 = tpu.matmul %719, %721, %cst_601 {dimension_numbers = #tpu.dot_dimension_numbers<[1], [0], [0], [1], [0, 0, 1, 1], [], []>} : vector<26x30xbf16>, vector<30x156xbf16>, vector<26x156xf32> -> vector<26x156xf32>
    %723 = arith.addf %718, %722 : vector<26x156xf32>
    %724 = vector.extract_strided_slice %702 {offsets = [4, 0], sizes = [26, 30], strides = [1, 1]} : vector<30x30xbf16> to vector<26x30xbf16>
    %c4_602 = arith.constant 4 : index
    %c0_603 = arith.constant 0 : index
    %c0_604 = arith.constant 0 : index
    %725 = vector.load %arg3[%c4_602, %c0_603, %c0_604] : memref<5x30x156xbf16, #tpu.memory_space<vmem>>, vector<1x30x156xbf16>
    %726 = vector.shape_cast %725 : vector<1x30x156xbf16> to vector<30x156xbf16>
    %cst_605 = arith.constant dense<0.000000e+00> : vector<26x156xf32>
    %727 = tpu.matmul %724, %726, %cst_605 {dimension_numbers = #tpu.dot_dimension_numbers<[1], [0], [0], [1], [0, 0, 1, 1], [], []>} : vector<26x30xbf16>, vector<30x156xbf16>, vector<26x156xf32> -> vector<26x156xf32>
    %728 = arith.addf %723, %727 : vector<26x156xf32>
    %c0_606 = arith.constant 0 : index
    %c0_607 = arith.constant 0 : index
    %729 = vector.load %arg13[%c0_606, %c0_607] : memref<1x156xf32, #tpu.memory_space<vmem>>, vector<1x156xf32>
    %730 = vector.broadcast %729 : vector<1x156xf32> to vector<26x156xf32>
    %731 = arith.addf %728, %730 : vector<26x156xf32>
    %cst_608 = arith.constant 0.000000e+00 : f32
    %732 = vector.broadcast %cst_608 : f32 to vector<26x156xf32>
    %733 = arith.maximumf %731, %732 : vector<26x156xf32>
    %734 = arith.truncf %733 : vector<26x156xf32> to vector<26x156xbf16>
    %c0_609 = arith.constant 0 : index
    %c0_610 = arith.constant 0 : index
    %735 = vector.load %arg5[%c0_609, %c0_610] : memref<15x26xbf16, #tpu.memory_space<vmem>>, vector<15x26xbf16>
    %cst_611 = arith.constant dense<0.000000e+00> : vector<15x156xf32>
    %736 = tpu.matmul %735, %734, %cst_611 {dimension_numbers = #tpu.dot_dimension_numbers<[1], [0], [0], [1], [0, 0, 1, 1], [], []>} : vector<15x26xbf16>, vector<26x156xbf16>, vector<15x156xf32> -> vector<15x156xf32>
    %c0_612 = arith.constant 0 : index
    %c0_613 = arith.constant 0 : index
    %737 = vector.load %arg6[%c0_612, %c0_613] : memref<15x26xbf16, #tpu.memory_space<vmem>>, vector<15x26xbf16>
    %cst_614 = arith.constant dense<0.000000e+00> : vector<15x156xf32>
    %738 = tpu.matmul %737, %734, %cst_614 {dimension_numbers = #tpu.dot_dimension_numbers<[1], [0], [0], [1], [0, 0, 1, 1], [], []>} : vector<15x26xbf16>, vector<26x156xbf16>, vector<15x156xf32> -> vector<15x156xf32>
    %739 = arith.maximumf %736, %738 : vector<15x156xf32>
    %740 = arith.truncf %739 : vector<15x156xf32> to vector<15x156xbf16>
    %c0_615 = arith.constant 0 : index
    %c0_616 = arith.constant 0 : index
    %741 = vector.load %arg7[%c0_615, %c0_616] : memref<156x90xbf16, #tpu.memory_space<vmem>>, vector<156x90xbf16>
    %cst_617 = arith.constant dense<0.000000e+00> : vector<15x90xf32>
    %742 = tpu.matmul %740, %741, %cst_617 {dimension_numbers = #tpu.dot_dimension_numbers<[1], [0], [0], [1], [0, 0, 1, 1], [], []>} : vector<15x156xbf16>, vector<156x90xbf16>, vector<15x90xf32> -> vector<15x90xf32>
    %c0_618 = arith.constant 0 : index
    %c0_619 = arith.constant 0 : index
    %743 = vector.load %arg8[%c0_618, %c0_619] : memref<156x90xbf16, #tpu.memory_space<vmem>>, vector<156x90xbf16>
    %cst_620 = arith.constant dense<0.000000e+00> : vector<15x90xf32>
    %744 = tpu.matmul %740, %743, %cst_620 {dimension_numbers = #tpu.dot_dimension_numbers<[1], [0], [0], [1], [0, 0, 1, 1], [], []>} : vector<15x156xbf16>, vector<156x90xbf16>, vector<15x90xf32> -> vector<15x90xf32>
    %745 = arith.maximumf %742, %744 : vector<15x90xf32>
    %746 = arith.truncf %745 : vector<15x90xf32> to vector<15x90xbf16>
    %cst_621 = arith.constant 0.000000e+00 : f32
    %747 = vector.broadcast %cst_621 : f32 to vector<11x176xf32>
    %748 = vector.extract_strided_slice %746 {offsets = [0, 0], sizes = [11, 90], strides = [1, 1]} : vector<15x90xbf16> to vector<11x90xbf16>
    %c0_622 = arith.constant 0 : index
    %c0_623 = arith.constant 0 : index
    %c0_624 = arith.constant 0 : index
    %749 = vector.load %arg4[%c0_622, %c0_623, %c0_624] : memref<5x90x176xbf16, #tpu.memory_space<vmem>>, vector<1x90x176xbf16>
    %750 = vector.shape_cast %749 : vector<1x90x176xbf16> to vector<90x176xbf16>
    %cst_625 = arith.constant dense<0.000000e+00> : vector<11x176xf32>
    %751 = tpu.matmul %748, %750, %cst_625 {dimension_numbers = #tpu.dot_dimension_numbers<[1], [0], [0], [1], [0, 0, 1, 1], [], []>} : vector<11x90xbf16>, vector<90x176xbf16>, vector<11x176xf32> -> vector<11x176xf32>
    %752 = arith.addf %747, %751 : vector<11x176xf32>
    %753 = vector.extract_strided_slice %746 {offsets = [1, 0], sizes = [11, 90], strides = [1, 1]} : vector<15x90xbf16> to vector<11x90xbf16>
    %c1_626 = arith.constant 1 : index
    %c0_627 = arith.constant 0 : index
    %c0_628 = arith.constant 0 : index
    %754 = vector.load %arg4[%c1_626, %c0_627, %c0_628] : memref<5x90x176xbf16, #tpu.memory_space<vmem>>, vector<1x90x176xbf16>
    %755 = vector.shape_cast %754 : vector<1x90x176xbf16> to vector<90x176xbf16>
    %cst_629 = arith.constant dense<0.000000e+00> : vector<11x176xf32>
    %756 = tpu.matmul %753, %755, %cst_629 {dimension_numbers = #tpu.dot_dimension_numbers<[1], [0], [0], [1], [0, 0, 1, 1], [], []>} : vector<11x90xbf16>, vector<90x176xbf16>, vector<11x176xf32> -> vector<11x176xf32>
    %757 = arith.addf %752, %756 : vector<11x176xf32>
    %758 = vector.extract_strided_slice %746 {offsets = [2, 0], sizes = [11, 90], strides = [1, 1]} : vector<15x90xbf16> to vector<11x90xbf16>
    %c2_630 = arith.constant 2 : index
    %c0_631 = arith.constant 0 : index
    %c0_632 = arith.constant 0 : index
    %759 = vector.load %arg4[%c2_630, %c0_631, %c0_632] : memref<5x90x176xbf16, #tpu.memory_space<vmem>>, vector<1x90x176xbf16>
    %760 = vector.shape_cast %759 : vector<1x90x176xbf16> to vector<90x176xbf16>
    %cst_633 = arith.constant dense<0.000000e+00> : vector<11x176xf32>
    %761 = tpu.matmul %758, %760, %cst_633 {dimension_numbers = #tpu.dot_dimension_numbers<[1], [0], [0], [1], [0, 0, 1, 1], [], []>} : vector<11x90xbf16>, vector<90x176xbf16>, vector<11x176xf32> -> vector<11x176xf32>
    %762 = arith.addf %757, %761 : vector<11x176xf32>
    %763 = vector.extract_strided_slice %746 {offsets = [3, 0], sizes = [11, 90], strides = [1, 1]} : vector<15x90xbf16> to vector<11x90xbf16>
    %c3_634 = arith.constant 3 : index
    %c0_635 = arith.constant 0 : index
    %c0_636 = arith.constant 0 : index
    %764 = vector.load %arg4[%c3_634, %c0_635, %c0_636] : memref<5x90x176xbf16, #tpu.memory_space<vmem>>, vector<1x90x176xbf16>
    %765 = vector.shape_cast %764 : vector<1x90x176xbf16> to vector<90x176xbf16>
    %cst_637 = arith.constant dense<0.000000e+00> : vector<11x176xf32>
    %766 = tpu.matmul %763, %765, %cst_637 {dimension_numbers = #tpu.dot_dimension_numbers<[1], [0], [0], [1], [0, 0, 1, 1], [], []>} : vector<11x90xbf16>, vector<90x176xbf16>, vector<11x176xf32> -> vector<11x176xf32>
    %767 = arith.addf %762, %766 : vector<11x176xf32>
    %768 = vector.extract_strided_slice %746 {offsets = [4, 0], sizes = [11, 90], strides = [1, 1]} : vector<15x90xbf16> to vector<11x90xbf16>
    %c4_638 = arith.constant 4 : index
    %c0_639 = arith.constant 0 : index
    %c0_640 = arith.constant 0 : index
    %769 = vector.load %arg4[%c4_638, %c0_639, %c0_640] : memref<5x90x176xbf16, #tpu.memory_space<vmem>>, vector<1x90x176xbf16>
    %770 = vector.shape_cast %769 : vector<1x90x176xbf16> to vector<90x176xbf16>
    %cst_641 = arith.constant dense<0.000000e+00> : vector<11x176xf32>
    %771 = tpu.matmul %768, %770, %cst_641 {dimension_numbers = #tpu.dot_dimension_numbers<[1], [0], [0], [1], [0, 0, 1, 1], [], []>} : vector<11x90xbf16>, vector<90x176xbf16>, vector<11x176xf32> -> vector<11x176xf32>
    %772 = arith.addf %767, %771 : vector<11x176xf32>
    %773 = arith.truncf %772 : vector<11x176xf32> to vector<11x176xbf16>
    %c0_642 = arith.constant 0 : index
    %c0_643 = arith.constant 0 : index
    %774 = vector.load %arg9[%c0_642, %c0_643] : memref<5x11xbf16, #tpu.memory_space<vmem>>, vector<5x11xbf16>
    %cst_644 = arith.constant dense<0.000000e+00> : vector<5x176xf32>
    %775 = tpu.matmul %774, %773, %cst_644 {dimension_numbers = #tpu.dot_dimension_numbers<[1], [0], [0], [1], [0, 0, 1, 1], [], []>} : vector<5x11xbf16>, vector<11x176xbf16>, vector<5x176xf32> -> vector<5x176xf32>
    %c0_645 = arith.constant 0 : index
    %c0_646 = arith.constant 0 : index
    %776 = vector.load %arg10[%c0_645, %c0_646] : memref<5x11xbf16, #tpu.memory_space<vmem>>, vector<5x11xbf16>
    %cst_647 = arith.constant dense<0.000000e+00> : vector<5x176xf32>
    %777 = tpu.matmul %776, %773, %cst_647 {dimension_numbers = #tpu.dot_dimension_numbers<[1], [0], [0], [1], [0, 0, 1, 1], [], []>} : vector<5x11xbf16>, vector<11x176xbf16>, vector<5x176xf32> -> vector<5x176xf32>
    %778 = arith.maximumf %775, %777 : vector<5x176xf32>
    %779 = arith.truncf %778 : vector<5x176xf32> to vector<5x176xbf16>
    %c0_648 = arith.constant 0 : index
    %c0_649 = arith.constant 0 : index
    %780 = vector.load %arg11[%c0_648, %c0_649] : memref<176x80xbf16, #tpu.memory_space<vmem>>, vector<176x80xbf16>
    %cst_650 = arith.constant dense<0.000000e+00> : vector<5x80xf32>
    %781 = tpu.matmul %779, %780, %cst_650 {dimension_numbers = #tpu.dot_dimension_numbers<[1], [0], [0], [1], [0, 0, 1, 1], [], []>} : vector<5x176xbf16>, vector<176x80xbf16>, vector<5x80xf32> -> vector<5x80xf32>
    %c0_651 = arith.constant 0 : index
    %c0_652 = arith.constant 0 : index
    %782 = vector.load %arg12[%c0_651, %c0_652] : memref<176x80xbf16, #tpu.memory_space<vmem>>, vector<176x80xbf16>
    %cst_653 = arith.constant dense<0.000000e+00> : vector<5x80xf32>
    %783 = tpu.matmul %779, %782, %cst_653 {dimension_numbers = #tpu.dot_dimension_numbers<[1], [0], [0], [1], [0, 0, 1, 1], [], []>} : vector<5x176xbf16>, vector<176x80xbf16>, vector<5x80xf32> -> vector<5x80xf32>
    %784 = arith.maximumf %781, %783 : vector<5x80xf32>
    %c0_654 = arith.constant 0 : index
    %c0_655 = arith.constant 0 : index
    %785 = vector.load %arg14[%c0_654, %c0_655] : memref<1x80xf32, #tpu.memory_space<vmem>>, vector<1x80xf32>
    %786 = vector.broadcast %785 : vector<1x80xf32> to vector<5x80xf32>
    %787 = arith.addf %784, %786 : vector<5x80xf32>
    %cst_656 = arith.constant 0.000000e+00 : f32
    %788 = vector.broadcast %cst_656 : f32 to vector<5x80xf32>
    %789 = arith.maximumf %787, %788 : vector<5x80xf32>
    %790 = vector.extract_strided_slice %789 {offsets = [0, 0], sizes = [1, 80], strides = [1, 1]} : vector<5x80xf32> to vector<1x80xf32>
    %c7_657 = arith.constant 7 : index
    %c0_658 = arith.constant 0 : index
    %791 = vector.load %arg22[%c7_657, %c0_658] : memref<8x400xf32, #tpu.memory_space<vmem>>, vector<1x80xf32>
    tpu.vector_store %arg22[%c7_657, %c0_658], %790 {strides = array<i32>} : memref<8x400xf32, #tpu.memory_space<vmem>>, vector<1x80xf32>,
    %792 = vector.extract_strided_slice %789 {offsets = [1, 0], sizes = [1, 80], strides = [1, 1]} : vector<5x80xf32> to vector<1x80xf32>
    %c7_659 = arith.constant 7 : index
    %c80_660 = arith.constant 80 : index
    %793 = vector.load %arg22[%c7_659, %c80_660] : memref<8x400xf32, #tpu.memory_space<vmem>>, vector<1x80xf32>
    tpu.vector_store %arg22[%c7_659, %c80_660], %792 {strides = array<i32>} : memref<8x400xf32, #tpu.memory_space<vmem>>, vector<1x80xf32>,
    %794 = vector.extract_strided_slice %789 {offsets = [2, 0], sizes = [1, 80], strides = [1, 1]} : vector<5x80xf32> to vector<1x80xf32>
    %c7_661 = arith.constant 7 : index
    %c160_662 = arith.constant 160 : index
    %795 = vector.load %arg22[%c7_661, %c160_662] : memref<8x400xf32, #tpu.memory_space<vmem>>, vector<1x80xf32>
    tpu.vector_store %arg22[%c7_661, %c160_662], %794 {strides = array<i32>} : memref<8x400xf32, #tpu.memory_space<vmem>>, vector<1x80xf32>,
    %796 = vector.extract_strided_slice %789 {offsets = [3, 0], sizes = [1, 80], strides = [1, 1]} : vector<5x80xf32> to vector<1x80xf32>
    %c7_663 = arith.constant 7 : index
    %c240_664 = arith.constant 240 : index
    %797 = vector.load %arg22[%c7_663, %c240_664] : memref<8x400xf32, #tpu.memory_space<vmem>>, vector<1x80xf32>
    tpu.vector_store %arg22[%c7_663, %c240_664], %796 {strides = array<i32>} : memref<8x400xf32, #tpu.memory_space<vmem>>, vector<1x80xf32>,
    %798 = vector.extract_strided_slice %789 {offsets = [4, 0], sizes = [1, 80], strides = [1, 1]} : vector<5x80xf32> to vector<1x80xf32>
    %c7_665 = arith.constant 7 : index
    %c320_666 = arith.constant 320 : index
    %799 = vector.load %arg22[%c7_665, %c320_666] : memref<8x400xf32, #tpu.memory_space<vmem>>, vector<1x80xf32>
    tpu.vector_store %arg22[%c7_665, %c320_666], %798 {strides = array<i32>} : memref<8x400xf32, #tpu.memory_space<vmem>>, vector<1x80xf32>,
    %c0_667 = arith.constant 0 : index
    %c0_668 = arith.constant 0 : index
    %800 = vector.load %arg22[%c0_667, %c0_668] : memref<8x400xf32, #tpu.memory_space<vmem>>, vector<8x400xf32>
    %801 = arith.truncf %800 : vector<8x400xf32> to vector<8x400xbf16>
    %c0_669 = arith.constant 0 : index
    %c0_670 = arith.constant 0 : index
    %802 = vector.load %arg15[%c0_669, %c0_670] : memref<400x120xbf16, #tpu.memory_space<vmem>>, vector<400x120xbf16>
    %cst_671 = arith.constant dense<0.000000e+00> : vector<8x120xf32>
    %803 = tpu.matmul %801, %802, %cst_671 {dimension_numbers = #tpu.dot_dimension_numbers<[1], [0], [0], [1], [0, 0, 1, 1], [], []>} : vector<8x400xbf16>, vector<400x120xbf16>, vector<8x120xf32> -> vector<8x120xf32>
    %c0_672 = arith.constant 0 : index
    %c0_673 = arith.constant 0 : index
    %804 = vector.load %arg16[%c0_672, %c0_673] : memref<1x120xf32, #tpu.memory_space<vmem>>, vector<1x120xf32>
    %805 = vector.broadcast %804 : vector<1x120xf32> to vector<8x120xf32>
    %806 = arith.addf %803, %805 : vector<8x120xf32>
    %cst_674 = arith.constant 0.000000e+00 : f32
    %807 = vector.broadcast %cst_674 : f32 to vector<8x120xf32>
    %808 = arith.maximumf %806, %807 : vector<8x120xf32>
    %809 = arith.truncf %808 : vector<8x120xf32> to vector<8x120xbf16>
    %c0_675 = arith.constant 0 : index
    %c0_676 = arith.constant 0 : index
    %810 = vector.load %arg17[%c0_675, %c0_676] : memref<120x84xbf16, #tpu.memory_space<vmem>>, vector<120x84xbf16>
    %cst_677 = arith.constant dense<0.000000e+00> : vector<8x84xf32>
    %811 = tpu.matmul %809, %810, %cst_677 {dimension_numbers = #tpu.dot_dimension_numbers<[1], [0], [0], [1], [0, 0, 1, 1], [], []>} : vector<8x120xbf16>, vector<120x84xbf16>, vector<8x84xf32> -> vector<8x84xf32>
    %c0_678 = arith.constant 0 : index
    %c0_679 = arith.constant 0 : index
    %812 = vector.load %arg18[%c0_678, %c0_679] : memref<1x84xf32, #tpu.memory_space<vmem>>, vector<1x84xf32>
    %813 = vector.broadcast %812 : vector<1x84xf32> to vector<8x84xf32>
    %814 = arith.addf %811, %813 : vector<8x84xf32>
    %cst_680 = arith.constant 0.000000e+00 : f32
    %815 = vector.broadcast %cst_680 : f32 to vector<8x84xf32>
    %816 = arith.maximumf %814, %815 : vector<8x84xf32>
    %817 = arith.truncf %816 : vector<8x84xf32> to vector<8x84xbf16>
    %c0_681 = arith.constant 0 : index
    %c0_682 = arith.constant 0 : index
    %818 = vector.load %arg19[%c0_681, %c0_682] : memref<84x10xbf16, #tpu.memory_space<vmem>>, vector<84x10xbf16>
    %cst_683 = arith.constant dense<0.000000e+00> : vector<8x10xf32>
    %819 = tpu.matmul %817, %818, %cst_683 {dimension_numbers = #tpu.dot_dimension_numbers<[1], [0], [0], [1], [0, 0, 1, 1], [], []>} : vector<8x84xbf16>, vector<84x10xbf16>, vector<8x10xf32> -> vector<8x10xf32>
    %c0_684 = arith.constant 0 : index
    %c0_685 = arith.constant 0 : index
    %820 = vector.load %arg20[%c0_684, %c0_685] : memref<1x10xf32, #tpu.memory_space<vmem>>, vector<1x10xf32>
    %821 = vector.broadcast %820 : vector<1x10xf32> to vector<8x10xf32>
    %822 = arith.addf %819, %821 : vector<8x10xf32>
    %c0_686 = arith.constant 0 : index
    %c0_687 = arith.constant 0 : index
    %823 = vector.load %arg2[%c0_686, %c0_687] : memref<8x1xi32, #tpu.memory_space<vmem>>, vector<8x1xi32>
    %cst_688 = arith.constant dense<0xFF800000> : vector<8xf32>
    %824 = vector.multi_reduction <maximumf>, %822, %cst_688 [1] : vector<8x10xf32> to vector<8xf32>
    %825 = vector.shape_cast %824 : vector<8xf32> to vector<8x1xf32>
    %826 = vector.broadcast %825 : vector<8x1xf32> to vector<8x10xf32>
    %827 = arith.subf %822, %826 : vector<8x10xf32>
    %828 = math.exp %827 : vector<8x10xf32>
    %cst_689 = arith.constant dense<0.000000e+00> : vector<8xf32>
    %829 = vector.multi_reduction <add>, %828, %cst_689 [1] : vector<8x10xf32> to vector<8xf32>
    %830 = vector.shape_cast %829 : vector<8xf32> to vector<8x1xf32>
    %831 = math.log %830 : vector<8x1xf32>
    %832 = arith.addf %825, %831 : vector<8x1xf32>
    %833 = tpu.iota {dimensions = array<i32: 1>} : vector<8x10xi32>
    %834 = vector.broadcast %823 : vector<8x1xi32> to vector<8x10xi32>
    %835 = arith.cmpi eq, %833, %834 : vector<8x10xi32>
    %cst_690 = arith.constant 0.000000e+00 : f32
    %836 = vector.broadcast %cst_690 : f32 to vector<8x10xf32>
    %837 = arith.select %835, %822, %836 : vector<8x10xi1>, vector<8x10xf32>
    %cst_691 = arith.constant dense<0.000000e+00> : vector<8xf32>
    %838 = vector.multi_reduction <add>, %837, %cst_691 [1] : vector<8x10xf32> to vector<8xf32>
    %839 = vector.shape_cast %838 : vector<8xf32> to vector<8x1xf32>
    %840 = vector.broadcast %825 : vector<8x1xf32> to vector<8x10xf32>
    %841 = arith.cmpf oeq, %822, %840 : vector<8x10xf32>
    %c10_i32 = arith.constant 10 : i32
    %842 = vector.broadcast %c10_i32 : i32 to vector<8x10xi32>
    %843 = arith.select %841, %833, %842 : vector<8x10xi1>, vector<8x10xi32>
    %cst_692 = arith.constant dense<2147483647> : vector<8xi32>
    %844 = vector.multi_reduction <minsi>, %843, %cst_692 [1] : vector<8x10xi32> to vector<8xi32>
    %845 = vector.shape_cast %844 : vector<8xi32> to vector<8x1xi32>
    %846 = arith.subf %832, %839 : vector<8x1xf32>
    %847 = arith.cmpi eq, %845, %823 : vector<8x1xi32>
    %848 = arith.extui %847 : vector<8x1xi1> to vector<8x1xi32>
    %849 = arith.sitofp %848 : vector<8x1xi32> to vector<8x1xf32>
    %850 = tpu.concatenate %846, %849 in 1 : vector<8x1xf32>, vector<8x1xf32> -> vector<8x2xf32>
    %c0_693 = arith.constant 0 : index
    %c0_694 = arith.constant 0 : index
    %851 = vector.load %arg21[%c0_693, %c0_694] : memref<8x2xf32, #tpu.memory_space<vmem>>, vector<8x2xf32>
    tpu.vector_store %arg21[%c0_693, %c0_694], %850 {strides = array<i32>} : memref<8x2xf32, #tpu.memory_space<vmem>>, vector<8x2xf32>,
    return
  }
  func.func @transform_0(%arg0: i32) -> (i32, i32, i32) {
    %c0_i32 = arith.constant 0 : i32
    %c0_i32_0 = arith.constant 0 : i32
    %c0_i32_1 = arith.constant 0 : i32
    return %arg0, %c0_i32, %c0_i32_0 : i32, i32, i32
  }
  func.func @transform_1(%arg0: i32) -> (i32, i32) {
    %c0_i32 = arith.constant 0 : i32
    %c0_i32_0 = arith.constant 0 : i32
    return %arg0, %c0_i32 : i32, i32
  }
  func.func @transform_2(%arg0: i32) -> (i32, i32, i32) {
    %c0_i32 = arith.constant 0 : i32
    %c0_i32_0 = arith.constant 0 : i32
    %c0_i32_1 = arith.constant 0 : i32
    %c0_i32_2 = arith.constant 0 : i32
    return %c0_i32, %c0_i32_0, %c0_i32_1 : i32, i32, i32
  }
  func.func @transform_3(%arg0: i32) -> (i32, i32, i32) {
    %c0_i32 = arith.constant 0 : i32
    %c0_i32_0 = arith.constant 0 : i32
    %c0_i32_1 = arith.constant 0 : i32
    %c0_i32_2 = arith.constant 0 : i32
    return %c0_i32, %c0_i32_0, %c0_i32_1 : i32, i32, i32
  }
  func.func @transform_4(%arg0: i32) -> (i32, i32) {
    %c0_i32 = arith.constant 0 : i32
    %c0_i32_0 = arith.constant 0 : i32
    %c0_i32_1 = arith.constant 0 : i32
    return %c0_i32, %c0_i32_0 : i32, i32
  }
  func.func @transform_5(%arg0: i32) -> (i32, i32) {
    %c0_i32 = arith.constant 0 : i32
    %c0_i32_0 = arith.constant 0 : i32
    %c0_i32_1 = arith.constant 0 : i32
    return %c0_i32, %c0_i32_0 : i32, i32
  }
  func.func @transform_6(%arg0: i32) -> (i32, i32) {
    %c0_i32 = arith.constant 0 : i32
    %c0_i32_0 = arith.constant 0 : i32
    %c0_i32_1 = arith.constant 0 : i32
    return %c0_i32, %c0_i32_0 : i32, i32
  }
  func.func @transform_7(%arg0: i32) -> (i32, i32) {
    %c0_i32 = arith.constant 0 : i32
    %c0_i32_0 = arith.constant 0 : i32
    %c0_i32_1 = arith.constant 0 : i32
    return %c0_i32, %c0_i32_0 : i32, i32
  }
  func.func @transform_8(%arg0: i32) -> (i32, i32) {
    %c0_i32 = arith.constant 0 : i32
    %c0_i32_0 = arith.constant 0 : i32
    %c0_i32_1 = arith.constant 0 : i32
    return %c0_i32, %c0_i32_0 : i32, i32
  }
  func.func @transform_9(%arg0: i32) -> (i32, i32) {
    %c0_i32 = arith.constant 0 : i32
    %c0_i32_0 = arith.constant 0 : i32
    %c0_i32_1 = arith.constant 0 : i32
    return %c0_i32, %c0_i32_0 : i32, i32
  }
  func.func @transform_10(%arg0: i32) -> (i32, i32) {
    %c0_i32 = arith.constant 0 : i32
    %c0_i32_0 = arith.constant 0 : i32
    %c0_i32_1 = arith.constant 0 : i32
    return %c0_i32, %c0_i32_0 : i32, i32
  }
  func.func @transform_11(%arg0: i32) -> (i32, i32) {
    %c0_i32 = arith.constant 0 : i32
    %c0_i32_0 = arith.constant 0 : i32
    %c0_i32_1 = arith.constant 0 : i32
    return %c0_i32, %c0_i32_0 : i32, i32
  }
  func.func @transform_12(%arg0: i32) -> (i32, i32) {
    %c0_i32 = arith.constant 0 : i32
    %c0_i32_0 = arith.constant 0 : i32
    %c0_i32_1 = arith.constant 0 : i32
    return %c0_i32, %c0_i32_0 : i32, i32
  }
  func.func @transform_13(%arg0: i32) -> (i32, i32) {
    %c0_i32 = arith.constant 0 : i32
    %c0_i32_0 = arith.constant 0 : i32
    %c0_i32_1 = arith.constant 0 : i32
    return %c0_i32, %c0_i32_0 : i32, i32
  }
  func.func @transform_14(%arg0: i32) -> (i32, i32) {
    %c0_i32 = arith.constant 0 : i32
    %c0_i32_0 = arith.constant 0 : i32
    %c0_i32_1 = arith.constant 0 : i32
    return %c0_i32, %c0_i32_0 : i32, i32
  }
  func.func @transform_15(%arg0: i32) -> (i32, i32) {
    %c0_i32 = arith.constant 0 : i32
    %c0_i32_0 = arith.constant 0 : i32
    %c0_i32_1 = arith.constant 0 : i32
    return %c0_i32, %c0_i32_0 : i32, i32
  }
  func.func @transform_16(%arg0: i32) -> (i32, i32) {
    %c0_i32 = arith.constant 0 : i32
    %c0_i32_0 = arith.constant 0 : i32
    %c0_i32_1 = arith.constant 0 : i32
    return %c0_i32, %c0_i32_0 : i32, i32
  }
  func.func @transform_17(%arg0: i32) -> (i32, i32) {
    %c0_i32 = arith.constant 0 : i32
    %c0_i32_0 = arith.constant 0 : i32
    %c0_i32_1 = arith.constant 0 : i32
    return %c0_i32, %c0_i32_0 : i32, i32
  }
  func.func @transform_18(%arg0: i32) -> (i32, i32) {
    %c0_i32 = arith.constant 0 : i32
    %c0_i32_0 = arith.constant 0 : i32
    %c0_i32_1 = arith.constant 0 : i32
    return %c0_i32, %c0_i32_0 : i32, i32
  }
  func.func @transform_19(%arg0: i32) -> (i32, i32) {
    %c0_i32 = arith.constant 0 : i32
    %c0_i32_0 = arith.constant 0 : i32
    %c0_i32_1 = arith.constant 0 : i32
    return %c0_i32, %c0_i32_0 : i32, i32
  }
  func.func @transform_20(%arg0: i32) -> (i32, i32) {
    %c0_i32 = arith.constant 0 : i32
    %c0_i32_0 = arith.constant 0 : i32
    return %arg0, %c0_i32 : i32, i32
  }
}

</mosaic_0001>

<bundles_post_ra>
// kernel: lenet_forward.1
= control target key start
LH: loop header
LB: loop body
LE: loop exit
PB: predicated region body
PF: predicated region fallthrough
CT: control target
= control target key end

     0   :  { %v19767_v1 = vmov 0   ;;  %vm122_vm0 = vcmask 1046528   ;;  %vm81_vm1 = vsmask.f32 7424  ;;  %vm115_vm2 = vcmask 244736   ;;  %s24671_s30 = smov 32   ;;  %s24636_s2 = inlined_call_operand.vmem [shape: bf16[5,30,156], index: 2, kind: input, shape index: {}]   ;;  %s24637_s0 = inlined_call_operand.vmem [shape: f32[8,30,30], index: 0, kind: input, shape index: {}]   ;;  %s24638_s4 = inlined_call_operand.vmem [shape: bf16[15,26], index: 4, kind: input, shape index: {}]   ;;  %s24639_s5 = inlined_call_operand.vmem [shape: bf16[15,26], index: 5, kind: input, shape index: {}]   ;;  %s24640_s6 = inlined_call_operand.vmem [shape: bf16[156,90], index: 6, kind: input, shape index: {}]   ;;  %s24641_s12 = inlined_call_operand.vmem [shape: f32[1,156], index: 12, kind: input, shape index: {}]   ;;  %s24642_s7 = inlined_call_operand.vmem [shape: bf16[156,90], index: 7, kind: input, shape index: {}]   ;;  %s24643_s3 = inlined_call_operand.vmem [shape: bf16[5,90,176], index: 3, kind: input, shape index: {}]   ;;  %s24644_s10 = inlined_call_operand.vmem [shape: bf16[176,80], index: 10, kind: input, shape index: {}]   ;;  %s24645_s8 = inlined_call_operand.vmem [shape: bf16[5,11], index: 8, kind: input, shape index: {}]   ;;  %s24646_s9 = inlined_call_operand.vmem [shape: bf16[5,11], index: 9, kind: input, shape index: {}]   ;;  %s24647_s11 = inlined_call_operand.vmem [shape: bf16[176,80], index: 11, kind: input, shape index: {}]   ;;  %s24648_s13 = inlined_call_operand.vmem [shape: f32[1,80], index: 13, kind: input, shape index: {}]   ;;  %s24649_s14 = inlined_call_operand.vmem [shape: bf16[400,120], index: 14, kind: input, shape index: {}]   ;;  %s24650_s16 = inlined_call_operand.vmem [shape: bf16[120,84], index: 16, kind: input, shape index: {}]   ;;  %s24651_s18 = inlined_call_operand.vmem [shape: bf16[84,10], index: 18, kind: input, shape index: {}]   ;;  %s24652_s15 = inlined_call_operand.vmem [shape: f32[1,120], index: 15, kind: input, shape index: {}]   ;;  %s24653_s17 = inlined_call_operand.vmem [shape: f32[1,84], index: 17, kind: input, shape index: {}]   ;;  %s24654_s19 = inlined_call_operand.vmem [shape: f32[1,10], index: 19, kind: input, shape index: {}]   ;;  %s24655_s1 = inlined_call_operand.vmem [shape: s32[8,1], index: 1, kind: input, shape index: {}]   ;;  %s24656_s20 = inlined_call_operand.vmem [shape: f32[8,2], index: 20, kind: output, shape index: {}]  }
   0x1   :  { %24675 = sst [smem:[#allocation3_spill]] %s24636_s2  ;;  %161 = vmatprep.mubr.bf16.mxu0 %v19767_v1  ;;  %651 = vmatprep.mubr.bf16.mxu1 %v19767_v1  ;;  %vm474_vm3 = vcmask 1045504   ;;  %vm370_vm4 = vsmask.f32 6400  ;;  %v571_v54 = vlaneseq  ;;  %v569_v57 = vld [vmem:[%s24641_s12] sm:$0x3] }
   0x2   :  { %24676 = sst [smem:[#allocation4_spill]] %s24637_s0  ;;  %s24684_s23 = sld [smem:[#allocation3_spill]]  ;;  %18411 = vset.pattern.permute.xlu0 %v19767_v1  ;;  %vm612_vm5 = vcmask 1044480   ;;  %vm24668_vm6 = vcmask 211968   ;;  %vm24666_vm7 = vcmask 228352   ;;  %vm1065_vm8 = vcmask 736256  }
   0x3   :  { %24677 = sst [smem:[#allocation5_spill]] %s24638_s4  ;;  %s24685_s29 = sld [smem:[#allocation4_spill]]  ;;  %v572_v55 = vshrl.u32 %v571_v54, 7  ;;  %vm24674_vm9 = vcmask 89088   ;;  %vm24673_vm10 = vcmask 392192   ;;  %vm24667_vm11 = vcmask 647168  }
   0x4   :  { %24678 = sst [smem:[#allocation6_spill]] %s24639_s5  ;;  %s24686_s0 = sld [smem:[#allocation5_spill]]  ;;  %vm1996_vm12 = vcmask 1041024   ;;  %vm1998_vm13 = vcmask 253952   ;;  %vm2004_vm14 = vcmask 909568   ;;  %vm2010_vm15 = vcmask 1041280  }
   0x5   :  { %24679 = sst [smem:[#allocation7_spill]] %s24640_s6  ;;  %v20002_v56 = vsub.s32 0, %v572_v55  ;;  %v20007_v58 = vsub.s32 1, %v572_v55  ;;  %s24687_s4 = sld [smem:[#allocation6_spill]]  ;;  %v18454_v55 = vld [vmem:[%s24642_s7] sm:$0xff]  }
   0x6   :  { %24680 = sst [smem:[#allocation8_spill]] %s24653_s17  ;;  %s24688_s26 = sld [smem:[#allocation7_spill]] }
   0x7   :  { %24681 = sst [smem:[#allocation9_spill]] %s24654_s19  ;;  %v574_v59 = vrot.slane %v569_v57, %v20002_v56  ;;  %v578_v60 = vrot.slane %v569_v57, %v20007_v58  ;;  %v18455_v57 = vld [vmem:[%s24642_s7 + $0x8] sm:$0xff]   ;;  %s24669_s6 = smov 80  }
   0x8   :  { %24682 = sst [smem:[#allocation10_spill]] %s24655_s1  ;;  %v18412_v0 = vld [vmem:[%s24684_s23 + $0x24] ss:$8 sps:$4 sm:$0xff]   ;;  %v18414_v2 = vld [vmem:[%s24684_s23 + $0x20] ss:$8 sps:$4 sm:$0xff]   ;;  %s24664_s2 = smov 112  }
   0x9   :  { %24683 = sst [smem:[#allocation11_spill]] %s24656_s20  ;;  %129 = vmatprep.subr.bf16.mxu0 %v18412_v0  ;;  %v18415_v3 = vld [vmem:[%s24684_s23 + $0x34] ss:$8 sps:$4 sm:$0x7f]   ;;  %v66_v5 = vld [vmem:[%s24685_s29] sm:$0xff]  ;;  %v67_v6 = vld [vmem:[%s24685_s29 + $0x8] sm:$0xff] }
   0xa   :  { %v18417_v4 = vld [vmem:[%s24684_s23 + $0x30] ss:$8 sps:$4 sm:$0x7f]   ;;  %130 = vmatpush1.bf16.msra.mxu0 %v18414_v2  ;;  %v70_v10 = vpack.c.bf16 %v67_v6, %v66_v5  ;;  %v18420_v12 = vld [vmem:[%s24684_s23 + $0x4] ss:$8 sps:$4 sm:$0xff]   ;;  %s24662_s21 = smov 64  }
   0xb   :  { %v68_v7 = vld [vmem:[%s24685_s29 + $0x10] sm:$0xff]  ;;  %16086 = vmatprep.subr.msk.bf16.mxu0 %vm122_vm0, %v18415_v3  ;;  %v124_v8 = vsel %vm122_vm0, %v18417_v4, 0  ;;  %v69_v9 = vld [vmem:[%s24685_s29 + $0x18] sm:$0x3f]  ;;  %v18418_v19 = vld [vmem:[%s24684_s23] ss:$8 sps:$4 sm:$0xff]  }
   0xc   :  { %v19910_v11 = vpack.c.bf16 %v69_v9, %v68_v7  ;;  %v83_v13 = vshrl.u32 %v70_v10, 16  ;;  %v85_v14 = vshll.u32 %v70_v10, 16  ;;  %v18421_v20 = vld [vmem:[%s24684_s23 + $0x14] ss:$8 sps:$4 sm:$0x7f]   ;;  %v475_v23 = vrot.slane %v70_v10, 2 }
   0xd   :  { %v18423_v21 = vld [vmem:[%s24684_s23 + $0x10] ss:$8 sps:$4 sm:$0x7f]   ;;  %v18426_v28 = vld [vmem:[%s24684_s23 + $0x44] ss:$8 sps:$4 sm:$0xff]   ;;  %v271_v35 = vrot.slane %v70_v10, 1 }
   0xe   :  { %132 = vmatpush1.bf16.msra.mxu0 %v124_v8  ;;  %v90_v15 = vshll.u32 %v19910_v11, 16  ;;  %v87_v16 = vrot.slane %v85_v14, 1  ;;  %v476_v24 = vrot.slane %v19910_v11, 2  ;;  %v94_v25 = vshrl.u32 %v19910_v11, 16  ;;  %v18424_v30 = vld [vmem:[%s24684_s23 + $0x40] ss:$8 sps:$4 sm:$0xff]  }
   0xf   :  { %210 = vmatprep.subr.bf16.mxu0 %v18420_v12  ;;  %v205_v27 = vsel %vm122_vm0, %v18423_v21, 0  ;;  %v18427_v31 = vld [vmem:[%s24684_s23 + $0x54] ss:$8 sps:$4 sm:$0x7f]   ;;  %v18432_v33 = vld [vmem:[%s24684_s23 + $0x64] ss:$8 sps:$4 sm:$0xff]  }
  0x10   :  { %v92_v17 = vrot.slane %v90_v15, 1  ;;  %v88_v18 = vor.u32 %v87_v16, %v83_v13  ;;  %v477_v26 = vsel %vm474_vm3, %v475_v23, %v476_v24  ;;  %v18429_v32 = vld [vmem:[%s24684_s23 + $0x50] ss:$8 sps:$4 sm:$0x7f]   ;;  %v272_v36 = vrot.slane %v19910_v11, 1  ;;  %s24692_s5 = smov 32  }
  0x11   :  { %v299_v34 = vsel %vm122_vm0, %v18429_v32, 0  ;;  %v18430_v37 = vld [vmem:[%s24684_s23 + $0x60] ss:$8 sps:$4 sm:$0xff]   ;;  %v18433_v38 = vld [vmem:[%s24684_s23 + $0x74] ss:$8 sps:$4 sm:$0x7f]  }
  0x12   :  { %v93_v22 = vsel %vm81_vm1, %v88_v18, %v92_v17  ;;  %v96_v29 = vor.u32 %v94_v25, %v92_v17  ;;  %v18435_v39 = vld [vmem:[%s24684_s23 + $0x70] ss:$8 sps:$4 sm:$0x7f]   ;;  %v273_v40 = vsel %vm122_vm0, %v271_v35, %v272_v36  ;;  %v18438_v41 = vld [vmem:[%s24684_s23 + $0x84] ss:$8 sps:$4 sm:$0xff]   ;;  %v371_v43 = vrot.slane %v83_v13, 1 }
  0x13   :  { %16087 = vmatmul.mubr.msk.bf16.vlgmr.msra.gmra.mrb[0].mxu0 %vm115_vm2, %v93_v22  ;;  %v403_v42 = vsel %vm122_vm0, %v18435_v39, 0  ;;  %v372_v44 = vrot.slane %v85_v14, 2  ;;  %v375_v45 = vrot.slane %v90_v15, 2  ;;  %v374_v46 = vrot.slane %v94_v25, 1  ;;  %v18436_v49 = vld [vmem:[%s24684_s23 + $0x80] ss:$8 sps:$4 sm:$0xff]  }
  0x14   :  { %211 = vmatpush1.bf16.msra.mxu0 %v18418_v19  ;;  %171 = vmatprep.mubr.bf16.mxu0 %v19767_v1  ;;  %v18439_v50 = vld [vmem:[%s24684_s23 + $0x94] ss:$8 sps:$4 sm:$0x7f]   ;;  %v18441_v51 = vld [vmem:[%s24684_s23 + $0x90] ss:$8 sps:$4 sm:$0x7f]  }
  0x15   :  { %16093 = vmatprep.subr.msk.bf16.mxu0 %vm122_vm0, %v18421_v20  ;;  %v373_v47 = vor.u32 %v372_v44, %v371_v43  ;;  %v376_v48 = vor.u32 %v375_v45, %v374_v46  ;;  %v503_v53 = vsel %vm122_vm0, %v18441_v51, 0  ;;  %v18447_v32 = vld [vmem:[%s24688_s26 + $0x18] sm:$0xff]   ;;  %v18450_v35 = vld [vmem:[%s24688_s26 + $0x30] sm:$0xff]   ;;  %s24695_s27 = smov 64   ;;  %s24750_s22 = sld [smem:[#allocation11_spill]] }
  0x17   :  { %v377_v52 = vsel %vm370_vm4, %v373_v47, %v376_v48 }
  0x18   :  { %213 = vmatpush1.bf16.msra.mxu0 %v205_v27  ;;  %v18442_v27 = vld [vmem:[%s24686_s0] sm:$0xff]  }
  0x19   :  { %304 = vmatprep.subr.bf16.mxu0 %v18426_v28  ;;  %v18443_v28 = vld [vmem:[%s24687_s4] sm:$0xff]  }
  0x1b   :  { %16088 = vmatmul.mubr.msk.bf16.gmra.mrb[4].mxu0 %vm115_vm2, %v96_v29  ;;  %v18444_v29 = vld [vmem:[%s24688_s26] sm:$0xff]  }
  0x1c   :  { %242 = vmatprep.mubr.bf16.mxu0 %v19767_v1 }
  0x23   :  { %16094 = vmatmul.mubr.msk.bf16.vlgmr.msra.gmra.mrb[0].mxu0 %vm115_vm2, %v70_v10 }
  0x24   :  { %305 = vmatpush1.bf16.msra.mxu0 %v18424_v30  ;;  %252 = vmatprep.mubr.bf16.mxu0 %v19767_v1  ;;  %v18445_v30 = vld [vmem:[%s24688_s26 + $0x8] sm:$0xff]  }
  0x25   :  { %16104 = vmatprep.subr.msk.bf16.mxu0 %vm122_vm0, %v18427_v31  ;;  %v18446_v31 = vld [vmem:[%s24688_s26 + $0x10] sm:$0xff]  }
  0x28   :  { %307 = vmatpush1.bf16.msra.mxu0 %v299_v34  ;;  %v18449_v34 = vld [vmem:[%s24688_s26 + $0x28] sm:$0xff]  }
  0x29   :  { %408 = vmatprep.subr.bf16.mxu0 %v18432_v33  ;;  %v18448_v33 = vld [vmem:[%s24688_s26 + $0x20] sm:$0xff]  }
  0x2b   :  { %16095 = vmatmul.mubr.msk.bf16.gmra.mrb[4].mxu0 %vm115_vm2, %v19910_v11 }
  0x2c   :  { %336 = vmatprep.mubr.bf16.mxu0 %v19767_v1 }
  0x33   :  { %16105 = vmatmul.mubr.msk.bf16.vlgmr.msra.gmra.mrb[0].mxu0 %vm115_vm2, %v273_v40 }
  0x34   :  { %409 = vmatpush1.bf16.msra.mxu0 %v18430_v37  ;;  %346 = vmatprep.mubr.bf16.mxu0 %v19767_v1  ;;  %v18452_v37 = vld [vmem:[%s24688_s26 + $0x40] sm:$0xff]  }
  0x35   :  { %16115 = vmatprep.subr.msk.bf16.mxu0 %vm122_vm0, %v18433_v38  ;;  %v18453_v38 = vld [vmem:[%s24688_s26 + $0x48] sm:$0x3f]  }
  0x36   :  { %v806_v39 = vsel %vm474_vm3, %v18453_v38, 0 }
  0x38   :  { %411 = vmatpush1.bf16.msra.mxu0 %v403_v42 }
  0x39   :  { %508 = vmatprep.subr.bf16.mxu0 %v18438_v41 }
  0x3b   :  { %16106 = vmatmul.mubr.msk.bf16.gmra.mrb[4].mxu0 %vm115_vm2, %v272_v36  ;;  %v18451_v36 = vld [vmem:[%s24688_s26 + $0x38] sm:$0xff]  }
  0x3c   :  { %440 = vmatprep.mubr.bf16.mxu0 %v19767_v1 }
  0x43   :  { %16116 = vmatmul.mubr.msk.bf16.vlgmr.msra.gmra.mrb[0].mxu0 %vm115_vm2, %v377_v52 }
  0x44   :  { %509 = vmatpush1.bf16.msra.mxu0 %v18436_v49  ;;  %450 = vmatprep.mubr.bf16.mxu0 %v19767_v1 }
  0x45   :  { %16126 = vmatprep.subr.msk.bf16.mxu0 %vm122_vm0, %v18439_v50 }
  0x48   :  { %511 = vmatpush1.bf16.msra.mxu0 %v503_v53 }
  0x4b   :  { %16117 = vmatmul.mubr.msk.bf16.gmra.mrb[4].mxu0 %vm115_vm2, %v376_v48 }
  0x4c   :  { %540 = vmatprep.mubr.bf16.mxu0 %v19767_v1 }
  0x53   :  { %16127 = vmatmul.mubr.msk.bf16.vlgmr.msra.gmra.mrb[0].mxu0 %vm115_vm2, %v477_v26 }
  0x54   :  { %550 = vmatprep.mubr.bf16.mxu0 %v19767_v1 }
  0x5b   :  { %16128 = vmatmul.mubr.msk.bf16.gmra.mrb[4].mxu0 %vm115_vm2, %v476_v24 }
  0x5c   :  { %1107 = vmatprep.mubr.bf16.mxu0 %v19767_v1 }
 0x126   :  { %v542_v61 = vpop.f32.mrb[0].mxu0 }
 0x127   :  { %v581_v62 = vadd.f32 %v574_v59, %v542_v61  ;;  %v544_v63 = vpop.f32.mrb[1].mxu0  ;;  %v18458_v61 = vld [vmem:[%s24642_s7 + $0x20] sm:$0xff]  }
 0x128   :  { %v582_v0 = vadd.f32 %v578_v60, %v544_v63  ;;  %v546_v2 = vpop.f32.mrb[2].mxu0  ;;  %v18460_v63 = vld [vmem:[%s24642_s7 + $0x30] sm:$0xff]  }
 0x129   :  { %v583_v3 = vadd.f32 %v574_v59, %v546_v2  ;;  %v548_v4 = vpop.f32.mrb[3].mxu0  ;;  %v589_v6 = vmax.f32 %v581_v62, 0.0  ;;  %v18459_v62 = vld [vmem:[%s24642_s7 + $0x28] sm:$0xff]   ;;  %v18462_v2 = vld [vmem:[%s24642_s7 + $0x40] sm:$0xff]  }
 0x12a   :  { %v584_v5 = vadd.f32 %v578_v60, %v548_v4  ;;  %v590_v8 = vmax.f32 %v582_v0, 0.0  ;;  %v18461_v0 = vld [vmem:[%s24642_s7 + $0x38] sm:$0xff]  }
 0x12b   :  { %v591_v7 = vmax.f32 %v583_v3, 0.0  ;;  %v18463_v3 = vld [vmem:[%s24642_s7 + $0x48] sm:$0x3f]  }
 0x12c   :  { %v592_v9 = vmax.f32 %v584_v5, 0.0  ;;  %v929_v4 = vsel %vm474_vm3, %v18463_v3, 0  ;;  %v18464_v5 = vld [vmem:[%s24643_s3 + $0x60] ss:$8 sps:$4 sm:$0xff]  }
 0x12d   :  { %v597_v10 = vpack.c.bf16 %v591_v7, %v589_v6  ;;  %v18466_v6 = vld [vmem:[%s24643_s3 + $0x64] ss:$8 sps:$4 sm:$0xff]   ;;  %v18469_v7 = vld [vmem:[%s24643_s3 + $0x74] ss:$8 sps:$4 sm:$0xff]   ;;  %v18518_v3 = vld [vmem:[%s24643_s3 + $0x120] ss:$8 sps:$4 sm:$0xff]  }
 0x12e   :  { %v552_v11 = vpop.f32.mrb[4].mxu0  ;;  %v598_v12 = vpack.c.bf16 %v592_v9, %v590_v8  ;;  %1075 = vmatprep.subr.bf16.mxu0 %v18466_v6  ;;  %v18467_v8 = vld [vmem:[%s24643_s3 + $0x70] ss:$8 sps:$4 sm:$0xff]   ;;  %v18472_v9 = vld [vmem:[%s24643_s3 + $0x84] ss:$8 sps:$4 sm:$0xff]  }
 0x12f   :  { %v585_v13 = vadd.f32 %v574_v59, %v552_v11  ;;  %v554_v14 = vpop.f32.mrb[5].mxu0  ;;  %1076 = vmatpush1.bf16.msra.mxu0 %v18464_v5  ;;  %v18475_v11 = vld [vmem:[%s24643_s3 + $0x94] ss:$8 sps:$4 sm:$0xff]   ;;  %v18521_v6 = vld [vmem:[%s24643_s3 + $0x130] ss:$8 sps:$4 sm:$0xff]  }
 0x130   :  { %v586_v15 = vadd.f32 %v578_v60, %v554_v14  ;;  %v556_v16 = vpop.f32.mrb[6].mxu0  ;;  %619 = vmatprep.subr.bf16.mxu1 %v598_v12  ;;  %1077 = vmatprep.subr.bf16.mxu0 %v18469_v7  ;;  %v18476_v14 = vld [vmem:[%s24643_s3 + $0xa0] ss:$8 sps:$4 sm:$0xff]   ;;  %v18523_v5 = vld [vmem:[%s24643_s3 + $0x134] ss:$8 sps:$4 sm:$0xff]  }
 0x131   :  { %v587_v17 = vadd.f32 %v574_v59, %v556_v16  ;;  %v558_v18 = vpop.f32.mrb[7].mxu0  ;;  %620 = vmatpush1.bf16.msra.mxu1 %v597_v10  ;;  %v593_v20 = vmax.f32 %v585_v13, 0.0  ;;  %v18456_v59 = vld [vmem:[%s24642_s7 + $0x10] sm:$0xff]   ;;  %v18478_v13 = vld [vmem:[%s24643_s3 + $0xa4] ss:$8 sps:$4 sm:$0xff]  }
 0x132   :  { %v588_v19 = vadd.f32 %v578_v60, %v558_v18  ;;  %v594_v22 = vmax.f32 %v586_v15, 0.0  ;;  %v18457_v60 = vld [vmem:[%s24642_s7 + $0x18] sm:$0xff]   ;;  %v18484_v18 = vld [vmem:[%s24643_s3 + $0x4] ss:$8 sps:$4 sm:$0xff]  }
 0x133   :  { %v595_v21 = vmax.f32 %v587_v17, 0.0  ;;  %1078 = vmatpush1.bf16.msra.mxu0 %v18467_v8  ;;  %v18479_v15 = vld [vmem:[%s24643_s3 + $0xb4] ss:$8 sps:$4 sm:$0x1f]   ;;  %v18526_v7 = vld [vmem:[%s24643_s3 + $0x144] ss:$8 sps:$4 sm:$0xff]  }
 0x134   :  { %v596_v23 = vmax.f32 %v588_v19, 0.0  ;;  %1079 = vmatprep.subr.bf16.mxu0 %v18472_v9  ;;  %v18481_v16 = vld [vmem:[%s24643_s3 + $0xb0] ss:$8 sps:$4 sm:$0x1f]   ;;  %v18524_v8 = vld [vmem:[%s24643_s3 + $0x140] ss:$8 sps:$4 sm:$0xff]  }
 0x135   :  { %v599_v24 = vpack.c.bf16 %v595_v21, %v593_v20  ;;  %v1070_v17 = vsel %vm612_vm5, %v18481_v16, 0  ;;  %v18529_v9 = vld [vmem:[%s24643_s3 + $0x154] ss:$8 sps:$4 sm:$0xff]   ;;  %v18538_v16 = vld [vmem:[%s24643_s3 + $0x184] ss:$8 sps:$4 sm:$0xff]  }
 0x136   :  { %v600_v25 = vpack.c.bf16 %v596_v23, %v594_v22 }
 0x137   :  { %v614_v26 = vsel %vm612_vm5, %v599_v24, 0 }
 0x138   :  { %16130 = vmatprep.subr.msk.bf16.mxu1 %vm612_vm5, %v600_v25 }
 0x139   :  { %622 = vmatpush1.bf16.msra.mxu1 %v614_v26 }
 0x13a   :  { %672 = vmatprep.subr.bf16.mxu1 %v598_v12  ;;  %v18473_v12 = vld [vmem:[%s24643_s3 + $0x90] ss:$8 sps:$4 sm:$0xff]  }
 0x13c   :  { %16131 = vmatmul.mubr.msk.bf16.vlgmr.msra.gmra.mrb[0].mxu1 %vm24668_vm6, %v18442_v27 }
 0x13d   :  { %673 = vmatpush1.bf16.msra.mxu1 %v597_v10  ;;  %704 = vmatprep.mubr.bf16.mxu1 %v19767_v1  ;;  %v18470_v10 = vld [vmem:[%s24643_s3 + $0x80] ss:$8 sps:$4 sm:$0xff]  }
 0x13e   :  { %16133 = vmatprep.subr.msk.bf16.mxu1 %vm612_vm5, %v600_v25  ;;  %1080 = vmatpush1.bf16.msra.mxu0 %v18470_v10  ;;  %v18527_v10 = vld [vmem:[%s24643_s3 + $0x150] ss:$8 sps:$4 sm:$0xff]  }
 0x13f   :  { %1081 = vmatprep.subr.bf16.mxu0 %v18475_v11  ;;  %v18532_v11 = vld [vmem:[%s24643_s3 + $0x164] ss:$8 sps:$4 sm:$0xff]  }
 0x141   :  { %675 = vmatpush1.bf16.msra.mxu1 %v614_v26 }
 0x142   :  { %808 = vmatprep.subr.bf16.mxu1 %v19767_v1  ;;  %1082 = vmatpush1.bf16.msra.mxu0 %v18473_v12  ;;  %v18530_v12 = vld [vmem:[%s24643_s3 + $0x160] ss:$8 sps:$4 sm:$0xff]  }
 0x143   :  { %1083 = vmatprep.subr.bf16.mxu0 %v18478_v13  ;;  %v18533_v13 = vld [vmem:[%s24643_s3 + $0x174] ss:$8 sps:$4 sm:$0x1f]  }
 0x144   :  { %16134 = vmatmul.mubr.msk.bf16.vlgmr.msra.gmra.mrb[4].mxu1 %vm24668_vm6, %v18443_v28 }
 0x145   :  { %809 = vmatpush1.bf16.msra.mxu1 %v18444_v29 }
 0x146   :  { %810 = vmatprep.subr.bf16.mxu1 %v19767_v1  ;;  %1084 = vmatpush1.bf16.msra.mxu0 %v18476_v14  ;;  %v18535_v14 = vld [vmem:[%s24643_s3 + $0x170] ss:$8 sps:$4 sm:$0x1f]  }
 0x147   :  { %16181 = vmatprep.subr.msk.bf16.mxu0 %vm612_vm5, %v18479_v15  ;;  %v1434_v15 = vsel %vm612_vm5, %v18535_v14, 0  ;;  %v18589_v14 = vld [vmem:[%s24644_s10 + $0x28] sm:$0xff]  }
 0x149   :  { %811 = vmatpush1.bf16.msra.mxu1 %v18445_v30 }
 0x14a   :  { %812 = vmatprep.subr.bf16.mxu1 %v19767_v1  ;;  %1086 = vmatpush1.bf16.msra.mxu0 %v1070_v17  ;;  %v18536_v17 = vld [vmem:[%s24643_s3 + $0x180] ss:$8 sps:$4 sm:$0xff]  }
 0x14b   :  { %1184 = vmatprep.subr.bf16.mxu0 %v18484_v18  ;;  %v18541_v18 = vld [vmem:[%s24643_s3 + $0x194] ss:$8 sps:$4 sm:$0xff]  }
 0x14d   :  { %813 = vmatpush1.bf16.msra.mxu1 %v18446_v31 }
 0x14e   :  { %814 = vmatprep.subr.bf16.mxu1 %v19767_v1 }
 0x151   :  { %815 = vmatpush1.bf16.msra.mxu1 %v18447_v32  ;;  %v18482_v32 = vld [vmem:[%s24643_s3] ss:$8 sps:$4 sm:$0xff]  }
 0x152   :  { %816 = vmatprep.subr.bf16.mxu1 %v19767_v1 }
 0x155   :  { %817 = vmatpush1.bf16.msra.mxu1 %v18448_v33 }
 0x156   :  { %818 = vmatprep.subr.bf16.mxu1 %v19767_v1 }
 0x159   :  { %819 = vmatpush1.bf16.msra.mxu1 %v18449_v34  ;;  %v18487_v34 = vld [vmem:[%s24643_s3 + $0x14] ss:$8 sps:$4 sm:$0xff]  }
 0x15a   :  { %820 = vmatprep.subr.bf16.mxu1 %v19767_v1 }
 0x15d   :  { %821 = vmatpush1.bf16.msra.mxu1 %v18450_v35 }
 0x15e   :  { %822 = vmatprep.subr.bf16.mxu1 %v19767_v1 }
 0x161   :  { %823 = vmatpush1.bf16.msra.mxu1 %v18451_v36 }
 0x162   :  { %824 = vmatprep.subr.bf16.mxu1 %v19767_v1 }
 0x165   :  { %825 = vmatpush1.bf16.msra.mxu1 %v18452_v37 }
 0x166   :  { %826 = vmatprep.subr.bf16.mxu1 %v19767_v1 }
 0x169   :  { %827 = vmatpush1.bf16.msra.mxu1 %v806_v39  ;;  %v18485_v39 = vld [vmem:[%s24643_s3 + $0x10] ss:$8 sps:$4 sm:$0xff]  }
 0x16a   :  { %931 = vmatprep.subr.bf16.mxu1 %v19767_v1 }
 0x20f   :  { %v653_v40 = vpop.f32.mrb[0].mxu1 }
 0x210   :  { %v655_v41 = vpop.f32.mrb[1].mxu1 }
 0x211   :  { %v657_v42 = vpop.f32.mrb[2].mxu1 }
 0x212   :  { %v659_v43 = vpop.f32.mrb[3].mxu1 }
 0x217   :  { %v706_v44 = vpop.f32.mrb[4].mxu1 }
 0x218   :  { %v715_v45 = vmax.f32 %v653_v40, %v706_v44  ;;  %v708_v46 = vpop.f32.mrb[5].mxu1  ;;  %v18490_v40 = vld [vmem:[%s24643_s3 + $0x24] ss:$8 sps:$4 sm:$0xff]  }
 0x219   :  { %v716_v47 = vmax.f32 %v655_v41, %v708_v46  ;;  %v710_v48 = vpop.f32.mrb[6].mxu1  ;;  %v18488_v41 = vld [vmem:[%s24643_s3 + $0x20] ss:$8 sps:$4 sm:$0xff]   ;;  %v18496_v44 = vld [vmem:[%s24643_s3 + $0x44] ss:$8 sps:$4 sm:$0xff]  }
 0x21a   :  { %v717_v49 = vmax.f32 %v657_v42, %v710_v48  ;;  %v712_v50 = vpop.f32.mrb[7].mxu1  ;;  %v18493_v42 = vld [vmem:[%s24643_s3 + $0x34] ss:$8 sps:$4 sm:$0xff]  }
 0x21b   :  { %v718_v51 = vmax.f32 %v659_v43, %v712_v50  ;;  %v18491_v43 = vld [vmem:[%s24643_s3 + $0x30] ss:$8 sps:$4 sm:$0xff]   ;;  %v18497_v46 = vld [vmem:[%s24643_s3 + $0x54] ss:$8 sps:$4 sm:$0x1f]  }
 0x21c   :  { %v719_v52 = vpack.c.bf16 %v717_v49, %v715_v45  ;;  %v18494_v45 = vld [vmem:[%s24643_s3 + $0x40] ss:$8 sps:$4 sm:$0xff]   ;;  %v18502_v49 = vld [vmem:[%s24643_s3 + $0xc4] ss:$8 sps:$4 sm:$0xff]  }
 0x21d   :  { %v720_v53 = vpack.c.bf16 %v718_v51, %v716_v47  ;;  %v18499_v47 = vld [vmem:[%s24643_s3 + $0x50] ss:$8 sps:$4 sm:$0x1f]   ;;  %v18500_v50 = vld [vmem:[%s24643_s3 + $0xc0] ss:$8 sps:$4 sm:$0xff]  }
 0x21e   :  { %v1179_v48 = vsel %vm612_vm5, %v18499_v47, 0  ;;  %v18505_v51 = vld [vmem:[%s24643_s3 + $0xd4] ss:$8 sps:$4 sm:$0xff]  }
 0x21f   :  { %16145 = vmatprep.mubr.msk.bf16.mxu1 %vm24666_vm7, %v720_v53 }
 0x220   :  { %841 = vmatmul.mubr.bf16.vlgmr.msra.gmra.mrb[8].mxu1 %v719_v52 }
 0x221   :  { %932 = vmatpush1.bf16.msra.mxu1 %v18454_v55  ;;  %16156 = vmatprep.mubr.msk.bf16.mxu1 %vm24666_vm7, %v720_v53  ;;  %v18508_v53 = vld [vmem:[%s24643_s3 + $0xe4] ss:$8 sps:$4 sm:$0xff]   ;;  %v18506_v55 = vld [vmem:[%s24643_s3 + $0xe0] ss:$8 sps:$4 sm:$0xff]  }
 0x222   :  { %933 = vmatprep.subr.bf16.mxu1 %v19767_v1 }
 0x225   :  { %934 = vmatpush1.bf16.msra.mxu1 %v18455_v57  ;;  %v18511_v57 = vld [vmem:[%s24643_s3 + $0xf4] ss:$8 sps:$4 sm:$0xff]  }
 0x226   :  { %935 = vmatprep.subr.bf16.mxu1 %v19767_v1 }
 0x229   :  { %936 = vmatpush1.bf16.msra.mxu1 %v18456_v59  ;;  %v18509_v59 = vld [vmem:[%s24643_s3 + $0xf0] ss:$8 sps:$4 sm:$0xff]  }
 0x22a   :  { %937 = vmatprep.subr.bf16.mxu1 %v19767_v1 }
 0x22d   :  { %938 = vmatpush1.bf16.msra.mxu1 %v18457_v60  ;;  %v18514_v60 = vld [vmem:[%s24643_s3 + $0x104] ss:$8 sps:$4 sm:$0xff]  }
 0x22e   :  { %939 = vmatprep.subr.bf16.mxu1 %v19767_v1 }
 0x231   :  { %940 = vmatpush1.bf16.msra.mxu1 %v18458_v61  ;;  %v18512_v61 = vld [vmem:[%s24643_s3 + $0x100] ss:$8 sps:$4 sm:$0xff]  }
 0x232   :  { %941 = vmatprep.subr.bf16.mxu1 %v19767_v1 }
 0x235   :  { %942 = vmatpush1.bf16.msra.mxu1 %v18459_v62  ;;  %v18515_v62 = vld [vmem:[%s24643_s3 + $0x114] ss:$8 sps:$4 sm:$0x1f]  }
 0x236   :  { %943 = vmatprep.subr.bf16.mxu1 %v19767_v1 }
 0x239   :  { %944 = vmatpush1.bf16.msra.mxu1 %v18460_v63  ;;  %v18517_v63 = vld [vmem:[%s24643_s3 + $0x110] ss:$8 sps:$4 sm:$0x1f]  }
 0x23a   :  { %945 = vmatprep.subr.bf16.mxu1 %v19767_v1 }
 0x23d   :  { %946 = vmatpush1.bf16.msra.mxu1 %v18461_v0  ;;  %v1304_v0 = vsel %vm612_vm5, %v18517_v63, 0  ;;  %v18554_v63 = vld [vmem:[%s24684_s23 + $0x20] ss:$8 sps:$4 sm:$0xff]  }
 0x23e   :  { %947 = vmatprep.subr.bf16.mxu1 %v19767_v1 }
 0x241   :  { %948 = vmatpush1.bf16.msra.mxu1 %v18462_v2  ;;  %v18520_v2 = vld [vmem:[%s24643_s3 + $0x124] ss:$8 sps:$4 sm:$0xff]  }
 0x242   :  { %949 = vmatprep.subr.bf16.mxu1 %v19767_v1 }
 0x245   :  { %950 = vmatpush1.bf16.msra.mxu1 %v929_v4 }
 0x248   :  { %964 = vmatmul.mubr.bf16.vlgmr.msra.gmra.mrb[12].mxu1 %v719_v52  ;;  %v18503_v52 = vld [vmem:[%s24643_s3 + $0xd0] ss:$8 sps:$4 sm:$0xff]  }
 0x249   :  { %1706 = vmatprep.mubr.bf16.mxu1 %v19767_v1 }
 0x2f3   :  { %v842_v19 = vpop.f32.mrb[8].mxu1 }
 0x2f4   :  { %v844_v20 = vpop.f32.mrb[9].mxu1 }
 0x2f5   :  { %v845_v21 = vpop.f32.mrb[10].mxu1  ;;  %v18544_v20 = vld [vmem:[%s24643_s3 + $0x1a4] ss:$8 sps:$4 sm:$0xff]  }
 0x2f6   :  { %v847_v22 = vpop.f32.mrb[11].mxu1 }
 0x2f7   :  { %v18547_v22 = vld [vmem:[%s24643_s3 + $0x1b4] ss:$8 sps:$4 sm:$0xff]  }
 0x31b   :  { %v965_v23 = vpop.f32.mrb[12].mxu1 }
 0x31c   :  { %v972_v24 = vmax.f32 %v842_v19, %v965_v23  ;;  %v967_v25 = vpop.f32.mrb[13].mxu1  ;;  %v18539_v19 = vld [vmem:[%s24643_s3 + $0x190] ss:$8 sps:$4 sm:$0xff]  }
 0x31d   :  { %v968_v26 = vpop.f32.mrb[14].mxu1  ;;  %v18545_v23 = vld [vmem:[%s24643_s3 + $0x1b0] ss:$8 sps:$4 sm:$0xff]   ;;  %v18548_v25 = vld [vmem:[%s24643_s3 + $0x1c0] ss:$8 sps:$4 sm:$0xff]  }
 0x31e   :  { %v973_v27 = vmax.f32 %v845_v21, %v968_v26  ;;  %v970_v28 = vpop.f32.mrb[15].mxu1  ;;  %v18542_v21 = vld [vmem:[%s24643_s3 + $0x1a0] ss:$8 sps:$4 sm:$0xff]   ;;  %v18551_v26 = vld [vmem:[%s24643_s3 + $0x1d4] ss:$8 sps:$4 sm:$0x1f]  }
 0x320   :  { %v20149_v29 = vpack.c.bf16 %v973_v27, %v972_v24  ;;  %v18550_v24 = vld [vmem:[%s24643_s3 + $0x1c4] ss:$8 sps:$4 sm:$0xff]   ;;  %v18553_v27 = vld [vmem:[%s24643_s3 + $0x1d0] ss:$8 sps:$4 sm:$0x1f]  }
 0x321   :  { %v1562_v28 = vsel %vm612_vm5, %v18553_v27, 0  ;;  %v18572_v27 = vld [vmem:[%s24684_s23 + $0x60] ss:$8 sps:$4 sm:$0xff]  }
 0x322   :  { %v1001_v30 = vshrl.u32 %v20149_v29, 16  ;;  %v1003_v31 = vshll.u32 %v20149_v29, 16  ;;  %v1241_v4 = vrot.slane %v20149_v29, 1 }
 0x324   :  { %v1005_v33 = vrot.slane %v1003_v31, 1  ;;  %v20159_v35 = vrot.slane %v1001_v30, 1  ;;  %v20161_v36 = vrot.slane %v1003_v31, 2  ;;  %v16302_v31 = vld [vmem:[%s24685_s29 + $0x20] sm:$0xff] }
 0x326   :  { %v1006_v37 = vor.u32 %v1005_v33, %v1001_v30  ;;  %v1371_v38 = vor.u32 %v20161_v36, %v20159_v35  ;;  %v1499_v30 = vrot.slane %v20149_v29, 2  ;;  %v16304_v33 = vld [vmem:[%s24685_s29 + $0x30] sm:$0xff]  ;;  %v19768_v35 = vmov 65535  }
 0x327   :  { %v1621_v36 = vsel %vm612_vm5, 4294967295, %v19768_v35 }
 0x328   :  { %16182 = vmatmul.mubr.msk.bf16.vlgmr.msra.gmra.mrb[8].mxu0 %vm1065_vm8, %v1006_v37 }
 0x329   :  { %1185 = vmatpush1.bf16.msra.mxu0 %v18482_v32  ;;  %1216 = vmatprep.mubr.bf16.mxu0 %v19767_v1  ;;  %v16303_v32 = vld [vmem:[%s24685_s29 + $0x28] sm:$0xff] }
 0x32a   :  { %1186 = vmatprep.subr.bf16.mxu0 %v18487_v34  ;;  %v18559_v34 = vld [vmem:[%s24684_s23 + $0x30] ss:$8 sps:$4 sm:$0x7f]   ;;  %v20340_v37 = vpack.c.bf16 %v16303_v32, %v16302_v31  ;;  %v18580_v32 = vld [vmem:[%s24684_s23 + $0x84] ss:$8 sps:$4 sm:$0xff]  }
 0x32d   :  { %1187 = vmatpush1.bf16.msra.mxu0 %v18485_v39  ;;  %v20345_v39 = vsel %vm474_vm3, %v1621_v36, 0 }
 0x32e   :  { %1188 = vmatprep.subr.bf16.mxu0 %v18490_v40  ;;  %v2038_v40 = vshrl.u32 %v20340_v37, 16 }
 0x331   :  { %1189 = vmatpush1.bf16.msra.mxu0 %v18488_v41  ;;  %v2040_v41 = vshll.u32 %v20340_v37, 16 }
 0x332   :  { %1190 = vmatprep.subr.bf16.mxu0 %v18493_v42  ;;  %v2077_v42 = vsel %vm122_vm0, %v18559_v34, 0 }
 0x333   :  { %v2321_v35 = vrot.slane %v2040_v41, 2 }
 0x335   :  { %1191 = vmatpush1.bf16.msra.mxu0 %v18491_v43 }
 0x336   :  { %1192 = vmatprep.subr.bf16.mxu0 %v18496_v44  ;;  %v18565_v44 = vld [vmem:[%s24684_s23 + $0x10] ss:$8 sps:$4 sm:$0x7f]  }
 0x339   :  { %1193 = vmatpush1.bf16.msra.mxu0 %v18494_v45 }
 0x33a   :  { %16195 = vmatprep.subr.msk.bf16.mxu0 %vm612_vm5, %v18497_v46  ;;  %v2042_v46 = vrot.slane %v2040_v41, 1  ;;  %v18583_v41 = vld [vmem:[%s24684_s23 + $0x90] ss:$8 sps:$4 sm:$0x7f]  }
 0x33d   :  { %1195 = vmatpush1.bf16.msra.mxu0 %v1179_v48 }
 0x33e   :  { %1309 = vmatprep.subr.bf16.mxu0 %v18502_v49 }
 0x340   :  { %16196 = vmatmul.mubr.msk.bf16.vlgmr.msra.gmra.mrb[8].mxu0 %vm1065_vm8, %v20149_v29  ;;  %v16305_v29 = vld [vmem:[%s24685_s29 + $0x38] sm:$0x3f] }
 0x341   :  { %1310 = vmatpush1.bf16.msra.mxu0 %v18500_v50  ;;  %1341 = vmatprep.mubr.bf16.mxu0 %v19767_v1 }
 0x342   :  { %1311 = vmatprep.subr.bf16.mxu0 %v18505_v51 }
 0x345   :  { %1312 = vmatpush1.bf16.msra.mxu0 %v18503_v52 }
 0x346   :  { %1313 = vmatprep.subr.bf16.mxu0 %v18508_v53  ;;  %v2158_v53 = vsel %vm122_vm0, %v18565_v44, 0 }
 0x349   :  { %1314 = vmatpush1.bf16.msra.mxu0 %v18506_v55 }
 0x34a   :  { %1315 = vmatprep.subr.bf16.mxu0 %v18511_v57  ;;  %v18556_v57 = vld [vmem:[%s24684_s23 + $0x24] ss:$8 sps:$4 sm:$0xff]  }
 0x34d   :  { %1316 = vmatpush1.bf16.msra.mxu0 %v18509_v59 }
 0x34e   :  { %1317 = vmatprep.subr.bf16.mxu0 %v18514_v60 }
 0x351   :  { %1318 = vmatpush1.bf16.msra.mxu0 %v18512_v61  ;;  %v1616_v61 = vld [vmem:[%s24645_s8] sm:$0x7] }
 0x352   :  { %16221 = vmatprep.subr.msk.bf16.mxu0 %vm612_vm5, %v18515_v62  ;;  %v1670_v62 = vld [vmem:[%s24646_s9] sm:$0x7] }
 0x355   :  { %1320 = vmatpush1.bf16.msra.mxu0 %v1304_v0  ;;  %v18557_v0 = vld [vmem:[%s24684_s23 + $0x34] ss:$8 sps:$4 sm:$0x7f]  }
 0x356   :  { %1439 = vmatprep.subr.bf16.mxu0 %v18520_v2  ;;  %v18584_v2 = vld [vmem:[%s24644_s10] sm:$0xff]  }
 0x358   :  { %16222 = vmatmul.mubr.msk.bf16.vlgmr.msra.gmra.mrb[8].mxu0 %vm1065_vm8, %v1241_v4  ;;  %v18585_v4 = vld [vmem:[%s24644_s10 + $0x8] sm:$0xff]  }
 0x359   :  { %1440 = vmatpush1.bf16.msra.mxu0 %v18518_v3  ;;  %1471 = vmatprep.mubr.bf16.mxu0 %v19767_v1  ;;  %v18562_v3 = vld [vmem:[%s24684_s23 + $0x4] ss:$8 sps:$4 sm:$0xff]  }
 0x35a   :  { %1441 = vmatprep.subr.bf16.mxu0 %v18523_v5  ;;  %v2043_v5 = vor.u32 %v2042_v46, %v2038_v40  ;;  %v2422_v46 = vrot.slane %v20340_v37, 2 }
 0x35d   :  { %1442 = vmatpush1.bf16.msra.mxu0 %v18521_v6  ;;  %v18560_v6 = vld [vmem:[%s24684_s23] ss:$8 sps:$4 sm:$0xff]  }
 0x35e   :  { %1443 = vmatprep.subr.bf16.mxu0 %v18526_v7  ;;  %v18563_v7 = vld [vmem:[%s24684_s23 + $0x14] ss:$8 sps:$4 sm:$0x7f]  }
 0x361   :  { %1444 = vmatpush1.bf16.msra.mxu0 %v18524_v8  ;;  %v18586_v8 = vld [vmem:[%s24644_s10 + $0x10] sm:$0xff]  }
 0x362   :  { %1445 = vmatprep.subr.bf16.mxu0 %v18529_v9 }
 0x365   :  { %1446 = vmatpush1.bf16.msra.mxu0 %v18527_v10  ;;  %v18568_v10 = vld [vmem:[%s24684_s23 + $0x44] ss:$8 sps:$4 sm:$0xff]  }
 0x366   :  { %1447 = vmatprep.subr.bf16.mxu0 %v18532_v11  ;;  %v18587_v11 = vld [vmem:[%s24644_s10 + $0x18] sm:$0xff]  }
 0x369   :  { %1448 = vmatpush1.bf16.msra.mxu0 %v18530_v12 }
 0x36a   :  { %16247 = vmatprep.subr.msk.bf16.mxu0 %vm612_vm5, %v18533_v13  ;;  %v18588_v13 = vld [vmem:[%s24644_s10 + $0x20] sm:$0xff]  }
 0x36d   :  { %1450 = vmatpush1.bf16.msra.mxu0 %v1434_v15  ;;  %v18566_v15 = vld [vmem:[%s24684_s23 + $0x40] ss:$8 sps:$4 sm:$0xff]  }
 0x36e   :  { %1567 = vmatprep.subr.bf16.mxu0 %v18538_v16  ;;  %v18569_v16 = vld [vmem:[%s24684_s23 + $0x54] ss:$8 sps:$4 sm:$0x7f]  }
 0x370   :  { %16248 = vmatmul.mubr.msk.bf16.vlgmr.msra.gmra.mrb[8].mxu0 %vm1065_vm8, %v1371_v38  ;;  %v20342_v38 = vpack.c.bf16 %v16305_v29, %v16304_v33  ;;  %v2320_v33 = vrot.slane %v2038_v40, 1  ;;  %v18578_v40 = vld [vmem:[%s24684_s23 + $0x80] ss:$8 sps:$4 sm:$0xff]  }
 0x371   :  { %1568 = vmatpush1.bf16.msra.mxu0 %v18536_v17  ;;  %1599 = vmatprep.mubr.bf16.mxu0 %v19767_v1  ;;  %v18571_v17 = vld [vmem:[%s24684_s23 + $0x50] ss:$8 sps:$4 sm:$0x7f]  }
 0x372   :  { %1569 = vmatprep.subr.bf16.mxu0 %v18541_v18  ;;  %v2045_v43 = vshll.u32 %v20342_v38, 16  ;;  %v2049_v50 = vshrl.u32 %v20342_v38, 16  ;;  %v18590_v18 = vld [vmem:[%s24644_s10 + $0x30] sm:$0xff]   ;;  %v2322_v36 = vor.u32 %v2321_v35, %v2320_v33 }
 0x374   :  { %v2047_v48 = vrot.slane %v2045_v43, 1  ;;  %v2324_v29 = vrot.slane %v2045_v43, 2  ;;  %v2323_v34 = vrot.slane %v2049_v50, 1  ;;  %v18581_v43 = vld [vmem:[%s24684_s23 + $0x94] ss:$8 sps:$4 sm:$0x7f]  }
 0x375   :  { %1570 = vmatpush1.bf16.msra.mxu0 %v18539_v19  ;;  %v2250_v19 = vsel %vm122_vm0, %v18571_v17, 0 }
 0x376   :  { %1571 = vmatprep.subr.bf16.mxu0 %v18544_v20  ;;  %v2048_v9 = vsel %vm81_vm1, %v2043_v5, %v2047_v48  ;;  %v2051_v12 = vor.u32 %v2049_v50, %v2047_v48  ;;  %v18574_v20 = vld [vmem:[%s24684_s23 + $0x64] ss:$8 sps:$4 sm:$0xff]  }
 0x377   :  { %v18600_v5 = vld [vmem:[%s24647_s11 + $0x28] sm:$0xff]  }
 0x379   :  { %1572 = vmatpush1.bf16.msra.mxu0 %v18542_v21  ;;  %v18591_v21 = vld [vmem:[%s24644_s10 + $0x38] sm:$0xff]  }
 0x37a   :  { %1573 = vmatprep.subr.bf16.mxu0 %v18547_v22  ;;  %v18592_v22 = vld [vmem:[%s24644_s10 + $0x40] sm:$0xff]  }
 0x37d   :  { %1574 = vmatpush1.bf16.msra.mxu0 %v18545_v23  ;;  %v2222_v23 = vrot.slane %v20340_v37, 1 }
 0x37e   :  { %1575 = vmatprep.subr.bf16.mxu0 %v18550_v24  ;;  %v2223_v24 = vrot.slane %v20342_v38, 1 }
 0x381   :  { %1576 = vmatpush1.bf16.msra.mxu0 %v18548_v25  ;;  %v18593_v25 = vld [vmem:[%s24644_s10 + $0x48] sm:$0xff]  }
 0x382   :  { %16273 = vmatprep.subr.msk.bf16.mxu0 %vm612_vm5, %v18551_v26  ;;  %v2224_v26 = vsel %vm122_vm0, %v2222_v23, %v2223_v24 }
 0x385   :  { %1578 = vmatpush1.bf16.msra.mxu0 %v1562_v28  ;;  %v18575_v28 = vld [vmem:[%s24684_s23 + $0x74] ss:$8 sps:$4 sm:$0x7f]  }
 0x388   :  { %16274 = vmatmul.mubr.msk.bf16.vlgmr.msra.gmra.mrb[8].mxu0 %vm1065_vm8, %v1499_v30  ;;  %v18577_v30 = vld [vmem:[%s24684_s23 + $0x70] ss:$8 sps:$4 sm:$0x7f]  }
 0x389   :  { %1661 = vmatprep.mubr.bf16.mxu0 %v19767_v1  ;;  %v2352_v31 = vsel %vm122_vm0, %v18577_v30, 0 }
 0x45b   :  { %v1601_v45 = vpop.f32.mrb[8].mxu0 }
 0x45c   :  { %v1603_v47 = vpop.f32.mrb[9].mxu0 }
 0x45d   :  { %v1605_v49 = vpop.f32.mrb[10].mxu0 }
 0x45e   :  { %v1614_v51 = vpack.c.bf16 %v1605_v49, %v1601_v45  ;;  %v1607_v52 = vpop.f32.mrb[11].mxu0  ;;  %v2450_v45 = vsel %vm122_vm0, %v18583_v41, 0  ;;  %v18594_v49 = vld [vmem:[%s24644_s10 + $0x50] sm:$0xff]  }
 0x45f   :  { %v1615_v55 = vpack.c.bf16 %v1607_v52, %v1603_v47  ;;  %v2423_v47 = vrot.slane %v20342_v38, 2 }
 0x460   :  { %v1624_v60 = vand.u32 %v20345_v39, %v1614_v51 }
 0x461   :  { %v1627_v59 = vand.u32 %v20345_v39, %v1615_v55  ;;  %v2424_v48 = vsel %vm474_vm3, %v2422_v46, %v2423_v47  ;;  %v18606_v46 = vld [vmem:[%s24686_s0] sm:$0xff]  }
 0x463   :  { %1629 = vmatprep.subr.bf16.mxu0 %v1627_v59  ;;  %1674 = vmatprep.subr.bf16.mxu1 %v1627_v59 }
 0x464   :  { %1630 = vmatpush1.bf16.msra.mxu0 %v1624_v60  ;;  %1675 = vmatpush1.bf16.msra.mxu1 %v1624_v60 }
 0x465   :  { %2082 = vmatprep.subr.bf16.mxu0 %v18556_v57  ;;  %1811 = vmatprep.subr.bf16.mxu1 %v19767_v1 }
 0x467   :  { %16275 = vmatmul.mubr.msk.bf16.vlgmr.msra.gmra.mrb[12].mxu0 %vm24674_vm9, %v1616_v61  ;;  %16276 = vmatmul.mubr.msk.bf16.vlgmr.msra.gmra.mrb[16].mxu1 %vm24674_vm9, %v1670_v62  ;;  %v18595_v62 = vld [vmem:[%s24647_s11] sm:$0xff]  }
 0x468   :  { %2083 = vmatpush1.bf16.msra.mxu0 %v18554_v63  ;;  %2114 = vmatprep.mubr.bf16.mxu0 %v19767_v1 }
 0x469   :  { %16314 = vmatprep.subr.msk.bf16.mxu0 %vm122_vm0, %v18557_v0  ;;  %1812 = vmatpush1.bf16.msra.mxu1 %v18584_v2  ;;  %v18596_v0 = vld [vmem:[%s24647_s11 + $0x8] sm:$0xff]   ;;  %v18597_v2 = vld [vmem:[%s24647_s11 + $0x10] sm:$0xff]  }
 0x46a   :  { %1813 = vmatprep.subr.bf16.mxu1 %v19767_v1 }
 0x46c   :  { %2085 = vmatpush1.bf16.msra.mxu0 %v2077_v42  ;;  %v2325_v42 = vor.u32 %v2324_v29, %v2323_v34 }
 0x46d   :  { %2163 = vmatprep.subr.bf16.mxu0 %v18562_v3  ;;  %1814 = vmatpush1.bf16.msra.mxu1 %v18585_v4  ;;  %v18598_v3 = vld [vmem:[%s24647_s11 + $0x18] sm:$0xff]   ;;  %v18599_v4 = vld [vmem:[%s24647_s11 + $0x20] sm:$0xff]  }
 0x46e   :  { %1815 = vmatprep.subr.bf16.mxu1 %v19767_v1  ;;  %v2326_v44 = vsel %vm370_vm4, %v2322_v36, %v2325_v42 }
 0x46f   :  { %16315 = vmatmul.mubr.msk.bf16.vlgmr.msra.gmra.mrb[16].mxu0 %vm115_vm2, %v2048_v9  ;;  %v18604_v9 = vld [vmem:[%s24647_s11 + $0x48] sm:$0xff]  }
 0x470   :  { %2164 = vmatpush1.bf16.msra.mxu0 %v18560_v6  ;;  %2124 = vmatprep.mubr.bf16.mxu0 %v19767_v1  ;;  %v18601_v6 = vld [vmem:[%s24647_s11 + $0x30] sm:$0xff]  }
 0x471   :  { %16321 = vmatprep.subr.msk.bf16.mxu0 %vm122_vm0, %v18563_v7  ;;  %1816 = vmatpush1.bf16.msra.mxu1 %v18586_v8  ;;  %v18602_v7 = vld [vmem:[%s24647_s11 + $0x38] sm:$0xff]   ;;  %v18603_v8 = vld [vmem:[%s24647_s11 + $0x40] sm:$0xff]  }
 0x472   :  { %1817 = vmatprep.subr.bf16.mxu1 %v19767_v1 }
 0x474   :  { %2166 = vmatpush1.bf16.msra.mxu0 %v2158_v53 }
 0x475   :  { %2255 = vmatprep.subr.bf16.mxu0 %v18568_v10  ;;  %1818 = vmatpush1.bf16.msra.mxu1 %v18587_v11  ;;  %v18605_v10 = vld [vmem:[%s24647_s11 + $0x50] sm:$0xff]   ;;  %v2516_v11 = vld [vmem:[%s24641_s12] sm:$0x3] }
 0x476   :  { %1819 = vmatprep.subr.bf16.mxu1 %v19767_v1 }
 0x477   :  { %16316 = vmatmul.mubr.msk.bf16.gmra.mrb[20].mxu0 %vm115_vm2, %v2051_v12  ;;  %v2521_v12 = vrot.slane %v2516_v11, %v20002_v56 }
 0x478   :  { %2195 = vmatprep.mubr.bf16.mxu0 %v19767_v1 }
 0x479   :  { %1820 = vmatpush1.bf16.msra.mxu1 %v18588_v13  ;;  %v2525_v13 = vrot.slane %v2516_v11, %v20007_v58 }
 0x47a   :  { %1821 = vmatprep.subr.bf16.mxu1 %v19767_v1 }
 0x47d   :  { %1822 = vmatpush1.bf16.msra.mxu1 %v18589_v14 }
 0x47e   :  { %1823 = vmatprep.subr.bf16.mxu1 %v19767_v1 }
 0x47f   :  { %16322 = vmatmul.mubr.msk.bf16.vlgmr.msra.gmra.mrb[16].mxu0 %vm115_vm2, %v20340_v37 }
 0x480   :  { %2256 = vmatpush1.bf16.msra.mxu0 %v18566_v15  ;;  %2205 = vmatprep.mubr.bf16.mxu0 %v19767_v1 }
 0x481   :  { %16332 = vmatprep.subr.msk.bf16.mxu0 %vm122_vm0, %v18569_v16  ;;  %1824 = vmatpush1.bf16.msra.mxu1 %v18590_v18 }
 0x482   :  { %1825 = vmatprep.subr.bf16.mxu1 %v19767_v1 }
 0x484   :  { %2258 = vmatpush1.bf16.msra.mxu0 %v2250_v19 }
 0x485   :  { %2357 = vmatprep.subr.bf16.mxu0 %v18574_v20  ;;  %1826 = vmatpush1.bf16.msra.mxu1 %v18591_v21 }
 0x486   :  { %1827 = vmatprep.subr.bf16.mxu1 %v19767_v1 }
 0x487   :  { %16323 = vmatmul.mubr.msk.bf16.gmra.mrb[20].mxu0 %vm115_vm2, %v20342_v38 }
 0x488   :  { %2287 = vmatprep.mubr.bf16.mxu0 %v19767_v1 }
 0x489   :  { %1828 = vmatpush1.bf16.msra.mxu1 %v18592_v22 }
 0x48a   :  { %1829 = vmatprep.subr.bf16.mxu1 %v19767_v1 }
 0x48d   :  { %1830 = vmatpush1.bf16.msra.mxu1 %v18593_v25 }
 0x48e   :  { %1831 = vmatprep.subr.bf16.mxu1 %v19767_v1 }
 0x48f   :  { %16333 = vmatmul.mubr.msk.bf16.vlgmr.msra.gmra.mrb[16].mxu0 %vm115_vm2, %v2224_v26 }
 0x490   :  { %2358 = vmatpush1.bf16.msra.mxu0 %v18572_v27  ;;  %2297 = vmatprep.mubr.bf16.mxu0 %v19767_v1 }
 0x491   :  { %16343 = vmatprep.subr.msk.bf16.mxu0 %vm122_vm0, %v18575_v28  ;;  %1832 = vmatpush1.bf16.msra.mxu1 %v18594_v49  ;;  %v18609_v49 = vld [vmem:[%s24688_s26 + $0x8] sm:$0xff]  }
 0x492   :  { %1939 = vmatprep.subr.bf16.mxu1 %v19767_v1 }
 0x494   :  { %2360 = vmatpush1.bf16.msra.mxu0 %v2352_v31 }
 0x495   :  { %2455 = vmatprep.subr.bf16.mxu0 %v18580_v32 }
 0x497   :  { %16334 = vmatmul.mubr.msk.bf16.gmra.mrb[20].mxu0 %vm115_vm2, %v2223_v24 }
 0x498   :  { %2389 = vmatprep.mubr.bf16.mxu0 %v19767_v1 }
 0x49f   :  { %16344 = vmatmul.mubr.msk.bf16.vlgmr.msra.gmra.mrb[16].mxu0 %vm115_vm2, %v2326_v44 }
 0x4a0   :  { %2456 = vmatpush1.bf16.msra.mxu0 %v18578_v40  ;;  %2399 = vmatprep.mubr.bf16.mxu0 %v19767_v1 }
 0x4a1   :  { %16354 = vmatprep.subr.msk.bf16.mxu0 %vm122_vm0, %v18581_v43 }
 0x4a4   :  { %2458 = vmatpush1.bf16.msra.mxu0 %v2450_v45 }
 0x4a7   :  { %16345 = vmatmul.mubr.msk.bf16.gmra.mrb[20].mxu0 %vm115_vm2, %v2325_v42 }
 0x4a8   :  { %2487 = vmatprep.mubr.bf16.mxu0 %v19767_v1 }
 0x4af   :  { %16355 = vmatmul.mubr.msk.bf16.vlgmr.msra.gmra.mrb[16].mxu0 %vm115_vm2, %v2424_v48  ;;  %v18608_v48 = vld [vmem:[%s24688_s26] sm:$0xff]  }
 0x4b0   :  { %2497 = vmatprep.mubr.bf16.mxu0 %v19767_v1 }
 0x4b7   :  { %16356 = vmatmul.mubr.msk.bf16.gmra.mrb[20].mxu0 %vm115_vm2, %v2423_v47  ;;  %v18607_v47 = vld [vmem:[%s24687_s4] sm:$0xff]  }
 0x4b8   :  { %3048 = vmatprep.mubr.bf16.mxu0 %v19767_v1 }
 0x53a   :  { %v1663_v37 = vpop.f32.mrb[12].mxu0  ;;  %v1708_v50 = vpop.f32.mrb[16].mxu1 }
 0x53b   :  { %v1715_v38 = vmax.f32 %v1663_v37, %v1708_v50  ;;  %v1665_v51 = vpop.f32.mrb[13].mxu0  ;;  %v1710_v52 = vpop.f32.mrb[17].mxu1  ;;  %v18610_v37 = vld [vmem:[%s24688_s26 + $0x10] sm:$0xff]   ;;  %v18611_v50 = vld [vmem:[%s24688_s26 + $0x18] sm:$0xff]  }
 0x53c   :  { %v1716_v53 = vmax.f32 %v1665_v51, %v1710_v52  ;;  %v1667_v55 = vpop.f32.mrb[14].mxu0  ;;  %v1712_v57 = vpop.f32.mrb[18].mxu1  ;;  %v18613_v51 = vld [vmem:[%s24688_s26 + $0x28] sm:$0xff]   ;;  %v18614_v52 = vld [vmem:[%s24688_s26 + $0x30] sm:$0xff]  }
 0x53d   :  { %v1668_v59 = vpop.f32.mrb[15].mxu0  ;;  %v1713_v60 = vpop.f32.mrb[19].mxu1  ;;  %v1717_v63 = vpack.c.bf16 %v1715_v38, %v1715_v38  ;;  %v18612_v38 = vld [vmem:[%s24688_s26 + $0x20] sm:$0xff]   ;;  %v18617_v57 = vld [vmem:[%s24688_s26 + $0x48] sm:$0x3f]  }
 0x53e   :  { %v1718_v61 = vpack.c.bf16 %v1716_v53, %v1716_v53  ;;  %v18615_v53 = vld [vmem:[%s24688_s26 + $0x38] sm:$0xff]   ;;  %v18616_v55 = vld [vmem:[%s24688_s26 + $0x40] sm:$0xff]   ;;  %v2749_v59 = vsel %vm474_vm3, %v18617_v57, 0 }
 0x540   :  { %16288 = vmatprep.mubr.msk.bf16.mxu1 %vm24673_vm10, %v1718_v61 }
 0x541   :  { %1844 = vmatmul.mubr.bf16.vlgmr.msra.gmra.mrb[20].mxu1 %v1717_v63 }
 0x542   :  { %1940 = vmatpush1.bf16.msra.mxu1 %v18595_v62  ;;  %16300 = vmatprep.mubr.msk.bf16.mxu1 %vm24673_vm10, %v1718_v61 }
 0x543   :  { %1941 = vmatprep.subr.bf16.mxu1 %v19767_v1 }
 0x546   :  { %1942 = vmatpush1.bf16.msra.mxu1 %v18596_v0 }
 0x547   :  { %1943 = vmatprep.subr.bf16.mxu1 %v19767_v1 }
 0x54a   :  { %1944 = vmatpush1.bf16.msra.mxu1 %v18597_v2  ;;  %v16301_v2 = vld [vmem:[%s24648_s13] ss:$0 sm:$0xff] }
 0x54b   :  { %1945 = vmatprep.subr.bf16.mxu1 %v19767_v1 }
 0x54e   :  { %1946 = vmatpush1.bf16.msra.mxu1 %v18598_v3 }
 0x54f   :  { %1947 = vmatprep.subr.bf16.mxu1 %v19767_v1 }
 0x552   :  { %1948 = vmatpush1.bf16.msra.mxu1 %v18599_v4 }
 0x553   :  { %1949 = vmatprep.subr.bf16.mxu1 %v19767_v1 }
 0x556   :  { %1950 = vmatpush1.bf16.msra.mxu1 %v18600_v5 }
 0x557   :  { %1951 = vmatprep.subr.bf16.mxu1 %v19767_v1 }
 0x55a   :  { %1952 = vmatpush1.bf16.msra.mxu1 %v18601_v6 }
 0x55b   :  { %1953 = vmatprep.subr.bf16.mxu1 %v19767_v1 }
 0x55e   :  { %1954 = vmatpush1.bf16.msra.mxu1 %v18602_v7 }
 0x55f   :  { %1955 = vmatprep.subr.bf16.mxu1 %v19767_v1 }
 0x562   :  { %1956 = vmatpush1.bf16.msra.mxu1 %v18603_v8 }
 0x563   :  { %1957 = vmatprep.subr.bf16.mxu1 %v19767_v1 }
 0x566   :  { %1958 = vmatpush1.bf16.msra.mxu1 %v18604_v9 }
 0x567   :  { %1959 = vmatprep.subr.bf16.mxu1 %v19767_v1 }
 0x56a   :  { %1960 = vmatpush1.bf16.msra.mxu1 %v18605_v10 }
 0x56d   :  { %1972 = vmatmul.mubr.bf16.vlgmr.msra.gmra.mrb[24].mxu1 %v1717_v63 }
 0x56e   :  { %2596 = vmatprep.mubr.bf16.mxu1 %v19767_v1 }
 0x582   :  { %v2489_v14 = vpop.f32.mrb[16].mxu0 }
 0x583   :  { %v2528_v15 = vadd.f32 %v2521_v12, %v2489_v14  ;;  %v2491_v16 = vpop.f32.mrb[17].mxu0 }
 0x584   :  { %v2529_v17 = vadd.f32 %v2525_v13, %v2491_v16  ;;  %v2493_v18 = vpop.f32.mrb[18].mxu0 }
 0x585   :  { %v2530_v19 = vadd.f32 %v2521_v12, %v2493_v18  ;;  %v2495_v20 = vpop.f32.mrb[19].mxu0  ;;  %v2536_v22 = vmax.f32 %v2528_v15, 0.0 }
 0x586   :  { %v2531_v21 = vadd.f32 %v2525_v13, %v2495_v20  ;;  %v2537_v24 = vmax.f32 %v2529_v17, 0.0 }
 0x587   :  { %v2538_v23 = vmax.f32 %v2530_v19, 0.0 }
 0x588   :  { %v2539_v25 = vmax.f32 %v2531_v21, 0.0 }
 0x589   :  { %v2544_v26 = vpack.c.bf16 %v2538_v23, %v2536_v22 }
 0x58a   :  { %v2545_v27 = vpack.c.bf16 %v2539_v25, %v2537_v24  ;;  %v2499_v28 = vpop.f32.mrb[20].mxu0 }
 0x58b   :  { %v2532_v30 = vadd.f32 %v2521_v12, %v2499_v28  ;;  %v2501_v31 = vpop.f32.mrb[21].mxu0  ;;  %v18619_v28 = vld [vmem:[%s24642_s7 + $0x8] sm:$0xff]  }
 0x58c   :  { %v2533_v32 = vadd.f32 %v2525_v13, %v2501_v31  ;;  %v2503_v33 = vpop.f32.mrb[22].mxu0  ;;  %2564 = vmatprep.subr.bf16.mxu1 %v2545_v27  ;;  %v18621_v31 = vld [vmem:[%s24642_s7 + $0x18] sm:$0xff]  }
 0x58d   :  { %v2534_v29 = vadd.f32 %v2521_v12, %v2503_v33  ;;  %v2505_v34 = vpop.f32.mrb[23].mxu0  ;;  %2565 = vmatpush1.bf16.msra.mxu1 %v2544_v26  ;;  %v2540_v36 = vmax.f32 %v2532_v30, 0.0  ;;  %v18620_v30 = vld [vmem:[%s24642_s7 + $0x10] sm:$0xff]   ;;  %v18623_v33 = vld [vmem:[%s24642_s7 + $0x28] sm:$0xff]  }
 0x58e   :  { %v2535_v35 = vadd.f32 %v2525_v13, %v2505_v34  ;;  %v2541_v44 = vmax.f32 %v2533_v32, 0.0  ;;  %v18622_v32 = vld [vmem:[%s24642_s7 + $0x20] sm:$0xff]   ;;  %v18625_v34 = vld [vmem:[%s24642_s7 + $0x38] sm:$0xff]  }
 0x58f   :  { %v2542_v42 = vmax.f32 %v2534_v29, 0.0  ;;  %v18624_v29 = vld [vmem:[%s24642_s7 + $0x30] sm:$0xff]  }
 0x590   :  { %v2543_v40 = vmax.f32 %v2535_v35, 0.0  ;;  %v18626_v35 = vld [vmem:[%s24642_s7 + $0x40] sm:$0xff]  }
 0x591   :  { %v2546_v43 = vpack.c.bf16 %v2542_v42, %v2540_v36  ;;  %v18627_v36 = vld [vmem:[%s24642_s7 + $0x48] sm:$0x3f]  }
 0x592   :  { %v2547_v41 = vpack.c.bf16 %v2543_v40, %v2541_v44  ;;  %v2872_v42 = vsel %vm474_vm3, %v18627_v36, 0  ;;  %v18676_v36 = vld [vmem:[%s24643_s3 + $0x100] ss:$8 sps:$4 sm:$0xff]  }
 0x593   :  { %v2559_v45 = vsel %vm612_vm5, %v2546_v43, 0 }
 0x594   :  { %16358 = vmatprep.subr.msk.bf16.mxu1 %vm612_vm5, %v2547_v41 }
 0x595   :  { %2567 = vmatpush1.bf16.msra.mxu1 %v2559_v45 }
 0x596   :  { %2617 = vmatprep.subr.bf16.mxu1 %v2545_v27  ;;  %v18618_v27 = vld [vmem:[%s24642_s7] sm:$0xff]  }
 0x598   :  { %16359 = vmatmul.mubr.msk.bf16.vlgmr.msra.gmra.mrb[28].mxu1 %vm24668_vm6, %v18606_v46  ;;  %v18630_v46 = vld [vmem:[%s24643_s3 + $0x64] ss:$8 sps:$4 sm:$0xff]  }
 0x599   :  { %2618 = vmatpush1.bf16.msra.mxu1 %v2544_v26  ;;  %2649 = vmatprep.mubr.bf16.mxu1 %v19767_v1 }
 0x59a   :  { %16361 = vmatprep.subr.msk.bf16.mxu1 %vm612_vm5, %v2547_v41  ;;  %3016 = vmatprep.subr.bf16.mxu0 %v18630_v46  ;;  %v18687_v46 = vld [vmem:[%s24643_s3 + $0x134] ss:$8 sps:$4 sm:$0xff]  }
 0x59d   :  { %2620 = vmatpush1.bf16.msra.mxu1 %v2559_v45  ;;  %v18628_v45 = vld [vmem:[%s24643_s3 + $0x60] ss:$8 sps:$4 sm:$0xff]  }
 0x59e   :  { %2751 = vmatprep.subr.bf16.mxu1 %v19767_v1  ;;  %3017 = vmatpush1.bf16.msra.mxu0 %v18628_v45 }
 0x5a0   :  { %16362 = vmatmul.mubr.msk.bf16.vlgmr.msra.gmra.mrb[32].mxu1 %vm24668_vm6, %v18607_v47  ;;  %vm2020_vm6 = vcmask 122880   ;;  %v18633_v47 = vld [vmem:[%s24643_s3 + $0x74] ss:$8 sps:$4 sm:$0xff]  }
 0x5a1   :  { %2752 = vmatpush1.bf16.msra.mxu1 %v18608_v48  ;;  %v18631_v48 = vld [vmem:[%s24643_s3 + $0x70] ss:$8 sps:$4 sm:$0xff]   ;;  %3018 = vmatprep.subr.bf16.mxu0 %v18633_v47 }
 0x5a2   :  { %2753 = vmatprep.subr.bf16.mxu1 %v19767_v1  ;;  %3019 = vmatpush1.bf16.msra.mxu0 %v18631_v48  ;;  %v18685_v47 = vld [vmem:[%s24643_s3 + $0x130] ss:$8 sps:$4 sm:$0xff]   ;;  %v18690_v48 = vld [vmem:[%s24643_s3 + $0x144] ss:$8 sps:$4 sm:$0xff]  }
 0x5a5   :  { %2754 = vmatpush1.bf16.msra.mxu1 %v18609_v49  ;;  %v18636_v49 = vld [vmem:[%s24643_s3 + $0x84] ss:$8 sps:$4 sm:$0xff]  }
 0x5a6   :  { %2755 = vmatprep.subr.bf16.mxu1 %v19767_v1  ;;  %3020 = vmatprep.subr.bf16.mxu0 %v18636_v49  ;;  %v18688_v49 = vld [vmem:[%s24643_s3 + $0x140] ss:$8 sps:$4 sm:$0xff]  }
 0x5a9   :  { %2756 = vmatpush1.bf16.msra.mxu1 %v18610_v37  ;;  %v18634_v37 = vld [vmem:[%s24643_s3 + $0x80] ss:$8 sps:$4 sm:$0xff]  }
 0x5aa   :  { %2757 = vmatprep.subr.bf16.mxu1 %v19767_v1  ;;  %3021 = vmatpush1.bf16.msra.mxu0 %v18634_v37  ;;  %v18693_v37 = vld [vmem:[%s24643_s3 + $0x154] ss:$8 sps:$4 sm:$0xff]  }
 0x5ad   :  { %2758 = vmatpush1.bf16.msra.mxu1 %v18611_v50  ;;  %v18639_v50 = vld [vmem:[%s24643_s3 + $0x94] ss:$8 sps:$4 sm:$0xff]  }
 0x5ae   :  { %2759 = vmatprep.subr.bf16.mxu1 %v19767_v1  ;;  %3022 = vmatprep.subr.bf16.mxu0 %v18639_v50  ;;  %v18691_v50 = vld [vmem:[%s24643_s3 + $0x150] ss:$8 sps:$4 sm:$0xff]  }
 0x5b1   :  { %2760 = vmatpush1.bf16.msra.mxu1 %v18612_v38  ;;  %v18637_v38 = vld [vmem:[%s24643_s3 + $0x90] ss:$8 sps:$4 sm:$0xff]  }
 0x5b2   :  { %2761 = vmatprep.subr.bf16.mxu1 %v19767_v1  ;;  %3023 = vmatpush1.bf16.msra.mxu0 %v18637_v38  ;;  %v18696_v38 = vld [vmem:[%s24643_s3 + $0x164] ss:$8 sps:$4 sm:$0xff]  }
 0x5b5   :  { %2762 = vmatpush1.bf16.msra.mxu1 %v18613_v51  ;;  %v18642_v51 = vld [vmem:[%s24643_s3 + $0xa4] ss:$8 sps:$4 sm:$0xff]  }
 0x5b6   :  { %2763 = vmatprep.subr.bf16.mxu1 %v19767_v1  ;;  %3024 = vmatprep.subr.bf16.mxu0 %v18642_v51  ;;  %v18694_v51 = vld [vmem:[%s24643_s3 + $0x160] ss:$8 sps:$4 sm:$0xff]  }
 0x5b9   :  { %2764 = vmatpush1.bf16.msra.mxu1 %v18614_v52  ;;  %v18640_v52 = vld [vmem:[%s24643_s3 + $0xa0] ss:$8 sps:$4 sm:$0xff]  }
 0x5ba   :  { %2765 = vmatprep.subr.bf16.mxu1 %v19767_v1  ;;  %3025 = vmatpush1.bf16.msra.mxu0 %v18640_v52  ;;  %v18697_v52 = vld [vmem:[%s24643_s3 + $0x174] ss:$8 sps:$4 sm:$0x1f]  }
 0x5bd   :  { %2766 = vmatpush1.bf16.msra.mxu1 %v18615_v53  ;;  %v18643_v53 = vld [vmem:[%s24643_s3 + $0xb4] ss:$8 sps:$4 sm:$0x1f]  }
 0x5be   :  { %2767 = vmatprep.subr.bf16.mxu1 %v19767_v1  ;;  %16409 = vmatprep.subr.msk.bf16.mxu0 %vm612_vm5, %v18643_v53  ;;  %v18699_v53 = vld [vmem:[%s24643_s3 + $0x170] ss:$8 sps:$4 sm:$0x1f]  }
 0x5c1   :  { %2768 = vmatpush1.bf16.msra.mxu1 %v18616_v55  ;;  %v18645_v55 = vld [vmem:[%s24643_s3 + $0xb0] ss:$8 sps:$4 sm:$0x1f]  }
 0x5c2   :  { %2769 = vmatprep.subr.bf16.mxu1 %v19767_v1  ;;  %v3011_v57 = vsel %vm612_vm5, %v18645_v55, 0  ;;  %v3373_v55 = vsel %vm612_vm5, %v18699_v53, 0 }
 0x5c3   :  { %3027 = vmatpush1.bf16.msra.mxu0 %v3011_v57  ;;  %v18702_v57 = vld [vmem:[%s24643_s3 + $0x184] ss:$8 sps:$4 sm:$0xff]  }
 0x5c5   :  { %2770 = vmatpush1.bf16.msra.mxu1 %v2749_v59  ;;  %v18648_v59 = vld [vmem:[%s24643_s3 + $0x4] ss:$8 sps:$4 sm:$0xff]  }
 0x5c6   :  { %2874 = vmatprep.subr.bf16.mxu1 %v19767_v1  ;;  %3125 = vmatprep.subr.bf16.mxu0 %v18648_v59  ;;  %v18700_v59 = vld [vmem:[%s24643_s3 + $0x180] ss:$8 sps:$4 sm:$0xff]  }
 0x614   :  { %v1845_v60 = vpop.f32.mrb[20].mxu1 }
 0x615   :  { %v1847_v61 = vpop.f32.mrb[21].mxu1 }
 0x616   :  { %v1848_v62 = vpop.f32.mrb[22].mxu1 }
 0x617   :  { %v1849_v63 = vpop.f32.mrb[23].mxu1 }
 0x640   :  { %v1973_v0 = vpop.f32.mrb[24].mxu1 }
 0x641   :  { %v1979_v3 = vmax.f32 %v1845_v60, %v1973_v0  ;;  %v1975_v4 = vpop.f32.mrb[25].mxu1 }
 0x642   :  { %v1976_v5 = vpop.f32.mrb[26].mxu1 }
 0x643   :  { %v1987_v6 = vadd.f32 %v16301_v2, %v1979_v3  ;;  %v1977_v7 = vpop.f32.mrb[27].mxu1 }
 0x645   :  { %v1988_v8 = vmax.f32 %v1987_v6, 0.0 }
 0x647   :  { %v1992_v9 = vrot.slane %v1988_v8, 1  ;;  %1990 = vst.msk [vmem:[#allocation2] sm:$0x1] %vm24667_vm11, %v1988_v8  ;;  %v2000_v10 = vrot.slane %v1988_v8, 2  ;;  %v2006_v11 = vrot.slane %v1988_v8, 3  ;;  %v2014_v12 = vrot.slane %v1988_v8, 4 }
 0x648   :  { %vm2018_vm11 = vcmask 1040896  }
 0x649   :  { %1993 = vrot.lane.b32.xlu0 %v1992_v9, %s24669_s6  ;;  %s24693_s6 = smov 80  }
 0x64d   :  { %2001 = vrot.lane.b32.xlu0 %v2000_v10, %s24671_s30  ;;  %s24694_s30 = smov 112  }
 0x651   :  { %2007 = vrot.lane.b32.xlu0 %v2006_v11, %s24664_s2 }
 0x655   :  { %2015 = vrot.lane.b32.xlu0 %v2014_v12, %s24662_s21 }
 0x66b   :  { %v2598_v13 = vpop.f32.mrb[28].mxu1 }
 0x66c   :  { %v2600_v14 = vpop.f32.mrb[29].mxu1 }
 0x66d   :  { %v2602_v15 = vpop.f32.mrb[30].mxu1 }
 0x66e   :  { %v2604_v16 = vpop.f32.mrb[31].mxu1 }
 0x673   :  { %v2651_v17 = vpop.f32.mrb[32].mxu1 }
 0x674   :  { %v2660_v18 = vmax.f32 %v2598_v13, %v2651_v17  ;;  %v2653_v19 = vpop.f32.mrb[33].mxu1  ;;  %v18646_v13 = vld [vmem:[%s24643_s3] ss:$8 sps:$4 sm:$0xff]   ;;  %v18649_v17 = vld [vmem:[%s24643_s3 + $0x10] ss:$8 sps:$4 sm:$0xff]  }
 0x675   :  { %v2661_v20 = vmax.f32 %v2600_v14, %v2653_v19  ;;  %v2655_v21 = vpop.f32.mrb[34].mxu1  ;;  %v18652_v19 = vld [vmem:[%s24643_s3 + $0x20] ss:$8 sps:$4 sm:$0xff]  }
 0x676   :  { %v2662_v22 = vmax.f32 %v2602_v15, %v2655_v21  ;;  %v2657_v23 = vpop.f32.mrb[35].mxu1  ;;  %v18651_v15 = vld [vmem:[%s24643_s3 + $0x14] ss:$8 sps:$4 sm:$0xff]   ;;  %v18655_v21 = vld [vmem:[%s24643_s3 + $0x30] ss:$8 sps:$4 sm:$0xff]  }
 0x677   :  { %v2663_v24 = vmax.f32 %v2604_v16, %v2657_v23  ;;  %v18658_v23 = vld [vmem:[%s24643_s3 + $0x40] ss:$8 sps:$4 sm:$0xff]  }
 0x678   :  { %v2664_v25 = vpack.c.bf16 %v2662_v22, %v2660_v18  ;;  %v18654_v18 = vld [vmem:[%s24643_s3 + $0x24] ss:$8 sps:$4 sm:$0xff]  }
 0x679   :  { %v2665_v26 = vpack.c.bf16 %v2663_v24, %v2661_v20  ;;  %v18657_v20 = vld [vmem:[%s24643_s3 + $0x34] ss:$8 sps:$4 sm:$0xff]   ;;  %v18660_v22 = vld [vmem:[%s24643_s3 + $0x44] ss:$8 sps:$4 sm:$0xff]  }
 0x67a   :  { %v18661_v24 = vld [vmem:[%s24643_s3 + $0x54] ss:$8 sps:$4 sm:$0x1f]  }
 0x67b   :  { %16373 = vmatprep.mubr.msk.bf16.mxu1 %vm24666_vm7, %v2665_v26 }
 0x67c   :  { %2784 = vmatmul.mubr.bf16.vlgmr.msra.gmra.mrb[36].mxu1 %v2664_v25 }
 0x67d   :  { %2875 = vmatpush1.bf16.msra.mxu1 %v18618_v27  ;;  %16384 = vmatprep.mubr.msk.bf16.mxu1 %vm24666_vm7, %v2665_v26  ;;  %vm2012_vm7 = vcmask 516096   ;;  %v18666_v27 = vld [vmem:[%s24643_s3 + $0xc4] ss:$8 sps:$4 sm:$0xff]  }
 0x67e   :  { %2876 = vmatprep.subr.bf16.mxu1 %v19767_v1 }
 0x681   :  { %2877 = vmatpush1.bf16.msra.mxu1 %v18619_v28  ;;  %v18664_v28 = vld [vmem:[%s24643_s3 + $0xc0] ss:$8 sps:$4 sm:$0xff]  }
 0x682   :  { %2878 = vmatprep.subr.bf16.mxu1 %v19767_v1 }
 0x685   :  { %2879 = vmatpush1.bf16.msra.mxu1 %v18620_v30  ;;  %v18669_v30 = vld [vmem:[%s24643_s3 + $0xd4] ss:$8 sps:$4 sm:$0xff]  }
 0x686   :  { %2880 = vmatprep.subr.bf16.mxu1 %v19767_v1 }
 0x689   :  { %2881 = vmatpush1.bf16.msra.mxu1 %v18621_v31  ;;  %v18667_v31 = vld [vmem:[%s24643_s3 + $0xd0] ss:$8 sps:$4 sm:$0xff]  }
 0x68a   :  { %2882 = vmatprep.subr.bf16.mxu1 %v19767_v1 }
 0x68d   :  { %2883 = vmatpush1.bf16.msra.mxu1 %v18622_v32  ;;  %v18672_v32 = vld [vmem:[%s24643_s3 + $0xe4] ss:$8 sps:$4 sm:$0xff]  }
 0x68e   :  { %2884 = vmatprep.subr.bf16.mxu1 %v19767_v1 }
 0x691   :  { %2885 = vmatpush1.bf16.msra.mxu1 %v18623_v33  ;;  %v18670_v33 = vld [vmem:[%s24643_s3 + $0xe0] ss:$8 sps:$4 sm:$0xff]  }
 0x692   :  { %2886 = vmatprep.subr.bf16.mxu1 %v19767_v1 }
 0x695   :  { %2887 = vmatpush1.bf16.msra.mxu1 %v18624_v29  ;;  %v18675_v29 = vld [vmem:[%s24643_s3 + $0xf4] ss:$8 sps:$4 sm:$0xff]  }
 0x696   :  { %2888 = vmatprep.subr.bf16.mxu1 %v19767_v1 }
 0x699   :  { %2889 = vmatpush1.bf16.msra.mxu1 %v18625_v34  ;;  %v18673_v34 = vld [vmem:[%s24643_s3 + $0xf0] ss:$8 sps:$4 sm:$0xff]  }
 0x69a   :  { %2890 = vmatprep.subr.bf16.mxu1 %v19767_v1 }
 0x69d   :  { %2891 = vmatpush1.bf16.msra.mxu1 %v18626_v35  ;;  %v18678_v35 = vld [vmem:[%s24643_s3 + $0x104] ss:$8 sps:$4 sm:$0xff]  }
 0x69e   :  { %2892 = vmatprep.subr.bf16.mxu1 %v19767_v1 }
 0x6a1   :  { %2893 = vmatpush1.bf16.msra.mxu1 %v2872_v42  ;;  %v18679_v42 = vld [vmem:[%s24643_s3 + $0x114] ss:$8 sps:$4 sm:$0x1f]  }
 0x6a4   :  { %2907 = vmatmul.mubr.bf16.vlgmr.msra.gmra.mrb[40].mxu1 %v2664_v25  ;;  %v18663_v25 = vld [vmem:[%s24643_s3 + $0x50] ss:$8 sps:$4 sm:$0x1f]  }
 0x6a5   :  { %3596 = vmatprep.mubr.bf16.mxu1 %v19767_v1  ;;  %v3120_v26 = vsel %vm612_vm5, %v18663_v25, 0 }
 0x6bb   :  { %v1994_v44 = vpop.permute.xlu0 %1993 }
 0x6bc   :  { %1997 = vst.msk [vmem:[#allocation2] sm:$0x1] %vm1996_vm12, %v1994_v44 }
 0x6bd   :  { %1999 = vst.msk [vmem:[#allocation2 + $0x8] sm:$0x1] %vm1998_vm13, %v1994_v44  ;;  %v18681_v44 = vld [vmem:[%s24643_s3 + $0x110] ss:$8 sps:$4 sm:$0x1f]  }
 0x6bf   :  { %v2002_v40 = vpop.permute.xlu0 %2001 }
 0x6c0   :  { %2005 = vst.msk [vmem:[#allocation2 + $0x8] sm:$0x1] %vm2004_vm14, %v2002_v40  ;;  %v3244_v40 = vsel %vm612_vm5, %v18681_v44, 0 }
 0x6c3   :  { %v2008_v43 = vpop.permute.xlu0 %2007 }
 0x6c4   :  { %2011 = vst.msk [vmem:[#allocation2 + $0x8] sm:$0x1] %vm2010_vm15, %v2008_v43 }
 0x6c5   :  { %2013 = vst.msk [vmem:[#allocation2 + $0x10] sm:$0x1] %vm2012_vm7, %v2008_v43  ;;  %v18684_v43 = vld [vmem:[%s24643_s3 + $0x124] ss:$8 sps:$4 sm:$0xff]  }
 0x6c7   :  { %v2016_v41 = vpop.permute.xlu0 %2015 }
 0x6c8   :  { %2019 = vst.msk [vmem:[#allocation2 + $0x10] sm:$0x1] %vm2018_vm11, %v2016_v41 }
 0x6c9   :  { %2021 = vst.msk [vmem:[#allocation2 + $0x18] sm:$0x1] %vm2020_vm6, %v2016_v41  ;;  %v18682_v41 = vld [vmem:[%s24643_s3 + $0x120] ss:$8 sps:$4 sm:$0xff]  }
 0x74f   :  { %v2785_v60 = vpop.f32.mrb[36].mxu1 }
 0x750   :  { %v2787_v61 = vpop.f32.mrb[37].mxu1 }
 0x751   :  { %v2788_v62 = vpop.f32.mrb[38].mxu1  ;;  %v18703_v61 = vld [vmem:[%s24643_s3 + $0x190] ss:$8 sps:$4 sm:$0xff]  }
 0x752   :  { %v2790_v63 = vpop.f32.mrb[39].mxu1 }
 0x753   :  { %v18706_v63 = vld [vmem:[%s24643_s3 + $0x1a0] ss:$8 sps:$4 sm:$0xff]  }
 0x777   :  { %v2908_v0 = vpop.f32.mrb[40].mxu1 }
 0x778   :  { %v2915_v2 = vmax.f32 %v2785_v60, %v2908_v0  ;;  %v2910_v3 = vpop.f32.mrb[41].mxu1  ;;  %v18705_v60 = vld [vmem:[%s24643_s3 + $0x194] ss:$8 sps:$4 sm:$0xff]  }
 0x779   :  { %v2911_v4 = vpop.f32.mrb[42].mxu1  ;;  %v18711_v0 = vld [vmem:[%s24643_s3 + $0x1b4] ss:$8 sps:$4 sm:$0xff]   ;;  %v18714_v3 = vld [vmem:[%s24643_s3 + $0x1c4] ss:$8 sps:$4 sm:$0xff]  }
 0x77a   :  { %v2916_v5 = vmax.f32 %v2788_v62, %v2911_v4  ;;  %v2913_v6 = vpop.f32.mrb[43].mxu1  ;;  %v18708_v62 = vld [vmem:[%s24643_s3 + $0x1a4] ss:$8 sps:$4 sm:$0xff]  }
 0x77b   :  { %v16530_v4 = vld [vmem:[%s24685_s29 + $0x40] sm:$0xff] }
 0x77c   :  { %v20724_v7 = vpack.c.bf16 %v2916_v5, %v2915_v2  ;;  %v18709_v2 = vld [vmem:[%s24643_s3 + $0x1b0] ss:$8 sps:$4 sm:$0xff]   ;;  %v16531_v5 = vld [vmem:[%s24685_s29 + $0x48] sm:$0xff] }
 0x77d   :  { %v18712_v6 = vld [vmem:[%s24643_s3 + $0x1c0] ss:$8 sps:$4 sm:$0xff]  }
 0x77e   :  { %v2943_v8 = vshrl.u32 %v20724_v7, 16  ;;  %v2945_v9 = vshll.u32 %v20724_v7, 16  ;;  %v3181_v45 = vrot.slane %v20724_v7, 1 }
 0x780   :  { %v2947_v10 = vrot.slane %v2945_v9, 1  ;;  %v20728_v11 = vrot.slane %v2943_v8, 1  ;;  %v20730_v12 = vrot.slane %v2945_v9, 2  ;;  %v20897_v9 = vpack.c.bf16 %v16531_v5, %v16530_v4 }
 0x782   :  { %v2948_v14 = vor.u32 %v2947_v10, %v2943_v8  ;;  %v3310_v16 = vor.u32 %v20730_v12, %v20728_v11  ;;  %v18715_v8 = vld [vmem:[%s24643_s3 + $0x1d4] ss:$8 sps:$4 sm:$0x1f]   ;;  %v18717_v10 = vld [vmem:[%s24643_s3 + $0x1d0] ss:$8 sps:$4 sm:$0x1f]  }
 0x783   :  { %v16532_v11 = vld [vmem:[%s24685_s29 + $0x50] sm:$0xff]  ;;  %v16533_v12 = vld [vmem:[%s24685_s29 + $0x58] sm:$0x3f] }
 0x784   :  { %16410 = vmatmul.mubr.msk.bf16.vlgmr.msra.gmra.mrb[24].mxu0 %vm1065_vm8, %v2948_v14  ;;  %v3966_v14 = vshll.u32 %v20897_v9, 16 }
 0x785   :  { %3126 = vmatpush1.bf16.msra.mxu0 %v18646_v13  ;;  %3157 = vmatprep.mubr.bf16.mxu0 %v19767_v1  ;;  %v20908_v13 = vpack.c.bf16 %v16533_v12, %v16532_v11  ;;  %v3554_v12 = vld [vmem:[%s24645_s8] sm:$0x7] }
 0x786   :  { %3127 = vmatprep.subr.bf16.mxu0 %v18651_v15  ;;  %v3500_v15 = vsel %vm612_vm5, %v18717_v10, 0 }
 0x789   :  { %3128 = vmatpush1.bf16.msra.mxu0 %v18649_v17  ;;  %v18718_v17 = vld [vmem:[%s24684_s23 + $0x20] ss:$8 sps:$4 sm:$0xff]  }
 0x78a   :  { %3129 = vmatprep.subr.bf16.mxu0 %v18654_v18  ;;  %v18721_v18 = vld [vmem:[%s24684_s23 + $0x34] ss:$8 sps:$4 sm:$0x7f]  }
 0x78d   :  { %3130 = vmatpush1.bf16.msra.mxu0 %v18652_v19  ;;  %v3964_v19 = vshrl.u32 %v20897_v9, 16 }
 0x78e   :  { %3131 = vmatprep.subr.bf16.mxu0 %v18657_v20  ;;  %v3968_v20 = vrot.slane %v3966_v14, 1 }
 0x791   :  { %3132 = vmatpush1.bf16.msra.mxu0 %v18655_v21  ;;  %v3971_v21 = vshll.u32 %v20908_v13, 16 }
 0x792   :  { %3133 = vmatprep.subr.bf16.mxu0 %v18660_v22  ;;  %v3437_v22 = vrot.slane %v20724_v7, 2 }
 0x793   :  { %v3973_v25 = vrot.slane %v3971_v21, 1 }
 0x795   :  { %3134 = vmatpush1.bf16.msra.mxu0 %v18658_v23  ;;  %v18723_v23 = vld [vmem:[%s24684_s23 + $0x30] ss:$8 sps:$4 sm:$0x7f]  }
 0x796   :  { %16423 = vmatprep.subr.msk.bf16.mxu0 %vm612_vm5, %v18661_v24  ;;  %v3969_v24 = vor.u32 %v3968_v20, %v3964_v19  ;;  %v18754_v20 = vld [vmem:[%s24644_s10 + $0x30] sm:$0xff]  }
 0x799   :  { %3136 = vmatpush1.bf16.msra.mxu0 %v3120_v26  ;;  %v4003_v26 = vsel %vm122_vm0, %v18723_v23, 0 }
 0x79a   :  { %3249 = vmatprep.subr.bf16.mxu0 %v18666_v27  ;;  %v3974_v27 = vsel %vm81_vm1, %v3969_v24, %v3973_v25 }
 0x79c   :  { %16424 = vmatmul.mubr.msk.bf16.vlgmr.msra.gmra.mrb[24].mxu0 %vm1065_vm8, %v20724_v7  ;;  %v18726_v7 = vld [vmem:[%s24684_s23 + $0x4] ss:$8 sps:$4 sm:$0xff]  }
 0x79d   :  { %3250 = vmatpush1.bf16.msra.mxu0 %v18664_v28  ;;  %3281 = vmatprep.mubr.bf16.mxu0 %v19767_v1  ;;  %v18724_v28 = vld [vmem:[%s24684_s23] ss:$8 sps:$4 sm:$0xff]  }
 0x79e   :  { %3251 = vmatprep.subr.bf16.mxu0 %v18669_v30  ;;  %v18727_v30 = vld [vmem:[%s24684_s23 + $0x14] ss:$8 sps:$4 sm:$0x7f]  }
 0x7a1   :  { %3252 = vmatpush1.bf16.msra.mxu0 %v18667_v31  ;;  %v18729_v31 = vld [vmem:[%s24684_s23 + $0x10] ss:$8 sps:$4 sm:$0x7f]  }
 0x7a2   :  { %3253 = vmatprep.subr.bf16.mxu0 %v18672_v32  ;;  %v3975_v32 = vshrl.u32 %v20908_v13, 16 }
 0x7a5   :  { %3254 = vmatpush1.bf16.msra.mxu0 %v18670_v33  ;;  %v4084_v33 = vsel %vm122_vm0, %v18729_v31, 0 }
 0x7a6   :  { %3255 = vmatprep.subr.bf16.mxu0 %v18675_v29  ;;  %v18732_v29 = vld [vmem:[%s24684_s23 + $0x44] ss:$8 sps:$4 sm:$0xff]  }
 0x7a9   :  { %3256 = vmatpush1.bf16.msra.mxu0 %v18673_v34  ;;  %v3977_v34 = vor.u32 %v3975_v32, %v3973_v25 }
 0x7aa   :  { %3257 = vmatprep.subr.bf16.mxu0 %v18678_v35  ;;  %v18730_v35 = vld [vmem:[%s24684_s23 + $0x40] ss:$8 sps:$4 sm:$0xff]  }
 0x7ad   :  { %3258 = vmatpush1.bf16.msra.mxu0 %v18676_v36  ;;  %v18733_v36 = vld [vmem:[%s24684_s23 + $0x54] ss:$8 sps:$4 sm:$0x7f]  }
 0x7ae   :  { %16449 = vmatprep.subr.msk.bf16.mxu0 %vm612_vm5, %v18679_v42  ;;  %v18735_v42 = vld [vmem:[%s24684_s23 + $0x50] ss:$8 sps:$4 sm:$0x7f]  }
 0x7af   :  { %v4176_v44 = vsel %vm122_vm0, %v18735_v42, 0 }
 0x7b1   :  { %3260 = vmatpush1.bf16.msra.mxu0 %v3244_v40  ;;  %v18738_v40 = vld [vmem:[%s24684_s23 + $0x64] ss:$8 sps:$4 sm:$0xff]  }
 0x7b2   :  { %3378 = vmatprep.subr.bf16.mxu0 %v18684_v43  ;;  %v4148_v43 = vrot.slane %v20897_v9, 1 }
 0x7b4   :  { %16450 = vmatmul.mubr.msk.bf16.vlgmr.msra.gmra.mrb[24].mxu0 %vm1065_vm8, %v3181_v45 }
 0x7b5   :  { %3379 = vmatpush1.bf16.msra.mxu0 %v18682_v41  ;;  %3410 = vmatprep.mubr.bf16.mxu0 %v19767_v1  ;;  %v4149_v41 = vrot.slane %v20908_v13, 1 }
 0x7b6   :  { %3380 = vmatprep.subr.bf16.mxu0 %v18687_v46  ;;  %v18736_v46 = vld [vmem:[%s24684_s23 + $0x60] ss:$8 sps:$4 sm:$0xff]  }
 0x7b7   :  { %v4150_v45 = vsel %vm122_vm0, %v4148_v43, %v4149_v41 }
 0x7b9   :  { %3381 = vmatpush1.bf16.msra.mxu0 %v18685_v47  ;;  %v18739_v47 = vld [vmem:[%s24684_s23 + $0x74] ss:$8 sps:$4 sm:$0x7f]  }
 0x7ba   :  { %3382 = vmatprep.subr.bf16.mxu0 %v18690_v48  ;;  %v18741_v48 = vld [vmem:[%s24684_s23 + $0x70] ss:$8 sps:$4 sm:$0x7f]  }
 0x7bd   :  { %3383 = vmatpush1.bf16.msra.mxu0 %v18688_v49  ;;  %v4278_v49 = vsel %vm122_vm0, %v18741_v48, 0 }
 0x7be   :  { %3384 = vmatprep.subr.bf16.mxu0 %v18693_v37  ;;  %v18744_v37 = vld [vmem:[%s24684_s23 + $0x84] ss:$8 sps:$4 sm:$0xff]  }
 0x7c1   :  { %3385 = vmatpush1.bf16.msra.mxu0 %v18691_v50  ;;  %v4246_v50 = vrot.slane %v3964_v19, 1  ;;  %v18753_v19 = vld [vmem:[%s24644_s10 + $0x28] sm:$0xff]  }
 0x7c2   :  { %3386 = vmatprep.subr.bf16.mxu0 %v18696_v38  ;;  %v4250_v38 = vrot.slane %v3971_v21, 2  ;;  %v18755_v21 = vld [vmem:[%s24644_s10 + $0x38] sm:$0xff]  }
 0x7c5   :  { %3387 = vmatpush1.bf16.msra.mxu0 %v18694_v51  ;;  %v4249_v51 = vrot.slane %v3975_v32, 1 }
 0x7c6   :  { %16475 = vmatprep.subr.msk.bf16.mxu0 %vm612_vm5, %v18697_v52  ;;  %v4247_v52 = vrot.slane %v3966_v14, 2  ;;  %v18748_v14 = vld [vmem:[%s24644_s10] sm:$0xff]  }
 0x7c8   :  { %v4248_v53 = vor.u32 %v4247_v52, %v4246_v50 }
 0x7c9   :  { %3389 = vmatpush1.bf16.msra.mxu0 %v3373_v55  ;;  %v4251_v55 = vor.u32 %v4250_v38, %v4249_v51 }
 0x7ca   :  { %3505 = vmatprep.subr.bf16.mxu0 %v18702_v57 }
 0x7cb   :  { %v4252_v57 = vsel %vm370_vm4, %v4248_v53, %v4251_v55  ;;  %v18756_v53 = vld [vmem:[%s24644_s10 + $0x40] sm:$0xff]  }
 0x7cc   :  { %16476 = vmatmul.mubr.msk.bf16.vlgmr.msra.gmra.mrb[24].mxu0 %vm1065_vm8, %v3310_v16  ;;  %v18720_v16 = vld [vmem:[%s24684_s23 + $0x24] ss:$8 sps:$4 sm:$0xff]  }
 0x7cd   :  { %3506 = vmatpush1.bf16.msra.mxu0 %v18700_v59  ;;  %3537 = vmatprep.mubr.bf16.mxu0 %v19767_v1  ;;  %v18742_v59 = vld [vmem:[%s24684_s23 + $0x80] ss:$8 sps:$4 sm:$0xff]  }
 0x7ce   :  { %3507 = vmatprep.subr.bf16.mxu0 %v18705_v60  ;;  %v18745_v60 = vld [vmem:[%s24684_s23 + $0x94] ss:$8 sps:$4 sm:$0x7f]  }
 0x7d1   :  { %3508 = vmatpush1.bf16.msra.mxu0 %v18703_v61  ;;  %v18747_v61 = vld [vmem:[%s24684_s23 + $0x90] ss:$8 sps:$4 sm:$0x7f]  }
 0x7d2   :  { %3509 = vmatprep.subr.bf16.mxu0 %v18708_v62  ;;  %v4376_v62 = vsel %vm122_vm0, %v18747_v61, 0 }
 0x7d5   :  { %3510 = vmatpush1.bf16.msra.mxu0 %v18706_v63  ;;  %v4348_v63 = vrot.slane %v20897_v9, 2 }
 0x7d6   :  { %3511 = vmatprep.subr.bf16.mxu0 %v18711_v0  ;;  %v4349_v0 = vrot.slane %v20908_v13, 2 }
 0x7d9   :  { %3512 = vmatpush1.bf16.msra.mxu0 %v18709_v2  ;;  %v4350_v2 = vsel %vm474_vm3, %v4348_v63, %v4349_v0 }
 0x7da   :  { %3513 = vmatprep.subr.bf16.mxu0 %v18714_v3 }
 0x7dd   :  { %3514 = vmatpush1.bf16.msra.mxu0 %v18712_v6 }
 0x7de   :  { %16501 = vmatprep.subr.msk.bf16.mxu0 %vm612_vm5, %v18715_v8 }
 0x7e1   :  { %3516 = vmatpush1.bf16.msra.mxu0 %v3500_v15  ;;  %v18749_v15 = vld [vmem:[%s24644_s10 + $0x8] sm:$0xff]  }
 0x7e2   :  { %4008 = vmatprep.subr.bf16.mxu0 %v18720_v16  ;;  %v18750_v16 = vld [vmem:[%s24644_s10 + $0x10] sm:$0xff]  }
 0x7e4   :  { %16502 = vmatmul.mubr.msk.bf16.vlgmr.msra.gmra.mrb[24].mxu0 %vm1065_vm8, %v3437_v22  ;;  %v4442_v22 = vld [vmem:[%s24641_s12] sm:$0x3] }
 0x7e5   :  { %4009 = vmatpush1.bf16.msra.mxu0 %v18718_v17  ;;  %4040 = vmatprep.mubr.bf16.mxu0 %v19767_v1  ;;  %v18751_v17 = vld [vmem:[%s24644_s10 + $0x18] sm:$0xff]   ;;  %v4447_v23 = vrot.slane %v4442_v22, %v20002_v56  ;;  %v4451_v24 = vrot.slane %v4442_v22, %v20007_v58  ;;  %v18771_v22 = vld [vmem:[%s24687_s4] sm:$0xff]  }
 0x7e6   :  { %16542 = vmatprep.subr.msk.bf16.mxu0 %vm122_vm0, %v18721_v18  ;;  %v18752_v18 = vld [vmem:[%s24644_s10 + $0x20] sm:$0xff]  }
 0x7e9   :  { %4011 = vmatpush1.bf16.msra.mxu0 %v4003_v26 }
 0x7ea   :  { %4089 = vmatprep.subr.bf16.mxu0 %v18726_v7 }
 0x7ec   :  { %16543 = vmatmul.mubr.msk.bf16.vlgmr.msra.gmra.mrb[28].mxu0 %vm115_vm2, %v3974_v27 }
 0x7ed   :  { %4050 = vmatprep.mubr.bf16.mxu0 %v19767_v1  ;;  %4090 = vmatpush1.bf16.msra.mxu0 %v18724_v28 }
 0x7ee   :  { %16549 = vmatprep.subr.msk.bf16.mxu0 %vm122_vm0, %v18727_v30 }
 0x7f1   :  { %4092 = vmatpush1.bf16.msra.mxu0 %v4084_v33 }
 0x7f2   :  { %4181 = vmatprep.subr.bf16.mxu0 %v18732_v29 }
 0x7f4   :  { %16544 = vmatmul.mubr.msk.bf16.gmra.mrb[32].mxu0 %vm115_vm2, %v3977_v34 }
 0x7f5   :  { %4121 = vmatprep.mubr.bf16.mxu0 %v19767_v1 }
 0x7fc   :  { %16550 = vmatmul.mubr.msk.bf16.vlgmr.msra.gmra.mrb[28].mxu0 %vm115_vm2, %v20897_v9 }
 0x7fd   :  { %4131 = vmatprep.mubr.bf16.mxu0 %v19767_v1  ;;  %4182 = vmatpush1.bf16.msra.mxu0 %v18730_v35 }
 0x7fe   :  { %16560 = vmatprep.subr.msk.bf16.mxu0 %vm122_vm0, %v18733_v36 }
 0x801   :  { %4184 = vmatpush1.bf16.msra.mxu0 %v4176_v44 }
 0x802   :  { %4283 = vmatprep.subr.bf16.mxu0 %v18738_v40 }
 0x804   :  { %16551 = vmatmul.mubr.msk.bf16.gmra.mrb[32].mxu0 %vm115_vm2, %v20908_v13  ;;  %v3605_v13 = vld [vmem:[%s24646_s9] sm:$0x7] }
 0x805   :  { %4213 = vmatprep.mubr.bf16.mxu0 %v19767_v1 }
 0x80c   :  { %16561 = vmatmul.mubr.msk.bf16.vlgmr.msra.gmra.mrb[28].mxu0 %vm115_vm2, %v4150_v45 }
 0x80d   :  { %4223 = vmatprep.mubr.bf16.mxu0 %v19767_v1  ;;  %4284 = vmatpush1.bf16.msra.mxu0 %v18736_v46 }
 0x80e   :  { %16571 = vmatprep.subr.msk.bf16.mxu0 %vm122_vm0, %v18739_v47 }
 0x811   :  { %4286 = vmatpush1.bf16.msra.mxu0 %v4278_v49 }
 0x812   :  { %4381 = vmatprep.subr.bf16.mxu0 %v18744_v37 }
 0x814   :  { %16562 = vmatmul.mubr.msk.bf16.gmra.mrb[32].mxu0 %vm115_vm2, %v4149_v41 }
 0x815   :  { %4315 = vmatprep.mubr.bf16.mxu0 %v19767_v1 }
 0x81c   :  { %16572 = vmatmul.mubr.msk.bf16.vlgmr.msra.gmra.mrb[28].mxu0 %vm115_vm2, %v4252_v57  ;;  %v18758_v57 = vld [vmem:[%s24644_s10 + $0x50] sm:$0xff]  }
 0x81d   :  { %4325 = vmatprep.mubr.bf16.mxu0 %v19767_v1  ;;  %4382 = vmatpush1.bf16.msra.mxu0 %v18742_v59 }
 0x81e   :  { %16582 = vmatprep.subr.msk.bf16.mxu0 %vm122_vm0, %v18745_v60 }
 0x821   :  { %4384 = vmatpush1.bf16.msra.mxu0 %v4376_v62 }
 0x822   :  { %4800 = vmatprep.subr.bf16.mxu0 %v19767_v1 }
 0x824   :  { %16573 = vmatmul.mubr.msk.bf16.gmra.mrb[32].mxu0 %vm115_vm2, %v4251_v55  ;;  %v18757_v55 = vld [vmem:[%s24644_s10 + $0x48] sm:$0xff]  }
 0x825   :  { %4413 = vmatprep.mubr.bf16.mxu0 %v19767_v1 }
 0x82c   :  { %16583 = vmatmul.mubr.msk.bf16.vlgmr.msra.gmra.mrb[28].mxu0 %vm115_vm2, %v4350_v2 }
 0x82d   :  { %4423 = vmatprep.mubr.bf16.mxu0 %v19767_v1 }
 0x834   :  { %16584 = vmatmul.mubr.msk.bf16.gmra.mrb[32].mxu0 %vm115_vm2, %v4349_v0 }
 0x8b7   :  { %v3539_v3 = vpop.f32.mrb[24].mxu0 }
 0x8b8   :  { %v3541_v4 = vpop.f32.mrb[25].mxu0 }
 0x8b9   :  { %v3543_v5 = vpop.f32.mrb[26].mxu0 }
 0x8ba   :  { %v3552_v6 = vpack.c.bf16 %v3543_v5, %v3539_v3  ;;  %v3545_v8 = vpop.f32.mrb[27].mxu0 }
 0x8bb   :  { %v3553_v10 = vpack.c.bf16 %v3545_v8, %v3541_v4  ;;  %v18759_v8 = vld [vmem:[%s24647_s11] sm:$0xff]  }
 0x8bc   :  { %v3559_v9 = vand.u32 %v3552_v6, %v20345_v39 }
 0x8bd   :  { %v3562_v11 = vand.u32 %v3553_v10, %v20345_v39 }
 0x8bf   :  { %3564 = vmatprep.subr.bf16.mxu1 %v3562_v11 }
 0x8c0   :  { %3565 = vmatpush1.bf16.msra.mxu1 %v3559_v9 }
 0x8c1   :  { %3609 = vmatprep.subr.bf16.mxu1 %v3562_v11  ;;  %v18760_v11 = vld [vmem:[%s24647_s11 + $0x8] sm:$0xff]  }
 0x8c3   :  { %16503 = vmatmul.mubr.msk.bf16.vlgmr.msra.gmra.mrb[44].mxu1 %vm24674_vm9, %v3554_v12  ;;  %v18762_v12 = vld [vmem:[%s24647_s11 + $0x18] sm:$0xff]  }
 0x8c4   :  { %3610 = vmatpush1.bf16.msra.mxu1 %v3559_v9  ;;  %3641 = vmatprep.mubr.bf16.mxu1 %v19767_v1  ;;  %v18761_v9 = vld [vmem:[%s24647_s11 + $0x10] sm:$0xff]  }
 0x8c5   :  { %3745 = vmatprep.subr.bf16.mxu1 %v19767_v1 }
 0x8cb   :  { %16504 = vmatmul.mubr.msk.bf16.vlgmr.msra.gmra.mrb[48].mxu1 %vm24674_vm9, %v3605_v13  ;;  %v18763_v13 = vld [vmem:[%s24647_s11 + $0x20] sm:$0xff]  }
 0x8cc   :  { %3746 = vmatpush1.bf16.msra.mxu1 %v18748_v14  ;;  %v18764_v14 = vld [vmem:[%s24647_s11 + $0x28] sm:$0xff]  }
 0x8cd   :  { %3747 = vmatprep.subr.bf16.mxu1 %v19767_v1 }
 0x8d0   :  { %3748 = vmatpush1.bf16.msra.mxu1 %v18749_v15  ;;  %v18765_v15 = vld [vmem:[%s24647_s11 + $0x30] sm:$0xff]  }
 0x8d1   :  { %3749 = vmatprep.subr.bf16.mxu1 %v19767_v1 }
 0x8d4   :  { %3750 = vmatpush1.bf16.msra.mxu1 %v18750_v16  ;;  %v18766_v16 = vld [vmem:[%s24647_s11 + $0x38] sm:$0xff]  }
 0x8d5   :  { %3751 = vmatprep.subr.bf16.mxu1 %v19767_v1 }
 0x8d8   :  { %3752 = vmatpush1.bf16.msra.mxu1 %v18751_v17  ;;  %v18767_v17 = vld [vmem:[%s24647_s11 + $0x40] sm:$0xff]  }
 0x8d9   :  { %3753 = vmatprep.subr.bf16.mxu1 %v19767_v1 }
 0x8dc   :  { %3754 = vmatpush1.bf16.msra.mxu1 %v18752_v18  ;;  %v18768_v18 = vld [vmem:[%s24647_s11 + $0x48] sm:$0xff]  }
 0x8dd   :  { %3755 = vmatprep.subr.bf16.mxu1 %v19767_v1 }
 0x8e0   :  { %3756 = vmatpush1.bf16.msra.mxu1 %v18753_v19  ;;  %v18769_v19 = vld [vmem:[%s24647_s11 + $0x50] sm:$0xff]  }
 0x8e1   :  { %3757 = vmatprep.subr.bf16.mxu1 %v19767_v1 }
 0x8e4   :  { %3758 = vmatpush1.bf16.msra.mxu1 %v18754_v20 }
 0x8e5   :  { %3759 = vmatprep.subr.bf16.mxu1 %v19767_v1 }
 0x8e8   :  { %3760 = vmatpush1.bf16.msra.mxu1 %v18755_v21  ;;  %v18770_v21 = vld [vmem:[%s24686_s0] sm:$0xff]  }
 0x8e9   :  { %3761 = vmatprep.subr.bf16.mxu1 %v19767_v1 }
 0x8ec   :  { %3762 = vmatpush1.bf16.msra.mxu1 %v18756_v53 }
 0x8ed   :  { %3763 = vmatprep.subr.bf16.mxu1 %v19767_v1 }
 0x8f0   :  { %3764 = vmatpush1.bf16.msra.mxu1 %v18757_v55 }
 0x8f1   :  { %3765 = vmatprep.subr.bf16.mxu1 %v19767_v1 }
 0x8f4   :  { %3766 = vmatpush1.bf16.msra.mxu1 %v18758_v57 }
 0x8f5   :  { %3873 = vmatprep.subr.bf16.mxu1 %v19767_v1 }
 0x8ff   :  { %v4415_v25 = vpop.f32.mrb[28].mxu0 }
 0x900   :  { %v4454_v26 = vadd.f32 %v4447_v23, %v4415_v25  ;;  %v4417_v7 = vpop.f32.mrb[29].mxu0  ;;  %v18774_v25 = vld [vmem:[%s24688_s26 + $0x8] sm:$0xff]  }
 0x901   :  { %v4455_v27 = vadd.f32 %v4451_v24, %v4417_v7  ;;  %v4419_v28 = vpop.f32.mrb[30].mxu0  ;;  %v18776_v7 = vld [vmem:[%s24688_s26 + $0x10] sm:$0xff]  }
 0x902   :  { %v4462_v30 = vmax.f32 %v4454_v26, 0.0  ;;  %v4456_v31 = vadd.f32 %v4447_v23, %v4419_v28  ;;  %v4421_v32 = vpop.f32.mrb[31].mxu0  ;;  %v18775_v26 = vld [vmem:[%s24642_s7 + $0x8] sm:$0xff]   ;;  %v18778_v28 = vld [vmem:[%s24688_s26 + $0x18] sm:$0xff]  }
 0x903   :  { %v4463_v33 = vmax.f32 %v4455_v27, 0.0  ;;  %v4457_v29 = vadd.f32 %v4451_v24, %v4421_v32  ;;  %v18777_v27 = vld [vmem:[%s24642_s7 + $0x10] sm:$0xff]   ;;  %v18781_v32 = vld [vmem:[%s24642_s7 + $0x20] sm:$0xff]  }
 0x904   :  { %v4464_v34 = vmax.f32 %v4456_v31, 0.0  ;;  %v18780_v31 = vld [vmem:[%s24688_s26 + $0x20] sm:$0xff]  }
 0x905   :  { %v4465_v35 = vmax.f32 %v4457_v29, 0.0  ;;  %v18783_v29 = vld [vmem:[%s24642_s7 + $0x28] sm:$0xff]  }
 0x906   :  { %v21072_v36 = vpack.c.bf16 %v4464_v34, %v4462_v30  ;;  %v18779_v30 = vld [vmem:[%s24642_s7 + $0x18] sm:$0xff]   ;;  %v18784_v34 = vld [vmem:[%s24688_s26 + $0x30] sm:$0xff]  }
 0x907   :  { %v21074_v42 = vpack.c.bf16 %v4465_v35, %v4463_v33  ;;  %v4425_v44 = vpop.f32.mrb[32].mxu0  ;;  %v18782_v33 = vld [vmem:[%s24688_s26 + $0x28] sm:$0xff]   ;;  %v18785_v35 = vld [vmem:[%s24642_s7 + $0x30] sm:$0xff]  }
 0x908   :  { %v4458_v40 = vadd.f32 %v4447_v23, %v4425_v44  ;;  %v4427_v43 = vpop.f32.mrb[33].mxu0  ;;  %v18788_v44 = vld [vmem:[%s24688_s26 + $0x40] sm:$0xff]  }
 0x909   :  { %v4459_v41 = vadd.f32 %v4451_v24, %v4427_v43  ;;  %v4429_v45 = vpop.f32.mrb[34].mxu0  ;;  %v18790_v43 = vld [vmem:[%s24688_s26 + $0x48] sm:$0x3f]  }
 0x90a   :  { %v4466_v46 = vmax.f32 %v4458_v40, 0.0  ;;  %v4460_v47 = vadd.f32 %v4447_v23, %v4429_v45  ;;  %v4431_v48 = vpop.f32.mrb[35].mxu0  ;;  %v18772_v23 = vld [vmem:[%s24688_s26] sm:$0xff]   ;;  %v4675_v45 = vsel %vm474_vm3, %v18790_v43, 0 }
 0x90b   :  { %v4467_v49 = vmax.f32 %v4459_v41, 0.0  ;;  %v4461_v37 = vadd.f32 %v4451_v24, %v4431_v48  ;;  %v18773_v24 = vld [vmem:[%s24642_s7] sm:$0xff]   ;;  %v18791_v41 = vld [vmem:[%s24642_s7 + $0x48] sm:$0x3f]  }
 0x90c   :  { %v4468_v50 = vmax.f32 %v4460_v47, 0.0  ;;  %4801 = vmatpush1.bf16.msra.mxu0 %v18773_v24  ;;  %v18789_v40 = vld [vmem:[%s24642_s7 + $0x40] sm:$0xff]  }
 0x90d   :  { %v4469_v38 = vmax.f32 %v4461_v37, 0.0  ;;  %4802 = vmatprep.subr.bf16.mxu0 %v19767_v1  ;;  %v18806_v24 = vld [vmem:[%s24643_s3 + $0xa4] ss:$8 sps:$4 sm:$0xff]  }
 0x90e   :  { %v21076_v51 = vpack.c.bf16 %v4468_v50, %v4466_v46  ;;  %v4798_v46 = vsel %vm474_vm3, %v18791_v41, 0 }
 0x90f   :  { %v21078_v52 = vpack.c.bf16 %v4469_v38, %v4467_v49  ;;  %v16529_v38 = vld [vmem:[%s24648_s13] ss:$0 sm:$0xff] }
 0x910   :  { %v4485_v20 = vsel %vm612_vm5, %v21076_v51, 0  ;;  %4803 = vmatpush1.bf16.msra.mxu0 %v18775_v26  ;;  %v18807_v26 = vld [vmem:[%s24643_s3 + $0xb4] ss:$8 sps:$4 sm:$0x1f]  }
 0x911   :  { %4804 = vmatprep.subr.bf16.mxu0 %v19767_v1 }
 0x914   :  { %4805 = vmatpush1.bf16.msra.mxu0 %v18777_v27  ;;  %v18812_v27 = vld [vmem:[%s24643_s3 + $0x4] ss:$8 sps:$4 sm:$0xff]  }
 0x915   :  { %4806 = vmatprep.subr.bf16.mxu0 %v19767_v1 }
 0x918   :  { %4807 = vmatpush1.bf16.msra.mxu0 %v18779_v30 }
 0x919   :  { %4808 = vmatprep.subr.bf16.mxu0 %v19767_v1 }
 0x91c   :  { %4809 = vmatpush1.bf16.msra.mxu0 %v18781_v32 }
 0x91d   :  { %4810 = vmatprep.subr.bf16.mxu0 %v19767_v1 }
 0x920   :  { %4811 = vmatpush1.bf16.msra.mxu0 %v18783_v29 }
 0x921   :  { %4812 = vmatprep.subr.bf16.mxu0 %v19767_v1 }
 0x924   :  { %4813 = vmatpush1.bf16.msra.mxu0 %v18785_v35 }
 0x925   :  { %4814 = vmatprep.subr.bf16.mxu0 %v19767_v1 }
 0x996   :  { %v3598_v59 = vpop.f32.mrb[44].mxu1 }
 0x997   :  { %v3600_v60 = vpop.f32.mrb[45].mxu1 }
 0x998   :  { %v3602_v61 = vpop.f32.mrb[46].mxu1 }
 0x999   :  { %v3603_v62 = vpop.f32.mrb[47].mxu1 }
 0x99e   :  { %v3643_v63 = vpop.f32.mrb[48].mxu1 }
 0x99f   :  { %v3650_v0 = vmax.f32 %v3598_v59, %v3643_v63  ;;  %v3645_v2 = vpop.f32.mrb[49].mxu1  ;;  %v18794_v59 = vld [vmem:[%s24643_s3 + $0x64] ss:$8 sps:$4 sm:$0xff]  }
 0x9a0   :  { %v3651_v3 = vmax.f32 %v3600_v60, %v3645_v2  ;;  %v3647_v4 = vpop.f32.mrb[50].mxu1 }
 0x9a1   :  { %v3648_v5 = vpop.f32.mrb[51].mxu1  ;;  %v3652_v10 = vpack.c.bf16 %v3650_v0, %v3650_v0 }
 0x9a2   :  { %v3653_v6 = vpack.c.bf16 %v3651_v3, %v3651_v3 }
 0x9a4   :  { %16516 = vmatprep.mubr.msk.bf16.mxu1 %vm24673_vm10, %v3653_v6 }
 0x9a5   :  { %3778 = vmatmul.mubr.bf16.vlgmr.msra.gmra.mrb[52].mxu1 %v3652_v10 }
 0x9a6   :  { %3874 = vmatpush1.bf16.msra.mxu1 %v18759_v8  ;;  %16528 = vmatprep.mubr.msk.bf16.mxu1 %vm24673_vm10, %v3653_v6  ;;  %vm24689_vm10 = vcmask 211968  }
 0x9a7   :  { %3875 = vmatprep.subr.bf16.mxu1 %v19767_v1  ;;  %vm24690_vm9 = vmmov %vm24689_vm10 }
 0x9aa   :  { %3876 = vmatpush1.bf16.msra.mxu1 %v18760_v11 }
 0x9ab   :  { %3877 = vmatprep.subr.bf16.mxu1 %v19767_v1 }
 0x9ae   :  { %3878 = vmatpush1.bf16.msra.mxu1 %v18761_v9 }
 0x9af   :  { %3879 = vmatprep.subr.bf16.mxu1 %v19767_v1 }
 0x9b2   :  { %3880 = vmatpush1.bf16.msra.mxu1 %v18762_v12 }
 0x9b3   :  { %3881 = vmatprep.subr.bf16.mxu1 %v19767_v1 }
 0x9b6   :  { %3882 = vmatpush1.bf16.msra.mxu1 %v18763_v13 }
 0x9b7   :  { %3883 = vmatprep.subr.bf16.mxu1 %v19767_v1 }
 0x9ba   :  { %3884 = vmatpush1.bf16.msra.mxu1 %v18764_v14 }
 0x9bb   :  { %3885 = vmatprep.subr.bf16.mxu1 %v19767_v1 }
 0x9be   :  { %3886 = vmatpush1.bf16.msra.mxu1 %v18765_v15 }
 0x9bf   :  { %3887 = vmatprep.subr.bf16.mxu1 %v19767_v1 }
 0x9c2   :  { %3888 = vmatpush1.bf16.msra.mxu1 %v18766_v16 }
 0x9c3   :  { %3889 = vmatprep.subr.bf16.mxu1 %v19767_v1 }
 0x9c6   :  { %3890 = vmatpush1.bf16.msra.mxu1 %v18767_v17  ;;  %v18792_v17 = vld [vmem:[%s24643_s3 + $0x60] ss:$8 sps:$4 sm:$0xff]  }
 0x9c7   :  { %3891 = vmatprep.subr.bf16.mxu1 %v19767_v1 }
 0x9ca   :  { %3892 = vmatpush1.bf16.msra.mxu1 %v18768_v18  ;;  %v18797_v18 = vld [vmem:[%s24643_s3 + $0x74] ss:$8 sps:$4 sm:$0xff]  }
 0x9cb   :  { %3893 = vmatprep.subr.bf16.mxu1 %v19767_v1 }
 0x9ce   :  { %3894 = vmatpush1.bf16.msra.mxu1 %v18769_v19  ;;  %v18795_v19 = vld [vmem:[%s24643_s3 + $0x70] ss:$8 sps:$4 sm:$0xff]  }
 0x9cf   :  { %4490 = vmatprep.subr.bf16.mxu1 %v21074_v42 }
 0x9d1   :  { %3906 = vmatmul.mubr.bf16.vlgmr.msra.gmra.mrb[56].mxu1 %v3652_v10 }
 0x9d2   :  { %4491 = vmatpush1.bf16.msra.mxu1 %v21072_v36  ;;  %4522 = vmatprep.mubr.bf16.mxu1 %v19767_v1 }
 0x9d3   :  { %16586 = vmatprep.subr.msk.bf16.mxu1 %vm612_vm5, %v21078_v52 }
 0x9d6   :  { %4493 = vmatpush1.bf16.msra.mxu1 %v4485_v20 }
 0x9d7   :  { %4543 = vmatprep.subr.bf16.mxu1 %v21074_v42  ;;  %v18787_v42 = vld [vmem:[%s24642_s7 + $0x38] sm:$0xff]  }
 0x9d8   :  { %4815 = vmatpush1.bf16.msra.mxu0 %v18787_v42 }
 0x9d9   :  { %16587 = vmatmul.mubr.msk.bf16.vlgmr.msra.gmra.mrb[60].mxu1 %vm24689_vm10, %v18770_v21  ;;  %4816 = vmatprep.subr.bf16.mxu0 %v19767_v1  ;;  %vm24696_vm10 = vcmask 228352   ;;  %v18798_v21 = vld [vmem:[%s24643_s3 + $0x80] ss:$8 sps:$4 sm:$0xff]  }
 0x9da   :  { %4544 = vmatpush1.bf16.msra.mxu1 %v21072_v36  ;;  %4575 = vmatprep.mubr.bf16.mxu1 %v19767_v1  ;;  %v18786_v36 = vld [vmem:[%s24688_s26 + $0x38] sm:$0xff]  }
 0x9db   :  { %16589 = vmatprep.subr.msk.bf16.mxu1 %vm612_vm5, %v21078_v52 }
 0x9dc   :  { %4817 = vmatpush1.bf16.msra.mxu0 %v18789_v40 }
 0x9dd   :  { %4818 = vmatprep.subr.bf16.mxu0 %v19767_v1 }
 0x9de   :  { %4546 = vmatpush1.bf16.msra.mxu1 %v4485_v20  ;;  %v18800_v20 = vld [vmem:[%s24643_s3 + $0x84] ss:$8 sps:$4 sm:$0xff]  }
 0x9df   :  { %4677 = vmatprep.subr.bf16.mxu1 %v19767_v1 }
 0x9e0   :  { %4819 = vmatpush1.bf16.msra.mxu0 %v4798_v46 }
 0x9e1   :  { %16590 = vmatmul.mubr.msk.bf16.vlgmr.msra.gmra.mrb[64].mxu1 %vm24690_vm9, %v18771_v22  ;;  %vm24691_vm9 = vcmask 647168   ;;  %v18803_v22 = vld [vmem:[%s24643_s3 + $0x94] ss:$8 sps:$4 sm:$0xff]  }
 0x9e2   :  { %4678 = vmatpush1.bf16.msra.mxu1 %v18772_v23  ;;  %v18801_v23 = vld [vmem:[%s24643_s3 + $0x90] ss:$8 sps:$4 sm:$0xff]  }
 0x9e3   :  { %4679 = vmatprep.subr.bf16.mxu1 %v19767_v1 }
 0x9e6   :  { %4680 = vmatpush1.bf16.msra.mxu1 %v18774_v25  ;;  %v18804_v25 = vld [vmem:[%s24643_s3 + $0xa0] ss:$8 sps:$4 sm:$0xff]  }
 0x9e7   :  { %4681 = vmatprep.subr.bf16.mxu1 %v19767_v1 }
 0x9ea   :  { %4682 = vmatpush1.bf16.msra.mxu1 %v18776_v7  ;;  %v18809_v7 = vld [vmem:[%s24643_s3 + $0xb0] ss:$8 sps:$4 sm:$0x1f]  }
 0x9eb   :  { %4683 = vmatprep.subr.bf16.mxu1 %v19767_v1 }
 0x9ee   :  { %4684 = vmatpush1.bf16.msra.mxu1 %v18778_v28  ;;  %v4937_v28 = vsel %vm612_vm5, %v18809_v7, 0  ;;  %v18860_v7 = vld [vmem:[%s24643_s3 + $0x164] ss:$8 sps:$4 sm:$0xff]  }
 0x9ef   :  { %4685 = vmatprep.subr.bf16.mxu1 %v19767_v1 }
 0x9f2   :  { %4686 = vmatpush1.bf16.msra.mxu1 %v18780_v31 }
 0x9f3   :  { %4687 = vmatprep.subr.bf16.mxu1 %v19767_v1 }
 0x9f6   :  { %4688 = vmatpush1.bf16.msra.mxu1 %v18782_v33 }
 0x9f7   :  { %4689 = vmatprep.subr.bf16.mxu1 %v19767_v1 }
 0x9fa   :  { %4690 = vmatpush1.bf16.msra.mxu1 %v18784_v34 }
 0x9fb   :  { %4691 = vmatprep.subr.bf16.mxu1 %v19767_v1 }
 0x9fe   :  { %4692 = vmatpush1.bf16.msra.mxu1 %v18786_v36 }
 0x9ff   :  { %4693 = vmatprep.subr.bf16.mxu1 %v19767_v1 }
 0xa02   :  { %4694 = vmatpush1.bf16.msra.mxu1 %v18788_v44 }
 0xa03   :  { %4695 = vmatprep.subr.bf16.mxu1 %v19767_v1 }
 0xa06   :  { %4696 = vmatpush1.bf16.msra.mxu1 %v4675_v45 }
 0xa07   :  { %4942 = vmatprep.subr.bf16.mxu1 %v18794_v59  ;;  %v18816_v59 = vld [vmem:[%s24643_s3 + $0x20] ss:$8 sps:$4 sm:$0xff]  }
 0xa78   :  { %v3779_v47 = vpop.f32.mrb[52].mxu1 }
 0xa79   :  { %v3781_v48 = vpop.f32.mrb[53].mxu1 }
 0xa7a   :  { %v3782_v49 = vpop.f32.mrb[54].mxu1 }
 0xa7b   :  { %v3783_v37 = vpop.f32.mrb[55].mxu1 }
 0xaa4   :  { %v3907_v50 = vpop.f32.mrb[56].mxu1 }
 0xaa5   :  { %v3913_v51 = vmax.f32 %v3779_v47, %v3907_v50  ;;  %v3909_v52 = vpop.f32.mrb[57].mxu1 }
 0xaa6   :  { %v3910_v53 = vpop.f32.mrb[58].mxu1  ;;  %v18815_v52 = vld [vmem:[%s24643_s3 + $0x14] ss:$8 sps:$4 sm:$0xff]  }
 0xaa7   :  { %v3921_v55 = vadd.f32 %v16529_v38, %v3913_v51  ;;  %v3911_v57 = vpop.f32.mrb[59].mxu1  ;;  %v18810_v38 = vld [vmem:[%s24643_s3] ss:$8 sps:$4 sm:$0xff]  }
 0xaa8   :  { %v18818_v57 = vld [vmem:[%s24643_s3 + $0x24] ss:$8 sps:$4 sm:$0xff]  }
 0xaa9   :  { %v3922_v60 = vmax.f32 %v3921_v55, 0.0  ;;  %v18813_v55 = vld [vmem:[%s24643_s3 + $0x10] ss:$8 sps:$4 sm:$0xff]  }
 0xaab   :  { %3923 = vst.msk [vmem:[#allocation2 + $0x1] sm:$0x1] %vm24691_vm9, %v3922_v60  ;;  %v3931_v61 = vrot.slane %v3922_v60, 2  ;;  %v3925_v62 = vrot.slane %v3922_v60, 1  ;;  %v3936_v4 = vrot.slane %v3922_v60, 3  ;;  %v3942_v5 = vrot.slane %v3922_v60, 4  ;;  %vm24697_vm9 = vmmov %vm24696_vm10 }
 0xaac   :  { %v4524_v63 = vpop.f32.mrb[60].mxu1  ;;  %v18821_v60 = vld [vmem:[%s24643_s3 + $0x34] ss:$8 sps:$4 sm:$0xff]  }
 0xaad   :  { %3932 = vrot.lane.b32.xlu1 %v3931_v61, %s24692_s5  ;;  %3926 = vrot.lane.b32.xlu0 %v3925_v62, %s24693_s6  ;;  %v4526_v0 = vpop.f32.mrb[61].mxu1  ;;  %v18819_v61 = vld [vmem:[%s24643_s3 + $0x30] ss:$8 sps:$4 sm:$0xff]   ;;  %v18824_v62 = vld [vmem:[%s24643_s3 + $0x44] ss:$8 sps:$4 sm:$0xff]  }
 0xaae   :  { %v4528_v2 = vpop.f32.mrb[62].mxu1 }
 0xaaf   :  { %v4530_v3 = vpop.f32.mrb[63].mxu1 }
 0xab1   :  { %3937 = vrot.lane.b32.xlu1 %v3936_v4, %s24694_s30  ;;  %v18830_v4 = vld [vmem:[%s24643_s3 + $0xc4] ss:$8 sps:$4 sm:$0xff]  }
 0xab4   :  { %v4577_v6 = vpop.f32.mrb[64].mxu1 }
 0xab5   :  { %v4586_v8 = vmax.f32 %v4524_v63, %v4577_v6  ;;  %3943 = vrot.lane.b32.xlu1 %v3942_v5, %s24695_s27  ;;  %v4579_v10 = vpop.f32.mrb[65].mxu1  ;;  %v18822_v63 = vld [vmem:[%s24643_s3 + $0x40] ss:$8 sps:$4 sm:$0xff]   ;;  %v18833_v6 = vld [vmem:[%s24643_s3 + $0xd4] ss:$8 sps:$4 sm:$0xff]  }
 0xab6   :  { %v4587_v11 = vmax.f32 %v4526_v0, %v4579_v10  ;;  %v4581_v9 = vpop.f32.mrb[66].mxu1  ;;  %v18825_v0 = vld [vmem:[%s24643_s3 + $0x54] ss:$8 sps:$4 sm:$0x1f]   ;;  %v18828_v5 = vld [vmem:[%s24643_s3 + $0xc0] ss:$8 sps:$4 sm:$0xff]  }
 0xab7   :  { %v4588_v12 = vmax.f32 %v4528_v2, %v4581_v9  ;;  %v4583_v13 = vpop.f32.mrb[67].mxu1  ;;  %v18827_v2 = vld [vmem:[%s24643_s3 + $0x50] ss:$8 sps:$4 sm:$0x1f]   ;;  %v18836_v10 = vld [vmem:[%s24643_s3 + $0xe4] ss:$8 sps:$4 sm:$0xff]  }
 0xab8   :  { %v4589_v14 = vmax.f32 %v4530_v3, %v4583_v13  ;;  %v5046_v3 = vsel %vm612_vm5, %v18827_v2, 0  ;;  %v18839_v9 = vld [vmem:[%s24643_s3 + $0xf4] ss:$8 sps:$4 sm:$0xff]   ;;  %v18842_v13 = vld [vmem:[%s24643_s3 + $0x104] ss:$8 sps:$4 sm:$0xff]  }
 0xab9   :  { %v4590_v15 = vpack.c.bf16 %v4588_v12, %v4586_v8  ;;  %v18831_v8 = vld [vmem:[%s24643_s3 + $0xd0] ss:$8 sps:$4 sm:$0xff]  }
 0xaba   :  { %v4591_v16 = vpack.c.bf16 %v4589_v14, %v4587_v11  ;;  %v18834_v11 = vld [vmem:[%s24643_s3 + $0xe0] ss:$8 sps:$4 sm:$0xff]   ;;  %v18837_v12 = vld [vmem:[%s24643_s3 + $0xf0] ss:$8 sps:$4 sm:$0xff]  }
 0xabb   :  { %v18840_v14 = vld [vmem:[%s24643_s3 + $0x100] ss:$8 sps:$4 sm:$0xff]  }
 0xabc   :  { %16601 = vmatprep.mubr.msk.bf16.mxu1 %vm24696_vm10, %v4591_v16  ;;  %16612 = vmatprep.mubr.msk.bf16.mxu0 %vm24697_vm9, %v4591_v16  ;;  %v18845_v16 = vld [vmem:[%s24643_s3 + $0x110] ss:$8 sps:$4 sm:$0x1f]   ;;  %vm24698_vm10 = vcmask 89088  }
 0xabd   :  { %4710 = vmatmul.mubr.bf16.vlgmr.msra.gmra.mrb[68].mxu1 %v4590_v15  ;;  %4833 = vmatmul.mubr.bf16.vlgmr.msra.gmra.mrb[36].mxu0 %v4590_v15  ;;  %v18843_v15 = vld [vmem:[%s24643_s3 + $0x114] ss:$8 sps:$4 sm:$0x1f]   ;;  %vm24699_vm9 = vmmov %vm24698_vm10 }
 0xabe   :  { %4943 = vmatpush1.bf16.msra.mxu1 %v18792_v17  ;;  %4974 = vmatprep.mubr.bf16.mxu1 %v19767_v1  ;;  %v5170_v17 = vsel %vm612_vm5, %v18845_v16, 0 }
 0xabf   :  { %4944 = vmatprep.subr.bf16.mxu1 %v18797_v18  ;;  %5522 = vmatprep.mubr.bf16.mxu0 %v19767_v1  ;;  %v18848_v18 = vld [vmem:[%s24643_s3 + $0x124] ss:$8 sps:$4 sm:$0xff]  }
 0xac2   :  { %4945 = vmatpush1.bf16.msra.mxu1 %v18795_v19  ;;  %v18846_v19 = vld [vmem:[%s24643_s3 + $0x120] ss:$8 sps:$4 sm:$0xff]  }
 0xac3   :  { %4946 = vmatprep.subr.bf16.mxu1 %v18800_v20 }
 0xac6   :  { %4947 = vmatpush1.bf16.msra.mxu1 %v18798_v21  ;;  %v18851_v21 = vld [vmem:[%s24643_s3 + $0x134] ss:$8 sps:$4 sm:$0xff]  }
 0xac7   :  { %4948 = vmatprep.subr.bf16.mxu1 %v18803_v22  ;;  %v18849_v22 = vld [vmem:[%s24643_s3 + $0x130] ss:$8 sps:$4 sm:$0xff]  }
 0xaca   :  { %4949 = vmatpush1.bf16.msra.mxu1 %v18801_v23  ;;  %v18854_v23 = vld [vmem:[%s24643_s3 + $0x144] ss:$8 sps:$4 sm:$0xff]  }
 0xacb   :  { %4950 = vmatprep.subr.bf16.mxu1 %v18806_v24  ;;  %v18852_v24 = vld [vmem:[%s24643_s3 + $0x140] ss:$8 sps:$4 sm:$0xff]  }
 0xace   :  { %4951 = vmatpush1.bf16.msra.mxu1 %v18804_v25  ;;  %v18857_v25 = vld [vmem:[%s24643_s3 + $0x154] ss:$8 sps:$4 sm:$0xff]  }
 0xacf   :  { %16637 = vmatprep.subr.msk.bf16.mxu1 %vm612_vm5, %v18807_v26  ;;  %v18855_v26 = vld [vmem:[%s24643_s3 + $0x150] ss:$8 sps:$4 sm:$0xff]  }
 0xad2   :  { %4953 = vmatpush1.bf16.msra.mxu1 %v4937_v28  ;;  %v18861_v28 = vld [vmem:[%s24643_s3 + $0x174] ss:$8 sps:$4 sm:$0x1f]  }
 0xad3   :  { %5051 = vmatprep.subr.bf16.mxu1 %v18812_v27  ;;  %v18858_v27 = vld [vmem:[%s24643_s3 + $0x160] ss:$8 sps:$4 sm:$0xff]  }
 0xb1f   :  { %v3933_v30 = vpop.permute.xlu1 %3932  ;;  %v3927_v31 = vpop.permute.xlu0 %3926 }
 0xb20   :  { %3929 = vst.msk [vmem:[#allocation2 + $0x1] sm:$0x1] %vm1996_vm12, %v3927_v31 }
 0xb21   :  { %3930 = vst.msk [vmem:[#allocation2 + $0x9] sm:$0x1] %vm1998_vm13, %v3927_v31 }
 0xb22   :  { %3935 = vst.msk [vmem:[#allocation2 + $0x9] sm:$0x1] %vm2004_vm14, %v3933_v30  ;;  %v18863_v30 = vld [vmem:[%s24643_s3 + $0x170] ss:$8 sps:$4 sm:$0x1f]  }
 0xb23   :  { %v3938_v32 = vpop.permute.xlu1 %3937  ;;  %v5299_v31 = vsel %vm612_vm5, %v18863_v30, 0 }
 0xb24   :  { %3940 = vst.msk [vmem:[#allocation2 + $0x9] sm:$0x1] %vm2010_vm15, %v3938_v32 }
 0xb25   :  { %3941 = vst.msk [vmem:[#allocation2 + $0x11] sm:$0x1] %vm2012_vm7, %v3938_v32  ;;  %v18866_v32 = vld [vmem:[%s24643_s3 + $0x184] ss:$8 sps:$4 sm:$0xff]  }
 0xb27   :  { %v3944_v33 = vpop.permute.xlu1 %3943 }
 0xb28   :  { %3946 = vst.msk [vmem:[#allocation2 + $0x11] sm:$0x1] %vm2018_vm11, %v3944_v33 }
 0xb29   :  { %3947 = vst.msk [vmem:[#allocation2 + $0x19] sm:$0x1] %vm2020_vm6, %v3944_v33  ;;  %v18864_v33 = vld [vmem:[%s24643_s3 + $0x180] ss:$8 sps:$4 sm:$0xff]  }
 0xb90   :  { %v4711_v29 = vpop.f32.mrb[68].mxu1  ;;  %v4834_v34 = vpop.f32.mrb[36].mxu0 }
 0xb91   :  { %v4841_v35 = vmax.f32 %v4711_v29, %v4834_v34  ;;  %v4713_v36 = vpop.f32.mrb[69].mxu1  ;;  %v4836_v42 = vpop.f32.mrb[37].mxu0  ;;  %v18869_v29 = vld [vmem:[%s24643_s3 + $0x194] ss:$8 sps:$4 sm:$0xff]   ;;  %v18867_v34 = vld [vmem:[%s24643_s3 + $0x190] ss:$8 sps:$4 sm:$0xff]  }
 0xb92   :  { %v4714_v44 = vpop.f32.mrb[70].mxu1  ;;  %v4837_v40 = vpop.f32.mrb[38].mxu0  ;;  %v18870_v36 = vld [vmem:[%s24643_s3 + $0x1a0] ss:$8 sps:$4 sm:$0xff]   ;;  %v18875_v42 = vld [vmem:[%s24643_s3 + $0x1b4] ss:$8 sps:$4 sm:$0xff]  }
 0xb93   :  { %v4842_v43 = vmax.f32 %v4714_v44, %v4837_v40  ;;  %v4716_v41 = vpop.f32.mrb[71].mxu1  ;;  %v4839_v45 = vpop.f32.mrb[39].mxu0  ;;  %v18873_v44 = vld [vmem:[%s24643_s3 + $0x1b0] ss:$8 sps:$4 sm:$0xff]   ;;  %v18878_v40 = vld [vmem:[%s24643_s3 + $0x1c4] ss:$8 sps:$4 sm:$0xff]  }
 0xb94   :  { %v16759_v41 = vld [vmem:[%s24685_s29 + $0x68] sm:$0xff] }
 0xb95   :  { %v21298_v46 = vpack.c.bf16 %v4842_v43, %v4841_v35  ;;  %v18872_v35 = vld [vmem:[%s24643_s3 + $0x1a4] ss:$8 sps:$4 sm:$0xff]   ;;  %v18876_v45 = vld [vmem:[%s24643_s3 + $0x1c0] ss:$8 sps:$4 sm:$0xff]  }
 0xb96   :  { %v16758_v43 = vld [vmem:[%s24685_s29 + $0x60] sm:$0xff] }
 0xb97   :  { %v4871_v47 = vshll.u32 %v21298_v46, 16  ;;  %v4869_v48 = vshrl.u32 %v21298_v46, 16  ;;  %v5107_v20 = vrot.slane %v21298_v46, 1 }
 0xb99   :  { %v4873_v49 = vrot.slane %v4871_v47, 1  ;;  %v21302_v37 = vrot.slane %v4869_v48, 1  ;;  %v21304_v50 = vrot.slane %v4871_v47, 2  ;;  %v18879_v47 = vld [vmem:[%s24643_s3 + $0x1d4] ss:$8 sps:$4 sm:$0x1f]  }
 0xb9b   :  { %v4874_v51 = vor.u32 %v4873_v49, %v4869_v48  ;;  %v5236_v53 = vor.u32 %v21304_v50, %v21302_v37  ;;  %v21471_v48 = vpack.c.bf16 %v16759_v41, %v16758_v43  ;;  %v18881_v49 = vld [vmem:[%s24643_s3 + $0x1d0] ss:$8 sps:$4 sm:$0x1f]  }
 0xb9c   :  { %v16760_v37 = vld [vmem:[%s24685_s29 + $0x70] sm:$0xff]  ;;  %v16761_v50 = vld [vmem:[%s24685_s29 + $0x78] sm:$0x3f] }
 0xb9d   :  { %16638 = vmatmul.mubr.msk.bf16.vlgmr.msra.gmra.mrb[72].mxu1 %vm1065_vm8, %v4874_v51  ;;  %v5892_v51 = vshll.u32 %v21471_v48, 16 }
 0xb9e   :  { %5052 = vmatpush1.bf16.msra.mxu1 %v18810_v38  ;;  %5083 = vmatprep.mubr.bf16.mxu1 %v19767_v1  ;;  %v21482_v38 = vpack.c.bf16 %v16761_v50, %v16760_v37  ;;  %v5480_v50 = vld [vmem:[%s24645_s8] sm:$0x7] }
 0xb9f   :  { %5053 = vmatprep.subr.bf16.mxu1 %v18815_v52  ;;  %v5426_v52 = vsel %vm612_vm5, %v18881_v49, 0 }
 0xba2   :  { %5054 = vmatpush1.bf16.msra.mxu1 %v18813_v55  ;;  %v18882_v55 = vld [vmem:[%s24684_s23 + $0x20] ss:$8 sps:$4 sm:$0xff]  }
 0xba3   :  { %5055 = vmatprep.subr.bf16.mxu1 %v18818_v57  ;;  %v18885_v57 = vld [vmem:[%s24684_s23 + $0x34] ss:$8 sps:$4 sm:$0x7f]  }
 0xba6   :  { %5056 = vmatpush1.bf16.msra.mxu1 %v18816_v59  ;;  %v5890_v59 = vshrl.u32 %v21471_v48, 16 }
 0xba7   :  { %5057 = vmatprep.subr.bf16.mxu1 %v18821_v60  ;;  %v5894_v60 = vrot.slane %v5892_v51, 1 }
 0xbaa   :  { %5058 = vmatpush1.bf16.msra.mxu1 %v18819_v61  ;;  %v5897_v61 = vshll.u32 %v21482_v38, 16 }
 0xbab   :  { %5059 = vmatprep.subr.bf16.mxu1 %v18824_v62  ;;  %v5363_v62 = vrot.slane %v21298_v46, 2 }
 0xbac   :  { %v5899_v2 = vrot.slane %v5897_v61, 1 }
 0xbae   :  { %5060 = vmatpush1.bf16.msra.mxu1 %v18822_v63  ;;  %v18887_v63 = vld [vmem:[%s24684_s23 + $0x30] ss:$8 sps:$4 sm:$0x7f]  }
 0xbaf   :  { %16651 = vmatprep.subr.msk.bf16.mxu1 %vm612_vm5, %v18825_v0  ;;  %v5895_v0 = vor.u32 %v5894_v60, %v5890_v59  ;;  %v18918_v60 = vld [vmem:[%s24644_s10 + $0x30] sm:$0xff]  }
 0xbb2   :  { %5062 = vmatpush1.bf16.msra.mxu1 %v5046_v3  ;;  %v5929_v3 = vsel %vm122_vm0, %v18887_v63, 0 }
 0xbb3   :  { %5175 = vmatprep.subr.bf16.mxu1 %v18830_v4  ;;  %v5900_v4 = vsel %vm81_vm1, %v5895_v0, %v5899_v2 }
 0xbb5   :  { %16652 = vmatmul.mubr.msk.bf16.vlgmr.msra.gmra.mrb[72].mxu1 %vm1065_vm8, %v21298_v46  ;;  %v18890_v46 = vld [vmem:[%s24684_s23 + $0x4] ss:$8 sps:$4 sm:$0xff]  }
 0xbb6   :  { %5176 = vmatpush1.bf16.msra.mxu1 %v18828_v5  ;;  %5207 = vmatprep.mubr.bf16.mxu1 %v19767_v1  ;;  %v18888_v5 = vld [vmem:[%s24684_s23] ss:$8 sps:$4 sm:$0xff]  }
 0xbb7   :  { %5177 = vmatprep.subr.bf16.mxu1 %v18833_v6  ;;  %v18891_v6 = vld [vmem:[%s24684_s23 + $0x14] ss:$8 sps:$4 sm:$0x7f]  }
 0xbba   :  { %5178 = vmatpush1.bf16.msra.mxu1 %v18831_v8  ;;  %v18893_v8 = vld [vmem:[%s24684_s23 + $0x10] ss:$8 sps:$4 sm:$0x7f]  }
 0xbbb   :  { %5179 = vmatprep.subr.bf16.mxu1 %v18836_v10  ;;  %v5901_v10 = vshrl.u32 %v21482_v38, 16 }
 0xbbe   :  { %5180 = vmatpush1.bf16.msra.mxu1 %v18834_v11  ;;  %v6010_v11 = vsel %vm122_vm0, %v18893_v8, 0 }
 0xbbf   :  { %5181 = vmatprep.subr.bf16.mxu1 %v18839_v9  ;;  %v18896_v9 = vld [vmem:[%s24684_s23 + $0x44] ss:$8 sps:$4 sm:$0xff]  }
 0xbc2   :  { %5182 = vmatpush1.bf16.msra.mxu1 %v18837_v12  ;;  %v5903_v12 = vor.u32 %v5901_v10, %v5899_v2 }
 0xbc3   :  { %5183 = vmatprep.subr.bf16.mxu1 %v18842_v13  ;;  %v18894_v13 = vld [vmem:[%s24684_s23 + $0x40] ss:$8 sps:$4 sm:$0xff]  }
 0xbc6   :  { %5184 = vmatpush1.bf16.msra.mxu1 %v18840_v14  ;;  %v18897_v14 = vld [vmem:[%s24684_s23 + $0x54] ss:$8 sps:$4 sm:$0x7f]  }
 0xbc7   :  { %16677 = vmatprep.subr.msk.bf16.mxu1 %vm612_vm5, %v18843_v15  ;;  %v18899_v15 = vld [vmem:[%s24684_s23 + $0x50] ss:$8 sps:$4 sm:$0x7f]  }
 0xbc8   :  { %v6102_v16 = vsel %vm122_vm0, %v18899_v15, 0 }
 0xbca   :  { %5186 = vmatpush1.bf16.msra.mxu1 %v5170_v17  ;;  %v18902_v17 = vld [vmem:[%s24684_s23 + $0x64] ss:$8 sps:$4 sm:$0xff]  }
 0xbcb   :  { %5304 = vmatprep.subr.bf16.mxu1 %v18848_v18  ;;  %v6074_v18 = vrot.slane %v21471_v48, 1 }
 0xbcd   :  { %16678 = vmatmul.mubr.msk.bf16.vlgmr.msra.gmra.mrb[72].mxu1 %vm1065_vm8, %v5107_v20 }
 0xbce   :  { %5305 = vmatpush1.bf16.msra.mxu1 %v18846_v19  ;;  %5336 = vmatprep.mubr.bf16.mxu1 %v19767_v1  ;;  %v6075_v19 = vrot.slane %v21482_v38, 1 }
 0xbcf   :  { %5306 = vmatprep.subr.bf16.mxu1 %v18851_v21  ;;  %v18900_v21 = vld [vmem:[%s24684_s23 + $0x60] ss:$8 sps:$4 sm:$0xff]  }
 0xbd0   :  { %v6076_v20 = vsel %vm122_vm0, %v6074_v18, %v6075_v19 }
 0xbd2   :  { %5307 = vmatpush1.bf16.msra.mxu1 %v18849_v22  ;;  %v18903_v22 = vld [vmem:[%s24684_s23 + $0x74] ss:$8 sps:$4 sm:$0x7f]  }
 0xbd3   :  { %5308 = vmatprep.subr.bf16.mxu1 %v18854_v23  ;;  %v18905_v23 = vld [vmem:[%s24684_s23 + $0x70] ss:$8 sps:$4 sm:$0x7f]  }
 0xbd6   :  { %5309 = vmatpush1.bf16.msra.mxu1 %v18852_v24  ;;  %v6204_v24 = vsel %vm122_vm0, %v18905_v23, 0 }
 0xbd7   :  { %5310 = vmatprep.subr.bf16.mxu1 %v18857_v25  ;;  %v18908_v25 = vld [vmem:[%s24684_s23 + $0x84] ss:$8 sps:$4 sm:$0xff]  }
 0xbda   :  { %5311 = vmatpush1.bf16.msra.mxu1 %v18855_v26  ;;  %v6172_v26 = vrot.slane %v5890_v59, 1  ;;  %v18917_v59 = vld [vmem:[%s24644_s10 + $0x28] sm:$0xff]  }
 0xbdb   :  { %5312 = vmatprep.subr.bf16.mxu1 %v18860_v7  ;;  %v6176_v7 = vrot.slane %v5897_v61, 2  ;;  %v18919_v61 = vld [vmem:[%s24644_s10 + $0x38] sm:$0xff]  }
 0xbde   :  { %5313 = vmatpush1.bf16.msra.mxu1 %v18858_v27  ;;  %v6175_v27 = vrot.slane %v5901_v10, 1 }
 0xbdf   :  { %16703 = vmatprep.subr.msk.bf16.mxu1 %vm612_vm5, %v18861_v28  ;;  %v6173_v28 = vrot.slane %v5892_v51, 2  ;;  %v18912_v51 = vld [vmem:[%s24644_s10] sm:$0xff]  }
 0xbe1   :  { %v6174_v30 = vor.u32 %v6173_v28, %v6172_v26 }
 0xbe2   :  { %5315 = vmatpush1.bf16.msra.mxu1 %v5299_v31  ;;  %v6177_v31 = vor.u32 %v6176_v7, %v6175_v27 }
 0xbe3   :  { %5431 = vmatprep.subr.bf16.mxu1 %v18866_v32 }
 0xbe4   :  { %v6178_v32 = vsel %vm370_vm4, %v6174_v30, %v6177_v31  ;;  %v18920_v30 = vld [vmem:[%s24644_s10 + $0x40] sm:$0xff]  }
 0xbe5   :  { %16704 = vmatmul.mubr.msk.bf16.vlgmr.msra.gmra.mrb[72].mxu1 %vm1065_vm8, %v5236_v53  ;;  %v18884_v53 = vld [vmem:[%s24684_s23 + $0x24] ss:$8 sps:$4 sm:$0xff]  }
 0xbe6   :  { %5432 = vmatpush1.bf16.msra.mxu1 %v18864_v33  ;;  %5463 = vmatprep.mubr.bf16.mxu1 %v19767_v1  ;;  %v18906_v33 = vld [vmem:[%s24684_s23 + $0x80] ss:$8 sps:$4 sm:$0xff]  }
 0xbe7   :  { %5433 = vmatprep.subr.bf16.mxu1 %v18869_v29  ;;  %v18909_v29 = vld [vmem:[%s24684_s23 + $0x94] ss:$8 sps:$4 sm:$0x7f]  }
 0xbea   :  { %5434 = vmatpush1.bf16.msra.mxu1 %v18867_v34  ;;  %v18911_v34 = vld [vmem:[%s24684_s23 + $0x90] ss:$8 sps:$4 sm:$0x7f]  }
 0xbeb   :  { %5435 = vmatprep.subr.bf16.mxu1 %v18872_v35  ;;  %v6302_v35 = vsel %vm122_vm0, %v18911_v34, 0 }
 0xbee   :  { %5436 = vmatpush1.bf16.msra.mxu1 %v18870_v36  ;;  %v6274_v36 = vrot.slane %v21471_v48, 2 }
 0xbef   :  { %5437 = vmatprep.subr.bf16.mxu1 %v18875_v42  ;;  %v6275_v42 = vrot.slane %v21482_v38, 2 }
 0xbf2   :  { %5438 = vmatpush1.bf16.msra.mxu1 %v18873_v44  ;;  %v6276_v44 = vsel %vm474_vm3, %v6274_v36, %v6275_v42 }
 0xbf3   :  { %5439 = vmatprep.subr.bf16.mxu1 %v18878_v40 }
 0xbf6   :  { %5440 = vmatpush1.bf16.msra.mxu1 %v18876_v45 }
 0xbf7   :  { %16729 = vmatprep.subr.msk.bf16.mxu1 %vm612_vm5, %v18879_v47 }
 0xbfa   :  { %5442 = vmatpush1.bf16.msra.mxu1 %v5426_v52  ;;  %v18913_v52 = vld [vmem:[%s24644_s10 + $0x8] sm:$0xff]  }
 0xbfb   :  { %5934 = vmatprep.subr.bf16.mxu1 %v18884_v53  ;;  %v18914_v53 = vld [vmem:[%s24644_s10 + $0x10] sm:$0xff]  }
 0xbfd   :  { %16730 = vmatmul.mubr.msk.bf16.vlgmr.msra.gmra.mrb[72].mxu1 %vm1065_vm8, %v5363_v62  ;;  %v6368_v62 = vld [vmem:[%s24641_s12] sm:$0x3] }
 0xbfe   :  { %5935 = vmatpush1.bf16.msra.mxu1 %v18882_v55  ;;  %5966 = vmatprep.mubr.bf16.mxu1 %v19767_v1  ;;  %v18915_v55 = vld [vmem:[%s24644_s10 + $0x18] sm:$0xff]   ;;  %v6373_v63 = vrot.slane %v6368_v62, %v20002_v56  ;;  %v6377_v0 = vrot.slane %v6368_v62, %v20007_v58  ;;  %v18935_v62 = vld [vmem:[%s24687_s4] sm:$0xff]  }
 0xbff   :  { %16770 = vmatprep.subr.msk.bf16.mxu1 %vm122_vm0, %v18885_v57  ;;  %v18916_v57 = vld [vmem:[%s24644_s10 + $0x20] sm:$0xff]  }
 0xc02   :  { %5937 = vmatpush1.bf16.msra.mxu1 %v5929_v3 }
 0xc03   :  { %6015 = vmatprep.subr.bf16.mxu1 %v18890_v46 }
 0xc05   :  { %16771 = vmatmul.mubr.msk.bf16.vlgmr.msra.gmra.mrb[76].mxu1 %vm115_vm2, %v5900_v4 }
 0xc06   :  { %5976 = vmatprep.mubr.bf16.mxu1 %v19767_v1  ;;  %6016 = vmatpush1.bf16.msra.mxu1 %v18888_v5 }
 0xc07   :  { %16777 = vmatprep.subr.msk.bf16.mxu1 %vm122_vm0, %v18891_v6 }
 0xc0a   :  { %6018 = vmatpush1.bf16.msra.mxu1 %v6010_v11 }
 0xc0b   :  { %6107 = vmatprep.subr.bf16.mxu1 %v18896_v9 }
 0xc0d   :  { %16772 = vmatmul.mubr.msk.bf16.gmra.mrb[80].mxu1 %vm115_vm2, %v5903_v12 }
 0xc0e   :  { %6047 = vmatprep.mubr.bf16.mxu1 %v19767_v1 }
 0xc15   :  { %16778 = vmatmul.mubr.msk.bf16.vlgmr.msra.gmra.mrb[76].mxu1 %vm115_vm2, %v21471_v48 }
 0xc16   :  { %6057 = vmatprep.mubr.bf16.mxu1 %v19767_v1  ;;  %6108 = vmatpush1.bf16.msra.mxu1 %v18894_v13 }
 0xc17   :  { %16788 = vmatprep.subr.msk.bf16.mxu1 %vm122_vm0, %v18897_v14 }
 0xc1a   :  { %6110 = vmatpush1.bf16.msra.mxu1 %v6102_v16 }
 0xc1b   :  { %6209 = vmatprep.subr.bf16.mxu1 %v18902_v17 }
 0xc1d   :  { %16779 = vmatmul.mubr.msk.bf16.gmra.mrb[80].mxu1 %vm115_vm2, %v21482_v38  ;;  %v5531_v38 = vld [vmem:[%s24646_s9] sm:$0x7] }
 0xc1e   :  { %6139 = vmatprep.mubr.bf16.mxu1 %v19767_v1 }
 0xc25   :  { %16789 = vmatmul.mubr.msk.bf16.vlgmr.msra.gmra.mrb[76].mxu1 %vm115_vm2, %v6076_v20 }
 0xc26   :  { %6149 = vmatprep.mubr.bf16.mxu1 %v19767_v1  ;;  %6210 = vmatpush1.bf16.msra.mxu1 %v18900_v21 }
 0xc27   :  { %16799 = vmatprep.subr.msk.bf16.mxu1 %vm122_vm0, %v18903_v22 }
 0xc2a   :  { %6212 = vmatpush1.bf16.msra.mxu1 %v6204_v24 }
 0xc2b   :  { %6307 = vmatprep.subr.bf16.mxu1 %v18908_v25 }
 0xc2d   :  { %16790 = vmatmul.mubr.msk.bf16.gmra.mrb[80].mxu1 %vm115_vm2, %v6075_v19 }
 0xc2e   :  { %6241 = vmatprep.mubr.bf16.mxu1 %v19767_v1 }
 0xc35   :  { %16800 = vmatmul.mubr.msk.bf16.vlgmr.msra.gmra.mrb[76].mxu1 %vm115_vm2, %v6178_v32  ;;  %v18922_v32 = vld [vmem:[%s24644_s10 + $0x50] sm:$0xff]  }
 0xc36   :  { %6251 = vmatprep.mubr.bf16.mxu1 %v19767_v1  ;;  %6308 = vmatpush1.bf16.msra.mxu1 %v18906_v33 }
 0xc37   :  { %16810 = vmatprep.subr.msk.bf16.mxu1 %vm122_vm0, %v18909_v29 }
 0xc3a   :  { %6310 = vmatpush1.bf16.msra.mxu1 %v6302_v35 }
 0xc3b   :  { %6726 = vmatprep.subr.bf16.mxu1 %v19767_v1 }
 0xc3d   :  { %16801 = vmatmul.mubr.msk.bf16.gmra.mrb[80].mxu1 %vm115_vm2, %v6177_v31  ;;  %v18921_v31 = vld [vmem:[%s24644_s10 + $0x48] sm:$0xff]  }
 0xc3e   :  { %6339 = vmatprep.mubr.bf16.mxu1 %v19767_v1 }
 0xc45   :  { %16811 = vmatmul.mubr.msk.bf16.vlgmr.msra.gmra.mrb[76].mxu1 %vm115_vm2, %v6276_v44 }
 0xc46   :  { %6349 = vmatprep.mubr.bf16.mxu1 %v19767_v1 }
 0xc4d   :  { %16812 = vmatmul.mubr.msk.bf16.gmra.mrb[80].mxu1 %vm115_vm2, %v6275_v42 }
 0xcd0   :  { %v5465_v40 = vpop.f32.mrb[72].mxu1 }
 0xcd1   :  { %v5467_v43 = vpop.f32.mrb[73].mxu1 }
 0xcd2   :  { %v5469_v41 = vpop.f32.mrb[74].mxu1 }
 0xcd3   :  { %v5478_v45 = vpack.c.bf16 %v5469_v41, %v5465_v40  ;;  %v5471_v47 = vpop.f32.mrb[75].mxu1 }
 0xcd4   :  { %v5479_v49 = vpack.c.bf16 %v5471_v47, %v5467_v43  ;;  %v18923_v47 = vld [vmem:[%s24647_s11] sm:$0xff]  }
 0xcd5   :  { %v5485_v48 = vand.u32 %v5478_v45, %v20345_v39 }
 0xcd6   :  { %v5488_v37 = vand.u32 %v5479_v49, %v20345_v39 }
 0xcd8   :  { %5490 = vmatprep.subr.bf16.mxu0 %v5488_v37 }
 0xcd9   :  { %5491 = vmatpush1.bf16.msra.mxu0 %v5485_v48 }
 0xcda   :  { %5535 = vmatprep.subr.bf16.mxu0 %v5488_v37  ;;  %v18924_v37 = vld [vmem:[%s24647_s11 + $0x8] sm:$0xff]  }
 0xcdc   :  { %16731 = vmatmul.mubr.msk.bf16.vlgmr.msra.gmra.mrb[40].mxu0 %vm24698_vm10, %v5480_v50  ;;  %vm24700_vm10 = vcmask 392192   ;;  %v18926_v50 = vld [vmem:[%s24647_s11 + $0x18] sm:$0xff]  }
 0xcdd   :  { %5536 = vmatpush1.bf16.msra.mxu0 %v5485_v48  ;;  %5567 = vmatprep.mubr.bf16.mxu0 %v19767_v1  ;;  %v18925_v48 = vld [vmem:[%s24647_s11 + $0x10] sm:$0xff]  }
 0xcde   :  { %5671 = vmatprep.subr.bf16.mxu0 %v19767_v1 }
 0xce4   :  { %16732 = vmatmul.mubr.msk.bf16.vlgmr.msra.gmra.mrb[44].mxu0 %vm24699_vm9, %v5531_v38  ;;  %vm24701_vm9 = vmmov %vm24700_vm10  ;;  %v18927_v38 = vld [vmem:[%s24647_s11 + $0x20] sm:$0xff]  }
 0xce5   :  { %5672 = vmatpush1.bf16.msra.mxu0 %v18912_v51  ;;  %v18928_v51 = vld [vmem:[%s24647_s11 + $0x28] sm:$0xff]  }
 0xce6   :  { %5673 = vmatprep.subr.bf16.mxu0 %v19767_v1 }
 0xce9   :  { %5674 = vmatpush1.bf16.msra.mxu0 %v18913_v52  ;;  %v18929_v52 = vld [vmem:[%s24647_s11 + $0x30] sm:$0xff]  }
 0xcea   :  { %5675 = vmatprep.subr.bf16.mxu0 %v19767_v1 }
 0xced   :  { %5676 = vmatpush1.bf16.msra.mxu0 %v18914_v53  ;;  %v18930_v53 = vld [vmem:[%s24647_s11 + $0x38] sm:$0xff]  }
 0xcee   :  { %5677 = vmatprep.subr.bf16.mxu0 %v19767_v1 }
 0xcf1   :  { %5678 = vmatpush1.bf16.msra.mxu0 %v18915_v55  ;;  %v18931_v55 = vld [vmem:[%s24647_s11 + $0x40] sm:$0xff]  }
 0xcf2   :  { %5679 = vmatprep.subr.bf16.mxu0 %v19767_v1 }
 0xcf5   :  { %5680 = vmatpush1.bf16.msra.mxu0 %v18916_v57  ;;  %v18932_v57 = vld [vmem:[%s24647_s11 + $0x48] sm:$0xff]  }
 0xcf6   :  { %5681 = vmatprep.subr.bf16.mxu0 %v19767_v1 }
 0xcf9   :  { %5682 = vmatpush1.bf16.msra.mxu0 %v18917_v59  ;;  %v18933_v59 = vld [vmem:[%s24647_s11 + $0x50] sm:$0xff]  }
 0xcfa   :  { %5683 = vmatprep.subr.bf16.mxu0 %v19767_v1 }
 0xcfd   :  { %5684 = vmatpush1.bf16.msra.mxu0 %v18918_v60 }
 0xcfe   :  { %5685 = vmatprep.subr.bf16.mxu0 %v19767_v1 }
 0xd01   :  { %5686 = vmatpush1.bf16.msra.mxu0 %v18919_v61  ;;  %v18934_v61 = vld [vmem:[%s24686_s0] sm:$0xff]  }
 0xd02   :  { %5687 = vmatprep.subr.bf16.mxu0 %v19767_v1 }
 0xd05   :  { %5688 = vmatpush1.bf16.msra.mxu0 %v18920_v30 }
 0xd06   :  { %5689 = vmatprep.subr.bf16.mxu0 %v19767_v1 }
 0xd09   :  { %5690 = vmatpush1.bf16.msra.mxu0 %v18921_v31 }
 0xd0a   :  { %5691 = vmatprep.subr.bf16.mxu0 %v19767_v1 }
 0xd0d   :  { %5692 = vmatpush1.bf16.msra.mxu0 %v18922_v32 }
 0xd0e   :  { %5799 = vmatprep.subr.bf16.mxu0 %v19767_v1 }
 0xd18   :  { %v6341_v2 = vpop.f32.mrb[76].mxu1 }
 0xd19   :  { %v6380_v3 = vadd.f32 %v6373_v63, %v6341_v2  ;;  %v6343_v46 = vpop.f32.mrb[77].mxu1  ;;  %v18938_v2 = vld [vmem:[%s24688_s26 + $0x8] sm:$0xff]  }
 0xd1a   :  { %v6381_v4 = vadd.f32 %v6377_v0, %v6343_v46  ;;  %v6345_v5 = vpop.f32.mrb[78].mxu1  ;;  %v18940_v46 = vld [vmem:[%s24688_s26 + $0x10] sm:$0xff]  }
 0xd1b   :  { %v6388_v6 = vmax.f32 %v6380_v3, 0.0  ;;  %v6382_v8 = vadd.f32 %v6373_v63, %v6345_v5  ;;  %v6347_v10 = vpop.f32.mrb[79].mxu1  ;;  %v18939_v3 = vld [vmem:[%s24642_s7 + $0x8] sm:$0xff]   ;;  %v18942_v5 = vld [vmem:[%s24688_s26 + $0x18] sm:$0xff]  }
 0xd1c   :  { %v6389_v11 = vmax.f32 %v6381_v4, 0.0  ;;  %v6383_v9 = vadd.f32 %v6377_v0, %v6347_v10  ;;  %v18941_v4 = vld [vmem:[%s24642_s7 + $0x10] sm:$0xff]   ;;  %v18945_v10 = vld [vmem:[%s24642_s7 + $0x20] sm:$0xff]  }
 0xd1d   :  { %v6390_v12 = vmax.f32 %v6382_v8, 0.0  ;;  %v18944_v8 = vld [vmem:[%s24688_s26 + $0x20] sm:$0xff]  }
 0xd1e   :  { %v6391_v13 = vmax.f32 %v6383_v9, 0.0  ;;  %v18947_v9 = vld [vmem:[%s24642_s7 + $0x28] sm:$0xff]  }
 0xd1f   :  { %v21646_v14 = vpack.c.bf16 %v6390_v12, %v6388_v6  ;;  %v18943_v6 = vld [vmem:[%s24642_s7 + $0x18] sm:$0xff]   ;;  %v18948_v12 = vld [vmem:[%s24688_s26 + $0x30] sm:$0xff]  }
 0xd20   :  { %v21648_v15 = vpack.c.bf16 %v6391_v13, %v6389_v11  ;;  %v6351_v16 = vpop.f32.mrb[80].mxu1  ;;  %v18946_v11 = vld [vmem:[%s24688_s26 + $0x28] sm:$0xff]   ;;  %v18949_v13 = vld [vmem:[%s24642_s7 + $0x30] sm:$0xff]  }
 0xd21   :  { %v6384_v17 = vadd.f32 %v6373_v63, %v6351_v16  ;;  %v6353_v18 = vpop.f32.mrb[81].mxu1  ;;  %v18952_v16 = vld [vmem:[%s24688_s26 + $0x40] sm:$0xff]  }
 0xd22   :  { %v6385_v19 = vadd.f32 %v6377_v0, %v6353_v18  ;;  %v6355_v20 = vpop.f32.mrb[82].mxu1  ;;  %v18954_v18 = vld [vmem:[%s24688_s26 + $0x48] sm:$0x3f]  }
 0xd23   :  { %v6392_v21 = vmax.f32 %v6384_v17, 0.0  ;;  %v6386_v22 = vadd.f32 %v6373_v63, %v6355_v20  ;;  %v6357_v23 = vpop.f32.mrb[83].mxu1  ;;  %v18936_v63 = vld [vmem:[%s24688_s26] sm:$0xff]   ;;  %v6601_v20 = vsel %vm474_vm3, %v18954_v18, 0 }
 0xd24   :  { %v6393_v24 = vmax.f32 %v6385_v19, 0.0  ;;  %v6387_v25 = vadd.f32 %v6377_v0, %v6357_v23  ;;  %v18937_v0 = vld [vmem:[%s24642_s7] sm:$0xff]   ;;  %v18955_v19 = vld [vmem:[%s24642_s7 + $0x48] sm:$0x3f]  }
 0xd25   :  { %v6394_v26 = vmax.f32 %v6386_v22, 0.0  ;;  %6727 = vmatpush1.bf16.msra.mxu1 %v18937_v0  ;;  %v18953_v17 = vld [vmem:[%s24642_s7 + $0x40] sm:$0xff]  }
 0xd26   :  { %v6395_v7 = vmax.f32 %v6387_v25, 0.0  ;;  %6728 = vmatprep.subr.bf16.mxu1 %v19767_v1  ;;  %v18970_v0 = vld [vmem:[%s24643_s3 + $0xa4] ss:$8 sps:$4 sm:$0xff]  }
 0xd27   :  { %v21650_v27 = vpack.c.bf16 %v6394_v26, %v6392_v21  ;;  %v6724_v21 = vsel %vm474_vm3, %v18955_v19, 0 }
 0xd28   :  { %v21652_v28 = vpack.c.bf16 %v6395_v7, %v6393_v24  ;;  %v16757_v7 = vld [vmem:[%s24648_s13] ss:$0 sm:$0xff] }
 0xd29   :  { %v6411_v60 = vsel %vm612_vm5, %v21650_v27, 0  ;;  %6729 = vmatpush1.bf16.msra.mxu1 %v18939_v3  ;;  %v18971_v3 = vld [vmem:[%s24643_s3 + $0xb4] ss:$8 sps:$4 sm:$0x1f]  }
 0xd2a   :  { %6730 = vmatprep.subr.bf16.mxu1 %v19767_v1 }
 0xd2d   :  { %6731 = vmatpush1.bf16.msra.mxu1 %v18941_v4  ;;  %v18976_v4 = vld [vmem:[%s24643_s3 + $0x4] ss:$8 sps:$4 sm:$0xff]  }
 0xd2e   :  { %6732 = vmatprep.subr.bf16.mxu1 %v19767_v1 }
 0xd31   :  { %6733 = vmatpush1.bf16.msra.mxu1 %v18943_v6 }
 0xd32   :  { %6734 = vmatprep.subr.bf16.mxu1 %v19767_v1 }
 0xd35   :  { %6735 = vmatpush1.bf16.msra.mxu1 %v18945_v10 }
 0xd36   :  { %6736 = vmatprep.subr.bf16.mxu1 %v19767_v1 }
 0xd39   :  { %6737 = vmatpush1.bf16.msra.mxu1 %v18947_v9 }
 0xd3a   :  { %6738 = vmatprep.subr.bf16.mxu1 %v19767_v1 }
 0xd3d   :  { %6739 = vmatpush1.bf16.msra.mxu1 %v18949_v13 }
 0xd3e   :  { %6740 = vmatprep.subr.bf16.mxu1 %v19767_v1 }
 0xdaf   :  { %v5524_v33 = vpop.f32.mrb[40].mxu0 }
 0xdb0   :  { %v5526_v29 = vpop.f32.mrb[41].mxu0 }
 0xdb1   :  { %v5528_v34 = vpop.f32.mrb[42].mxu0 }
 0xdb2   :  { %v5529_v35 = vpop.f32.mrb[43].mxu0 }
 0xdb7   :  { %v5569_v36 = vpop.f32.mrb[44].mxu0 }
 0xdb8   :  { %v5576_v42 = vmax.f32 %v5524_v33, %v5569_v36  ;;  %v5571_v44 = vpop.f32.mrb[45].mxu0  ;;  %v18958_v33 = vld [vmem:[%s24643_s3 + $0x64] ss:$8 sps:$4 sm:$0xff]  }
 0xdb9   :  { %v5577_v40 = vmax.f32 %v5526_v29, %v5571_v44  ;;  %v5573_v43 = vpop.f32.mrb[46].mxu0 }
 0xdba   :  { %v5574_v41 = vpop.f32.mrb[47].mxu0  ;;  %v5578_v49 = vpack.c.bf16 %v5576_v42, %v5576_v42 }
 0xdbb   :  { %v5579_v45 = vpack.c.bf16 %v5577_v40, %v5577_v40 }
 0xdbd   :  { %16744 = vmatprep.mubr.msk.bf16.mxu0 %vm24700_vm10, %v5579_v45  ;;  %vm24702_vm10 = vcmask 211968  }
 0xdbe   :  { %5704 = vmatmul.mubr.bf16.vlgmr.msra.gmra.mrb[48].mxu0 %v5578_v49 }
 0xdbf   :  { %5800 = vmatpush1.bf16.msra.mxu0 %v18923_v47  ;;  %16756 = vmatprep.mubr.msk.bf16.mxu0 %vm24701_vm9, %v5579_v45  ;;  %vm24703_vm9 = vmmov %vm24702_vm10 }
 0xdc0   :  { %5801 = vmatprep.subr.bf16.mxu0 %v19767_v1 }
 0xdc3   :  { %5802 = vmatpush1.bf16.msra.mxu0 %v18924_v37 }
 0xdc4   :  { %5803 = vmatprep.subr.bf16.mxu0 %v19767_v1 }
 0xdc7   :  { %5804 = vmatpush1.bf16.msra.mxu0 %v18925_v48 }
 0xdc8   :  { %5805 = vmatprep.subr.bf16.mxu0 %v19767_v1 }
 0xdcb   :  { %5806 = vmatpush1.bf16.msra.mxu0 %v18926_v50 }
 0xdcc   :  { %5807 = vmatprep.subr.bf16.mxu0 %v19767_v1 }
 0xdcf   :  { %5808 = vmatpush1.bf16.msra.mxu0 %v18927_v38 }
 0xdd0   :  { %5809 = vmatprep.subr.bf16.mxu0 %v19767_v1 }
 0xdd3   :  { %5810 = vmatpush1.bf16.msra.mxu0 %v18928_v51 }
 0xdd4   :  { %5811 = vmatprep.subr.bf16.mxu0 %v19767_v1 }
 0xdd7   :  { %5812 = vmatpush1.bf16.msra.mxu0 %v18929_v52 }
 0xdd8   :  { %5813 = vmatprep.subr.bf16.mxu0 %v19767_v1 }
 0xddb   :  { %5814 = vmatpush1.bf16.msra.mxu0 %v18930_v53 }
 0xddc   :  { %5815 = vmatprep.subr.bf16.mxu0 %v19767_v1 }
 0xddf   :  { %5816 = vmatpush1.bf16.msra.mxu0 %v18931_v55  ;;  %v18956_v55 = vld [vmem:[%s24643_s3 + $0x60] ss:$8 sps:$4 sm:$0xff]  }
 0xde0   :  { %5817 = vmatprep.subr.bf16.mxu0 %v19767_v1 }
 0xde3   :  { %5818 = vmatpush1.bf16.msra.mxu0 %v18932_v57  ;;  %v18961_v57 = vld [vmem:[%s24643_s3 + $0x74] ss:$8 sps:$4 sm:$0xff]  }
 0xde4   :  { %5819 = vmatprep.subr.bf16.mxu0 %v19767_v1 }
 0xde7   :  { %5820 = vmatpush1.bf16.msra.mxu0 %v18933_v59  ;;  %v18959_v59 = vld [vmem:[%s24643_s3 + $0x70] ss:$8 sps:$4 sm:$0xff]  }
 0xde8   :  { %6416 = vmatprep.subr.bf16.mxu0 %v21648_v15 }
 0xdea   :  { %5832 = vmatmul.mubr.bf16.vlgmr.msra.gmra.mrb[52].mxu0 %v5578_v49 }
 0xdeb   :  { %6417 = vmatpush1.bf16.msra.mxu0 %v21646_v14  ;;  %6448 = vmatprep.mubr.bf16.mxu0 %v19767_v1 }
 0xdec   :  { %16814 = vmatprep.subr.msk.bf16.mxu0 %vm612_vm5, %v21652_v28 }
 0xdef   :  { %6419 = vmatpush1.bf16.msra.mxu0 %v6411_v60 }
 0xdf0   :  { %6469 = vmatprep.subr.bf16.mxu0 %v21648_v15  ;;  %v18951_v15 = vld [vmem:[%s24642_s7 + $0x38] sm:$0xff]  }
 0xdf1   :  { %6741 = vmatpush1.bf16.msra.mxu1 %v18951_v15 }
 0xdf2   :  { %16815 = vmatmul.mubr.msk.bf16.vlgmr.msra.gmra.mrb[56].mxu0 %vm24702_vm10, %v18934_v61  ;;  %6742 = vmatprep.subr.bf16.mxu1 %v19767_v1  ;;  %vm24704_vm10 = vcmask 647168   ;;  %v18962_v61 = vld [vmem:[%s24643_s3 + $0x80] ss:$8 sps:$4 sm:$0xff]  }
 0xdf3   :  { %6470 = vmatpush1.bf16.msra.mxu0 %v21646_v14  ;;  %6501 = vmatprep.mubr.bf16.mxu0 %v19767_v1  ;;  %v18950_v14 = vld [vmem:[%s24688_s26 + $0x38] sm:$0xff]  }
 0xdf4   :  { %16817 = vmatprep.subr.msk.bf16.mxu0 %vm612_vm5, %v21652_v28 }
 0xdf5   :  { %6743 = vmatpush1.bf16.msra.mxu1 %v18953_v17 }
 0xdf6   :  { %6744 = vmatprep.subr.bf16.mxu1 %v19767_v1 }
 0xdf7   :  { %6472 = vmatpush1.bf16.msra.mxu0 %v6411_v60  ;;  %v18964_v60 = vld [vmem:[%s24643_s3 + $0x84] ss:$8 sps:$4 sm:$0xff]  }
 0xdf8   :  { %6603 = vmatprep.subr.bf16.mxu0 %v19767_v1 }
 0xdf9   :  { %6745 = vmatpush1.bf16.msra.mxu1 %v6724_v21 }
 0xdfa   :  { %16818 = vmatmul.mubr.msk.bf16.vlgmr.msra.gmra.mrb[60].mxu0 %vm24703_vm9, %v18935_v62  ;;  %vm24705_vm9 = vcmask 228352   ;;  %v18967_v62 = vld [vmem:[%s24643_s3 + $0x94] ss:$8 sps:$4 sm:$0xff]  }
 0xdfb   :  { %6604 = vmatpush1.bf16.msra.mxu0 %v18936_v63  ;;  %v18965_v63 = vld [vmem:[%s24643_s3 + $0x90] ss:$8 sps:$4 sm:$0xff]  }
 0xdfc   :  { %6605 = vmatprep.subr.bf16.mxu0 %v19767_v1 }
 0xdff   :  { %6606 = vmatpush1.bf16.msra.mxu0 %v18938_v2  ;;  %v18968_v2 = vld [vmem:[%s24643_s3 + $0xa0] ss:$8 sps:$4 sm:$0xff]  }
 0xe00   :  { %6607 = vmatprep.subr.bf16.mxu0 %v19767_v1 }
 0xe03   :  { %6608 = vmatpush1.bf16.msra.mxu0 %v18940_v46  ;;  %v18973_v46 = vld [vmem:[%s24643_s3 + $0xb0] ss:$8 sps:$4 sm:$0x1f]  }
 0xe04   :  { %6609 = vmatprep.subr.bf16.mxu0 %v19767_v1 }
 0xe07   :  { %6610 = vmatpush1.bf16.msra.mxu0 %v18942_v5  ;;  %v6863_v5 = vsel %vm612_vm5, %v18973_v46, 0  ;;  %v19024_v46 = vld [vmem:[%s24643_s3 + $0x164] ss:$8 sps:$4 sm:$0xff]  }
 0xe08   :  { %6611 = vmatprep.subr.bf16.mxu0 %v19767_v1 }
 0xe0b   :  { %6612 = vmatpush1.bf16.msra.mxu0 %v18944_v8 }
 0xe0c   :  { %6613 = vmatprep.subr.bf16.mxu0 %v19767_v1 }
 0xe0f   :  { %6614 = vmatpush1.bf16.msra.mxu0 %v18946_v11 }
 0xe10   :  { %6615 = vmatprep.subr.bf16.mxu0 %v19767_v1 }
 0xe13   :  { %6616 = vmatpush1.bf16.msra.mxu0 %v18948_v12 }
 0xe14   :  { %6617 = vmatprep.subr.bf16.mxu0 %v19767_v1 }
 0xe17   :  { %6618 = vmatpush1.bf16.msra.mxu0 %v18950_v14 }
 0xe18   :  { %6619 = vmatprep.subr.bf16.mxu0 %v19767_v1 }
 0xe1b   :  { %6620 = vmatpush1.bf16.msra.mxu0 %v18952_v16 }
 0xe1c   :  { %6621 = vmatprep.subr.bf16.mxu0 %v19767_v1 }
 0xe1f   :  { %6622 = vmatpush1.bf16.msra.mxu0 %v6601_v20 }
 0xe20   :  { %6868 = vmatprep.subr.bf16.mxu0 %v18958_v33  ;;  %v18980_v33 = vld [vmem:[%s24643_s3 + $0x20] ss:$8 sps:$4 sm:$0xff]  }
 0xe91   :  { %v5705_v22 = vpop.f32.mrb[48].mxu0 }
 0xe92   :  { %v5707_v23 = vpop.f32.mrb[49].mxu0 }
 0xe93   :  { %v5708_v24 = vpop.f32.mrb[50].mxu0 }
 0xe94   :  { %v5709_v25 = vpop.f32.mrb[51].mxu0 }
 0xebd   :  { %v5833_v26 = vpop.f32.mrb[52].mxu0 }
 0xebe   :  { %v5839_v27 = vmax.f32 %v5705_v22, %v5833_v26  ;;  %v5835_v28 = vpop.f32.mrb[53].mxu0 }
 0xebf   :  { %v5836_v30 = vpop.f32.mrb[54].mxu0  ;;  %v18979_v28 = vld [vmem:[%s24643_s3 + $0x14] ss:$8 sps:$4 sm:$0xff]  }
 0xec0   :  { %v5847_v31 = vadd.f32 %v16757_v7, %v5839_v27  ;;  %v5837_v32 = vpop.f32.mrb[55].mxu0  ;;  %v18974_v7 = vld [vmem:[%s24643_s3] ss:$8 sps:$4 sm:$0xff]  }
 0xec1   :  { %v18982_v32 = vld [vmem:[%s24643_s3 + $0x24] ss:$8 sps:$4 sm:$0xff]  }
 0xec2   :  { %v5848_v29 = vmax.f32 %v5847_v31, 0.0  ;;  %v18977_v31 = vld [vmem:[%s24643_s3 + $0x10] ss:$8 sps:$4 sm:$0xff]  }
 0xec4   :  { %5849 = vst.msk [vmem:[#allocation2 + $0x2] sm:$0x1] %vm24704_vm10, %v5848_v29  ;;  %v5857_v34 = vrot.slane %v5848_v29, 2  ;;  %v5851_v35 = vrot.slane %v5848_v29, 1  ;;  %v5862_v43 = vrot.slane %v5848_v29, 3  ;;  %v5868_v41 = vrot.slane %v5848_v29, 4  ;;  %vm24706_vm10 = vmmov %vm24705_vm9 }
 0xec5   :  { %v6450_v36 = vpop.f32.mrb[56].mxu0  ;;  %v18985_v29 = vld [vmem:[%s24643_s3 + $0x34] ss:$8 sps:$4 sm:$0xff]  }
 0xec6   :  { %5858 = vrot.lane.b32.xlu0 %v5857_v34, %s24692_s5  ;;  %5852 = vrot.lane.b32.xlu1 %v5851_v35, %s24693_s6  ;;  %v6452_v42 = vpop.f32.mrb[57].mxu0  ;;  %v18983_v34 = vld [vmem:[%s24643_s3 + $0x30] ss:$8 sps:$4 sm:$0xff]   ;;  %v18988_v35 = vld [vmem:[%s24643_s3 + $0x44] ss:$8 sps:$4 sm:$0xff]  }
 0xec7   :  { %v6454_v44 = vpop.f32.mrb[58].mxu0 }
 0xec8   :  { %v6456_v40 = vpop.f32.mrb[59].mxu0 }
 0xeca   :  { %5863 = vrot.lane.b32.xlu0 %v5862_v43, %s24694_s30  ;;  %v18994_v43 = vld [vmem:[%s24643_s3 + $0xc4] ss:$8 sps:$4 sm:$0xff]  }
 0xecd   :  { %v6503_v45 = vpop.f32.mrb[60].mxu0 }
 0xece   :  { %v6512_v47 = vmax.f32 %v6450_v36, %v6503_v45  ;;  %5869 = vrot.lane.b32.xlu0 %v5868_v41, %s24695_s27  ;;  %v6505_v49 = vpop.f32.mrb[61].mxu0  ;;  %v18986_v36 = vld [vmem:[%s24643_s3 + $0x40] ss:$8 sps:$4 sm:$0xff]   ;;  %v18997_v45 = vld [vmem:[%s24643_s3 + $0xd4] ss:$8 sps:$4 sm:$0xff]  }
 0xecf   :  { %v6513_v37 = vmax.f32 %v6452_v42, %v6505_v49  ;;  %v6507_v48 = vpop.f32.mrb[62].mxu0  ;;  %v18989_v42 = vld [vmem:[%s24643_s3 + $0x54] ss:$8 sps:$4 sm:$0x1f]   ;;  %v18992_v41 = vld [vmem:[%s24643_s3 + $0xc0] ss:$8 sps:$4 sm:$0xff]  }
 0xed0   :  { %v6514_v50 = vmax.f32 %v6454_v44, %v6507_v48  ;;  %v6509_v38 = vpop.f32.mrb[63].mxu0  ;;  %v18991_v44 = vld [vmem:[%s24643_s3 + $0x50] ss:$8 sps:$4 sm:$0x1f]   ;;  %v19000_v49 = vld [vmem:[%s24643_s3 + $0xe4] ss:$8 sps:$4 sm:$0xff]  }
 0xed1   :  { %v6515_v51 = vmax.f32 %v6456_v40, %v6509_v38  ;;  %v6972_v40 = vsel %vm612_vm5, %v18991_v44, 0  ;;  %v19003_v48 = vld [vmem:[%s24643_s3 + $0xf4] ss:$8 sps:$4 sm:$0xff]   ;;  %v19006_v38 = vld [vmem:[%s24643_s3 + $0x104] ss:$8 sps:$4 sm:$0xff]  }
 0xed2   :  { %v6516_v52 = vpack.c.bf16 %v6514_v50, %v6512_v47  ;;  %v18995_v47 = vld [vmem:[%s24643_s3 + $0xd0] ss:$8 sps:$4 sm:$0xff]  }
 0xed3   :  { %v6517_v53 = vpack.c.bf16 %v6515_v51, %v6513_v37  ;;  %v18998_v37 = vld [vmem:[%s24643_s3 + $0xe0] ss:$8 sps:$4 sm:$0xff]   ;;  %v19001_v50 = vld [vmem:[%s24643_s3 + $0xf0] ss:$8 sps:$4 sm:$0xff]  }
 0xed4   :  { %v19004_v51 = vld [vmem:[%s24643_s3 + $0x100] ss:$8 sps:$4 sm:$0xff]  }
 0xed5   :  { %16829 = vmatprep.mubr.msk.bf16.mxu0 %vm24705_vm9, %v6517_v53  ;;  %16840 = vmatprep.mubr.msk.bf16.mxu1 %vm24706_vm10, %v6517_v53  ;;  %v19009_v53 = vld [vmem:[%s24643_s3 + $0x110] ss:$8 sps:$4 sm:$0x1f]   ;;  %vm24707_vm9 = vcmask 89088  }
 0xed6   :  { %6636 = vmatmul.mubr.bf16.vlgmr.msra.gmra.mrb[64].mxu0 %v6516_v52  ;;  %6759 = vmatmul.mubr.bf16.vlgmr.msra.gmra.mrb[84].mxu1 %v6516_v52  ;;  %v19007_v52 = vld [vmem:[%s24643_s3 + $0x114] ss:$8 sps:$4 sm:$0x1f]   ;;  %vm24708_vm10 = vmmov %vm24707_vm9 }
 0xed7   :  { %6869 = vmatpush1.bf16.msra.mxu0 %v18956_v55  ;;  %6900 = vmatprep.mubr.bf16.mxu0 %v19767_v1  ;;  %v7096_v55 = vsel %vm612_vm5, %v19009_v53, 0 }
 0xed8   :  { %6870 = vmatprep.subr.bf16.mxu0 %v18961_v57  ;;  %7448 = vmatprep.mubr.bf16.mxu1 %v19767_v1  ;;  %v19012_v57 = vld [vmem:[%s24643_s3 + $0x124] ss:$8 sps:$4 sm:$0xff]  }
 0xedb   :  { %6871 = vmatpush1.bf16.msra.mxu0 %v18959_v59  ;;  %v19010_v59 = vld [vmem:[%s24643_s3 + $0x120] ss:$8 sps:$4 sm:$0xff]  }
 0xedc   :  { %6872 = vmatprep.subr.bf16.mxu0 %v18964_v60 }
 0xedf   :  { %6873 = vmatpush1.bf16.msra.mxu0 %v18962_v61  ;;  %v19015_v61 = vld [vmem:[%s24643_s3 + $0x134] ss:$8 sps:$4 sm:$0xff]  }
 0xee0   :  { %6874 = vmatprep.subr.bf16.mxu0 %v18967_v62  ;;  %v19013_v62 = vld [vmem:[%s24643_s3 + $0x130] ss:$8 sps:$4 sm:$0xff]  }
 0xee3   :  { %6875 = vmatpush1.bf16.msra.mxu0 %v18965_v63  ;;  %v19018_v63 = vld [vmem:[%s24643_s3 + $0x144] ss:$8 sps:$4 sm:$0xff]  }
 0xee4   :  { %6876 = vmatprep.subr.bf16.mxu0 %v18970_v0  ;;  %v19016_v0 = vld [vmem:[%s24643_s3 + $0x140] ss:$8 sps:$4 sm:$0xff]  }
 0xee7   :  { %6877 = vmatpush1.bf16.msra.mxu0 %v18968_v2  ;;  %v19021_v2 = vld [vmem:[%s24643_s3 + $0x154] ss:$8 sps:$4 sm:$0xff]  }
 0xee8   :  { %16865 = vmatprep.subr.msk.bf16.mxu0 %vm612_vm5, %v18971_v3  ;;  %v19019_v3 = vld [vmem:[%s24643_s3 + $0x150] ss:$8 sps:$4 sm:$0xff]  }
 0xeeb   :  { %6879 = vmatpush1.bf16.msra.mxu0 %v6863_v5  ;;  %v19025_v5 = vld [vmem:[%s24643_s3 + $0x174] ss:$8 sps:$4 sm:$0x1f]  }
 0xeec   :  { %6977 = vmatprep.subr.bf16.mxu0 %v18976_v4  ;;  %v19022_v4 = vld [vmem:[%s24643_s3 + $0x160] ss:$8 sps:$4 sm:$0xff]  }
 0xf38   :  { %v5859_v6 = vpop.permute.xlu0 %5858  ;;  %v5853_v8 = vpop.permute.xlu1 %5852 }
 0xf39   :  { %5855 = vst.msk [vmem:[#allocation2 + $0x2] sm:$0x1] %vm1996_vm12, %v5853_v8 }
 0xf3a   :  { %5856 = vst.msk [vmem:[#allocation2 + $0xa] sm:$0x1] %vm1998_vm13, %v5853_v8 }
 0xf3b   :  { %5861 = vst.msk [vmem:[#allocation2 + $0xa] sm:$0x1] %vm2004_vm14, %v5859_v6  ;;  %v19027_v6 = vld [vmem:[%s24643_s3 + $0x170] ss:$8 sps:$4 sm:$0x1f]  }
 0xf3c   :  { %v5864_v10 = vpop.permute.xlu0 %5863  ;;  %v7225_v8 = vsel %vm612_vm5, %v19027_v6, 0 }
 0xf3d   :  { %5866 = vst.msk [vmem:[#allocation2 + $0xa] sm:$0x1] %vm2010_vm15, %v5864_v10 }
 0xf3e   :  { %5867 = vst.msk [vmem:[#allocation2 + $0x12] sm:$0x1] %vm2012_vm7, %v5864_v10  ;;  %v19030_v10 = vld [vmem:[%s24643_s3 + $0x184] ss:$8 sps:$4 sm:$0xff]  }
 0xf40   :  { %v5870_v11 = vpop.permute.xlu0 %5869 }
 0xf41   :  { %5872 = vst.msk [vmem:[#allocation2 + $0x12] sm:$0x1] %vm2018_vm11, %v5870_v11 }
 0xf42   :  { %5873 = vst.msk [vmem:[#allocation2 + $0x1a] sm:$0x1] %vm2020_vm6, %v5870_v11  ;;  %v19028_v11 = vld [vmem:[%s24643_s3 + $0x180] ss:$8 sps:$4 sm:$0xff]  }
 0xfa9   :  { %v6637_v9 = vpop.f32.mrb[64].mxu0  ;;  %v6760_v12 = vpop.f32.mrb[84].mxu1 }
 0xfaa   :  { %v6767_v13 = vmax.f32 %v6637_v9, %v6760_v12  ;;  %v6639_v14 = vpop.f32.mrb[65].mxu0  ;;  %v6762_v15 = vpop.f32.mrb[85].mxu1  ;;  %v19033_v9 = vld [vmem:[%s24643_s3 + $0x194] ss:$8 sps:$4 sm:$0xff]   ;;  %v19031_v12 = vld [vmem:[%s24643_s3 + $0x190] ss:$8 sps:$4 sm:$0xff]  }
 0xfab   :  { %v6640_v16 = vpop.f32.mrb[66].mxu0  ;;  %v6763_v17 = vpop.f32.mrb[86].mxu1  ;;  %v19034_v14 = vld [vmem:[%s24643_s3 + $0x1a0] ss:$8 sps:$4 sm:$0xff]   ;;  %v19039_v15 = vld [vmem:[%s24643_s3 + $0x1b4] ss:$8 sps:$4 sm:$0xff]  }
 0xfac   :  { %v6768_v18 = vmax.f32 %v6640_v16, %v6763_v17  ;;  %v6642_v19 = vpop.f32.mrb[67].mxu0  ;;  %v6765_v20 = vpop.f32.mrb[87].mxu1  ;;  %v19037_v16 = vld [vmem:[%s24643_s3 + $0x1b0] ss:$8 sps:$4 sm:$0xff]   ;;  %v19042_v17 = vld [vmem:[%s24643_s3 + $0x1c4] ss:$8 sps:$4 sm:$0xff]  }
 0xfad   :  { %v16987_v19 = vld [vmem:[%s24685_s29 + $0x88] sm:$0xff] }
 0xfae   :  { %v21872_v21 = vpack.c.bf16 %v6768_v18, %v6767_v13  ;;  %v19036_v13 = vld [vmem:[%s24643_s3 + $0x1a4] ss:$8 sps:$4 sm:$0xff]   ;;  %v19040_v20 = vld [vmem:[%s24643_s3 + $0x1c0] ss:$8 sps:$4 sm:$0xff]  }
 0xfaf   :  { %v16986_v18 = vld [vmem:[%s24685_s29 + $0x80] sm:$0xff] }
 0xfb0   :  { %v6797_v22 = vshll.u32 %v21872_v21, 16  ;;  %v6795_v23 = vshrl.u32 %v21872_v21, 16  ;;  %v7033_v60 = vrot.slane %v21872_v21, 1 }
 0xfb2   :  { %v6799_v24 = vrot.slane %v6797_v22, 1  ;;  %v21876_v25 = vrot.slane %v6795_v23, 1  ;;  %v21878_v26 = vrot.slane %v6797_v22, 2  ;;  %v19043_v22 = vld [vmem:[%s24643_s3 + $0x1d4] ss:$8 sps:$4 sm:$0x1f]  }
 0xfb4   :  { %v6800_v27 = vor.u32 %v6799_v24, %v6795_v23  ;;  %v7162_v30 = vor.u32 %v21878_v26, %v21876_v25  ;;  %v22045_v23 = vpack.c.bf16 %v16987_v19, %v16986_v18  ;;  %v19045_v24 = vld [vmem:[%s24643_s3 + $0x1d0] ss:$8 sps:$4 sm:$0x1f]  }
 0xfb5   :  { %v16988_v25 = vld [vmem:[%s24685_s29 + $0x90] sm:$0xff]  ;;  %v16989_v26 = vld [vmem:[%s24685_s29 + $0x98] sm:$0x3f] }
 0xfb6   :  { %16866 = vmatmul.mubr.msk.bf16.vlgmr.msra.gmra.mrb[68].mxu0 %vm1065_vm8, %v6800_v27  ;;  %v7818_v27 = vshll.u32 %v22045_v23, 16 }
 0xfb7   :  { %6978 = vmatpush1.bf16.msra.mxu0 %v18974_v7  ;;  %7009 = vmatprep.mubr.bf16.mxu0 %v19767_v1  ;;  %v22056_v7 = vpack.c.bf16 %v16989_v26, %v16988_v25  ;;  %v7406_v26 = vld [vmem:[%s24645_s8] sm:$0x7] }
 0xfb8   :  { %6979 = vmatprep.subr.bf16.mxu0 %v18979_v28  ;;  %v7352_v28 = vsel %vm612_vm5, %v19045_v24, 0 }
 0xfbb   :  { %6980 = vmatpush1.bf16.msra.mxu0 %v18977_v31  ;;  %v19046_v31 = vld [vmem:[%s24684_s23 + $0x20] ss:$8 sps:$4 sm:$0xff]  }
 0xfbc   :  { %6981 = vmatprep.subr.bf16.mxu0 %v18982_v32  ;;  %v19049_v32 = vld [vmem:[%s24684_s23 + $0x34] ss:$8 sps:$4 sm:$0x7f]  }
 0xfbf   :  { %6982 = vmatpush1.bf16.msra.mxu0 %v18980_v33  ;;  %v7816_v33 = vshrl.u32 %v22045_v23, 16 }
 0xfc0   :  { %6983 = vmatprep.subr.bf16.mxu0 %v18985_v29  ;;  %v7820_v29 = vrot.slane %v7818_v27, 1 }
 0xfc3   :  { %6984 = vmatpush1.bf16.msra.mxu0 %v18983_v34  ;;  %v7823_v34 = vshll.u32 %v22056_v7, 16 }
 0xfc4   :  { %6985 = vmatprep.subr.bf16.mxu0 %v18988_v35  ;;  %v7289_v35 = vrot.slane %v21872_v21, 2 }
 0xfc5   :  { %v7825_v44 = vrot.slane %v7823_v34, 1 }
 0xfc7   :  { %6986 = vmatpush1.bf16.msra.mxu0 %v18986_v36  ;;  %v19051_v36 = vld [vmem:[%s24684_s23 + $0x30] ss:$8 sps:$4 sm:$0x7f]  }
 0xfc8   :  { %16879 = vmatprep.subr.msk.bf16.mxu0 %vm612_vm5, %v18989_v42  ;;  %v7821_v42 = vor.u32 %v7820_v29, %v7816_v33  ;;  %v19082_v29 = vld [vmem:[%s24644_s10 + $0x30] sm:$0xff]  }
 0xfcb   :  { %6988 = vmatpush1.bf16.msra.mxu0 %v6972_v40  ;;  %v7855_v40 = vsel %vm122_vm0, %v19051_v36, 0 }
 0xfcc   :  { %7101 = vmatprep.subr.bf16.mxu0 %v18994_v43  ;;  %v7826_v43 = vsel %vm81_vm1, %v7821_v42, %v7825_v44 }
 0xfce   :  { %16880 = vmatmul.mubr.msk.bf16.vlgmr.msra.gmra.mrb[68].mxu0 %vm1065_vm8, %v21872_v21  ;;  %v19054_v21 = vld [vmem:[%s24684_s23 + $0x4] ss:$8 sps:$4 sm:$0xff]  }
 0xfcf   :  { %7102 = vmatpush1.bf16.msra.mxu0 %v18992_v41  ;;  %7133 = vmatprep.mubr.bf16.mxu0 %v19767_v1  ;;  %v19052_v41 = vld [vmem:[%s24684_s23] ss:$8 sps:$4 sm:$0xff]  }
 0xfd0   :  { %7103 = vmatprep.subr.bf16.mxu0 %v18997_v45  ;;  %v19055_v45 = vld [vmem:[%s24684_s23 + $0x14] ss:$8 sps:$4 sm:$0x7f]  }
 0xfd3   :  { %7104 = vmatpush1.bf16.msra.mxu0 %v18995_v47  ;;  %v19057_v47 = vld [vmem:[%s24684_s23 + $0x10] ss:$8 sps:$4 sm:$0x7f]  }
 0xfd4   :  { %7105 = vmatprep.subr.bf16.mxu0 %v19000_v49  ;;  %v7827_v49 = vshrl.u32 %v22056_v7, 16 }
 0xfd7   :  { %7106 = vmatpush1.bf16.msra.mxu0 %v18998_v37  ;;  %v7936_v37 = vsel %vm122_vm0, %v19057_v47, 0 }
 0xfd8   :  { %7107 = vmatprep.subr.bf16.mxu0 %v19003_v48  ;;  %v19060_v48 = vld [vmem:[%s24684_s23 + $0x44] ss:$8 sps:$4 sm:$0xff]  }
 0xfdb   :  { %7108 = vmatpush1.bf16.msra.mxu0 %v19001_v50  ;;  %v7829_v50 = vor.u32 %v7827_v49, %v7825_v44 }
 0xfdc   :  { %7109 = vmatprep.subr.bf16.mxu0 %v19006_v38  ;;  %v19058_v38 = vld [vmem:[%s24684_s23 + $0x40] ss:$8 sps:$4 sm:$0xff]  }
 0xfdf   :  { %7110 = vmatpush1.bf16.msra.mxu0 %v19004_v51  ;;  %v19061_v51 = vld [vmem:[%s24684_s23 + $0x54] ss:$8 sps:$4 sm:$0x7f]  }
 0xfe0   :  { %16905 = vmatprep.subr.msk.bf16.mxu0 %vm612_vm5, %v19007_v52  ;;  %v19063_v52 = vld [vmem:[%s24684_s23 + $0x50] ss:$8 sps:$4 sm:$0x7f]  }
 0xfe1   :  { %v8028_v53 = vsel %vm122_vm0, %v19063_v52, 0 }
 0xfe3   :  { %7112 = vmatpush1.bf16.msra.mxu0 %v7096_v55  ;;  %v19066_v55 = vld [vmem:[%s24684_s23 + $0x64] ss:$8 sps:$4 sm:$0xff]  }
 0xfe4   :  { %7230 = vmatprep.subr.bf16.mxu0 %v19012_v57  ;;  %v8000_v57 = vrot.slane %v22045_v23, 1 }
 0xfe6   :  { %16906 = vmatmul.mubr.msk.bf16.vlgmr.msra.gmra.mrb[68].mxu0 %vm1065_vm8, %v7033_v60 }
 0xfe7   :  { %7231 = vmatpush1.bf16.msra.mxu0 %v19010_v59  ;;  %7262 = vmatprep.mubr.bf16.mxu0 %v19767_v1  ;;  %v8001_v59 = vrot.slane %v22056_v7, 1 }
 0xfe8   :  { %7232 = vmatprep.subr.bf16.mxu0 %v19015_v61  ;;  %v19064_v61 = vld [vmem:[%s24684_s23 + $0x60] ss:$8 sps:$4 sm:$0xff]  }
 0xfe9   :  { %v8002_v60 = vsel %vm122_vm0, %v8000_v57, %v8001_v59 }
 0xfeb   :  { %7233 = vmatpush1.bf16.msra.mxu0 %v19013_v62  ;;  %v19067_v62 = vld [vmem:[%s24684_s23 + $0x74] ss:$8 sps:$4 sm:$0x7f]  }
 0xfec   :  { %7234 = vmatprep.subr.bf16.mxu0 %v19018_v63  ;;  %v19069_v63 = vld [vmem:[%s24684_s23 + $0x70] ss:$8 sps:$4 sm:$0x7f]  }
 0xfef   :  { %7235 = vmatpush1.bf16.msra.mxu0 %v19016_v0  ;;  %v8130_v0 = vsel %vm122_vm0, %v19069_v63, 0 }
 0xff0   :  { %7236 = vmatprep.subr.bf16.mxu0 %v19021_v2  ;;  %v19072_v2 = vld [vmem:[%s24684_s23 + $0x84] ss:$8 sps:$4 sm:$0xff]  }
 0xff3   :  { %7237 = vmatpush1.bf16.msra.mxu0 %v19019_v3  ;;  %v8098_v3 = vrot.slane %v7816_v33, 1  ;;  %v19081_v33 = vld [vmem:[%s24644_s10 + $0x28] sm:$0xff]  }
 0xff4   :  { %7238 = vmatprep.subr.bf16.mxu0 %v19024_v46  ;;  %v8102_v46 = vrot.slane %v7823_v34, 2  ;;  %v19083_v34 = vld [vmem:[%s24644_s10 + $0x38] sm:$0xff]  }
 0xff7   :  { %7239 = vmatpush1.bf16.msra.mxu0 %v19022_v4  ;;  %v8101_v4 = vrot.slane %v7827_v49, 1 }
 0xff8   :  { %16931 = vmatprep.subr.msk.bf16.mxu0 %vm612_vm5, %v19025_v5  ;;  %v8099_v5 = vrot.slane %v7818_v27, 2  ;;  %v19076_v27 = vld [vmem:[%s24644_s10] sm:$0xff]  }
 0xffa   :  { %v8100_v6 = vor.u32 %v8099_v5, %v8098_v3 }
 0xffb   :  { %7241 = vmatpush1.bf16.msra.mxu0 %v7225_v8  ;;  %v8103_v8 = vor.u32 %v8102_v46, %v8101_v4 }
 0xffc   :  { %7357 = vmatprep.subr.bf16.mxu0 %v19030_v10 }
 0xffd   :  { %v8104_v10 = vsel %vm370_vm4, %v8100_v6, %v8103_v8  ;;  %v19084_v6 = vld [vmem:[%s24644_s10 + $0x40] sm:$0xff]  }
 0xffe   :  { %16932 = vmatmul.mubr.msk.bf16.vlgmr.msra.gmra.mrb[68].mxu0 %vm1065_vm8, %v7162_v30  ;;  %v19048_v30 = vld [vmem:[%s24684_s23 + $0x24] ss:$8 sps:$4 sm:$0xff]  }
 0xfff   :  { %7358 = vmatpush1.bf16.msra.mxu0 %v19028_v11  ;;  %7389 = vmatprep.mubr.bf16.mxu0 %v19767_v1  ;;  %v19070_v11 = vld [vmem:[%s24684_s23 + $0x80] ss:$8 sps:$4 sm:$0xff]  }
0x1000   :  { %7359 = vmatprep.subr.bf16.mxu0 %v19033_v9  ;;  %v19073_v9 = vld [vmem:[%s24684_s23 + $0x94] ss:$8 sps:$4 sm:$0x7f]  }
0x1003   :  { %7360 = vmatpush1.bf16.msra.mxu0 %v19031_v12  ;;  %v19075_v12 = vld [vmem:[%s24684_s23 + $0x90] ss:$8 sps:$4 sm:$0x7f]  }
0x1004   :  { %7361 = vmatprep.subr.bf16.mxu0 %v19036_v13  ;;  %v8228_v13 = vsel %vm122_vm0, %v19075_v12, 0 }
0x1007   :  { %7362 = vmatpush1.bf16.msra.mxu0 %v19034_v14  ;;  %v8200_v14 = vrot.slane %v22045_v23, 2 }
0x1008   :  { %7363 = vmatprep.subr.bf16.mxu0 %v19039_v15  ;;  %v8201_v15 = vrot.slane %v22056_v7, 2 }
0x100b   :  { %7364 = vmatpush1.bf16.msra.mxu0 %v19037_v16  ;;  %v8202_v16 = vsel %vm474_vm3, %v8200_v14, %v8201_v15 }
0x100c   :  { %7365 = vmatprep.subr.bf16.mxu0 %v19042_v17 }
0x100f   :  { %7366 = vmatpush1.bf16.msra.mxu0 %v19040_v20 }
0x1010   :  { %16957 = vmatprep.subr.msk.bf16.mxu0 %vm612_vm5, %v19043_v22 }
0x1013   :  { %7368 = vmatpush1.bf16.msra.mxu0 %v7352_v28  ;;  %v19077_v28 = vld [vmem:[%s24644_s10 + $0x8] sm:$0xff]  }
0x1014   :  { %7860 = vmatprep.subr.bf16.mxu0 %v19048_v30  ;;  %v19078_v30 = vld [vmem:[%s24644_s10 + $0x10] sm:$0xff]  }
0x1016   :  { %16958 = vmatmul.mubr.msk.bf16.vlgmr.msra.gmra.mrb[68].mxu0 %vm1065_vm8, %v7289_v35  ;;  %v8294_v35 = vld [vmem:[%s24641_s12] sm:$0x3] }
0x1017   :  { %7861 = vmatpush1.bf16.msra.mxu0 %v19046_v31  ;;  %7892 = vmatprep.mubr.bf16.mxu0 %v19767_v1  ;;  %v19079_v31 = vld [vmem:[%s24644_s10 + $0x18] sm:$0xff]   ;;  %v8299_v36 = vrot.slane %v8294_v35, %v20002_v56  ;;  %v8303_v42 = vrot.slane %v8294_v35, %v20007_v58  ;;  %v19099_v35 = vld [vmem:[%s24687_s4] sm:$0xff]  }
0x1018   :  { %16998 = vmatprep.subr.msk.bf16.mxu0 %vm122_vm0, %v19049_v32  ;;  %v19080_v32 = vld [vmem:[%s24644_s10 + $0x20] sm:$0xff]  }
0x101b   :  { %7863 = vmatpush1.bf16.msra.mxu0 %v7855_v40 }
0x101c   :  { %7941 = vmatprep.subr.bf16.mxu0 %v19054_v21 }
0x101e   :  { %16999 = vmatmul.mubr.msk.bf16.vlgmr.msra.gmra.mrb[72].mxu0 %vm115_vm2, %v7826_v43 }
0x101f   :  { %7902 = vmatprep.mubr.bf16.mxu0 %v19767_v1  ;;  %7942 = vmatpush1.bf16.msra.mxu0 %v19052_v41 }
0x1020   :  { %17005 = vmatprep.subr.msk.bf16.mxu0 %vm122_vm0, %v19055_v45 }
0x1023   :  { %7944 = vmatpush1.bf16.msra.mxu0 %v7936_v37 }
0x1024   :  { %8033 = vmatprep.subr.bf16.mxu0 %v19060_v48 }
0x1026   :  { %17000 = vmatmul.mubr.msk.bf16.gmra.mrb[76].mxu0 %vm115_vm2, %v7829_v50 }
0x1027   :  { %7973 = vmatprep.mubr.bf16.mxu0 %v19767_v1 }
0x102e   :  { %17006 = vmatmul.mubr.msk.bf16.vlgmr.msra.gmra.mrb[72].mxu0 %vm115_vm2, %v22045_v23 }
0x102f   :  { %7983 = vmatprep.mubr.bf16.mxu0 %v19767_v1  ;;  %8034 = vmatpush1.bf16.msra.mxu0 %v19058_v38 }
0x1030   :  { %17016 = vmatprep.subr.msk.bf16.mxu0 %vm122_vm0, %v19061_v51 }
0x1033   :  { %8036 = vmatpush1.bf16.msra.mxu0 %v8028_v53 }
0x1034   :  { %8135 = vmatprep.subr.bf16.mxu0 %v19066_v55 }
0x1036   :  { %17007 = vmatmul.mubr.msk.bf16.gmra.mrb[76].mxu0 %vm115_vm2, %v22056_v7  ;;  %v7457_v7 = vld [vmem:[%s24646_s9] sm:$0x7] }
0x1037   :  { %8065 = vmatprep.mubr.bf16.mxu0 %v19767_v1 }
0x103e   :  { %17017 = vmatmul.mubr.msk.bf16.vlgmr.msra.gmra.mrb[72].mxu0 %vm115_vm2, %v8002_v60 }
0x103f   :  { %8075 = vmatprep.mubr.bf16.mxu0 %v19767_v1  ;;  %8136 = vmatpush1.bf16.msra.mxu0 %v19064_v61 }
0x1040   :  { %17027 = vmatprep.subr.msk.bf16.mxu0 %vm122_vm0, %v19067_v62 }
0x1043   :  { %8138 = vmatpush1.bf16.msra.mxu0 %v8130_v0 }
0x1044   :  { %8233 = vmatprep.subr.bf16.mxu0 %v19072_v2 }
0x1046   :  { %17018 = vmatmul.mubr.msk.bf16.gmra.mrb[76].mxu0 %vm115_vm2, %v8001_v59 }
0x1047   :  { %8167 = vmatprep.mubr.bf16.mxu0 %v19767_v1 }
0x104e   :  { %17028 = vmatmul.mubr.msk.bf16.vlgmr.msra.gmra.mrb[72].mxu0 %vm115_vm2, %v8104_v10  ;;  %v19086_v10 = vld [vmem:[%s24644_s10 + $0x50] sm:$0xff]  }
0x104f   :  { %8177 = vmatprep.mubr.bf16.mxu0 %v19767_v1  ;;  %8234 = vmatpush1.bf16.msra.mxu0 %v19070_v11 }
0x1050   :  { %17038 = vmatprep.subr.msk.bf16.mxu0 %vm122_vm0, %v19073_v9 }
0x1053   :  { %8236 = vmatpush1.bf16.msra.mxu0 %v8228_v13 }
0x1054   :  { %8652 = vmatprep.subr.bf16.mxu0 %v19767_v1 }
0x1056   :  { %17029 = vmatmul.mubr.msk.bf16.gmra.mrb[76].mxu0 %vm115_vm2, %v8103_v8  ;;  %v19085_v8 = vld [vmem:[%s24644_s10 + $0x48] sm:$0xff]  }
0x1057   :  { %8265 = vmatprep.mubr.bf16.mxu0 %v19767_v1 }
0x105e   :  { %17039 = vmatmul.mubr.msk.bf16.vlgmr.msra.gmra.mrb[72].mxu0 %vm115_vm2, %v8202_v16 }
0x105f   :  { %8275 = vmatprep.mubr.bf16.mxu0 %v19767_v1 }
0x1066   :  { %17040 = vmatmul.mubr.msk.bf16.gmra.mrb[76].mxu0 %vm115_vm2, %v8201_v15 }
0x10e9   :  { %v7391_v17 = vpop.f32.mrb[68].mxu0 }
0x10ea   :  { %v7393_v18 = vpop.f32.mrb[69].mxu0 }
0x10eb   :  { %v7395_v19 = vpop.f32.mrb[70].mxu0 }
0x10ec   :  { %v7404_v20 = vpack.c.bf16 %v7395_v19, %v7391_v17  ;;  %v7397_v22 = vpop.f32.mrb[71].mxu0 }
0x10ed   :  { %v7405_v24 = vpack.c.bf16 %v7397_v22, %v7393_v18  ;;  %v19087_v22 = vld [vmem:[%s24647_s11] sm:$0xff]  }
0x10ee   :  { %v7411_v23 = vand.u32 %v7404_v20, %v20345_v39 }
0x10ef   :  { %v7414_v25 = vand.u32 %v7405_v24, %v20345_v39 }
0x10f1   :  { %7416 = vmatprep.subr.bf16.mxu1 %v7414_v25 }
0x10f2   :  { %7417 = vmatpush1.bf16.msra.mxu1 %v7411_v23 }
0x10f3   :  { %7461 = vmatprep.subr.bf16.mxu1 %v7414_v25  ;;  %v19088_v25 = vld [vmem:[%s24647_s11 + $0x8] sm:$0xff]  }
0x10f5   :  { %16959 = vmatmul.mubr.msk.bf16.vlgmr.msra.gmra.mrb[88].mxu1 %vm24707_vm9, %v7406_v26  ;;  %vm24709_vm9 = vcmask 392192   ;;  %v19090_v26 = vld [vmem:[%s24647_s11 + $0x18] sm:$0xff]  }
0x10f6   :  { %7462 = vmatpush1.bf16.msra.mxu1 %v7411_v23  ;;  %7493 = vmatprep.mubr.bf16.mxu1 %v19767_v1  ;;  %v19089_v23 = vld [vmem:[%s24647_s11 + $0x10] sm:$0xff]  }
0x10f7   :  { %7597 = vmatprep.subr.bf16.mxu1 %v19767_v1 }
0x10fd   :  { %16960 = vmatmul.mubr.msk.bf16.vlgmr.msra.gmra.mrb[92].mxu1 %vm24708_vm10, %v7457_v7  ;;  %vm24710_vm10 = vmmov %vm24709_vm9  ;;  %v19091_v7 = vld [vmem:[%s24647_s11 + $0x20] sm:$0xff]  }
0x10fe   :  { %7598 = vmatpush1.bf16.msra.mxu1 %v19076_v27  ;;  %v19092_v27 = vld [vmem:[%s24647_s11 + $0x28] sm:$0xff]  }
0x10ff   :  { %7599 = vmatprep.subr.bf16.mxu1 %v19767_v1 }
0x1102   :  { %7600 = vmatpush1.bf16.msra.mxu1 %v19077_v28  ;;  %v19093_v28 = vld [vmem:[%s24647_s11 + $0x30] sm:$0xff]  }
0x1103   :  { %7601 = vmatprep.subr.bf16.mxu1 %v19767_v1 }
0x1106   :  { %7602 = vmatpush1.bf16.msra.mxu1 %v19078_v30  ;;  %v19094_v30 = vld [vmem:[%s24647_s11 + $0x38] sm:$0xff]  }
0x1107   :  { %7603 = vmatprep.subr.bf16.mxu1 %v19767_v1 }
0x110a   :  { %7604 = vmatpush1.bf16.msra.mxu1 %v19079_v31  ;;  %v19095_v31 = vld [vmem:[%s24647_s11 + $0x40] sm:$0xff]  }
0x110b   :  { %7605 = vmatprep.subr.bf16.mxu1 %v19767_v1 }
0x110e   :  { %7606 = vmatpush1.bf16.msra.mxu1 %v19080_v32  ;;  %v19096_v32 = vld [vmem:[%s24647_s11 + $0x48] sm:$0xff]  }
0x110f   :  { %7607 = vmatprep.subr.bf16.mxu1 %v19767_v1 }
0x1112   :  { %7608 = vmatpush1.bf16.msra.mxu1 %v19081_v33  ;;  %v19097_v33 = vld [vmem:[%s24647_s11 + $0x50] sm:$0xff]  }
0x1113   :  { %7609 = vmatprep.subr.bf16.mxu1 %v19767_v1 }
0x1116   :  { %7610 = vmatpush1.bf16.msra.mxu1 %v19082_v29 }
0x1117   :  { %7611 = vmatprep.subr.bf16.mxu1 %v19767_v1 }
0x111a   :  { %7612 = vmatpush1.bf16.msra.mxu1 %v19083_v34  ;;  %v19098_v34 = vld [vmem:[%s24686_s0] sm:$0xff]  }
0x111b   :  { %7613 = vmatprep.subr.bf16.mxu1 %v19767_v1 }
0x111e   :  { %7614 = vmatpush1.bf16.msra.mxu1 %v19084_v6 }
0x111f   :  { %7615 = vmatprep.subr.bf16.mxu1 %v19767_v1 }
0x1122   :  { %7616 = vmatpush1.bf16.msra.mxu1 %v19085_v8 }
0x1123   :  { %7617 = vmatprep.subr.bf16.mxu1 %v19767_v1 }
0x1126   :  { %7618 = vmatpush1.bf16.msra.mxu1 %v19086_v10 }
0x1127   :  { %7725 = vmatprep.subr.bf16.mxu1 %v19767_v1 }
0x1131   :  { %v8267_v44 = vpop.f32.mrb[72].mxu0 }
0x1132   :  { %v8306_v40 = vadd.f32 %v8299_v36, %v8267_v44  ;;  %v8269_v21 = vpop.f32.mrb[73].mxu0  ;;  %v19102_v44 = vld [vmem:[%s24688_s26 + $0x8] sm:$0xff]  }
0x1133   :  { %v8307_v43 = vadd.f32 %v8303_v42, %v8269_v21  ;;  %v8271_v41 = vpop.f32.mrb[74].mxu0  ;;  %v19104_v21 = vld [vmem:[%s24688_s26 + $0x10] sm:$0xff]  }
0x1134   :  { %v8314_v45 = vmax.f32 %v8306_v40, 0.0  ;;  %v8308_v47 = vadd.f32 %v8299_v36, %v8271_v41  ;;  %v8273_v49 = vpop.f32.mrb[75].mxu0  ;;  %v19103_v40 = vld [vmem:[%s24642_s7 + $0x8] sm:$0xff]   ;;  %v19106_v41 = vld [vmem:[%s24688_s26 + $0x18] sm:$0xff]  }
0x1135   :  { %v8315_v37 = vmax.f32 %v8307_v43, 0.0  ;;  %v8309_v48 = vadd.f32 %v8303_v42, %v8273_v49  ;;  %v19105_v43 = vld [vmem:[%s24642_s7 + $0x10] sm:$0xff]   ;;  %v19109_v49 = vld [vmem:[%s24642_s7 + $0x20] sm:$0xff]  }
0x1136   :  { %v8316_v50 = vmax.f32 %v8308_v47, 0.0  ;;  %v19108_v47 = vld [vmem:[%s24688_s26 + $0x20] sm:$0xff]  }
0x1137   :  { %v8317_v38 = vmax.f32 %v8309_v48, 0.0  ;;  %v19111_v48 = vld [vmem:[%s24642_s7 + $0x28] sm:$0xff]  }
0x1138   :  { %v22220_v51 = vpack.c.bf16 %v8316_v50, %v8314_v45  ;;  %v19107_v45 = vld [vmem:[%s24642_s7 + $0x18] sm:$0xff]   ;;  %v19112_v50 = vld [vmem:[%s24688_s26 + $0x30] sm:$0xff]  }
0x1139   :  { %v22222_v52 = vpack.c.bf16 %v8317_v38, %v8315_v37  ;;  %v8277_v53 = vpop.f32.mrb[76].mxu0  ;;  %v19110_v37 = vld [vmem:[%s24688_s26 + $0x28] sm:$0xff]   ;;  %v19113_v38 = vld [vmem:[%s24642_s7 + $0x30] sm:$0xff]  }
0x113a   :  { %v8310_v55 = vadd.f32 %v8299_v36, %v8277_v53  ;;  %v8279_v57 = vpop.f32.mrb[77].mxu0  ;;  %v19116_v53 = vld [vmem:[%s24688_s26 + $0x40] sm:$0xff]  }
0x113b   :  { %v8311_v59 = vadd.f32 %v8303_v42, %v8279_v57  ;;  %v8281_v60 = vpop.f32.mrb[78].mxu0  ;;  %v19118_v57 = vld [vmem:[%s24688_s26 + $0x48] sm:$0x3f]  }
0x113c   :  { %v8318_v61 = vmax.f32 %v8310_v55, 0.0  ;;  %v8312_v62 = vadd.f32 %v8299_v36, %v8281_v60  ;;  %v8283_v63 = vpop.f32.mrb[79].mxu0  ;;  %v19100_v36 = vld [vmem:[%s24688_s26] sm:$0xff]   ;;  %v8527_v60 = vsel %vm474_vm3, %v19118_v57, 0 }
0x113d   :  { %v8319_v0 = vmax.f32 %v8311_v59, 0.0  ;;  %v8313_v2 = vadd.f32 %v8303_v42, %v8283_v63  ;;  %v19101_v42 = vld [vmem:[%s24642_s7] sm:$0xff]   ;;  %v19119_v59 = vld [vmem:[%s24642_s7 + $0x48] sm:$0x3f]  }
0x113e   :  { %v8320_v3 = vmax.f32 %v8312_v62, 0.0  ;;  %8653 = vmatpush1.bf16.msra.mxu0 %v19101_v42  ;;  %v19117_v55 = vld [vmem:[%s24642_s7 + $0x40] sm:$0xff]  }
0x113f   :  { %v8321_v46 = vmax.f32 %v8313_v2, 0.0  ;;  %8654 = vmatprep.subr.bf16.mxu0 %v19767_v1  ;;  %v19134_v42 = vld [vmem:[%s24643_s3 + $0xa4] ss:$8 sps:$4 sm:$0xff]  }
0x1140   :  { %v22224_v4 = vpack.c.bf16 %v8320_v3, %v8318_v61  ;;  %v8650_v61 = vsel %vm474_vm3, %v19119_v59, 0 }
0x1141   :  { %v22226_v5 = vpack.c.bf16 %v8321_v46, %v8319_v0  ;;  %v16985_v46 = vld [vmem:[%s24648_s13] ss:$0 sm:$0xff] }
0x1142   :  { %v8337_v29 = vsel %vm612_vm5, %v22224_v4, 0  ;;  %8655 = vmatpush1.bf16.msra.mxu0 %v19103_v40  ;;  %v19135_v40 = vld [vmem:[%s24643_s3 + $0xb4] ss:$8 sps:$4 sm:$0x1f]  }
0x1143   :  { %8656 = vmatprep.subr.bf16.mxu0 %v19767_v1 }
0x1146   :  { %8657 = vmatpush1.bf16.msra.mxu0 %v19105_v43  ;;  %v19140_v43 = vld [vmem:[%s24643_s3 + $0x4] ss:$8 sps:$4 sm:$0xff]  }
0x1147   :  { %8658 = vmatprep.subr.bf16.mxu0 %v19767_v1 }
0x114a   :  { %8659 = vmatpush1.bf16.msra.mxu0 %v19107_v45 }
0x114b   :  { %8660 = vmatprep.subr.bf16.mxu0 %v19767_v1 }
0x114e   :  { %8661 = vmatpush1.bf16.msra.mxu0 %v19109_v49 }
0x114f   :  { %8662 = vmatprep.subr.bf16.mxu0 %v19767_v1 }
0x1152   :  { %8663 = vmatpush1.bf16.msra.mxu0 %v19111_v48 }
0x1153   :  { %8664 = vmatprep.subr.bf16.mxu0 %v19767_v1 }
0x1156   :  { %8665 = vmatpush1.bf16.msra.mxu0 %v19113_v38 }
0x1157   :  { %8666 = vmatprep.subr.bf16.mxu0 %v19767_v1 }
0x11c8   :  { %v7450_v11 = vpop.f32.mrb[88].mxu1 }
0x11c9   :  { %v7452_v9 = vpop.f32.mrb[89].mxu1 }
0x11ca   :  { %v7454_v12 = vpop.f32.mrb[90].mxu1 }
0x11cb   :  { %v7455_v13 = vpop.f32.mrb[91].mxu1 }
0x11cc   :  { %v19122_v13 = vld [vmem:[%s24643_s3 + $0x64] ss:$8 sps:$4 sm:$0xff]  }
0x11d0   :  { %v7495_v14 = vpop.f32.mrb[92].mxu1 }
0x11d1   :  { %v7502_v15 = vmax.f32 %v7450_v11, %v7495_v14  ;;  %v7497_v16 = vpop.f32.mrb[93].mxu1 }
0x11d2   :  { %v7503_v17 = vmax.f32 %v7452_v9, %v7497_v16  ;;  %v7499_v18 = vpop.f32.mrb[94].mxu1 }
0x11d3   :  { %v7500_v19 = vpop.f32.mrb[95].mxu1  ;;  %v7504_v24 = vpack.c.bf16 %v7502_v15, %v7502_v15 }
0x11d4   :  { %v7505_v20 = vpack.c.bf16 %v7503_v17, %v7503_v17 }
0x11d6   :  { %16972 = vmatprep.mubr.msk.bf16.mxu1 %vm24709_vm9, %v7505_v20  ;;  %vm24711_vm9 = vcmask 211968  }
0x11d7   :  { %7630 = vmatmul.mubr.bf16.vlgmr.msra.gmra.mrb[96].mxu1 %v7504_v24 }
0x11d8   :  { %7726 = vmatpush1.bf16.msra.mxu1 %v19087_v22  ;;  %16984 = vmatprep.mubr.msk.bf16.mxu1 %vm24710_vm10, %v7505_v20  ;;  %vm24712_vm10 = vmmov %vm24711_vm9 }
0x11d9   :  { %7727 = vmatprep.subr.bf16.mxu1 %v19767_v1 }
0x11dc   :  { %7728 = vmatpush1.bf16.msra.mxu1 %v19088_v25 }
0x11dd   :  { %7729 = vmatprep.subr.bf16.mxu1 %v19767_v1 }
0x11e0   :  { %7730 = vmatpush1.bf16.msra.mxu1 %v19089_v23 }
0x11e1   :  { %7731 = vmatprep.subr.bf16.mxu1 %v19767_v1 }
0x11e4   :  { %7732 = vmatpush1.bf16.msra.mxu1 %v19090_v26 }
0x11e5   :  { %7733 = vmatprep.subr.bf16.mxu1 %v19767_v1 }
0x11e8   :  { %7734 = vmatpush1.bf16.msra.mxu1 %v19091_v7 }
0x11e9   :  { %7735 = vmatprep.subr.bf16.mxu1 %v19767_v1 }
0x11ec   :  { %7736 = vmatpush1.bf16.msra.mxu1 %v19092_v27 }
0x11ed   :  { %7737 = vmatprep.subr.bf16.mxu1 %v19767_v1 }
0x11f0   :  { %7738 = vmatpush1.bf16.msra.mxu1 %v19093_v28 }
0x11f1   :  { %7739 = vmatprep.subr.bf16.mxu1 %v19767_v1 }
0x11f4   :  { %7740 = vmatpush1.bf16.msra.mxu1 %v19094_v30 }
0x11f5   :  { %7741 = vmatprep.subr.bf16.mxu1 %v19767_v1 }
0x11f8   :  { %7742 = vmatpush1.bf16.msra.mxu1 %v19095_v31  ;;  %v19120_v31 = vld [vmem:[%s24643_s3 + $0x60] ss:$8 sps:$4 sm:$0xff]  }
0x11f9   :  { %7743 = vmatprep.subr.bf16.mxu1 %v19767_v1 }
0x11fc   :  { %7744 = vmatpush1.bf16.msra.mxu1 %v19096_v32  ;;  %v19125_v32 = vld [vmem:[%s24643_s3 + $0x74] ss:$8 sps:$4 sm:$0xff]  }
0x11fd   :  { %7745 = vmatprep.subr.bf16.mxu1 %v19767_v1 }
0x1200   :  { %7746 = vmatpush1.bf16.msra.mxu1 %v19097_v33  ;;  %v19123_v33 = vld [vmem:[%s24643_s3 + $0x70] ss:$8 sps:$4 sm:$0xff]  }
0x1201   :  { %8342 = vmatprep.subr.bf16.mxu1 %v22222_v52 }
0x1203   :  { %7758 = vmatmul.mubr.bf16.vlgmr.msra.gmra.mrb[100].mxu1 %v7504_v24 }
0x1204   :  { %8343 = vmatpush1.bf16.msra.mxu1 %v22220_v51  ;;  %8374 = vmatprep.mubr.bf16.mxu1 %v19767_v1 }
0x1205   :  { %17042 = vmatprep.subr.msk.bf16.mxu1 %vm612_vm5, %v22226_v5 }
0x1208   :  { %8345 = vmatpush1.bf16.msra.mxu1 %v8337_v29 }
0x1209   :  { %8395 = vmatprep.subr.bf16.mxu1 %v22222_v52  ;;  %v19115_v52 = vld [vmem:[%s24642_s7 + $0x38] sm:$0xff]  }
0x120a   :  { %8667 = vmatpush1.bf16.msra.mxu0 %v19115_v52 }
0x120b   :  { %17043 = vmatmul.mubr.msk.bf16.vlgmr.msra.gmra.mrb[104].mxu1 %vm24711_vm9, %v19098_v34  ;;  %8668 = vmatprep.subr.bf16.mxu0 %v19767_v1  ;;  %vm24713_vm9 = vcmask 647168   ;;  %v19126_v34 = vld [vmem:[%s24643_s3 + $0x80] ss:$8 sps:$4 sm:$0xff]  }
0x120c   :  { %8396 = vmatpush1.bf16.msra.mxu1 %v22220_v51  ;;  %8427 = vmatprep.mubr.bf16.mxu1 %v19767_v1  ;;  %v19114_v51 = vld [vmem:[%s24688_s26 + $0x38] sm:$0xff]  }
0x120d   :  { %17045 = vmatprep.subr.msk.bf16.mxu1 %vm612_vm5, %v22226_v5 }
0x120e   :  { %8669 = vmatpush1.bf16.msra.mxu0 %v19117_v55 }
0x120f   :  { %8670 = vmatprep.subr.bf16.mxu0 %v19767_v1 }
0x1210   :  { %8398 = vmatpush1.bf16.msra.mxu1 %v8337_v29  ;;  %v19128_v29 = vld [vmem:[%s24643_s3 + $0x84] ss:$8 sps:$4 sm:$0xff]  }
0x1211   :  { %8529 = vmatprep.subr.bf16.mxu1 %v19767_v1 }
0x1212   :  { %8671 = vmatpush1.bf16.msra.mxu0 %v8650_v61 }
0x1213   :  { %17046 = vmatmul.mubr.msk.bf16.vlgmr.msra.gmra.mrb[108].mxu1 %vm24712_vm10, %v19099_v35  ;;  %vm24714_vm10 = vcmask 228352   ;;  %v19131_v35 = vld [vmem:[%s24643_s3 + $0x94] ss:$8 sps:$4 sm:$0xff]  }
0x1214   :  { %8530 = vmatpush1.bf16.msra.mxu1 %v19100_v36  ;;  %v19129_v36 = vld [vmem:[%s24643_s3 + $0x90] ss:$8 sps:$4 sm:$0xff]  }
0x1215   :  { %8531 = vmatprep.subr.bf16.mxu1 %v19767_v1 }
0x1218   :  { %8532 = vmatpush1.bf16.msra.mxu1 %v19102_v44  ;;  %v19132_v44 = vld [vmem:[%s24643_s3 + $0xa0] ss:$8 sps:$4 sm:$0xff]  }
0x1219   :  { %8533 = vmatprep.subr.bf16.mxu1 %v19767_v1 }
0x121c   :  { %8534 = vmatpush1.bf16.msra.mxu1 %v19104_v21  ;;  %v19137_v21 = vld [vmem:[%s24643_s3 + $0xb0] ss:$8 sps:$4 sm:$0x1f]  }
0x121d   :  { %8535 = vmatprep.subr.bf16.mxu1 %v19767_v1 }
0x1220   :  { %8536 = vmatpush1.bf16.msra.mxu1 %v19106_v41  ;;  %v8789_v41 = vsel %vm612_vm5, %v19137_v21, 0  ;;  %v19188_v21 = vld [vmem:[%s24643_s3 + $0x164] ss:$8 sps:$4 sm:$0xff]  }
0x1221   :  { %8537 = vmatprep.subr.bf16.mxu1 %v19767_v1 }
0x1224   :  { %8538 = vmatpush1.bf16.msra.mxu1 %v19108_v47 }
0x1225   :  { %8539 = vmatprep.subr.bf16.mxu1 %v19767_v1 }
0x1228   :  { %8540 = vmatpush1.bf16.msra.mxu1 %v19110_v37 }
0x1229   :  { %8541 = vmatprep.subr.bf16.mxu1 %v19767_v1 }
0x122c   :  { %8542 = vmatpush1.bf16.msra.mxu1 %v19112_v50 }
0x122d   :  { %8543 = vmatprep.subr.bf16.mxu1 %v19767_v1 }
0x1230   :  { %8544 = vmatpush1.bf16.msra.mxu1 %v19114_v51 }
0x1231   :  { %8545 = vmatprep.subr.bf16.mxu1 %v19767_v1 }
0x1234   :  { %8546 = vmatpush1.bf16.msra.mxu1 %v19116_v53 }
0x1235   :  { %8547 = vmatprep.subr.bf16.mxu1 %v19767_v1 }
0x1238   :  { %8548 = vmatpush1.bf16.msra.mxu1 %v8527_v60 }
0x1239   :  { %8794 = vmatprep.subr.bf16.mxu1 %v19122_v13  ;;  %v19152_v13 = vld [vmem:[%s24643_s3 + $0x44] ss:$8 sps:$4 sm:$0xff]  }
0x12aa   :  { %v7631_v62 = vpop.f32.mrb[96].mxu1 }
0x12ab   :  { %v7633_v63 = vpop.f32.mrb[97].mxu1 }
0x12ac   :  { %v7634_v0 = vpop.f32.mrb[98].mxu1 }
0x12ad   :  { %v7635_v2 = vpop.f32.mrb[99].mxu1 }
0x12d6   :  { %v7759_v3 = vpop.f32.mrb[100].mxu1 }
0x12d7   :  { %v7765_v4 = vmax.f32 %v7631_v62, %v7759_v3  ;;  %v7761_v5 = vpop.f32.mrb[101].mxu1 }
0x12d8   :  { %v7762_v6 = vpop.f32.mrb[102].mxu1  ;;  %v19143_v5 = vld [vmem:[%s24643_s3 + $0x14] ss:$8 sps:$4 sm:$0xff]  }
0x12d9   :  { %v7773_v8 = vadd.f32 %v16985_v46, %v7765_v4  ;;  %v7763_v10 = vpop.f32.mrb[103].mxu1  ;;  %v19138_v46 = vld [vmem:[%s24643_s3] ss:$8 sps:$4 sm:$0xff]  }
0x12da   :  { %v19146_v10 = vld [vmem:[%s24643_s3 + $0x24] ss:$8 sps:$4 sm:$0xff]  }
0x12db   :  { %v7774_v11 = vmax.f32 %v7773_v8, 0.0  ;;  %v19141_v8 = vld [vmem:[%s24643_s3 + $0x10] ss:$8 sps:$4 sm:$0xff]  }
0x12dd   :  { %7775 = vst.msk [vmem:[#allocation2 + $0x3] sm:$0x1] %vm24713_vm9, %v7774_v11  ;;  %v7777_v9 = vrot.slane %v7774_v11, 1  ;;  %v7783_v17 = vrot.slane %v7774_v11, 2  ;;  %v7788_v18 = vrot.slane %v7774_v11, 3  ;;  %v7794_v7 = vrot.slane %v7774_v11, 4  ;;  %vm24715_vm9 = vmmov %vm24714_vm10 }
0x12de   :  { %v8376_v12 = vpop.f32.mrb[104].mxu1  ;;  %v19144_v11 = vld [vmem:[%s24643_s3 + $0x20] ss:$8 sps:$4 sm:$0xff]  }
0x12df   :  { %7778 = vrot.lane.b32.xlu1 %v7777_v9, %s24693_s6  ;;  %v8378_v14 = vpop.f32.mrb[105].mxu1  ;;  %v19149_v9 = vld [vmem:[%s24643_s3 + $0x34] ss:$8 sps:$4 sm:$0xff]  }
0x12e0   :  { %v8380_v15 = vpop.f32.mrb[106].mxu1 }
0x12e1   :  { %v8382_v16 = vpop.f32.mrb[107].mxu1 }
0x12e3   :  { %7784 = vrot.lane.b32.xlu1 %v7783_v17, %s24692_s5 }
0x12e6   :  { %v8429_v19 = vpop.f32.mrb[108].mxu1 }
0x12e7   :  { %v8438_v20 = vmax.f32 %v8376_v12, %v8429_v19  ;;  %7789 = vrot.lane.b32.xlu1 %v7788_v18, %s24694_s30  ;;  %v8431_v22 = vpop.f32.mrb[109].mxu1  ;;  %v19147_v12 = vld [vmem:[%s24643_s3 + $0x30] ss:$8 sps:$4 sm:$0xff]   ;;  %v19158_v18 = vld [vmem:[%s24643_s3 + $0xc4] ss:$8 sps:$4 sm:$0xff]  }
0x12e8   :  { %v8439_v24 = vmax.f32 %v8378_v14, %v8431_v22  ;;  %v8433_v25 = vpop.f32.mrb[110].mxu1  ;;  %v19150_v14 = vld [vmem:[%s24643_s3 + $0x40] ss:$8 sps:$4 sm:$0xff]   ;;  %v19159_v22 = vld [vmem:[%s24643_s3 + $0xd0] ss:$8 sps:$4 sm:$0xff]  }
0x12e9   :  { %v8440_v23 = vmax.f32 %v8380_v15, %v8433_v25  ;;  %v8435_v26 = vpop.f32.mrb[111].mxu1  ;;  %v19153_v15 = vld [vmem:[%s24643_s3 + $0x54] ss:$8 sps:$4 sm:$0x1f]   ;;  %v19156_v19 = vld [vmem:[%s24643_s3 + $0xc0] ss:$8 sps:$4 sm:$0xff]  }
0x12ea   :  { %v8441_v27 = vmax.f32 %v8382_v16, %v8435_v26  ;;  %v19155_v16 = vld [vmem:[%s24643_s3 + $0x50] ss:$8 sps:$4 sm:$0x1f]   ;;  %v19162_v25 = vld [vmem:[%s24643_s3 + $0xe0] ss:$8 sps:$4 sm:$0xff]  }
0x12eb   :  { %v8442_v28 = vpack.c.bf16 %v8440_v23, %v8438_v20  ;;  %7795 = vrot.lane.b32.xlu1 %v7794_v7, %s24695_s27  ;;  %v8898_v17 = vsel %vm612_vm5, %v19155_v16, 0  ;;  %v19161_v20 = vld [vmem:[%s24643_s3 + $0xd4] ss:$8 sps:$4 sm:$0xff]   ;;  %v19165_v26 = vld [vmem:[%s24643_s3 + $0xf0] ss:$8 sps:$4 sm:$0xff]  }
0x12ec   :  { %v8443_v30 = vpack.c.bf16 %v8441_v27, %v8439_v24  ;;  %v19164_v24 = vld [vmem:[%s24643_s3 + $0xe4] ss:$8 sps:$4 sm:$0xff]   ;;  %v19167_v23 = vld [vmem:[%s24643_s3 + $0xf4] ss:$8 sps:$4 sm:$0xff]   ;;  %v19168_v27 = vld [vmem:[%s24643_s3 + $0x100] ss:$8 sps:$4 sm:$0xff]  }
0x12ed   :  { %v19170_v7 = vld [vmem:[%s24643_s3 + $0x104] ss:$8 sps:$4 sm:$0xff]  }
0x12ee   :  { %17057 = vmatprep.mubr.msk.bf16.mxu1 %vm24714_vm10, %v8443_v30  ;;  %17068 = vmatprep.mubr.msk.bf16.mxu0 %vm24715_vm9, %v8443_v30  ;;  %v19173_v30 = vld [vmem:[%s24643_s3 + $0x110] ss:$8 sps:$4 sm:$0x1f]   ;;  %vm24716_vm10 = vcmask 89088  }
0x12ef   :  { %8562 = vmatmul.mubr.bf16.vlgmr.msra.gmra.mrb[112].mxu1 %v8442_v28  ;;  %8685 = vmatmul.mubr.bf16.vlgmr.msra.gmra.mrb[80].mxu0 %v8442_v28  ;;  %v19171_v28 = vld [vmem:[%s24643_s3 + $0x114] ss:$8 sps:$4 sm:$0x1f]   ;;  %vm24717_vm9 = vmmov %vm24716_vm10 }
0x12f0   :  { %8795 = vmatpush1.bf16.msra.mxu1 %v19120_v31  ;;  %8826 = vmatprep.mubr.bf16.mxu1 %v19767_v1  ;;  %v9022_v31 = vsel %vm612_vm5, %v19173_v30, 0 }
0x12f1   :  { %8796 = vmatprep.subr.bf16.mxu1 %v19125_v32  ;;  %9374 = vmatprep.mubr.bf16.mxu0 %v19767_v1  ;;  %v19176_v32 = vld [vmem:[%s24643_s3 + $0x124] ss:$8 sps:$4 sm:$0xff]  }
0x12f4   :  { %8797 = vmatpush1.bf16.msra.mxu1 %v19123_v33  ;;  %v19174_v33 = vld [vmem:[%s24643_s3 + $0x120] ss:$8 sps:$4 sm:$0xff]  }
0x12f5   :  { %8798 = vmatprep.subr.bf16.mxu1 %v19128_v29 }
0x12f8   :  { %8799 = vmatpush1.bf16.msra.mxu1 %v19126_v34  ;;  %v19179_v34 = vld [vmem:[%s24643_s3 + $0x134] ss:$8 sps:$4 sm:$0xff]  }
0x12f9   :  { %8800 = vmatprep.subr.bf16.mxu1 %v19131_v35  ;;  %v19177_v35 = vld [vmem:[%s24643_s3 + $0x130] ss:$8 sps:$4 sm:$0xff]  }
0x12fc   :  { %8801 = vmatpush1.bf16.msra.mxu1 %v19129_v36  ;;  %v19182_v36 = vld [vmem:[%s24643_s3 + $0x144] ss:$8 sps:$4 sm:$0xff]  }
0x12fd   :  { %8802 = vmatprep.subr.bf16.mxu1 %v19134_v42  ;;  %v19180_v42 = vld [vmem:[%s24643_s3 + $0x140] ss:$8 sps:$4 sm:$0xff]  }
0x1300   :  { %8803 = vmatpush1.bf16.msra.mxu1 %v19132_v44  ;;  %v19185_v44 = vld [vmem:[%s24643_s3 + $0x154] ss:$8 sps:$4 sm:$0xff]  }
0x1301   :  { %17093 = vmatprep.subr.msk.bf16.mxu1 %vm612_vm5, %v19135_v40  ;;  %v19183_v40 = vld [vmem:[%s24643_s3 + $0x150] ss:$8 sps:$4 sm:$0xff]  }
0x1304   :  { %8805 = vmatpush1.bf16.msra.mxu1 %v8789_v41  ;;  %v19189_v41 = vld [vmem:[%s24643_s3 + $0x174] ss:$8 sps:$4 sm:$0x1f]  }
0x1305   :  { %8903 = vmatprep.subr.bf16.mxu1 %v19140_v43  ;;  %v19186_v43 = vld [vmem:[%s24643_s3 + $0x160] ss:$8 sps:$4 sm:$0xff]  }
0x1351   :  { %v7779_v45 = vpop.permute.xlu1 %7778 }
0x1352   :  { %7781 = vst.msk [vmem:[#allocation2 + $0x3] sm:$0x1] %vm1996_vm12, %v7779_v45 }
0x1353   :  { %7782 = vst.msk [vmem:[#allocation2 + $0xb] sm:$0x1] %vm1998_vm13, %v7779_v45  ;;  %v19191_v45 = vld [vmem:[%s24643_s3 + $0x170] ss:$8 sps:$4 sm:$0x1f]  }
0x1355   :  { %v7785_v47 = vpop.permute.xlu1 %7784 }
0x1356   :  { %7787 = vst.msk [vmem:[#allocation2 + $0xb] sm:$0x1] %vm2004_vm14, %v7785_v47  ;;  %v9151_v47 = vsel %vm612_vm5, %v19191_v45, 0 }
0x1359   :  { %v7790_v49 = vpop.permute.xlu1 %7789 }
0x135a   :  { %7792 = vst.msk [vmem:[#allocation2 + $0xb] sm:$0x1] %vm2010_vm15, %v7790_v49 }
0x135b   :  { %7793 = vst.msk [vmem:[#allocation2 + $0x13] sm:$0x1] %vm2012_vm7, %v7790_v49  ;;  %v19194_v49 = vld [vmem:[%s24643_s3 + $0x184] ss:$8 sps:$4 sm:$0xff]  }
0x135d   :  { %v7796_v37 = vpop.permute.xlu1 %7795 }
0x135e   :  { %7798 = vst.msk [vmem:[#allocation2 + $0x13] sm:$0x1] %vm2018_vm11, %v7796_v37 }
0x135f   :  { %7799 = vst.msk [vmem:[#allocation2 + $0x1b] sm:$0x1] %vm2020_vm6, %v7796_v37  ;;  %v19192_v37 = vld [vmem:[%s24643_s3 + $0x180] ss:$8 sps:$4 sm:$0xff]  }
0x13c2   :  { %v8563_v48 = vpop.f32.mrb[112].mxu1  ;;  %v8686_v50 = vpop.f32.mrb[80].mxu0 }
0x13c3   :  { %v8693_v38 = vmax.f32 %v8563_v48, %v8686_v50  ;;  %v8565_v51 = vpop.f32.mrb[113].mxu1  ;;  %v8688_v52 = vpop.f32.mrb[81].mxu0  ;;  %v19197_v48 = vld [vmem:[%s24643_s3 + $0x194] ss:$8 sps:$4 sm:$0xff]   ;;  %v19195_v50 = vld [vmem:[%s24643_s3 + $0x190] ss:$8 sps:$4 sm:$0xff]  }
0x13c4   :  { %v8566_v53 = vpop.f32.mrb[114].mxu1  ;;  %v8689_v55 = vpop.f32.mrb[82].mxu0  ;;  %v19198_v51 = vld [vmem:[%s24643_s3 + $0x1a0] ss:$8 sps:$4 sm:$0xff]   ;;  %v19203_v52 = vld [vmem:[%s24643_s3 + $0x1b4] ss:$8 sps:$4 sm:$0xff]  }
0x13c5   :  { %v8694_v57 = vmax.f32 %v8566_v53, %v8689_v55  ;;  %v8568_v59 = vpop.f32.mrb[115].mxu1  ;;  %v8691_v60 = vpop.f32.mrb[83].mxu0  ;;  %v19201_v53 = vld [vmem:[%s24643_s3 + $0x1b0] ss:$8 sps:$4 sm:$0xff]   ;;  %v19206_v55 = vld [vmem:[%s24643_s3 + $0x1c4] ss:$8 sps:$4 sm:$0xff]  }
0x13c6   :  { %v17215_v59 = vld [vmem:[%s24685_s29 + $0xa8] sm:$0xff] }
0x13c7   :  { %v22446_v61 = vpack.c.bf16 %v8694_v57, %v8693_v38  ;;  %v19200_v38 = vld [vmem:[%s24643_s3 + $0x1a4] ss:$8 sps:$4 sm:$0xff]   ;;  %v19204_v60 = vld [vmem:[%s24643_s3 + $0x1c0] ss:$8 sps:$4 sm:$0xff]  }
0x13c8   :  { %v17214_v57 = vld [vmem:[%s24685_s29 + $0xa0] sm:$0xff] }
0x13c9   :  { %v8723_v62 = vshll.u32 %v22446_v61, 16  ;;  %v8721_v63 = vshrl.u32 %v22446_v61, 16  ;;  %v8959_v29 = vrot.slane %v22446_v61, 1 }
0x13cb   :  { %v8725_v0 = vrot.slane %v8723_v62, 1  ;;  %v22450_v2 = vrot.slane %v8721_v63, 1  ;;  %v22452_v3 = vrot.slane %v8723_v62, 2  ;;  %v19207_v62 = vld [vmem:[%s24643_s3 + $0x1d4] ss:$8 sps:$4 sm:$0x1f]  }
0x13cd   :  { %v8726_v4 = vor.u32 %v8725_v0, %v8721_v63  ;;  %v9088_v6 = vor.u32 %v22452_v3, %v22450_v2  ;;  %v22619_v63 = vpack.c.bf16 %v17215_v59, %v17214_v57  ;;  %v19209_v0 = vld [vmem:[%s24643_s3 + $0x1d0] ss:$8 sps:$4 sm:$0x1f]  }
0x13ce   :  { %v17216_v2 = vld [vmem:[%s24685_s29 + $0xb0] sm:$0xff]  ;;  %v17217_v3 = vld [vmem:[%s24685_s29 + $0xb8] sm:$0x3f] }
0x13cf   :  { %17094 = vmatmul.mubr.msk.bf16.vlgmr.msra.gmra.mrb[116].mxu1 %vm1065_vm8, %v8726_v4  ;;  %v9744_v4 = vshll.u32 %v22619_v63, 16 }
0x13d0   :  { %8904 = vmatpush1.bf16.msra.mxu1 %v19138_v46  ;;  %8935 = vmatprep.mubr.bf16.mxu1 %v19767_v1  ;;  %v22630_v46 = vpack.c.bf16 %v17217_v3, %v17216_v2  ;;  %v9332_v3 = vld [vmem:[%s24645_s8] sm:$0x7] }
0x13d1   :  { %8905 = vmatprep.subr.bf16.mxu1 %v19143_v5  ;;  %v9278_v5 = vsel %vm612_vm5, %v19209_v0, 0 }
0x13d4   :  { %8906 = vmatpush1.bf16.msra.mxu1 %v19141_v8  ;;  %v19210_v8 = vld [vmem:[%s24684_s23 + $0x20] ss:$8 sps:$4 sm:$0xff]  }
0x13d5   :  { %8907 = vmatprep.subr.bf16.mxu1 %v19146_v10  ;;  %v19213_v10 = vld [vmem:[%s24684_s23 + $0x34] ss:$8 sps:$4 sm:$0x7f]  }
0x13d8   :  { %8908 = vmatpush1.bf16.msra.mxu1 %v19144_v11  ;;  %v9742_v11 = vshrl.u32 %v22619_v63, 16 }
0x13d9   :  { %8909 = vmatprep.subr.bf16.mxu1 %v19149_v9  ;;  %v9746_v9 = vrot.slane %v9744_v4, 1 }
0x13dc   :  { %8910 = vmatpush1.bf16.msra.mxu1 %v19147_v12  ;;  %v9749_v12 = vshll.u32 %v22630_v46, 16 }
0x13dd   :  { %8911 = vmatprep.subr.bf16.mxu1 %v19152_v13  ;;  %v9215_v13 = vrot.slane %v22446_v61, 2 }
0x13de   :  { %v9751_v16 = vrot.slane %v9749_v12, 1 }
0x13e0   :  { %8912 = vmatpush1.bf16.msra.mxu1 %v19150_v14  ;;  %v19215_v14 = vld [vmem:[%s24684_s23 + $0x30] ss:$8 sps:$4 sm:$0x7f]  }
0x13e1   :  { %17107 = vmatprep.subr.msk.bf16.mxu1 %vm612_vm5, %v19153_v15  ;;  %v9747_v15 = vor.u32 %v9746_v9, %v9742_v11  ;;  %v19246_v9 = vld [vmem:[%s24644_s10 + $0x30] sm:$0xff]  }
0x13e4   :  { %8914 = vmatpush1.bf16.msra.mxu1 %v8898_v17  ;;  %v9781_v17 = vsel %vm122_vm0, %v19215_v14, 0 }
0x13e5   :  { %9027 = vmatprep.subr.bf16.mxu1 %v19158_v18  ;;  %v9752_v18 = vsel %vm81_vm1, %v9747_v15, %v9751_v16 }
0x13e7   :  { %17108 = vmatmul.mubr.msk.bf16.vlgmr.msra.gmra.mrb[116].mxu1 %vm1065_vm8, %v22446_v61  ;;  %v19218_v61 = vld [vmem:[%s24684_s23 + $0x4] ss:$8 sps:$4 sm:$0xff]  }
0x13e8   :  { %9028 = vmatpush1.bf16.msra.mxu1 %v19156_v19  ;;  %9059 = vmatprep.mubr.bf16.mxu1 %v19767_v1  ;;  %v19216_v19 = vld [vmem:[%s24684_s23] ss:$8 sps:$4 sm:$0xff]  }
0x13e9   :  { %9029 = vmatprep.subr.bf16.mxu1 %v19161_v20  ;;  %v19219_v20 = vld [vmem:[%s24684_s23 + $0x14] ss:$8 sps:$4 sm:$0x7f]  }
0x13ec   :  { %9030 = vmatpush1.bf16.msra.mxu1 %v19159_v22  ;;  %v19221_v22 = vld [vmem:[%s24684_s23 + $0x10] ss:$8 sps:$4 sm:$0x7f]  }
0x13ed   :  { %9031 = vmatprep.subr.bf16.mxu1 %v19164_v24  ;;  %v9753_v24 = vshrl.u32 %v22630_v46, 16 }
0x13f0   :  { %9032 = vmatpush1.bf16.msra.mxu1 %v19162_v25  ;;  %v9862_v25 = vsel %vm122_vm0, %v19221_v22, 0 }
0x13f1   :  { %9033 = vmatprep.subr.bf16.mxu1 %v19167_v23  ;;  %v19224_v23 = vld [vmem:[%s24684_s23 + $0x44] ss:$8 sps:$4 sm:$0xff]  }
0x13f4   :  { %9034 = vmatpush1.bf16.msra.mxu1 %v19165_v26  ;;  %v9755_v26 = vor.u32 %v9753_v24, %v9751_v16 }
0x13f5   :  { %9035 = vmatprep.subr.bf16.mxu1 %v19170_v7  ;;  %v19222_v7 = vld [vmem:[%s24684_s23 + $0x40] ss:$8 sps:$4 sm:$0xff]  }
0x13f8   :  { %9036 = vmatpush1.bf16.msra.mxu1 %v19168_v27  ;;  %v19225_v27 = vld [vmem:[%s24684_s23 + $0x54] ss:$8 sps:$4 sm:$0x7f]  }
0x13f9   :  { %17133 = vmatprep.subr.msk.bf16.mxu1 %vm612_vm5, %v19171_v28  ;;  %v19227_v28 = vld [vmem:[%s24684_s23 + $0x50] ss:$8 sps:$4 sm:$0x7f]  }
0x13fa   :  { %v9954_v30 = vsel %vm122_vm0, %v19227_v28, 0 }
0x13fc   :  { %9038 = vmatpush1.bf16.msra.mxu1 %v9022_v31  ;;  %v19230_v31 = vld [vmem:[%s24684_s23 + $0x64] ss:$8 sps:$4 sm:$0xff]  }
0x13fd   :  { %9156 = vmatprep.subr.bf16.mxu1 %v19176_v32  ;;  %v9926_v32 = vrot.slane %v22619_v63, 1 }
0x13ff   :  { %17134 = vmatmul.mubr.msk.bf16.vlgmr.msra.gmra.mrb[116].mxu1 %vm1065_vm8, %v8959_v29 }
0x1400   :  { %9157 = vmatpush1.bf16.msra.mxu1 %v19174_v33  ;;  %9188 = vmatprep.mubr.bf16.mxu1 %v19767_v1  ;;  %v9927_v33 = vrot.slane %v22630_v46, 1 }
0x1401   :  { %9158 = vmatprep.subr.bf16.mxu1 %v19179_v34  ;;  %v19228_v34 = vld [vmem:[%s24684_s23 + $0x60] ss:$8 sps:$4 sm:$0xff]  }
0x1402   :  { %v9928_v29 = vsel %vm122_vm0, %v9926_v32, %v9927_v33 }
0x1404   :  { %9159 = vmatpush1.bf16.msra.mxu1 %v19177_v35  ;;  %v19231_v35 = vld [vmem:[%s24684_s23 + $0x74] ss:$8 sps:$4 sm:$0x7f]  }
0x1405   :  { %9160 = vmatprep.subr.bf16.mxu1 %v19182_v36  ;;  %v19233_v36 = vld [vmem:[%s24684_s23 + $0x70] ss:$8 sps:$4 sm:$0x7f]  }
0x1408   :  { %9161 = vmatpush1.bf16.msra.mxu1 %v19180_v42  ;;  %v10056_v42 = vsel %vm122_vm0, %v19233_v36, 0 }
0x1409   :  { %9162 = vmatprep.subr.bf16.mxu1 %v19185_v44  ;;  %v19236_v44 = vld [vmem:[%s24684_s23 + $0x84] ss:$8 sps:$4 sm:$0xff]  }
0x140c   :  { %9163 = vmatpush1.bf16.msra.mxu1 %v19183_v40  ;;  %v10024_v40 = vrot.slane %v9742_v11, 1  ;;  %v19245_v11 = vld [vmem:[%s24644_s10 + $0x28] sm:$0xff]  }
0x140d   :  { %9164 = vmatprep.subr.bf16.mxu1 %v19188_v21  ;;  %v10028_v21 = vrot.slane %v9749_v12, 2  ;;  %v19247_v12 = vld [vmem:[%s24644_s10 + $0x38] sm:$0xff]  }
0x1410   :  { %9165 = vmatpush1.bf16.msra.mxu1 %v19186_v43  ;;  %v10027_v43 = vrot.slane %v9753_v24, 1 }
0x1411   :  { %17159 = vmatprep.subr.msk.bf16.mxu1 %vm612_vm5, %v19189_v41  ;;  %v10025_v41 = vrot.slane %v9744_v4, 2  ;;  %v19240_v4 = vld [vmem:[%s24644_s10] sm:$0xff]  }
0x1413   :  { %v10026_v45 = vor.u32 %v10025_v41, %v10024_v40 }
0x1414   :  { %9167 = vmatpush1.bf16.msra.mxu1 %v9151_v47  ;;  %v10029_v47 = vor.u32 %v10028_v21, %v10027_v43 }
0x1415   :  { %9283 = vmatprep.subr.bf16.mxu1 %v19194_v49 }
0x1416   :  { %v10030_v49 = vsel %vm370_vm4, %v10026_v45, %v10029_v47  ;;  %v19248_v45 = vld [vmem:[%s24644_s10 + $0x40] sm:$0xff]  }
0x1417   :  { %17160 = vmatmul.mubr.msk.bf16.vlgmr.msra.gmra.mrb[116].mxu1 %vm1065_vm8, %v9088_v6  ;;  %v19212_v6 = vld [vmem:[%s24684_s23 + $0x24] ss:$8 sps:$4 sm:$0xff]  }
0x1418   :  { %9284 = vmatpush1.bf16.msra.mxu1 %v19192_v37  ;;  %9315 = vmatprep.mubr.bf16.mxu1 %v19767_v1  ;;  %v19234_v37 = vld [vmem:[%s24684_s23 + $0x80] ss:$8 sps:$4 sm:$0xff]  }
0x1419   :  { %9285 = vmatprep.subr.bf16.mxu1 %v19197_v48  ;;  %v19237_v48 = vld [vmem:[%s24684_s23 + $0x94] ss:$8 sps:$4 sm:$0x7f]  }
0x141c   :  { %9286 = vmatpush1.bf16.msra.mxu1 %v19195_v50  ;;  %v19239_v50 = vld [vmem:[%s24684_s23 + $0x90] ss:$8 sps:$4 sm:$0x7f]  }
0x141d   :  { %9287 = vmatprep.subr.bf16.mxu1 %v19200_v38  ;;  %v10154_v38 = vsel %vm122_vm0, %v19239_v50, 0 }
0x1420   :  { %9288 = vmatpush1.bf16.msra.mxu1 %v19198_v51  ;;  %v10126_v51 = vrot.slane %v22619_v63, 2 }
0x1421   :  { %9289 = vmatprep.subr.bf16.mxu1 %v19203_v52  ;;  %v10127_v52 = vrot.slane %v22630_v46, 2 }
0x1424   :  { %9290 = vmatpush1.bf16.msra.mxu1 %v19201_v53  ;;  %v10128_v53 = vsel %vm474_vm3, %v10126_v51, %v10127_v52 }
0x1425   :  { %9291 = vmatprep.subr.bf16.mxu1 %v19206_v55 }
0x1428   :  { %9292 = vmatpush1.bf16.msra.mxu1 %v19204_v60 }
0x1429   :  { %17185 = vmatprep.subr.msk.bf16.mxu1 %vm612_vm5, %v19207_v62 }
0x142c   :  { %9294 = vmatpush1.bf16.msra.mxu1 %v9278_v5  ;;  %v19241_v5 = vld [vmem:[%s24644_s10 + $0x8] sm:$0xff]  }
0x142d   :  { %9786 = vmatprep.subr.bf16.mxu1 %v19212_v6  ;;  %v19242_v6 = vld [vmem:[%s24644_s10 + $0x10] sm:$0xff]  }
0x142f   :  { %17186 = vmatmul.mubr.msk.bf16.vlgmr.msra.gmra.mrb[116].mxu1 %vm1065_vm8, %v9215_v13  ;;  %v10220_v13 = vld [vmem:[%s24641_s12] sm:$0x3] }
0x1430   :  { %9787 = vmatpush1.bf16.msra.mxu1 %v19210_v8  ;;  %9818 = vmatprep.mubr.bf16.mxu1 %v19767_v1  ;;  %v19243_v8 = vld [vmem:[%s24644_s10 + $0x18] sm:$0xff]   ;;  %v10225_v14 = vrot.slane %v10220_v13, %v20002_v56  ;;  %v10229_v15 = vrot.slane %v10220_v13, %v20007_v58  ;;  %v19263_v13 = vld [vmem:[%s24687_s4] sm:$0xff]  }
0x1431   :  { %17226 = vmatprep.subr.msk.bf16.mxu1 %vm122_vm0, %v19213_v10  ;;  %v19244_v10 = vld [vmem:[%s24644_s10 + $0x20] sm:$0xff]  }
0x1434   :  { %9789 = vmatpush1.bf16.msra.mxu1 %v9781_v17 }
0x1435   :  { %9867 = vmatprep.subr.bf16.mxu1 %v19218_v61 }
0x1437   :  { %17227 = vmatmul.mubr.msk.bf16.vlgmr.msra.gmra.mrb[120].mxu1 %vm115_vm2, %v9752_v18 }
0x1438   :  { %9828 = vmatprep.mubr.bf16.mxu1 %v19767_v1  ;;  %9868 = vmatpush1.bf16.msra.mxu1 %v19216_v19 }
0x1439   :  { %17233 = vmatprep.subr.msk.bf16.mxu1 %vm122_vm0, %v19219_v20 }
0x143c   :  { %9870 = vmatpush1.bf16.msra.mxu1 %v9862_v25 }
0x143d   :  { %9959 = vmatprep.subr.bf16.mxu1 %v19224_v23 }
0x143f   :  { %17228 = vmatmul.mubr.msk.bf16.gmra.mrb[124].mxu1 %vm115_vm2, %v9755_v26 }
0x1440   :  { %9899 = vmatprep.mubr.bf16.mxu1 %v19767_v1 }
0x1447   :  { %17234 = vmatmul.mubr.msk.bf16.vlgmr.msra.gmra.mrb[120].mxu1 %vm115_vm2, %v22619_v63 }
0x1448   :  { %9909 = vmatprep.mubr.bf16.mxu1 %v19767_v1  ;;  %9960 = vmatpush1.bf16.msra.mxu1 %v19222_v7 }
0x1449   :  { %17244 = vmatprep.subr.msk.bf16.mxu1 %vm122_vm0, %v19225_v27 }
0x144c   :  { %9962 = vmatpush1.bf16.msra.mxu1 %v9954_v30 }
0x144d   :  { %10061 = vmatprep.subr.bf16.mxu1 %v19230_v31 }
0x144f   :  { %17235 = vmatmul.mubr.msk.bf16.gmra.mrb[124].mxu1 %vm115_vm2, %v22630_v46  ;;  %v9383_v46 = vld [vmem:[%s24646_s9] sm:$0x7] }
0x1450   :  { %9991 = vmatprep.mubr.bf16.mxu1 %v19767_v1 }
0x1457   :  { %17245 = vmatmul.mubr.msk.bf16.vlgmr.msra.gmra.mrb[120].mxu1 %vm115_vm2, %v9928_v29 }
0x1458   :  { %10001 = vmatprep.mubr.bf16.mxu1 %v19767_v1  ;;  %10062 = vmatpush1.bf16.msra.mxu1 %v19228_v34 }
0x1459   :  { %17255 = vmatprep.subr.msk.bf16.mxu1 %vm122_vm0, %v19231_v35 }
0x145c   :  { %10064 = vmatpush1.bf16.msra.mxu1 %v10056_v42 }
0x145d   :  { %10159 = vmatprep.subr.bf16.mxu1 %v19236_v44 }
0x145f   :  { %17246 = vmatmul.mubr.msk.bf16.gmra.mrb[124].mxu1 %vm115_vm2, %v9927_v33 }
0x1460   :  { %10093 = vmatprep.mubr.bf16.mxu1 %v19767_v1 }
0x1467   :  { %17256 = vmatmul.mubr.msk.bf16.vlgmr.msra.gmra.mrb[120].mxu1 %vm115_vm2, %v10030_v49  ;;  %v19250_v49 = vld [vmem:[%s24644_s10 + $0x50] sm:$0xff]  }
0x1468   :  { %10103 = vmatprep.mubr.bf16.mxu1 %v19767_v1  ;;  %10160 = vmatpush1.bf16.msra.mxu1 %v19234_v37 }
0x1469   :  { %17266 = vmatprep.subr.msk.bf16.mxu1 %vm122_vm0, %v19237_v48 }
0x146c   :  { %10162 = vmatpush1.bf16.msra.mxu1 %v10154_v38 }
0x146d   :  { %10578 = vmatprep.subr.bf16.mxu1 %v19767_v1 }
0x146f   :  { %17257 = vmatmul.mubr.msk.bf16.gmra.mrb[124].mxu1 %vm115_vm2, %v10029_v47  ;;  %v19249_v47 = vld [vmem:[%s24644_s10 + $0x48] sm:$0xff]  }
0x1470   :  { %10191 = vmatprep.mubr.bf16.mxu1 %v19767_v1 }
0x1477   :  { %17267 = vmatmul.mubr.msk.bf16.vlgmr.msra.gmra.mrb[120].mxu1 %vm115_vm2, %v10128_v53 }
0x1478   :  { %10201 = vmatprep.mubr.bf16.mxu1 %v19767_v1 }
0x147f   :  { %17268 = vmatmul.mubr.msk.bf16.gmra.mrb[124].mxu1 %vm115_vm2, %v10127_v52 }
0x1502   :  { %v9317_v55 = vpop.f32.mrb[116].mxu1 }
0x1503   :  { %v9319_v57 = vpop.f32.mrb[117].mxu1 }
0x1504   :  { %v9321_v59 = vpop.f32.mrb[118].mxu1 }
0x1505   :  { %v9330_v60 = vpack.c.bf16 %v9321_v59, %v9317_v55  ;;  %v9323_v62 = vpop.f32.mrb[119].mxu1 }
0x1506   :  { %v9331_v0 = vpack.c.bf16 %v9323_v62, %v9319_v57  ;;  %v19251_v62 = vld [vmem:[%s24647_s11] sm:$0xff]  }
0x1507   :  { %v9337_v63 = vand.u32 %v9330_v60, %v20345_v39 }
0x1508   :  { %v9340_v2 = vand.u32 %v9331_v0, %v20345_v39 }
0x150a   :  { %9342 = vmatprep.subr.bf16.mxu0 %v9340_v2 }
0x150b   :  { %9343 = vmatpush1.bf16.msra.mxu0 %v9337_v63 }
0x150c   :  { %9387 = vmatprep.subr.bf16.mxu0 %v9340_v2  ;;  %v19252_v2 = vld [vmem:[%s24647_s11 + $0x8] sm:$0xff]  }
0x150e   :  { %17187 = vmatmul.mubr.msk.bf16.vlgmr.msra.gmra.mrb[84].mxu0 %vm24716_vm10, %v9332_v3  ;;  %vm24718_vm10 = vcmask 392192   ;;  %v19254_v3 = vld [vmem:[%s24647_s11 + $0x18] sm:$0xff]  }
0x150f   :  { %9388 = vmatpush1.bf16.msra.mxu0 %v9337_v63  ;;  %9419 = vmatprep.mubr.bf16.mxu0 %v19767_v1  ;;  %v19253_v63 = vld [vmem:[%s24647_s11 + $0x10] sm:$0xff]  }
0x1510   :  { %9523 = vmatprep.subr.bf16.mxu0 %v19767_v1 }
0x1516   :  { %17188 = vmatmul.mubr.msk.bf16.vlgmr.msra.gmra.mrb[88].mxu0 %vm24717_vm9, %v9383_v46  ;;  %vm24719_vm9 = vmmov %vm24718_vm10  ;;  %v19255_v46 = vld [vmem:[%s24647_s11 + $0x20] sm:$0xff]  }
0x1517   :  { %9524 = vmatpush1.bf16.msra.mxu0 %v19240_v4  ;;  %v19256_v4 = vld [vmem:[%s24647_s11 + $0x28] sm:$0xff]  }
0x1518   :  { %9525 = vmatprep.subr.bf16.mxu0 %v19767_v1 }
0x151b   :  { %9526 = vmatpush1.bf16.msra.mxu0 %v19241_v5  ;;  %v19257_v5 = vld [vmem:[%s24647_s11 + $0x30] sm:$0xff]  }
0x151c   :  { %9527 = vmatprep.subr.bf16.mxu0 %v19767_v1 }
0x151f   :  { %9528 = vmatpush1.bf16.msra.mxu0 %v19242_v6  ;;  %v19258_v6 = vld [vmem:[%s24647_s11 + $0x38] sm:$0xff]  }
0x1520   :  { %9529 = vmatprep.subr.bf16.mxu0 %v19767_v1 }
0x1523   :  { %9530 = vmatpush1.bf16.msra.mxu0 %v19243_v8  ;;  %v19259_v8 = vld [vmem:[%s24647_s11 + $0x40] sm:$0xff]  }
0x1524   :  { %9531 = vmatprep.subr.bf16.mxu0 %v19767_v1 }
0x1527   :  { %9532 = vmatpush1.bf16.msra.mxu0 %v19244_v10  ;;  %v19260_v10 = vld [vmem:[%s24647_s11 + $0x48] sm:$0xff]  }
0x1528   :  { %9533 = vmatprep.subr.bf16.mxu0 %v19767_v1 }
0x152b   :  { %9534 = vmatpush1.bf16.msra.mxu0 %v19245_v11  ;;  %v19261_v11 = vld [vmem:[%s24647_s11 + $0x50] sm:$0xff]  }
0x152c   :  { %9535 = vmatprep.subr.bf16.mxu0 %v19767_v1 }
0x152f   :  { %9536 = vmatpush1.bf16.msra.mxu0 %v19246_v9 }
0x1530   :  { %9537 = vmatprep.subr.bf16.mxu0 %v19767_v1 }
0x1533   :  { %9538 = vmatpush1.bf16.msra.mxu0 %v19247_v12  ;;  %v19262_v12 = vld [vmem:[%s24686_s0] sm:$0xff]  }
0x1534   :  { %9539 = vmatprep.subr.bf16.mxu0 %v19767_v1 }
0x1537   :  { %9540 = vmatpush1.bf16.msra.mxu0 %v19248_v45 }
0x1538   :  { %9541 = vmatprep.subr.bf16.mxu0 %v19767_v1 }
0x153b   :  { %9542 = vmatpush1.bf16.msra.mxu0 %v19249_v47 }
0x153c   :  { %9543 = vmatprep.subr.bf16.mxu0 %v19767_v1 }
0x153f   :  { %9544 = vmatpush1.bf16.msra.mxu0 %v19250_v49 }
0x1540   :  { %9651 = vmatprep.subr.bf16.mxu0 %v19767_v1 }
0x154a   :  { %v10193_v16 = vpop.f32.mrb[120].mxu1 }
0x154b   :  { %v10232_v17 = vadd.f32 %v10225_v14, %v10193_v16  ;;  %v10195_v61 = vpop.f32.mrb[121].mxu1  ;;  %v19266_v16 = vld [vmem:[%s24688_s26 + $0x8] sm:$0xff]  }
0x154c   :  { %v10233_v18 = vadd.f32 %v10229_v15, %v10195_v61  ;;  %v10197_v19 = vpop.f32.mrb[122].mxu1  ;;  %v19268_v61 = vld [vmem:[%s24688_s26 + $0x10] sm:$0xff]  }
0x154d   :  { %v10240_v20 = vmax.f32 %v10232_v17, 0.0  ;;  %v10234_v22 = vadd.f32 %v10225_v14, %v10197_v19  ;;  %v10199_v24 = vpop.f32.mrb[123].mxu1  ;;  %v19267_v17 = vld [vmem:[%s24642_s7 + $0x8] sm:$0xff]   ;;  %v19270_v19 = vld [vmem:[%s24688_s26 + $0x18] sm:$0xff]  }
0x154e   :  { %v10241_v25 = vmax.f32 %v10233_v18, 0.0  ;;  %v10235_v23 = vadd.f32 %v10229_v15, %v10199_v24  ;;  %v19269_v18 = vld [vmem:[%s24642_s7 + $0x10] sm:$0xff]   ;;  %v19273_v24 = vld [vmem:[%s24642_s7 + $0x20] sm:$0xff]  }
0x154f   :  { %v10242_v26 = vmax.f32 %v10234_v22, 0.0  ;;  %v19272_v22 = vld [vmem:[%s24688_s26 + $0x20] sm:$0xff]  }
0x1550   :  { %v10243_v7 = vmax.f32 %v10235_v23, 0.0  ;;  %v19275_v23 = vld [vmem:[%s24642_s7 + $0x28] sm:$0xff]  }
0x1551   :  { %v22794_v27 = vpack.c.bf16 %v10242_v26, %v10240_v20  ;;  %v19271_v20 = vld [vmem:[%s24642_s7 + $0x18] sm:$0xff]   ;;  %v19276_v26 = vld [vmem:[%s24688_s26 + $0x30] sm:$0xff]  }
0x1552   :  { %v22796_v28 = vpack.c.bf16 %v10243_v7, %v10241_v25  ;;  %v10203_v30 = vpop.f32.mrb[124].mxu1  ;;  %v19274_v25 = vld [vmem:[%s24688_s26 + $0x28] sm:$0xff]   ;;  %v19277_v7 = vld [vmem:[%s24642_s7 + $0x30] sm:$0xff]  }
0x1553   :  { %v10236_v31 = vadd.f32 %v10225_v14, %v10203_v30  ;;  %v10205_v32 = vpop.f32.mrb[125].mxu1  ;;  %v19280_v30 = vld [vmem:[%s24688_s26 + $0x40] sm:$0xff]  }
0x1554   :  { %v10237_v33 = vadd.f32 %v10229_v15, %v10205_v32  ;;  %v10207_v29 = vpop.f32.mrb[126].mxu1  ;;  %v19282_v32 = vld [vmem:[%s24688_s26 + $0x48] sm:$0x3f]  }
0x1555   :  { %v10244_v34 = vmax.f32 %v10236_v31, 0.0  ;;  %v10238_v35 = vadd.f32 %v10225_v14, %v10207_v29  ;;  %v10209_v36 = vpop.f32.mrb[127].mxu1  ;;  %v19264_v14 = vld [vmem:[%s24688_s26] sm:$0xff]   ;;  %v10453_v29 = vsel %vm474_vm3, %v19282_v32, 0 }
0x1556   :  { %v10245_v42 = vmax.f32 %v10237_v33, 0.0  ;;  %v10239_v44 = vadd.f32 %v10229_v15, %v10209_v36  ;;  %v19265_v15 = vld [vmem:[%s24642_s7] sm:$0xff]   ;;  %v19283_v33 = vld [vmem:[%s24642_s7 + $0x48] sm:$0x3f]  }
0x1557   :  { %v10246_v40 = vmax.f32 %v10238_v35, 0.0  ;;  %10579 = vmatpush1.bf16.msra.mxu1 %v19265_v15  ;;  %v19281_v31 = vld [vmem:[%s24642_s7 + $0x40] sm:$0xff]  }
0x1558   :  { %v10247_v21 = vmax.f32 %v10239_v44, 0.0  ;;  %10580 = vmatprep.subr.bf16.mxu1 %v19767_v1  ;;  %v19296_v15 = vld [vmem:[%s24643_s3 + $0xa0] ss:$8 sps:$4 sm:$0xff]  }
0x1559   :  { %v22798_v43 = vpack.c.bf16 %v10246_v40, %v10244_v34  ;;  %v10576_v34 = vsel %vm474_vm3, %v19283_v33, 0 }
0x155a   :  { %v22800_v41 = vpack.c.bf16 %v10247_v21, %v10245_v42  ;;  %v17213_v21 = vld [vmem:[%s24648_s13] ss:$0 sm:$0xff] }
0x155b   :  { %v10263_v9 = vsel %vm612_vm5, %v22798_v43, 0  ;;  %10581 = vmatpush1.bf16.msra.mxu1 %v19267_v17  ;;  %v19301_v17 = vld [vmem:[%s24643_s3 + $0xb0] ss:$8 sps:$4 sm:$0x1f]  }
0x155c   :  { %10582 = vmatprep.subr.bf16.mxu1 %v19767_v1 }
0x155f   :  { %10583 = vmatpush1.bf16.msra.mxu1 %v19269_v18  ;;  %v10715_v18 = vsel %vm612_vm5, %v19301_v17, 0  ;;  %v19352_v17 = vld [vmem:[%s24643_s3 + $0x164] ss:$8 sps:$4 sm:$0xff]  }
0x1560   :  { %10584 = vmatprep.subr.bf16.mxu1 %v19767_v1 }
0x1563   :  { %10585 = vmatpush1.bf16.msra.mxu1 %v19271_v20 }
0x1564   :  { %10586 = vmatprep.subr.bf16.mxu1 %v19767_v1 }
0x1567   :  { %10587 = vmatpush1.bf16.msra.mxu1 %v19273_v24 }
0x1568   :  { %10588 = vmatprep.subr.bf16.mxu1 %v19767_v1 }
0x156b   :  { %10589 = vmatpush1.bf16.msra.mxu1 %v19275_v23 }
0x156c   :  { %10590 = vmatprep.subr.bf16.mxu1 %v19767_v1 }
0x156f   :  { %10591 = vmatpush1.bf16.msra.mxu1 %v19277_v7 }
0x1570   :  { %10592 = vmatprep.subr.bf16.mxu1 %v19767_v1 }
0x15e1   :  { %v9376_v37 = vpop.f32.mrb[84].mxu0 }
0x15e2   :  { %v9378_v48 = vpop.f32.mrb[85].mxu0 }
0x15e3   :  { %v9380_v50 = vpop.f32.mrb[86].mxu0 }
0x15e4   :  { %v9381_v38 = vpop.f32.mrb[87].mxu0 }
0x15e9   :  { %v9421_v51 = vpop.f32.mrb[88].mxu0 }
0x15ea   :  { %v9428_v52 = vmax.f32 %v9376_v37, %v9421_v51  ;;  %v9423_v53 = vpop.f32.mrb[89].mxu0  ;;  %v19286_v37 = vld [vmem:[%s24643_s3 + $0x64] ss:$8 sps:$4 sm:$0xff]  }
0x15eb   :  { %v9429_v55 = vmax.f32 %v9378_v48, %v9423_v53  ;;  %v9425_v57 = vpop.f32.mrb[90].mxu0 }
0x15ec   :  { %v9426_v59 = vpop.f32.mrb[91].mxu0  ;;  %v9430_v0 = vpack.c.bf16 %v9428_v52, %v9428_v52 }
0x15ed   :  { %v9431_v60 = vpack.c.bf16 %v9429_v55, %v9429_v55 }
0x15ef   :  { %17200 = vmatprep.mubr.msk.bf16.mxu0 %vm24718_vm10, %v9431_v60  ;;  %vm24720_vm10 = vcmask 211968  }
0x15f0   :  { %9556 = vmatmul.mubr.bf16.vlgmr.msra.gmra.mrb[92].mxu0 %v9430_v0 }
0x15f1   :  { %9652 = vmatpush1.bf16.msra.mxu0 %v19251_v62  ;;  %17212 = vmatprep.mubr.msk.bf16.mxu0 %vm24719_vm9, %v9431_v60  ;;  %vm24721_vm9 = vmmov %vm24720_vm10 }
0x15f2   :  { %9653 = vmatprep.subr.bf16.mxu0 %v19767_v1 }
0x15f5   :  { %9654 = vmatpush1.bf16.msra.mxu0 %v19252_v2 }
0x15f6   :  { %9655 = vmatprep.subr.bf16.mxu0 %v19767_v1 }
0x15f9   :  { %9656 = vmatpush1.bf16.msra.mxu0 %v19253_v63 }
0x15fa   :  { %9657 = vmatprep.subr.bf16.mxu0 %v19767_v1 }
0x15fd   :  { %9658 = vmatpush1.bf16.msra.mxu0 %v19254_v3 }
0x15fe   :  { %9659 = vmatprep.subr.bf16.mxu0 %v19767_v1 }
0x1601   :  { %9660 = vmatpush1.bf16.msra.mxu0 %v19255_v46 }
0x1602   :  { %9661 = vmatprep.subr.bf16.mxu0 %v19767_v1 }
0x1605   :  { %9662 = vmatpush1.bf16.msra.mxu0 %v19256_v4 }
0x1606   :  { %9663 = vmatprep.subr.bf16.mxu0 %v19767_v1 }
0x1609   :  { %9664 = vmatpush1.bf16.msra.mxu0 %v19257_v5 }
0x160a   :  { %9665 = vmatprep.subr.bf16.mxu0 %v19767_v1 }
0x160d   :  { %9666 = vmatpush1.bf16.msra.mxu0 %v19258_v6  ;;  %v19284_v6 = vld [vmem:[%s24643_s3 + $0x60] ss:$8 sps:$4 sm:$0xff]  }
0x160e   :  { %9667 = vmatprep.subr.bf16.mxu0 %v19767_v1 }
0x1611   :  { %9668 = vmatpush1.bf16.msra.mxu0 %v19259_v8  ;;  %v19289_v8 = vld [vmem:[%s24643_s3 + $0x74] ss:$8 sps:$4 sm:$0xff]  }
0x1612   :  { %9669 = vmatprep.subr.bf16.mxu0 %v19767_v1 }
0x1615   :  { %9670 = vmatpush1.bf16.msra.mxu0 %v19260_v10  ;;  %v19287_v10 = vld [vmem:[%s24643_s3 + $0x70] ss:$8 sps:$4 sm:$0xff]  }
0x1616   :  { %9671 = vmatprep.subr.bf16.mxu0 %v19767_v1 }
0x1619   :  { %9672 = vmatpush1.bf16.msra.mxu0 %v19261_v11  ;;  %v19292_v11 = vld [vmem:[%s24643_s3 + $0x84] ss:$8 sps:$4 sm:$0xff]  }
0x161a   :  { %10268 = vmatprep.subr.bf16.mxu0 %v22796_v28 }
0x161c   :  { %9684 = vmatmul.mubr.bf16.vlgmr.msra.gmra.mrb[96].mxu0 %v9430_v0 }
0x161d   :  { %10269 = vmatpush1.bf16.msra.mxu0 %v22794_v27  ;;  %10300 = vmatprep.mubr.bf16.mxu0 %v19767_v1 }
0x161e   :  { %17270 = vmatprep.subr.msk.bf16.mxu0 %vm612_vm5, %v22800_v41 }
0x1621   :  { %10271 = vmatpush1.bf16.msra.mxu0 %v10263_v9 }
0x1622   :  { %10321 = vmatprep.subr.bf16.mxu0 %v22796_v28  ;;  %v19279_v28 = vld [vmem:[%s24642_s7 + $0x38] sm:$0xff]  }
0x1623   :  { %10593 = vmatpush1.bf16.msra.mxu1 %v19279_v28 }
0x1624   :  { %17271 = vmatmul.mubr.msk.bf16.vlgmr.msra.gmra.mrb[100].mxu0 %vm24720_vm10, %v19262_v12  ;;  %10594 = vmatprep.subr.bf16.mxu1 %v19767_v1  ;;  %vm24722_vm10 = vcmask 647168   ;;  %v19295_v12 = vld [vmem:[%s24643_s3 + $0x94] ss:$8 sps:$4 sm:$0xff]  }
0x1625   :  { %10322 = vmatpush1.bf16.msra.mxu0 %v22794_v27  ;;  %10353 = vmatprep.mubr.bf16.mxu0 %v19767_v1  ;;  %v19278_v27 = vld [vmem:[%s24688_s26 + $0x38] sm:$0xff]  }
0x1626   :  { %17273 = vmatprep.subr.msk.bf16.mxu0 %vm612_vm5, %v22800_v41 }
0x1627   :  { %10595 = vmatpush1.bf16.msra.mxu1 %v19281_v31 }
0x1628   :  { %10596 = vmatprep.subr.bf16.mxu1 %v19767_v1 }
0x1629   :  { %10324 = vmatpush1.bf16.msra.mxu0 %v10263_v9  ;;  %v19290_v9 = vld [vmem:[%s24643_s3 + $0x80] ss:$8 sps:$4 sm:$0xff]  }
0x162a   :  { %10455 = vmatprep.subr.bf16.mxu0 %v19767_v1 }
0x162b   :  { %10597 = vmatpush1.bf16.msra.mxu1 %v10576_v34 }
0x162c   :  { %17274 = vmatmul.mubr.msk.bf16.vlgmr.msra.gmra.mrb[104].mxu0 %vm24721_vm9, %v19263_v13  ;;  %vm24723_vm9 = vcmask 228352   ;;  %v19293_v13 = vld [vmem:[%s24643_s3 + $0x90] ss:$8 sps:$4 sm:$0xff]  }
0x162d   :  { %10456 = vmatpush1.bf16.msra.mxu0 %v19264_v14  ;;  %v19298_v14 = vld [vmem:[%s24643_s3 + $0xa4] ss:$8 sps:$4 sm:$0xff]  }
0x162e   :  { %10457 = vmatprep.subr.bf16.mxu0 %v19767_v1 }
0x1631   :  { %10458 = vmatpush1.bf16.msra.mxu0 %v19266_v16  ;;  %v19299_v16 = vld [vmem:[%s24643_s3 + $0xb4] ss:$8 sps:$4 sm:$0x1f]  }
0x1632   :  { %10459 = vmatprep.subr.bf16.mxu0 %v19767_v1 }
0x1635   :  { %10460 = vmatpush1.bf16.msra.mxu0 %v19268_v61  ;;  %v19304_v61 = vld [vmem:[%s24643_s3 + $0x4] ss:$8 sps:$4 sm:$0xff]  }
0x1636   :  { %10461 = vmatprep.subr.bf16.mxu0 %v19767_v1 }
0x1639   :  { %10462 = vmatpush1.bf16.msra.mxu0 %v19270_v19 }
0x163a   :  { %10463 = vmatprep.subr.bf16.mxu0 %v19767_v1 }
0x163d   :  { %10464 = vmatpush1.bf16.msra.mxu0 %v19272_v22 }
0x163e   :  { %10465 = vmatprep.subr.bf16.mxu0 %v19767_v1 }
0x1641   :  { %10466 = vmatpush1.bf16.msra.mxu0 %v19274_v25 }
0x1642   :  { %10467 = vmatprep.subr.bf16.mxu0 %v19767_v1 }
0x1645   :  { %10468 = vmatpush1.bf16.msra.mxu0 %v19276_v26 }
0x1646   :  { %10469 = vmatprep.subr.bf16.mxu0 %v19767_v1 }
0x1649   :  { %10470 = vmatpush1.bf16.msra.mxu0 %v19278_v27 }
0x164a   :  { %10471 = vmatprep.subr.bf16.mxu0 %v19767_v1 }
0x164d   :  { %10472 = vmatpush1.bf16.msra.mxu0 %v19280_v30 }
0x164e   :  { %10473 = vmatprep.subr.bf16.mxu0 %v19767_v1 }
0x1651   :  { %10474 = vmatpush1.bf16.msra.mxu0 %v10453_v29 }
0x1652   :  { %10720 = vmatprep.subr.bf16.mxu0 %v19286_v37  ;;  %v19311_v37 = vld [vmem:[%s24643_s3 + $0x30] ss:$8 sps:$4 sm:$0xff]  }
0x16c3   :  { %v9557_v35 = vpop.f32.mrb[92].mxu0 }
0x16c4   :  { %v9559_v36 = vpop.f32.mrb[93].mxu0 }
0x16c5   :  { %v9560_v42 = vpop.f32.mrb[94].mxu0 }
0x16c6   :  { %v9561_v44 = vpop.f32.mrb[95].mxu0 }
0x16c7   :  { %v19302_v44 = vld [vmem:[%s24643_s3] ss:$8 sps:$4 sm:$0xff]  }
0x16ef   :  { %v9685_v40 = vpop.f32.mrb[96].mxu0 }
0x16f0   :  { %v9691_v43 = vmax.f32 %v9557_v35, %v9685_v40  ;;  %v9687_v41 = vpop.f32.mrb[97].mxu0 }
0x16f1   :  { %v9688_v45 = vpop.f32.mrb[98].mxu0  ;;  %v19305_v41 = vld [vmem:[%s24643_s3 + $0x10] ss:$8 sps:$4 sm:$0xff]  }
0x16f2   :  { %v9699_v47 = vadd.f32 %v17213_v21, %v9691_v43  ;;  %v9689_v49 = vpop.f32.mrb[99].mxu0  ;;  %v19307_v21 = vld [vmem:[%s24643_s3 + $0x14] ss:$8 sps:$4 sm:$0xff]   ;;  %v19310_v45 = vld [vmem:[%s24643_s3 + $0x24] ss:$8 sps:$4 sm:$0xff]  }
0x16f3   :  { %v19313_v49 = vld [vmem:[%s24643_s3 + $0x34] ss:$8 sps:$4 sm:$0xff]  }
0x16f4   :  { %v22966_v48 = vmax.f32 %v9699_v47, 0.0  ;;  %v19308_v47 = vld [vmem:[%s24643_s3 + $0x20] ss:$8 sps:$4 sm:$0xff]  }
0x16f6   :  { %9701 = vst.msk [vmem:[#allocation2 + $0x4] sm:$0x1] %vm24722_vm10, %v22966_v48  ;;  %v9703_v50 = vrot.slane %v22966_v48, 1  ;;  %v9709_v55 = vrot.slane %v22966_v48, 2  ;;  %v9714_v57 = vrot.slane %v22966_v48, 3  ;;  %vm24724_vm10 = vmmov %vm24723_vm9 }
0x16f7   :  { %v10302_v38 = vpop.f32.mrb[100].mxu0 }
0x16f8   :  { %9704 = vrot.lane.b32.xlu0 %v9703_v50, %s24693_s6  ;;  %v10304_v51 = vpop.f32.mrb[101].mxu0  ;;  %v19316_v50 = vld [vmem:[%s24643_s3 + $0x44] ss:$8 sps:$4 sm:$0xff]  }
0x16f9   :  { %v10306_v52 = vpop.f32.mrb[102].mxu0 }
0x16fa   :  { %v10308_v53 = vpop.f32.mrb[103].mxu0 }
0x16fc   :  { %9710 = vrot.lane.b32.xlu0 %v9709_v55, %s24692_s5  ;;  %v19322_v55 = vld [vmem:[%s24643_s3 + $0xc4] ss:$8 sps:$4 sm:$0xff]  }
0x16ff   :  { %v10355_v59 = vpop.f32.mrb[104].mxu0 }
0x1700   :  { %v10364_v60 = vmax.f32 %v10302_v38, %v10355_v59  ;;  %9715 = vrot.lane.b32.xlu0 %v9714_v57, %s24694_s30  ;;  %v10357_v62 = vpop.f32.mrb[105].mxu0  ;;  %v19314_v38 = vld [vmem:[%s24643_s3 + $0x40] ss:$8 sps:$4 sm:$0xff]   ;;  %v19325_v59 = vld [vmem:[%s24643_s3 + $0xd4] ss:$8 sps:$4 sm:$0xff]  }
0x1701   :  { %v10365_v0 = vmax.f32 %v10304_v51, %v10357_v62  ;;  %v10359_v2 = vpop.f32.mrb[106].mxu0  ;;  %v19317_v51 = vld [vmem:[%s24643_s3 + $0x54] ss:$8 sps:$4 sm:$0x1f]   ;;  %v19320_v57 = vld [vmem:[%s24643_s3 + $0xc0] ss:$8 sps:$4 sm:$0xff]  }
0x1702   :  { %v10366_v63 = vmax.f32 %v10306_v52, %v10359_v2  ;;  %v10361_v3 = vpop.f32.mrb[107].mxu0  ;;  %v19319_v52 = vld [vmem:[%s24643_s3 + $0x50] ss:$8 sps:$4 sm:$0x1f]   ;;  %v19328_v62 = vld [vmem:[%s24643_s3 + $0xe4] ss:$8 sps:$4 sm:$0xff]  }
0x1703   :  { %v10367_v46 = vmax.f32 %v10308_v53, %v10361_v3  ;;  %v10824_v53 = vsel %vm612_vm5, %v19319_v52, 0  ;;  %v19331_v2 = vld [vmem:[%s24643_s3 + $0xf4] ss:$8 sps:$4 sm:$0xff]   ;;  %v19334_v3 = vld [vmem:[%s24643_s3 + $0x104] ss:$8 sps:$4 sm:$0xff]  }
0x1704   :  { %v10368_v4 = vpack.c.bf16 %v10366_v63, %v10364_v60  ;;  %v19323_v60 = vld [vmem:[%s24643_s3 + $0xd0] ss:$8 sps:$4 sm:$0xff]  }
0x1705   :  { %v10369_v5 = vpack.c.bf16 %v10367_v46, %v10365_v0  ;;  %v19326_v0 = vld [vmem:[%s24643_s3 + $0xe0] ss:$8 sps:$4 sm:$0xff]   ;;  %v19329_v63 = vld [vmem:[%s24643_s3 + $0xf0] ss:$8 sps:$4 sm:$0xff]  }
0x1706   :  { %v19332_v46 = vld [vmem:[%s24643_s3 + $0x100] ss:$8 sps:$4 sm:$0xff]  }
0x1707   :  { %17285 = vmatprep.mubr.msk.bf16.mxu0 %vm24723_vm9, %v10369_v5  ;;  %17296 = vmatprep.mubr.msk.bf16.mxu1 %vm24724_vm10, %v10369_v5  ;;  %v19337_v5 = vld [vmem:[%s24643_s3 + $0x110] ss:$8 sps:$4 sm:$0x1f]   ;;  %vm24725_vm9 = vcmask 89088  }
0x1708   :  { %10488 = vmatmul.mubr.bf16.vlgmr.msra.gmra.mrb[108].mxu0 %v10368_v4  ;;  %10611 = vmatmul.mubr.bf16.vlgmr.msra.gmra.mrb[128].mxu1 %v10368_v4  ;;  %v19335_v4 = vld [vmem:[%s24643_s3 + $0x114] ss:$8 sps:$4 sm:$0x1f]   ;;  %vm24726_vm10 = vmmov %vm24725_vm9 }
0x1709   :  { %10721 = vmatpush1.bf16.msra.mxu0 %v19284_v6  ;;  %10752 = vmatprep.mubr.bf16.mxu0 %v19767_v1  ;;  %v10948_v6 = vsel %vm612_vm5, %v19337_v5, 0  ;;  %v19391_v5 = vld [vmem:[%s24684_s23 + $0x50] ss:$8 sps:$4 sm:$0x7f]  }
0x170a   :  { %10722 = vmatprep.subr.bf16.mxu0 %v19289_v8  ;;  %11300 = vmatprep.mubr.bf16.mxu1 %v19767_v1  ;;  %v19340_v8 = vld [vmem:[%s24643_s3 + $0x124] ss:$8 sps:$4 sm:$0xff]  }
0x170d   :  { %10723 = vmatpush1.bf16.msra.mxu0 %v19287_v10  ;;  %v19338_v10 = vld [vmem:[%s24643_s3 + $0x120] ss:$8 sps:$4 sm:$0xff]  }
0x170e   :  { %10724 = vmatprep.subr.bf16.mxu0 %v19292_v11 }
0x1711   :  { %10725 = vmatpush1.bf16.msra.mxu0 %v19290_v9  ;;  %v19343_v9 = vld [vmem:[%s24643_s3 + $0x134] ss:$8 sps:$4 sm:$0xff]  }
0x1712   :  { %10726 = vmatprep.subr.bf16.mxu0 %v19295_v12  ;;  %v19341_v12 = vld [vmem:[%s24643_s3 + $0x130] ss:$8 sps:$4 sm:$0xff]  }
0x1715   :  { %10727 = vmatpush1.bf16.msra.mxu0 %v19293_v13  ;;  %v19346_v13 = vld [vmem:[%s24643_s3 + $0x144] ss:$8 sps:$4 sm:$0xff]  }
0x1716   :  { %10728 = vmatprep.subr.bf16.mxu0 %v19298_v14  ;;  %v19344_v14 = vld [vmem:[%s24643_s3 + $0x140] ss:$8 sps:$4 sm:$0xff]  }
0x1719   :  { %10729 = vmatpush1.bf16.msra.mxu0 %v19296_v15  ;;  %v19349_v15 = vld [vmem:[%s24643_s3 + $0x154] ss:$8 sps:$4 sm:$0xff]  }
0x171a   :  { %17321 = vmatprep.subr.msk.bf16.mxu0 %vm612_vm5, %v19299_v16  ;;  %v19347_v16 = vld [vmem:[%s24643_s3 + $0x150] ss:$8 sps:$4 sm:$0xff]  }
0x171d   :  { %10731 = vmatpush1.bf16.msra.mxu0 %v10715_v18  ;;  %v19353_v18 = vld [vmem:[%s24643_s3 + $0x174] ss:$8 sps:$4 sm:$0x1f]  }
0x171e   :  { %10829 = vmatprep.subr.bf16.mxu0 %v19304_v61  ;;  %v19350_v61 = vld [vmem:[%s24643_s3 + $0x160] ss:$8 sps:$4 sm:$0xff]  }
0x176a   :  { %v9705_v19 = vpop.permute.xlu0 %9704 }
0x176b   :  { %9707 = vst.msk [vmem:[#allocation2 + $0x4] sm:$0x1] %vm1996_vm12, %v9705_v19 }
0x176c   :  { %9708 = vst.msk [vmem:[#allocation2 + $0xc] sm:$0x1] %vm1998_vm13, %v9705_v19  ;;  %v19355_v19 = vld [vmem:[%s24643_s3 + $0x170] ss:$8 sps:$4 sm:$0x1f]  }
0x176e   :  { %v9711_v20 = vpop.permute.xlu0 %9710 }
0x176f   :  { %9713 = vst.msk [vmem:[#allocation2 + $0xc] sm:$0x1] %vm2004_vm14, %v9711_v20  ;;  %v11077_v20 = vsel %vm612_vm5, %v19355_v19, 0 }
0x1772   :  { %v9716_v22 = vpop.permute.xlu0 %9715 }
0x1773   :  { %9718 = vst.msk [vmem:[#allocation2 + $0xc] sm:$0x1] %vm2010_vm15, %v9716_v22 }
0x1774   :  { %9719 = vst.msk [vmem:[#allocation2 + $0x14] sm:$0x1] %vm2012_vm7, %v9716_v22  ;;  %v19358_v22 = vld [vmem:[%s24643_s3 + $0x184] ss:$8 sps:$4 sm:$0xff]  }
0x17db   :  { %v10489_v24 = vpop.f32.mrb[108].mxu0  ;;  %v10612_v25 = vpop.f32.mrb[128].mxu1 }
0x17dc   :  { %v10619_v23 = vmax.f32 %v10489_v24, %v10612_v25  ;;  %v10491_v26 = vpop.f32.mrb[109].mxu0  ;;  %v10614_v7 = vpop.f32.mrb[129].mxu1  ;;  %v19356_v24 = vld [vmem:[%s24643_s3 + $0x180] ss:$8 sps:$4 sm:$0xff]   ;;  %v19361_v25 = vld [vmem:[%s24643_s3 + $0x194] ss:$8 sps:$4 sm:$0xff]  }
0x17dd   :  { %v10492_v27 = vpop.f32.mrb[110].mxu0  ;;  %v10615_v28 = vpop.f32.mrb[130].mxu1  ;;  %v19364_v26 = vld [vmem:[%s24643_s3 + $0x1a4] ss:$8 sps:$4 sm:$0xff]   ;;  %v19362_v7 = vld [vmem:[%s24643_s3 + $0x1a0] ss:$8 sps:$4 sm:$0xff]  }
0x17de   :  { %v10620_v30 = vmax.f32 %v10492_v27, %v10615_v28  ;;  %v10494_v31 = vpop.f32.mrb[111].mxu0  ;;  %v10617_v32 = vpop.f32.mrb[131].mxu1  ;;  %v19367_v27 = vld [vmem:[%s24643_s3 + $0x1b4] ss:$8 sps:$4 sm:$0xff]   ;;  %v19365_v28 = vld [vmem:[%s24643_s3 + $0x1b0] ss:$8 sps:$4 sm:$0xff]  }
0x17df   :  { %v17442_v31 = vld [vmem:[%s24685_s29 + $0xc0] sm:$0xff]  ;;  %v17443_v32 = vld [vmem:[%s24685_s29 + $0xc8] sm:$0xff] }
0x17e0   :  { %v23023_v33 = vpack.c.bf16 %v10620_v30, %v10619_v23  ;;  %v19359_v23 = vld [vmem:[%s24643_s3 + $0x190] ss:$8 sps:$4 sm:$0xff]   ;;  %v19370_v30 = vld [vmem:[%s24643_s3 + $0x1c4] ss:$8 sps:$4 sm:$0xff]  }
0x17e2   :  { %v10649_v29 = vshll.u32 %v23023_v33, 16  ;;  %v10647_v34 = vshrl.u32 %v23023_v33, 16  ;;  %v10885_v11 = vrot.slane %v23023_v33, 1 }
0x17e4   :  { %v10651_v35 = vrot.slane %v10649_v29, 1  ;;  %v23027_v36 = vrot.slane %v10647_v34, 1  ;;  %v23029_v42 = vrot.slane %v10649_v29, 2  ;;  %v19368_v29 = vld [vmem:[%s24643_s3 + $0x1c0] ss:$8 sps:$4 sm:$0xff]  }
0x17e6   :  { %v10652_v40 = vor.u32 %v10651_v35, %v10647_v34  ;;  %v11014_v43 = vor.u32 %v23029_v42, %v23027_v36  ;;  %v19371_v34 = vld [vmem:[%s24643_s3 + $0x1d4] ss:$8 sps:$4 sm:$0x1f]   ;;  %v23196_v35 = vpack.c.bf16 %v17443_v32, %v17442_v31  ;;  %v19373_v36 = vld [vmem:[%s24643_s3 + $0x1d0] ss:$8 sps:$4 sm:$0x1f]  }
0x17e7   :  { %v17444_v42 = vld [vmem:[%s24685_s29 + $0xd0] sm:$0xff] }
0x17e8   :  { %17322 = vmatmul.mubr.msk.bf16.vlgmr.msra.gmra.mrb[112].mxu0 %vm1065_vm8, %v10652_v40 }
0x17e9   :  { %10830 = vmatpush1.bf16.msra.mxu0 %v19302_v44  ;;  %10861 = vmatprep.mubr.bf16.mxu0 %v19767_v1  ;;  %v17445_v44 = vld [vmem:[%s24685_s29 + $0xd8] sm:$0x3f] }
0x17ea   :  { %10831 = vmatprep.subr.bf16.mxu0 %v19307_v21  ;;  %v23207_v40 = vpack.c.bf16 %v17445_v44, %v17444_v42  ;;  %v11670_v21 = vshll.u32 %v23196_v35, 16 }
0x17ec   :  { %v11951_v19 = vrot.slane %v11670_v21, 2 }
0x17ed   :  { %10832 = vmatpush1.bf16.msra.mxu0 %v19305_v41  ;;  %v19376_v41 = vld [vmem:[%s24684_s23 + $0x24] ss:$8 sps:$4 sm:$0xff]  }
0x17ee   :  { %10833 = vmatprep.subr.bf16.mxu0 %v19310_v45  ;;  %v19374_v45 = vld [vmem:[%s24684_s23 + $0x20] ss:$8 sps:$4 sm:$0xff]  }
0x17f1   :  { %10834 = vmatpush1.bf16.msra.mxu0 %v19308_v47  ;;  %v19377_v47 = vld [vmem:[%s24684_s23 + $0x34] ss:$8 sps:$4 sm:$0x7f]  }
0x17f2   :  { %10835 = vmatprep.subr.bf16.mxu0 %v19313_v49  ;;  %v11668_v49 = vshrl.u32 %v23196_v35, 16 }
0x17f5   :  { %10836 = vmatpush1.bf16.msra.mxu0 %v19311_v37  ;;  %v11672_v37 = vrot.slane %v11670_v21, 1  ;;  %v11309_v21 = vld [vmem:[%s24646_s9] sm:$0x7] }
0x17f6   :  { %10837 = vmatprep.subr.bf16.mxu0 %v19316_v50  ;;  %v11675_v50 = vshll.u32 %v23207_v40, 16 }
0x17f7   :  { %v11673_v52 = vor.u32 %v11672_v37, %v11668_v49  ;;  %v19409_v37 = vld [vmem:[%s24644_s10 + $0x28] sm:$0xff]  }
0x17f9   :  { %10838 = vmatpush1.bf16.msra.mxu0 %v19314_v38  ;;  %v11141_v38 = vrot.slane %v23023_v33, 2 }
0x17fa   :  { %17335 = vmatprep.subr.msk.bf16.mxu0 %vm612_vm5, %v19317_v51  ;;  %v19379_v51 = vld [vmem:[%s24684_s23 + $0x30] ss:$8 sps:$4 sm:$0x7f]  }
0x17fd   :  { %10840 = vmatpush1.bf16.msra.mxu0 %v10824_v53  ;;  %v11677_v53 = vrot.slane %v11675_v50, 1 }
0x17fe   :  { %10953 = vmatprep.subr.bf16.mxu0 %v19322_v55  ;;  %v11707_v55 = vsel %vm122_vm0, %v19379_v51, 0  ;;  %v12146_v51 = vld [vmem:[%s24641_s12] sm:$0x3] }
0x1800   :  { %17336 = vmatmul.mubr.msk.bf16.vlgmr.msra.gmra.mrb[112].mxu0 %vm1065_vm8, %v23023_v33  ;;  %v19382_v33 = vld [vmem:[%s24684_s23 + $0x4] ss:$8 sps:$4 sm:$0xff]  }
0x1801   :  { %10954 = vmatpush1.bf16.msra.mxu0 %v19320_v57  ;;  %10985 = vmatprep.mubr.bf16.mxu0 %v19767_v1  ;;  %v11678_v57 = vsel %vm81_vm1, %v11673_v52, %v11677_v53  ;;  %v12151_v52 = vrot.slane %v12146_v51, %v20002_v56 }
0x1802   :  { %10955 = vmatprep.subr.bf16.mxu0 %v19325_v59  ;;  %v19380_v59 = vld [vmem:[%s24684_s23] ss:$8 sps:$4 sm:$0xff]  }
0x1805   :  { %10956 = vmatpush1.bf16.msra.mxu0 %v19323_v60  ;;  %v19383_v60 = vld [vmem:[%s24684_s23 + $0x14] ss:$8 sps:$4 sm:$0x7f]  }
0x1806   :  { %10957 = vmatprep.subr.bf16.mxu0 %v19328_v62  ;;  %v19385_v62 = vld [vmem:[%s24684_s23 + $0x10] ss:$8 sps:$4 sm:$0x7f]  }
0x1809   :  { %10958 = vmatpush1.bf16.msra.mxu0 %v19326_v0  ;;  %v11679_v0 = vshrl.u32 %v23207_v40, 16 }
0x180a   :  { %10959 = vmatprep.subr.bf16.mxu0 %v19331_v2  ;;  %v11788_v2 = vsel %vm122_vm0, %v19385_v62, 0 }
0x180d   :  { %10960 = vmatpush1.bf16.msra.mxu0 %v19329_v63  ;;  %v19388_v63 = vld [vmem:[%s24684_s23 + $0x44] ss:$8 sps:$4 sm:$0xff]  }
0x180e   :  { %10961 = vmatprep.subr.bf16.mxu0 %v19334_v3  ;;  %v11681_v3 = vor.u32 %v11679_v0, %v11677_v53  ;;  %v12155_v53 = vrot.slane %v12146_v51, %v20007_v58  ;;  %v19426_v51 = vld [vmem:[%s24686_s0] sm:$0xff]  }
0x1811   :  { %10962 = vmatpush1.bf16.msra.mxu0 %v19332_v46  ;;  %v19386_v46 = vld [vmem:[%s24684_s23 + $0x40] ss:$8 sps:$4 sm:$0xff]  }
0x1812   :  { %17361 = vmatprep.subr.msk.bf16.mxu0 %vm612_vm5, %v19335_v4  ;;  %v19389_v4 = vld [vmem:[%s24684_s23 + $0x54] ss:$8 sps:$4 sm:$0x7f]  }
0x1815   :  { %10964 = vmatpush1.bf16.msra.mxu0 %v10948_v6  ;;  %v11880_v6 = vsel %vm122_vm0, %v19391_v5, 0 }
0x1816   :  { %11082 = vmatprep.subr.bf16.mxu0 %v19340_v8  ;;  %v19394_v8 = vld [vmem:[%s24684_s23 + $0x64] ss:$8 sps:$4 sm:$0xff]  }
0x1818   :  { %17362 = vmatmul.mubr.msk.bf16.vlgmr.msra.gmra.mrb[112].mxu0 %vm1065_vm8, %v10885_v11  ;;  %v11853_v11 = vrot.slane %v23207_v40, 1 }
0x1819   :  { %11083 = vmatpush1.bf16.msra.mxu0 %v19338_v10  ;;  %11114 = vmatprep.mubr.bf16.mxu0 %v19767_v1  ;;  %v11852_v10 = vrot.slane %v23196_v35, 1 }
0x181a   :  { %11084 = vmatprep.subr.bf16.mxu0 %v19343_v9 }
0x181b   :  { %v11854_v9 = vsel %vm122_vm0, %v11852_v10, %v11853_v11 }
0x181d   :  { %11085 = vmatpush1.bf16.msra.mxu0 %v19341_v12  ;;  %v19392_v12 = vld [vmem:[%s24684_s23 + $0x60] ss:$8 sps:$4 sm:$0xff]  }
0x181e   :  { %11086 = vmatprep.subr.bf16.mxu0 %v19346_v13  ;;  %v19395_v13 = vld [vmem:[%s24684_s23 + $0x74] ss:$8 sps:$4 sm:$0x7f]  }
0x1821   :  { %11087 = vmatpush1.bf16.msra.mxu0 %v19344_v14  ;;  %v19397_v14 = vld [vmem:[%s24684_s23 + $0x70] ss:$8 sps:$4 sm:$0x7f]  }
0x1822   :  { %11088 = vmatprep.subr.bf16.mxu0 %v19349_v15  ;;  %v11982_v15 = vsel %vm122_vm0, %v19397_v14, 0 }
0x1825   :  { %11089 = vmatpush1.bf16.msra.mxu0 %v19347_v16  ;;  %v19400_v16 = vld [vmem:[%s24684_s23 + $0x84] ss:$8 sps:$4 sm:$0xff]  }
0x1826   :  { %11090 = vmatprep.subr.bf16.mxu0 %v19352_v17  ;;  %v11950_v17 = vrot.slane %v11668_v49, 1  ;;  %v19408_v49 = vld [vmem:[%s24644_s10 + $0x20] sm:$0xff]  }
0x1829   :  { %11091 = vmatpush1.bf16.msra.mxu0 %v19350_v61  ;;  %v11954_v61 = vrot.slane %v11675_v50, 2  ;;  %v19410_v50 = vld [vmem:[%s24644_s10 + $0x30] sm:$0xff]  }
0x182a   :  { %17387 = vmatprep.subr.msk.bf16.mxu0 %vm612_vm5, %v19353_v18  ;;  %v11953_v18 = vrot.slane %v11679_v0, 1 }
0x182d   :  { %11093 = vmatpush1.bf16.msra.mxu0 %v11077_v20  ;;  %v11952_v20 = vor.u32 %v11951_v19, %v11950_v17 }
0x182e   :  { %11209 = vmatprep.subr.bf16.mxu0 %v19358_v22  ;;  %v11955_v22 = vor.u32 %v11954_v61, %v11953_v18 }
0x1830   :  { %17388 = vmatmul.mubr.msk.bf16.vlgmr.msra.gmra.mrb[112].mxu0 %vm1065_vm8, %v11014_v43  ;;  %v11204_v43 = vsel %vm612_vm5, %v19373_v36, 0 }
0x1831   :  { %11210 = vmatpush1.bf16.msra.mxu0 %v19356_v24  ;;  %11241 = vmatprep.mubr.bf16.mxu0 %v19767_v1  ;;  %v11956_v24 = vsel %vm370_vm4, %v11952_v20, %v11955_v22 }
0x1832   :  { %11211 = vmatprep.subr.bf16.mxu0 %v19361_v25  ;;  %v19398_v25 = vld [vmem:[%s24684_s23 + $0x80] ss:$8 sps:$4 sm:$0xff]  }
0x1835   :  { %11212 = vmatpush1.bf16.msra.mxu0 %v19359_v23  ;;  %v19401_v23 = vld [vmem:[%s24684_s23 + $0x94] ss:$8 sps:$4 sm:$0x7f]  }
0x1836   :  { %11213 = vmatprep.subr.bf16.mxu0 %v19364_v26  ;;  %v19403_v26 = vld [vmem:[%s24684_s23 + $0x90] ss:$8 sps:$4 sm:$0x7f]  }
0x1839   :  { %11214 = vmatpush1.bf16.msra.mxu0 %v19362_v7  ;;  %v12080_v7 = vsel %vm122_vm0, %v19403_v26, 0 }
0x183a   :  { %11215 = vmatprep.subr.bf16.mxu0 %v19367_v27  ;;  %v12052_v27 = vrot.slane %v23196_v35, 2 }
0x183d   :  { %11216 = vmatpush1.bf16.msra.mxu0 %v19365_v28  ;;  %v12053_v28 = vrot.slane %v23207_v40, 2 }
0x183e   :  { %11217 = vmatprep.subr.bf16.mxu0 %v19370_v30 }
0x183f   :  { %v12054_v30 = vsel %vm474_vm3, %v12052_v27, %v12053_v28 }
0x1841   :  { %11218 = vmatpush1.bf16.msra.mxu0 %v19368_v29 }
0x1842   :  { %17413 = vmatprep.subr.msk.bf16.mxu0 %vm612_vm5, %v19371_v34 }
0x1845   :  { %11220 = vmatpush1.bf16.msra.mxu0 %v11204_v43  ;;  %v19404_v43 = vld [vmem:[%s24644_s10] sm:$0xff]  }
0x1846   :  { %11712 = vmatprep.subr.bf16.mxu0 %v19376_v41  ;;  %v19405_v41 = vld [vmem:[%s24644_s10 + $0x8] sm:$0xff]  }
0x1848   :  { %17414 = vmatmul.mubr.msk.bf16.vlgmr.msra.gmra.mrb[112].mxu0 %vm1065_vm8, %v11141_v38  ;;  %v19411_v38 = vld [vmem:[%s24644_s10 + $0x38] sm:$0xff]  }
0x1849   :  { %11713 = vmatpush1.bf16.msra.mxu0 %v19374_v45  ;;  %11744 = vmatprep.mubr.bf16.mxu0 %v19767_v1  ;;  %v19406_v45 = vld [vmem:[%s24644_s10 + $0x10] sm:$0xff]  }
0x184a   :  { %17454 = vmatprep.subr.msk.bf16.mxu0 %vm122_vm0, %v19377_v47  ;;  %v19407_v47 = vld [vmem:[%s24644_s10 + $0x18] sm:$0xff]  }
0x184d   :  { %11715 = vmatpush1.bf16.msra.mxu0 %v11707_v55 }
0x184e   :  { %11793 = vmatprep.subr.bf16.mxu0 %v19382_v33 }
0x1850   :  { %17455 = vmatmul.mubr.msk.bf16.vlgmr.msra.gmra.mrb[116].mxu0 %vm115_vm2, %v11678_v57 }
0x1851   :  { %11754 = vmatprep.mubr.bf16.mxu0 %v19767_v1  ;;  %11794 = vmatpush1.bf16.msra.mxu0 %v19380_v59 }
0x1852   :  { %17461 = vmatprep.subr.msk.bf16.mxu0 %vm122_vm0, %v19383_v60 }
0x1855   :  { %11796 = vmatpush1.bf16.msra.mxu0 %v11788_v2 }
0x1856   :  { %11885 = vmatprep.subr.bf16.mxu0 %v19388_v63 }
0x1858   :  { %17456 = vmatmul.mubr.msk.bf16.gmra.mrb[120].mxu0 %vm115_vm2, %v11681_v3 }
0x1859   :  { %11825 = vmatprep.mubr.bf16.mxu0 %v19767_v1 }
0x1860   :  { %17462 = vmatmul.mubr.msk.bf16.vlgmr.msra.gmra.mrb[116].mxu0 %vm115_vm2, %v23196_v35 }
0x1861   :  { %11835 = vmatprep.mubr.bf16.mxu0 %v19767_v1  ;;  %11886 = vmatpush1.bf16.msra.mxu0 %v19386_v46 }
0x1862   :  { %17472 = vmatprep.subr.msk.bf16.mxu0 %vm122_vm0, %v19389_v4 }
0x1865   :  { %11888 = vmatpush1.bf16.msra.mxu0 %v11880_v6 }
0x1866   :  { %11987 = vmatprep.subr.bf16.mxu0 %v19394_v8 }
0x1868   :  { %17463 = vmatmul.mubr.msk.bf16.gmra.mrb[120].mxu0 %vm115_vm2, %v23207_v40  ;;  %v11258_v40 = vld [vmem:[%s24645_s8] sm:$0x7] }
0x1869   :  { %11917 = vmatprep.mubr.bf16.mxu0 %v19767_v1 }
0x1870   :  { %17473 = vmatmul.mubr.msk.bf16.vlgmr.msra.gmra.mrb[116].mxu0 %vm115_vm2, %v11854_v9 }
0x1871   :  { %11927 = vmatprep.mubr.bf16.mxu0 %v19767_v1  ;;  %11988 = vmatpush1.bf16.msra.mxu0 %v19392_v12 }
0x1872   :  { %17483 = vmatprep.subr.msk.bf16.mxu0 %vm122_vm0, %v19395_v13 }
0x1875   :  { %11990 = vmatpush1.bf16.msra.mxu0 %v11982_v15 }
0x1876   :  { %12085 = vmatprep.subr.bf16.mxu0 %v19400_v16 }
0x1878   :  { %17474 = vmatmul.mubr.msk.bf16.gmra.mrb[120].mxu0 %vm115_vm2, %v11853_v11 }
0x1879   :  { %12019 = vmatprep.mubr.bf16.mxu0 %v19767_v1 }
0x1880   :  { %17484 = vmatmul.mubr.msk.bf16.vlgmr.msra.gmra.mrb[116].mxu0 %vm115_vm2, %v11956_v24  ;;  %v19413_v24 = vld [vmem:[%s24644_s10 + $0x48] sm:$0xff]  }
0x1881   :  { %12029 = vmatprep.mubr.bf16.mxu0 %v19767_v1  ;;  %12086 = vmatpush1.bf16.msra.mxu0 %v19398_v25  ;;  %v19414_v25 = vld [vmem:[%s24644_s10 + $0x50] sm:$0xff]  }
0x1882   :  { %17494 = vmatprep.subr.msk.bf16.mxu0 %vm122_vm0, %v19401_v23 }
0x1885   :  { %12088 = vmatpush1.bf16.msra.mxu0 %v12080_v7 }
0x1886   :  { %12504 = vmatprep.subr.bf16.mxu0 %v19767_v1 }
0x1888   :  { %17485 = vmatmul.mubr.msk.bf16.gmra.mrb[120].mxu0 %vm115_vm2, %v11955_v22  ;;  %v19412_v22 = vld [vmem:[%s24644_s10 + $0x40] sm:$0xff]  }
0x1889   :  { %12117 = vmatprep.mubr.bf16.mxu0 %v19767_v1 }
0x1890   :  { %17495 = vmatmul.mubr.msk.bf16.vlgmr.msra.gmra.mrb[116].mxu0 %vm115_vm2, %v12054_v30 }
0x1891   :  { %12127 = vmatprep.mubr.bf16.mxu0 %v19767_v1 }
0x1898   :  { %17496 = vmatmul.mubr.msk.bf16.gmra.mrb[120].mxu0 %vm115_vm2, %v12053_v28 }
0x191b   :  { %v11243_v31 = vpop.f32.mrb[112].mxu0 }
0x191c   :  { %v11245_v32 = vpop.f32.mrb[113].mxu0 }
0x191d   :  { %v11247_v29 = vpop.f32.mrb[114].mxu0 }
0x191e   :  { %v11256_v34 = vpack.c.bf16 %v11247_v29, %v11243_v31  ;;  %v11249_v36 = vpop.f32.mrb[115].mxu0 }
0x191f   :  { %v11257_v42 = vpack.c.bf16 %v11249_v36, %v11245_v32 }
0x1920   :  { %v11263_v35 = vand.u32 %v11256_v34, %v20345_v39 }
0x1921   :  { %v11266_v44 = vand.u32 %v11257_v42, %v20345_v39  ;;  %v19415_v42 = vld [vmem:[%s24647_s11] sm:$0xff]  }
0x1923   :  { %11268 = vmatprep.subr.bf16.mxu1 %v11266_v44 }
0x1924   :  { %11269 = vmatpush1.bf16.msra.mxu1 %v11263_v35 }
0x1925   :  { %11313 = vmatprep.subr.bf16.mxu1 %v11266_v44 }
0x1927   :  { %17415 = vmatmul.mubr.msk.bf16.vlgmr.msra.gmra.mrb[132].mxu1 %vm24725_vm9, %v11258_v40  ;;  %vm24727_vm9 = vcmask 392192   ;;  %v19417_v40 = vld [vmem:[%s24647_s11 + $0x10] sm:$0xff]  }
0x1928   :  { %11314 = vmatpush1.bf16.msra.mxu1 %v11263_v35  ;;  %11345 = vmatprep.mubr.bf16.mxu1 %v19767_v1  ;;  %v19416_v35 = vld [vmem:[%s24647_s11 + $0x8] sm:$0xff]  }
0x1929   :  { %11449 = vmatprep.subr.bf16.mxu1 %v19767_v1 }
0x192f   :  { %17416 = vmatmul.mubr.msk.bf16.vlgmr.msra.gmra.mrb[136].mxu1 %vm24726_vm10, %v11309_v21  ;;  %vm24728_vm10 = vmmov %vm24727_vm9  ;;  %v19418_v21 = vld [vmem:[%s24647_s11 + $0x18] sm:$0xff]  }
0x1930   :  { %11450 = vmatpush1.bf16.msra.mxu1 %v19404_v43  ;;  %v19419_v43 = vld [vmem:[%s24647_s11 + $0x20] sm:$0xff]  }
0x1931   :  { %11451 = vmatprep.subr.bf16.mxu1 %v19767_v1 }
0x1934   :  { %11452 = vmatpush1.bf16.msra.mxu1 %v19405_v41  ;;  %v19420_v41 = vld [vmem:[%s24647_s11 + $0x28] sm:$0xff]  }
0x1935   :  { %11453 = vmatprep.subr.bf16.mxu1 %v19767_v1 }
0x1938   :  { %11454 = vmatpush1.bf16.msra.mxu1 %v19406_v45  ;;  %v19421_v45 = vld [vmem:[%s24647_s11 + $0x30] sm:$0xff]  }
0x1939   :  { %11455 = vmatprep.subr.bf16.mxu1 %v19767_v1 }
0x193c   :  { %11456 = vmatpush1.bf16.msra.mxu1 %v19407_v47  ;;  %v19422_v47 = vld [vmem:[%s24647_s11 + $0x38] sm:$0xff]  }
0x193d   :  { %11457 = vmatprep.subr.bf16.mxu1 %v19767_v1 }
0x1940   :  { %11458 = vmatpush1.bf16.msra.mxu1 %v19408_v49  ;;  %v19423_v49 = vld [vmem:[%s24647_s11 + $0x40] sm:$0xff]  }
0x1941   :  { %11459 = vmatprep.subr.bf16.mxu1 %v19767_v1 }
0x1944   :  { %11460 = vmatpush1.bf16.msra.mxu1 %v19409_v37  ;;  %v19424_v37 = vld [vmem:[%s24647_s11 + $0x48] sm:$0xff]  }
0x1945   :  { %11461 = vmatprep.subr.bf16.mxu1 %v19767_v1 }
0x1948   :  { %11462 = vmatpush1.bf16.msra.mxu1 %v19410_v50  ;;  %v19425_v50 = vld [vmem:[%s24647_s11 + $0x50] sm:$0xff]  }
0x1949   :  { %11463 = vmatprep.subr.bf16.mxu1 %v19767_v1 }
0x194c   :  { %11464 = vmatpush1.bf16.msra.mxu1 %v19411_v38 }
0x194d   :  { %11465 = vmatprep.subr.bf16.mxu1 %v19767_v1 }
0x1950   :  { %11466 = vmatpush1.bf16.msra.mxu1 %v19412_v22 }
0x1951   :  { %11467 = vmatprep.subr.bf16.mxu1 %v19767_v1 }
0x1954   :  { %11468 = vmatpush1.bf16.msra.mxu1 %v19413_v24 }
0x1955   :  { %11469 = vmatprep.subr.bf16.mxu1 %v19767_v1 }
0x1958   :  { %11470 = vmatpush1.bf16.msra.mxu1 %v19414_v25 }
0x1959   :  { %11577 = vmatprep.subr.bf16.mxu1 %v19767_v1 }
0x1963   :  { %v12119_v55 = vpop.f32.mrb[116].mxu0 }
0x1964   :  { %v12158_v33 = vadd.f32 %v12151_v52, %v12119_v55  ;;  %v12121_v57 = vpop.f32.mrb[117].mxu0  ;;  %v19429_v55 = vld [vmem:[%s24642_s7] sm:$0xff]  }
0x1965   :  { %v12159_v59 = vadd.f32 %v12155_v53, %v12121_v57  ;;  %v12123_v60 = vpop.f32.mrb[118].mxu0  ;;  %12505 = vmatpush1.bf16.msra.mxu0 %v19429_v55  ;;  %v19431_v57 = vld [vmem:[%s24642_s7 + $0x8] sm:$0xff]  }
0x1966   :  { %v12166_v62 = vmax.f32 %v12158_v33, 0.0  ;;  %v12160_v0 = vadd.f32 %v12151_v52, %v12123_v60  ;;  %v12125_v2 = vpop.f32.mrb[119].mxu0  ;;  %v19430_v33 = vld [vmem:[%s24688_s26 + $0x8] sm:$0xff]   ;;  %12506 = vmatprep.subr.bf16.mxu0 %v19767_v1  ;;  %v19433_v60 = vld [vmem:[%s24642_s7 + $0x10] sm:$0xff]  }
0x1967   :  { %v12167_v63 = vmax.f32 %v12159_v59, 0.0  ;;  %v12161_v3 = vadd.f32 %v12155_v53, %v12125_v2  ;;  %v19432_v59 = vld [vmem:[%s24688_s26 + $0x10] sm:$0xff]   ;;  %v19436_v2 = vld [vmem:[%s24688_s26 + $0x20] sm:$0xff]  }
0x1968   :  { %v12168_v46 = vmax.f32 %v12160_v0, 0.0  ;;  %v19435_v0 = vld [vmem:[%s24642_s7 + $0x18] sm:$0xff]   ;;  %v19462_v55 = vld [vmem:[%s24643_s3 + $0xa4] ss:$8 sps:$4 sm:$0xff]  }
0x1969   :  { %v12169_v4 = vmax.f32 %v12161_v3, 0.0  ;;  %12507 = vmatpush1.bf16.msra.mxu0 %v19431_v57  ;;  %v19438_v3 = vld [vmem:[%s24688_s26 + $0x28] sm:$0xff]   ;;  %v19463_v57 = vld [vmem:[%s24643_s3 + $0xb4] ss:$8 sps:$4 sm:$0x1f]  }
0x196a   :  { %v23371_v5 = vpack.c.bf16 %v12168_v46, %v12166_v62  ;;  %12508 = vmatprep.subr.bf16.mxu0 %v19767_v1  ;;  %v19434_v62 = vld [vmem:[%s24688_s26 + $0x18] sm:$0xff]   ;;  %v19439_v46 = vld [vmem:[%s24642_s7 + $0x28] sm:$0xff]  }
0x196b   :  { %v23373_v6 = vpack.c.bf16 %v12169_v4, %v12167_v63  ;;  %v12129_v8 = vpop.f32.mrb[120].mxu0  ;;  %v19437_v63 = vld [vmem:[%s24642_s7 + $0x20] sm:$0xff]   ;;  %v19440_v4 = vld [vmem:[%s24688_s26 + $0x30] sm:$0xff]  }
0x196c   :  { %v12162_v10 = vadd.f32 %v12151_v52, %v12129_v8  ;;  %v12131_v11 = vpop.f32.mrb[121].mxu0  ;;  %v19443_v8 = vld [vmem:[%s24642_s7 + $0x38] sm:$0xff]  }
0x196d   :  { %v12163_v9 = vadd.f32 %v12155_v53, %v12131_v11  ;;  %v12133_v12 = vpop.f32.mrb[122].mxu0  ;;  %12509 = vmatpush1.bf16.msra.mxu0 %v19433_v60  ;;  %v19445_v11 = vld [vmem:[%s24642_s7 + $0x40] sm:$0xff]  }
0x196e   :  { %v12170_v13 = vmax.f32 %v12162_v10, 0.0  ;;  %v12164_v14 = vadd.f32 %v12151_v52, %v12133_v12  ;;  %v12135_v15 = vpop.f32.mrb[123].mxu0  ;;  %v19427_v52 = vld [vmem:[%s24687_s4] sm:$0xff]   ;;  %12510 = vmatprep.subr.bf16.mxu0 %v19767_v1  ;;  %v19447_v12 = vld [vmem:[%s24642_s7 + $0x48] sm:$0x3f]  }
0x196f   :  { %v12171_v16 = vmax.f32 %v12163_v9, 0.0  ;;  %v12165_v17 = vadd.f32 %v12155_v53, %v12135_v15  ;;  %v19428_v53 = vld [vmem:[%s24688_s26] sm:$0xff]   ;;  %v19446_v9 = vld [vmem:[%s24688_s26 + $0x48] sm:$0x3f]  }
0x1970   :  { %v12172_v61 = vmax.f32 %v12164_v14, 0.0  ;;  %v19444_v10 = vld [vmem:[%s24688_s26 + $0x40] sm:$0xff]   ;;  %v12502_v14 = vsel %vm474_vm3, %v19447_v12, 0 }
0x1971   :  { %v12173_v18 = vmax.f32 %v12165_v17, 0.0  ;;  %12511 = vmatpush1.bf16.msra.mxu0 %v19435_v0  ;;  %v19468_v60 = vld [vmem:[%s24643_s3 + $0x4] ss:$8 sps:$4 sm:$0xff]  }
0x1972   :  { %v23375_v19 = vpack.c.bf16 %v12172_v61, %v12170_v13  ;;  %12512 = vmatprep.subr.bf16.mxu0 %v19767_v1  ;;  %v12379_v13 = vsel %vm474_vm3, %v19446_v9, 0 }
0x1973   :  { %v23377_v20 = vpack.c.bf16 %v12173_v18, %v12171_v16 }
0x1974   :  { %v12189_v38 = vsel %vm612_vm5, %v23375_v19, 0  ;;  %v17441_v19 = vld [vmem:[%s24648_s13] ss:$0 sm:$0xff] }
0x1975   :  { %12513 = vmatpush1.bf16.msra.mxu0 %v19437_v63 }
0x1976   :  { %12514 = vmatprep.subr.bf16.mxu0 %v19767_v1 }
0x1979   :  { %12515 = vmatpush1.bf16.msra.mxu0 %v19439_v46 }
0x197a   :  { %12516 = vmatprep.subr.bf16.mxu0 %v19767_v1 }
0x19fa   :  { %v11302_v23 = vpop.f32.mrb[132].mxu1 }
0x19fb   :  { %v11304_v26 = vpop.f32.mrb[133].mxu1 }
0x19fc   :  { %v11306_v7 = vpop.f32.mrb[134].mxu1 }
0x19fd   :  { %v11307_v27 = vpop.f32.mrb[135].mxu1 }
0x1a02   :  { %v11347_v28 = vpop.f32.mrb[136].mxu1 }
0x1a03   :  { %v11354_v30 = vmax.f32 %v11302_v23, %v11347_v28  ;;  %v11349_v31 = vpop.f32.mrb[137].mxu1 }
0x1a04   :  { %v11355_v32 = vmax.f32 %v11304_v26, %v11349_v31  ;;  %v11351_v29 = vpop.f32.mrb[138].mxu1  ;;  %v19450_v26 = vld [vmem:[%s24643_s3 + $0x64] ss:$8 sps:$4 sm:$0xff]  }
0x1a05   :  { %v11352_v34 = vpop.f32.mrb[139].mxu1  ;;  %v11356_v44 = vpack.c.bf16 %v11354_v30, %v11354_v30 }
0x1a06   :  { %v11357_v36 = vpack.c.bf16 %v11355_v32, %v11355_v32 }
0x1a08   :  { %17428 = vmatprep.mubr.msk.bf16.mxu1 %vm24727_vm9, %v11357_v36  ;;  %vm24729_vm9 = vcmask 211968  }
0x1a09   :  { %11482 = vmatmul.mubr.bf16.vlgmr.msra.gmra.mrb[140].mxu1 %v11356_v44 }
0x1a0a   :  { %11578 = vmatpush1.bf16.msra.mxu1 %v19415_v42  ;;  %17440 = vmatprep.mubr.msk.bf16.mxu1 %vm24728_vm10, %v11357_v36  ;;  %vm24730_vm10 = vmmov %vm24729_vm9 }
0x1a0b   :  { %11579 = vmatprep.subr.bf16.mxu1 %v19767_v1 }
0x1a0e   :  { %11580 = vmatpush1.bf16.msra.mxu1 %v19416_v35 }
0x1a0f   :  { %11581 = vmatprep.subr.bf16.mxu1 %v19767_v1 }
0x1a12   :  { %11582 = vmatpush1.bf16.msra.mxu1 %v19417_v40 }
0x1a13   :  { %11583 = vmatprep.subr.bf16.mxu1 %v19767_v1 }
0x1a16   :  { %11584 = vmatpush1.bf16.msra.mxu1 %v19418_v21 }
0x1a17   :  { %11585 = vmatprep.subr.bf16.mxu1 %v19767_v1 }
0x1a1a   :  { %11586 = vmatpush1.bf16.msra.mxu1 %v19419_v43 }
0x1a1b   :  { %11587 = vmatprep.subr.bf16.mxu1 %v19767_v1 }
0x1a1e   :  { %11588 = vmatpush1.bf16.msra.mxu1 %v19420_v41 }
0x1a1f   :  { %11589 = vmatprep.subr.bf16.mxu1 %v19767_v1 }
0x1a22   :  { %11590 = vmatpush1.bf16.msra.mxu1 %v19421_v45 }
0x1a23   :  { %11591 = vmatprep.subr.bf16.mxu1 %v19767_v1 }
0x1a26   :  { %11592 = vmatpush1.bf16.msra.mxu1 %v19422_v47 }
0x1a27   :  { %11593 = vmatprep.subr.bf16.mxu1 %v19767_v1 }
0x1a2a   :  { %11594 = vmatpush1.bf16.msra.mxu1 %v19423_v49  ;;  %v19448_v49 = vld [vmem:[%s24643_s3 + $0x60] ss:$8 sps:$4 sm:$0xff]  }
0x1a2b   :  { %11595 = vmatprep.subr.bf16.mxu1 %v19767_v1 }
0x1a2e   :  { %11596 = vmatpush1.bf16.msra.mxu1 %v19424_v37  ;;  %v19453_v37 = vld [vmem:[%s24643_s3 + $0x74] ss:$8 sps:$4 sm:$0xff]  }
0x1a2f   :  { %11597 = vmatprep.subr.bf16.mxu1 %v19767_v1 }
0x1a32   :  { %11598 = vmatpush1.bf16.msra.mxu1 %v19425_v50  ;;  %v19451_v50 = vld [vmem:[%s24643_s3 + $0x70] ss:$8 sps:$4 sm:$0xff]  }
0x1a33   :  { %12194 = vmatprep.subr.bf16.mxu1 %v23373_v6 }
0x1a35   :  { %11610 = vmatmul.mubr.bf16.vlgmr.msra.gmra.mrb[144].mxu1 %v11356_v44 }
0x1a36   :  { %12195 = vmatpush1.bf16.msra.mxu1 %v23371_v5  ;;  %12226 = vmatprep.mubr.bf16.mxu1 %v19767_v1 }
0x1a37   :  { %17498 = vmatprep.subr.msk.bf16.mxu1 %vm612_vm5, %v23377_v20 }
0x1a3a   :  { %12197 = vmatpush1.bf16.msra.mxu1 %v12189_v38 }
0x1a3b   :  { %12247 = vmatprep.subr.bf16.mxu1 %v23373_v6  ;;  %v19442_v6 = vld [vmem:[%s24688_s26 + $0x38] sm:$0xff]  }
0x1a3d   :  { %17499 = vmatmul.mubr.msk.bf16.vlgmr.msra.gmra.mrb[148].mxu1 %vm24729_vm9, %v19426_v51  ;;  %vm24731_vm9 = vcmask 647168   ;;  %v19454_v51 = vld [vmem:[%s24643_s3 + $0x80] ss:$8 sps:$4 sm:$0xff]  }
0x1a3e   :  { %12248 = vmatpush1.bf16.msra.mxu1 %v23371_v5  ;;  %12279 = vmatprep.mubr.bf16.mxu1 %v19767_v1  ;;  %v19441_v5 = vld [vmem:[%s24642_s7 + $0x30] sm:$0xff]  }
0x1a3f   :  { %17501 = vmatprep.subr.msk.bf16.mxu1 %vm612_vm5, %v23377_v20  ;;  %12517 = vmatpush1.bf16.msra.mxu0 %v19441_v5 }
0x1a40   :  { %12518 = vmatprep.subr.bf16.mxu0 %v19767_v1 }
0x1a42   :  { %12250 = vmatpush1.bf16.msra.mxu1 %v12189_v38  ;;  %v19456_v38 = vld [vmem:[%s24643_s3 + $0x84] ss:$8 sps:$4 sm:$0xff]  }
0x1a43   :  { %12381 = vmatprep.subr.bf16.mxu1 %v19767_v1  ;;  %12519 = vmatpush1.bf16.msra.mxu0 %v19443_v8 }
0x1a44   :  { %12520 = vmatprep.subr.bf16.mxu0 %v19767_v1 }
0x1a45   :  { %17502 = vmatmul.mubr.msk.bf16.vlgmr.msra.gmra.mrb[152].mxu1 %vm24730_vm10, %v19427_v52  ;;  %vm24732_vm10 = vcmask 228352   ;;  %v19459_v52 = vld [vmem:[%s24643_s3 + $0x94] ss:$8 sps:$4 sm:$0xff]  }
0x1a46   :  { %12382 = vmatpush1.bf16.msra.mxu1 %v19428_v53  ;;  %v19457_v53 = vld [vmem:[%s24643_s3 + $0x90] ss:$8 sps:$4 sm:$0xff]  }
0x1a47   :  { %12383 = vmatprep.subr.bf16.mxu1 %v19767_v1  ;;  %12521 = vmatpush1.bf16.msra.mxu0 %v19445_v11 }
0x1a48   :  { %12522 = vmatprep.subr.bf16.mxu0 %v19767_v1 }
0x1a4a   :  { %12384 = vmatpush1.bf16.msra.mxu1 %v19430_v33  ;;  %v19460_v33 = vld [vmem:[%s24643_s3 + $0xa0] ss:$8 sps:$4 sm:$0xff]  }
0x1a4b   :  { %12385 = vmatprep.subr.bf16.mxu1 %v19767_v1  ;;  %12523 = vmatpush1.bf16.msra.mxu0 %v12502_v14 }
0x1a4e   :  { %12386 = vmatpush1.bf16.msra.mxu1 %v19432_v59  ;;  %v19465_v59 = vld [vmem:[%s24643_s3 + $0xb0] ss:$8 sps:$4 sm:$0x1f]  }
0x1a4f   :  { %12387 = vmatprep.subr.bf16.mxu1 %v19767_v1 }
0x1a52   :  { %12388 = vmatpush1.bf16.msra.mxu1 %v19434_v62  ;;  %v12641_v62 = vsel %vm612_vm5, %v19465_v59, 0  ;;  %v19511_v59 = vld [vmem:[%s24643_s3 + $0x150] ss:$8 sps:$4 sm:$0xff]  }
0x1a53   :  { %12389 = vmatprep.subr.bf16.mxu1 %v19767_v1 }
0x1a56   :  { %12390 = vmatpush1.bf16.msra.mxu1 %v19436_v2 }
0x1a57   :  { %12391 = vmatprep.subr.bf16.mxu1 %v19767_v1 }
0x1a5a   :  { %12392 = vmatpush1.bf16.msra.mxu1 %v19438_v3 }
0x1a5b   :  { %12393 = vmatprep.subr.bf16.mxu1 %v19767_v1 }
0x1a5e   :  { %12394 = vmatpush1.bf16.msra.mxu1 %v19440_v4 }
0x1a5f   :  { %12395 = vmatprep.subr.bf16.mxu1 %v19767_v1 }
0x1a62   :  { %12396 = vmatpush1.bf16.msra.mxu1 %v19442_v6 }
0x1a63   :  { %12397 = vmatprep.subr.bf16.mxu1 %v19767_v1 }
0x1a66   :  { %12398 = vmatpush1.bf16.msra.mxu1 %v19444_v10 }
0x1a67   :  { %12399 = vmatprep.subr.bf16.mxu1 %v19767_v1 }
0x1a6a   :  { %12400 = vmatpush1.bf16.msra.mxu1 %v12379_v13 }
0x1a6b   :  { %12646 = vmatprep.subr.bf16.mxu1 %v19450_v26  ;;  %v19477_v26 = vld [vmem:[%s24643_s3 + $0x34] ss:$8 sps:$4 sm:$0xff]  }
0x1adc   :  { %v11483_v15 = vpop.f32.mrb[140].mxu1 }
0x1add   :  { %v11485_v16 = vpop.f32.mrb[141].mxu1 }
0x1ade   :  { %v11486_v17 = vpop.f32.mrb[142].mxu1 }
0x1adf   :  { %v11487_v61 = vpop.f32.mrb[143].mxu1 }
0x1b08   :  { %v11611_v18 = vpop.f32.mrb[144].mxu1 }
0x1b09   :  { %v11617_v20 = vmax.f32 %v11483_v15, %v11611_v18  ;;  %v11613_v22 = vpop.f32.mrb[145].mxu1  ;;  %v19466_v18 = vld [vmem:[%s24643_s3] ss:$8 sps:$4 sm:$0xff]  }
0x1b0a   :  { %v11614_v24 = vpop.f32.mrb[146].mxu1 }
0x1b0b   :  { %v11625_v25 = vadd.f32 %v17441_v19, %v11617_v20  ;;  %v11615_v23 = vpop.f32.mrb[147].mxu1  ;;  %v19471_v20 = vld [vmem:[%s24643_s3 + $0x14] ss:$8 sps:$4 sm:$0xff]   ;;  %v19469_v24 = vld [vmem:[%s24643_s3 + $0x10] ss:$8 sps:$4 sm:$0xff]  }
0x1b0c   :  { %v19472_v23 = vld [vmem:[%s24643_s3 + $0x20] ss:$8 sps:$4 sm:$0xff]  }
0x1b0d   :  { %v23543_v7 = vmax.f32 %v11625_v25, 0.0  ;;  %v19474_v25 = vld [vmem:[%s24643_s3 + $0x24] ss:$8 sps:$4 sm:$0xff]  }
0x1b0f   :  { %11627 = vst.msk [vmem:[#allocation2 + $0x5] sm:$0x1] %vm24731_vm9, %v23543_v7  ;;  %v11629_v27 = vrot.slane %v23543_v7, 1  ;;  %v11635_v29 = vrot.slane %v23543_v7, 2  ;;  %v11640_v34 = vrot.slane %v23543_v7, 3  ;;  %vm24733_vm9 = vmmov %vm24732_vm10 }
0x1b10   :  { %v12228_v28 = vpop.f32.mrb[148].mxu1 }
0x1b11   :  { %11630 = vrot.lane.b32.xlu1 %v11629_v27, %s24693_s6  ;;  %v12230_v30 = vpop.f32.mrb[149].mxu1  ;;  %v19475_v27 = vld [vmem:[%s24643_s3 + $0x30] ss:$8 sps:$4 sm:$0xff]  }
0x1b12   :  { %v12232_v31 = vpop.f32.mrb[150].mxu1 }
0x1b13   :  { %v12234_v32 = vpop.f32.mrb[151].mxu1 }
0x1b15   :  { %11636 = vrot.lane.b32.xlu1 %v11635_v29, %s24692_s5 }
0x1b18   :  { %v12281_v36 = vpop.f32.mrb[152].mxu1 }
0x1b19   :  { %v12290_v42 = vmax.f32 %v12228_v28, %v12281_v36  ;;  %11641 = vrot.lane.b32.xlu1 %v11640_v34, %s24694_s30  ;;  %v12283_v44 = vpop.f32.mrb[153].mxu1  ;;  %v19480_v28 = vld [vmem:[%s24643_s3 + $0x44] ss:$8 sps:$4 sm:$0xff]   ;;  %v19484_v36 = vld [vmem:[%s24643_s3 + $0xc0] ss:$8 sps:$4 sm:$0xff]  }
0x1b1a   :  { %v12291_v35 = vmax.f32 %v12230_v30, %v12283_v44  ;;  %v12285_v40 = vpop.f32.mrb[154].mxu1  ;;  %v19478_v30 = vld [vmem:[%s24643_s3 + $0x40] ss:$8 sps:$4 sm:$0xff]   ;;  %v19486_v34 = vld [vmem:[%s24643_s3 + $0xc4] ss:$8 sps:$4 sm:$0xff]  }
0x1b1b   :  { %v12292_v21 = vmax.f32 %v12232_v31, %v12285_v40  ;;  %v12287_v43 = vpop.f32.mrb[155].mxu1  ;;  %v19481_v31 = vld [vmem:[%s24643_s3 + $0x54] ss:$8 sps:$4 sm:$0x1f]   ;;  %v19487_v44 = vld [vmem:[%s24643_s3 + $0xd0] ss:$8 sps:$4 sm:$0xff]  }
0x1b1c   :  { %v12293_v41 = vmax.f32 %v12234_v32, %v12287_v43  ;;  %v19483_v32 = vld [vmem:[%s24643_s3 + $0x50] ss:$8 sps:$4 sm:$0x1f]   ;;  %v19490_v40 = vld [vmem:[%s24643_s3 + $0xe0] ss:$8 sps:$4 sm:$0xff]  }
0x1b1d   :  { %v12294_v45 = vpack.c.bf16 %v12292_v21, %v12290_v42  ;;  %v12750_v29 = vsel %vm612_vm5, %v19483_v32, 0  ;;  %v19489_v42 = vld [vmem:[%s24643_s3 + $0xd4] ss:$8 sps:$4 sm:$0xff]   ;;  %v19493_v43 = vld [vmem:[%s24643_s3 + $0xf0] ss:$8 sps:$4 sm:$0xff]  }
0x1b1e   :  { %v12295_v47 = vpack.c.bf16 %v12293_v41, %v12291_v35  ;;  %v19492_v35 = vld [vmem:[%s24643_s3 + $0xe4] ss:$8 sps:$4 sm:$0xff]   ;;  %v19495_v21 = vld [vmem:[%s24643_s3 + $0xf4] ss:$8 sps:$4 sm:$0xff]  }
0x1b1f   :  { %v19498_v41 = vld [vmem:[%s24643_s3 + $0x104] ss:$8 sps:$4 sm:$0xff]   ;;  %v19543_v32 = vld [vmem:[%s24684_s23 + $0x30] ss:$8 sps:$4 sm:$0x7f]  }
0x1b20   :  { %17513 = vmatprep.mubr.msk.bf16.mxu1 %vm24732_vm10, %v12295_v47  ;;  %17524 = vmatprep.mubr.msk.bf16.mxu0 %vm24733_vm9, %v12295_v47  ;;  %v19499_v47 = vld [vmem:[%s24643_s3 + $0x114] ss:$8 sps:$4 sm:$0x1f]   ;;  %vm24738_vm10 = vcmask 211968  }
0x1b21   :  { %12414 = vmatmul.mubr.bf16.vlgmr.msra.gmra.mrb[156].mxu1 %v12294_v45  ;;  %12537 = vmatmul.mubr.bf16.vlgmr.msra.gmra.mrb[124].mxu0 %v12294_v45  ;;  %v19496_v45 = vld [vmem:[%s24643_s3 + $0x100] ss:$8 sps:$4 sm:$0xff]   ;;  %vm24739_vm9 = vmmov %vm24738_vm10 }
0x1b22   :  { %12647 = vmatpush1.bf16.msra.mxu1 %v19448_v49  ;;  %12678 = vmatprep.mubr.bf16.mxu1 %v19767_v1  ;;  %v19501_v49 = vld [vmem:[%s24643_s3 + $0x110] ss:$8 sps:$4 sm:$0x1f]  }
0x1b23   :  { %12648 = vmatprep.subr.bf16.mxu1 %v19453_v37  ;;  %13226 = vmatprep.mubr.bf16.mxu0 %v19767_v1  ;;  %v12874_v37 = vsel %vm612_vm5, %v19501_v49, 0  ;;  %v19553_v49 = vld [vmem:[%s24684_s23 + $0x54] ss:$8 sps:$4 sm:$0x7f]  }
0x1b26   :  { %12649 = vmatpush1.bf16.msra.mxu1 %v19451_v50  ;;  %v19504_v50 = vld [vmem:[%s24643_s3 + $0x124] ss:$8 sps:$4 sm:$0xff]  }
0x1b27   :  { %12650 = vmatprep.subr.bf16.mxu1 %v19456_v38  ;;  %v19502_v38 = vld [vmem:[%s24643_s3 + $0x120] ss:$8 sps:$4 sm:$0xff]  }
0x1b2a   :  { %12651 = vmatpush1.bf16.msra.mxu1 %v19454_v51 }
0x1b2b   :  { %12652 = vmatprep.subr.bf16.mxu1 %v19459_v52  ;;  %v19507_v52 = vld [vmem:[%s24643_s3 + $0x134] ss:$8 sps:$4 sm:$0xff]  }
0x1b2e   :  { %12653 = vmatpush1.bf16.msra.mxu1 %v19457_v53  ;;  %v19505_v53 = vld [vmem:[%s24643_s3 + $0x130] ss:$8 sps:$4 sm:$0xff]  }
0x1b2f   :  { %12654 = vmatprep.subr.bf16.mxu1 %v19462_v55  ;;  %v19510_v55 = vld [vmem:[%s24643_s3 + $0x144] ss:$8 sps:$4 sm:$0xff]  }
0x1b32   :  { %12655 = vmatpush1.bf16.msra.mxu1 %v19460_v33  ;;  %v19508_v33 = vld [vmem:[%s24643_s3 + $0x140] ss:$8 sps:$4 sm:$0xff]  }
0x1b33   :  { %17549 = vmatprep.subr.msk.bf16.mxu1 %vm612_vm5, %v19463_v57  ;;  %v19513_v57 = vld [vmem:[%s24643_s3 + $0x154] ss:$8 sps:$4 sm:$0xff]  }
0x1b36   :  { %12657 = vmatpush1.bf16.msra.mxu1 %v12641_v62  ;;  %v19514_v62 = vld [vmem:[%s24643_s3 + $0x160] ss:$8 sps:$4 sm:$0xff]  }
0x1b37   :  { %12755 = vmatprep.subr.bf16.mxu1 %v19468_v60  ;;  %v19516_v60 = vld [vmem:[%s24643_s3 + $0x164] ss:$8 sps:$4 sm:$0xff]  }
0x1b83   :  { %v11631_v0 = vpop.permute.xlu1 %11630 }
0x1b84   :  { %11633 = vst.msk [vmem:[#allocation2 + $0x5] sm:$0x1] %vm1996_vm12, %v11631_v0 }
0x1b85   :  { %11634 = vst.msk [vmem:[#allocation2 + $0xd] sm:$0x1] %vm1998_vm13, %v11631_v0  ;;  %v19517_v0 = vld [vmem:[%s24643_s3 + $0x174] ss:$8 sps:$4 sm:$0x1f]  }
0x1b87   :  { %v11637_v2 = vpop.permute.xlu1 %11636 }
0x1b88   :  { %11639 = vst.msk [vmem:[#allocation2 + $0xd] sm:$0x1] %vm2004_vm14, %v11637_v2  ;;  %v19519_v2 = vld [vmem:[%s24643_s3 + $0x170] ss:$8 sps:$4 sm:$0x1f]  }
0x1b8b   :  { %v11642_v63 = vpop.permute.xlu1 %11641 }
0x1b8c   :  { %11644 = vst.msk [vmem:[#allocation2 + $0xd] sm:$0x1] %vm2010_vm15, %v11642_v63 }
0x1b8d   :  { %11645 = vst.msk [vmem:[#allocation2 + $0x15] sm:$0x1] %vm2012_vm7, %v11642_v63  ;;  %v13003_v63 = vsel %vm612_vm5, %v19519_v2, 0 }
0x1bf4   :  { %v12415_v3 = vpop.f32.mrb[156].mxu1  ;;  %v12538_v46 = vpop.f32.mrb[124].mxu0 }
0x1bf5   :  { %v12545_v4 = vmax.f32 %v12415_v3, %v12538_v46  ;;  %v12417_v5 = vpop.f32.mrb[157].mxu1  ;;  %v12540_v6 = vpop.f32.mrb[125].mxu0  ;;  %v19522_v3 = vld [vmem:[%s24643_s3 + $0x184] ss:$8 sps:$4 sm:$0xff]   ;;  %v19520_v46 = vld [vmem:[%s24643_s3 + $0x180] ss:$8 sps:$4 sm:$0xff]  }
0x1bf6   :  { %v12418_v8 = vpop.f32.mrb[158].mxu1  ;;  %v12541_v10 = vpop.f32.mrb[126].mxu0  ;;  %v19523_v5 = vld [vmem:[%s24643_s3 + $0x190] ss:$8 sps:$4 sm:$0xff]   ;;  %v19528_v6 = vld [vmem:[%s24643_s3 + $0x1a4] ss:$8 sps:$4 sm:$0xff]  }
0x1bf7   :  { %v12546_v11 = vmax.f32 %v12418_v8, %v12541_v10  ;;  %v12420_v9 = vpop.f32.mrb[159].mxu1  ;;  %v12543_v12 = vpop.f32.mrb[127].mxu0  ;;  %v19526_v8 = vld [vmem:[%s24643_s3 + $0x1a0] ss:$8 sps:$4 sm:$0xff]   ;;  %v19531_v10 = vld [vmem:[%s24643_s3 + $0x1b4] ss:$8 sps:$4 sm:$0xff]  }
0x1bf8   :  { %v19534_v9 = vld [vmem:[%s24643_s3 + $0x1c4] ss:$8 sps:$4 sm:$0xff]  }
0x1bf9   :  { %v23600_v13 = vpack.c.bf16 %v12546_v11, %v12545_v4  ;;  %v19525_v4 = vld [vmem:[%s24643_s3 + $0x194] ss:$8 sps:$4 sm:$0xff]   ;;  %v19529_v11 = vld [vmem:[%s24643_s3 + $0x1b0] ss:$8 sps:$4 sm:$0xff]   ;;  %v17670_v12 = vld [vmem:[%s24685_s29 + $0xe0] sm:$0xff] }
0x1bfb   :  { %v12575_v14 = vshll.u32 %v23600_v13, 16  ;;  %v12573_v15 = vshrl.u32 %v23600_v13, 16  ;;  %v12811_v51 = vrot.slane %v23600_v13, 1 }
0x1bfd   :  { %v12577_v16 = vrot.slane %v12575_v14, 1  ;;  %v23604_v17 = vrot.slane %v12573_v15, 1  ;;  %v23606_v61 = vrot.slane %v12575_v14, 2  ;;  %v17671_v14 = vld [vmem:[%s24685_s29 + $0xe8] sm:$0xff] }
0x1bff   :  { %v12578_v19 = vor.u32 %v12577_v16, %v12573_v15  ;;  %v12940_v22 = vor.u32 %v23606_v61, %v23604_v17  ;;  %v19532_v15 = vld [vmem:[%s24643_s3 + $0x1c0] ss:$8 sps:$4 sm:$0xff]   ;;  %v19535_v16 = vld [vmem:[%s24643_s3 + $0x1d4] ss:$8 sps:$4 sm:$0x1f]   ;;  %v23773_v17 = vpack.c.bf16 %v17671_v14, %v17670_v12 }
0x1c00   :  { %v19537_v61 = vld [vmem:[%s24643_s3 + $0x1d0] ss:$8 sps:$4 sm:$0x1f]  }
0x1c01   :  { %17550 = vmatmul.mubr.msk.bf16.vlgmr.msra.gmra.mrb[160].mxu1 %vm1065_vm8, %v12578_v19  ;;  %v17673_v19 = vld [vmem:[%s24685_s29 + $0xf8] sm:$0x3f] }
0x1c02   :  { %12756 = vmatpush1.bf16.msra.mxu1 %v19466_v18  ;;  %12787 = vmatprep.mubr.bf16.mxu1 %v19767_v1  ;;  %v17672_v18 = vld [vmem:[%s24685_s29 + $0xf0] sm:$0xff] }
0x1c03   :  { %12757 = vmatprep.subr.bf16.mxu1 %v19471_v20  ;;  %v23784_v20 = vpack.c.bf16 %v17673_v19, %v17672_v18 }
0x1c06   :  { %12758 = vmatpush1.bf16.msra.mxu1 %v19469_v24  ;;  %v13130_v24 = vsel %vm612_vm5, %v19537_v61, 0 }
0x1c07   :  { %12759 = vmatprep.subr.bf16.mxu1 %v19474_v25  ;;  %v19540_v25 = vld [vmem:[%s24684_s23 + $0x24] ss:$8 sps:$4 sm:$0xff]  }
0x1c0a   :  { %12760 = vmatpush1.bf16.msra.mxu1 %v19472_v23  ;;  %v19538_v23 = vld [vmem:[%s24684_s23 + $0x20] ss:$8 sps:$4 sm:$0xff]  }
0x1c0b   :  { %12761 = vmatprep.subr.bf16.mxu1 %v19477_v26  ;;  %v19541_v26 = vld [vmem:[%s24684_s23 + $0x34] ss:$8 sps:$4 sm:$0x7f]  }
0x1c0e   :  { %12762 = vmatpush1.bf16.msra.mxu1 %v19475_v27  ;;  %v13594_v27 = vshrl.u32 %v23773_v17, 16 }
0x1c0f   :  { %12763 = vmatprep.subr.bf16.mxu1 %v19480_v28 }
0x1c12   :  { %12764 = vmatpush1.bf16.msra.mxu1 %v19478_v30  ;;  %v13601_v30 = vshll.u32 %v23784_v20, 16 }
0x1c13   :  { %17563 = vmatprep.subr.msk.bf16.mxu1 %vm612_vm5, %v19481_v31  ;;  %v13067_v31 = vrot.slane %v23600_v13, 2 }
0x1c16   :  { %12766 = vmatpush1.bf16.msra.mxu1 %v12750_v29 }
0x1c17   :  { %12879 = vmatprep.subr.bf16.mxu1 %v19486_v34  ;;  %v13603_v34 = vrot.slane %v13601_v30, 1 }
0x1c19   :  { %17564 = vmatmul.mubr.msk.bf16.vlgmr.msra.gmra.mrb[160].mxu1 %vm1065_vm8, %v23600_v13  ;;  %v19546_v13 = vld [vmem:[%s24684_s23 + $0x4] ss:$8 sps:$4 sm:$0xff]  }
0x1c1a   :  { %12880 = vmatpush1.bf16.msra.mxu1 %v19484_v36  ;;  %12911 = vmatprep.mubr.bf16.mxu1 %v19767_v1  ;;  %v13633_v36 = vsel %vm122_vm0, %v19543_v32, 0  ;;  %v19575_v32 = vld [vmem:[%s24644_s10 + $0x38] sm:$0xff]  }
0x1c1b   :  { %12881 = vmatprep.subr.bf16.mxu1 %v19489_v42 }
0x1c1e   :  { %12882 = vmatpush1.bf16.msra.mxu1 %v19487_v44  ;;  %v19544_v44 = vld [vmem:[%s24684_s23] ss:$8 sps:$4 sm:$0xff]  }
0x1c1f   :  { %12883 = vmatprep.subr.bf16.mxu1 %v19492_v35  ;;  %v19547_v35 = vld [vmem:[%s24684_s23 + $0x14] ss:$8 sps:$4 sm:$0x7f]  }
0x1c22   :  { %12884 = vmatpush1.bf16.msra.mxu1 %v19490_v40  ;;  %v19549_v40 = vld [vmem:[%s24684_s23 + $0x10] ss:$8 sps:$4 sm:$0x7f]  }
0x1c23   :  { %12885 = vmatprep.subr.bf16.mxu1 %v19495_v21  ;;  %v13605_v21 = vshrl.u32 %v23784_v20, 16 }
0x1c25   :  { %v13879_v2 = vrot.slane %v13605_v21, 1 }
0x1c26   :  { %12886 = vmatpush1.bf16.msra.mxu1 %v19493_v43  ;;  %v13714_v43 = vsel %vm122_vm0, %v19549_v40, 0 }
0x1c27   :  { %12887 = vmatprep.subr.bf16.mxu1 %v19498_v41  ;;  %v19552_v41 = vld [vmem:[%s24684_s23 + $0x44] ss:$8 sps:$4 sm:$0xff]  }
0x1c2a   :  { %12888 = vmatpush1.bf16.msra.mxu1 %v19496_v45  ;;  %v13607_v45 = vor.u32 %v13605_v21, %v13603_v34 }
0x1c2b   :  { %17589 = vmatprep.subr.msk.bf16.mxu1 %vm612_vm5, %v19499_v47  ;;  %v19550_v47 = vld [vmem:[%s24684_s23 + $0x40] ss:$8 sps:$4 sm:$0xff]  }
0x1c2e   :  { %12890 = vmatpush1.bf16.msra.mxu1 %v12874_v37  ;;  %v19555_v37 = vld [vmem:[%s24684_s23 + $0x50] ss:$8 sps:$4 sm:$0x7f]  }
0x1c2f   :  { %13008 = vmatprep.subr.bf16.mxu1 %v19504_v50  ;;  %v13806_v50 = vsel %vm122_vm0, %v19555_v37, 0 }
0x1c31   :  { %17590 = vmatmul.mubr.msk.bf16.vlgmr.msra.gmra.mrb[160].mxu1 %vm1065_vm8, %v12811_v51  ;;  %v13778_v51 = vrot.slane %v23773_v17, 1 }
0x1c32   :  { %13009 = vmatpush1.bf16.msra.mxu1 %v19502_v38  ;;  %13040 = vmatprep.mubr.bf16.mxu1 %v19767_v1  ;;  %v19558_v38 = vld [vmem:[%s24684_s23 + $0x64] ss:$8 sps:$4 sm:$0xff]  }
0x1c33   :  { %13010 = vmatprep.subr.bf16.mxu1 %v19507_v52  ;;  %v13779_v52 = vrot.slane %v23784_v20, 1 }
0x1c36   :  { %13011 = vmatpush1.bf16.msra.mxu1 %v19505_v53  ;;  %v13780_v53 = vsel %vm122_vm0, %v13778_v51, %v13779_v52 }
0x1c37   :  { %13012 = vmatprep.subr.bf16.mxu1 %v19510_v55  ;;  %v19556_v55 = vld [vmem:[%s24684_s23 + $0x60] ss:$8 sps:$4 sm:$0xff]  }
0x1c3a   :  { %13013 = vmatpush1.bf16.msra.mxu1 %v19508_v33  ;;  %v19559_v33 = vld [vmem:[%s24684_s23 + $0x74] ss:$8 sps:$4 sm:$0x7f]  }
0x1c3b   :  { %13014 = vmatprep.subr.bf16.mxu1 %v19513_v57  ;;  %v19561_v57 = vld [vmem:[%s24684_s23 + $0x70] ss:$8 sps:$4 sm:$0x7f]  }
0x1c3e   :  { %13015 = vmatpush1.bf16.msra.mxu1 %v19511_v59  ;;  %v13908_v59 = vsel %vm122_vm0, %v19561_v57, 0 }
0x1c3f   :  { %13016 = vmatprep.subr.bf16.mxu1 %v19516_v60  ;;  %v19564_v60 = vld [vmem:[%s24684_s23 + $0x84] ss:$8 sps:$4 sm:$0xff]  }
0x1c42   :  { %13017 = vmatpush1.bf16.msra.mxu1 %v19514_v62  ;;  %v13876_v62 = vrot.slane %v13594_v27, 1 }
0x1c43   :  { %17615 = vmatprep.subr.msk.bf16.mxu1 %vm612_vm5, %v19517_v0  ;;  %v13880_v0 = vrot.slane %v13601_v30, 2  ;;  %v19573_v30 = vld [vmem:[%s24644_s10 + $0x28] sm:$0xff]  }
0x1c46   :  { %13019 = vmatpush1.bf16.msra.mxu1 %v13003_v63 }
0x1c47   :  { %13135 = vmatprep.subr.bf16.mxu1 %v19522_v3 }
0x1c49   :  { %17616 = vmatmul.mubr.msk.bf16.vlgmr.msra.gmra.mrb[160].mxu1 %vm1065_vm8, %v12940_v22  ;;  %v13596_v22 = vshll.u32 %v23773_v17, 16 }
0x1c4a   :  { %13136 = vmatpush1.bf16.msra.mxu1 %v19520_v46  ;;  %13167 = vmatprep.mubr.bf16.mxu1 %v19767_v1  ;;  %v13881_v46 = vor.u32 %v13880_v0, %v13879_v2 }
0x1c4b   :  { %13137 = vmatprep.subr.bf16.mxu1 %v19525_v4  ;;  %v13598_v28 = vrot.slane %v13596_v22, 1  ;;  %v13877_v63 = vrot.slane %v13596_v22, 2 }
0x1c4d   :  { %v13599_v29 = vor.u32 %v13598_v28, %v13594_v27  ;;  %v13878_v3 = vor.u32 %v13877_v63, %v13876_v62  ;;  %v19571_v27 = vld [vmem:[%s24644_s10 + $0x18] sm:$0xff]   ;;  %v19572_v28 = vld [vmem:[%s24644_s10 + $0x20] sm:$0xff]  }
0x1c4e   :  { %13138 = vmatpush1.bf16.msra.mxu1 %v19523_v5  ;;  %v19562_v5 = vld [vmem:[%s24684_s23 + $0x80] ss:$8 sps:$4 sm:$0xff]  }
0x1c4f   :  { %13139 = vmatprep.subr.bf16.mxu1 %v19528_v6  ;;  %v13604_v42 = vsel %vm81_vm1, %v13599_v29, %v13603_v34  ;;  %v13882_v4 = vsel %vm370_vm4, %v13878_v3, %v13881_v46  ;;  %v19565_v6 = vld [vmem:[%s24684_s23 + $0x94] ss:$8 sps:$4 sm:$0x7f]   ;;  %v14072_v29 = vld [vmem:[%s24641_s12] sm:$0x3] }
0x1c50   :  { %v14077_v34 = vrot.slane %v14072_v29, %v20002_v56  ;;  %v19576_v3 = vld [vmem:[%s24644_s10 + $0x40] sm:$0xff]  }
0x1c52   :  { %13140 = vmatpush1.bf16.msra.mxu1 %v19526_v8  ;;  %v19567_v8 = vld [vmem:[%s24684_s23 + $0x90] ss:$8 sps:$4 sm:$0x7f]  }
0x1c53   :  { %13141 = vmatprep.subr.bf16.mxu1 %v19531_v10  ;;  %v14006_v10 = vsel %vm122_vm0, %v19567_v8, 0 }
0x1c56   :  { %13142 = vmatpush1.bf16.msra.mxu1 %v19529_v11  ;;  %v13978_v11 = vrot.slane %v23773_v17, 2 }
0x1c57   :  { %13143 = vmatprep.subr.bf16.mxu1 %v19534_v9  ;;  %v13979_v9 = vrot.slane %v23784_v20, 2 }
0x1c59   :  { %v13980_v12 = vsel %vm474_vm3, %v13978_v11, %v13979_v9 }
0x1c5a   :  { %13144 = vmatpush1.bf16.msra.mxu1 %v19532_v15 }
0x1c5b   :  { %17641 = vmatprep.subr.msk.bf16.mxu1 %vm612_vm5, %v19535_v16 }
0x1c5e   :  { %13146 = vmatpush1.bf16.msra.mxu1 %v13130_v24  ;;  %v13235_v24 = vld [vmem:[%s24646_s9] sm:$0x7] }
0x1c5f   :  { %13638 = vmatprep.subr.bf16.mxu1 %v19540_v25  ;;  %v19568_v25 = vld [vmem:[%s24644_s10] sm:$0xff]  }
0x1c61   :  { %17642 = vmatmul.mubr.msk.bf16.vlgmr.msra.gmra.mrb[160].mxu1 %vm1065_vm8, %v13067_v31  ;;  %v19574_v31 = vld [vmem:[%s24644_s10 + $0x30] sm:$0xff]  }
0x1c62   :  { %13639 = vmatpush1.bf16.msra.mxu1 %v19538_v23  ;;  %13670 = vmatprep.mubr.bf16.mxu1 %v19767_v1  ;;  %v19569_v23 = vld [vmem:[%s24644_s10 + $0x8] sm:$0xff]  }
0x1c63   :  { %17682 = vmatprep.subr.msk.bf16.mxu1 %vm122_vm0, %v19541_v26  ;;  %v19570_v26 = vld [vmem:[%s24644_s10 + $0x10] sm:$0xff]  }
0x1c66   :  { %13641 = vmatpush1.bf16.msra.mxu1 %v13633_v36  ;;  %v14081_v36 = vrot.slane %v14072_v29, %v20007_v58  ;;  %v19591_v29 = vld [vmem:[%s24687_s4] sm:$0xff]  }
0x1c67   :  { %13719 = vmatprep.subr.bf16.mxu1 %v19546_v13 }
0x1c69   :  { %17683 = vmatmul.mubr.msk.bf16.vlgmr.msra.gmra.mrb[164].mxu1 %vm115_vm2, %v13604_v42 }
0x1c6a   :  { %13680 = vmatprep.mubr.bf16.mxu1 %v19767_v1  ;;  %13720 = vmatpush1.bf16.msra.mxu1 %v19544_v44 }
0x1c6b   :  { %17689 = vmatprep.subr.msk.bf16.mxu1 %vm122_vm0, %v19547_v35 }
0x1c6e   :  { %13722 = vmatpush1.bf16.msra.mxu1 %v13714_v43 }
0x1c6f   :  { %13811 = vmatprep.subr.bf16.mxu1 %v19552_v41 }
0x1c71   :  { %17684 = vmatmul.mubr.msk.bf16.gmra.mrb[168].mxu1 %vm115_vm2, %v13607_v45 }
0x1c72   :  { %13751 = vmatprep.mubr.bf16.mxu1 %v19767_v1 }
0x1c79   :  { %17690 = vmatmul.mubr.msk.bf16.vlgmr.msra.gmra.mrb[164].mxu1 %vm115_vm2, %v23773_v17 }
0x1c7a   :  { %13761 = vmatprep.mubr.bf16.mxu1 %v19767_v1  ;;  %13812 = vmatpush1.bf16.msra.mxu1 %v19550_v47 }
0x1c7b   :  { %17700 = vmatprep.subr.msk.bf16.mxu1 %vm122_vm0, %v19553_v49 }
0x1c7e   :  { %13814 = vmatpush1.bf16.msra.mxu1 %v13806_v50 }
0x1c7f   :  { %13913 = vmatprep.subr.bf16.mxu1 %v19558_v38 }
0x1c81   :  { %17691 = vmatmul.mubr.msk.bf16.gmra.mrb[168].mxu1 %vm115_vm2, %v23784_v20  ;;  %v13184_v20 = vld [vmem:[%s24645_s8] sm:$0x7] }
0x1c82   :  { %13843 = vmatprep.mubr.bf16.mxu1 %v19767_v1 }
0x1c89   :  { %17701 = vmatmul.mubr.msk.bf16.vlgmr.msra.gmra.mrb[164].mxu1 %vm115_vm2, %v13780_v53 }
0x1c8a   :  { %13853 = vmatprep.mubr.bf16.mxu1 %v19767_v1  ;;  %13914 = vmatpush1.bf16.msra.mxu1 %v19556_v55 }
0x1c8b   :  { %17711 = vmatprep.subr.msk.bf16.mxu1 %vm122_vm0, %v19559_v33 }
0x1c8e   :  { %13916 = vmatpush1.bf16.msra.mxu1 %v13908_v59 }
0x1c8f   :  { %14011 = vmatprep.subr.bf16.mxu1 %v19564_v60 }
0x1c91   :  { %17702 = vmatmul.mubr.msk.bf16.gmra.mrb[168].mxu1 %vm115_vm2, %v13779_v52 }
0x1c92   :  { %13945 = vmatprep.mubr.bf16.mxu1 %v19767_v1 }
0x1c99   :  { %17712 = vmatmul.mubr.msk.bf16.vlgmr.msra.gmra.mrb[164].mxu1 %vm115_vm2, %v13882_v4  ;;  %v19578_v4 = vld [vmem:[%s24644_s10 + $0x50] sm:$0xff]  }
0x1c9a   :  { %13955 = vmatprep.mubr.bf16.mxu1 %v19767_v1  ;;  %14012 = vmatpush1.bf16.msra.mxu1 %v19562_v5 }
0x1c9b   :  { %17722 = vmatprep.subr.msk.bf16.mxu1 %vm122_vm0, %v19565_v6  ;;  %vm24734_vm0 = vcmask 89088  }
0x1c9c   :  { %vm24735_vm1 = vmmov %vm24734_vm0 }
0x1c9e   :  { %14014 = vmatpush1.bf16.msra.mxu1 %v14006_v10 }
0x1c9f   :  { %14430 = vmatprep.subr.bf16.mxu1 %v19767_v1 }
0x1ca1   :  { %17713 = vmatmul.mubr.msk.bf16.gmra.mrb[168].mxu1 %vm115_vm2, %v13881_v46  ;;  %v19577_v46 = vld [vmem:[%s24644_s10 + $0x48] sm:$0xff]  }
0x1ca2   :  { %14043 = vmatprep.mubr.bf16.mxu1 %v19767_v1 }
0x1ca9   :  { %17723 = vmatmul.mubr.msk.bf16.vlgmr.msra.gmra.mrb[164].mxu1 %vm115_vm2, %v13980_v12 }
0x1caa   :  { %14053 = vmatprep.mubr.bf16.mxu1 %v19767_v1 }
0x1cb1   :  { %17724 = vmatmul.mubr.msk.bf16.gmra.mrb[168].mxu1 %vm115_vm2, %v13979_v9  ;;  %vm24736_vm2 = vcmask 392192  }
0x1cb2   :  { %vm24737_vm4 = vmmov %vm24736_vm2 }
0x1d34   :  { %v13169_v14 = vpop.f32.mrb[160].mxu1 }
0x1d35   :  { %v13171_v15 = vpop.f32.mrb[161].mxu1 }
0x1d36   :  { %v13173_v16 = vpop.f32.mrb[162].mxu1 }
0x1d37   :  { %v13182_v61 = vpack.c.bf16 %v13173_v16, %v13169_v14  ;;  %v13175_v18 = vpop.f32.mrb[163].mxu1 }
0x1d38   :  { %v13183_v19 = vpack.c.bf16 %v13175_v18, %v13171_v15  ;;  %v19579_v18 = vld [vmem:[%s24647_s11] sm:$0xff]  }
0x1d39   :  { %v13189_v17 = vand.u32 %v13182_v61, %v20345_v39 }
0x1d3a   :  { %v13192_v22 = vand.u32 %v13183_v19, %v20345_v39 }
0x1d3c   :  { %13194 = vmatprep.subr.bf16.mxu0 %v13192_v22 }
0x1d3d   :  { %13195 = vmatpush1.bf16.msra.mxu0 %v13189_v17 }
0x1d3e   :  { %13239 = vmatprep.subr.bf16.mxu0 %v13192_v22  ;;  %v19580_v22 = vld [vmem:[%s24647_s11 + $0x8] sm:$0xff]  }
0x1d40   :  { %17643 = vmatmul.mubr.msk.bf16.vlgmr.msra.gmra.mrb[128].mxu0 %vm24734_vm0, %v13184_v20  ;;  %v19582_v20 = vld [vmem:[%s24647_s11 + $0x18] sm:$0xff]   ;;  %vm24741_vm0 = vcmask 228352  }
0x1d41   :  { %13240 = vmatpush1.bf16.msra.mxu0 %v13189_v17  ;;  %13271 = vmatprep.mubr.bf16.mxu0 %v19767_v1  ;;  %v19581_v17 = vld [vmem:[%s24647_s11 + $0x10] sm:$0xff]  }
0x1d42   :  { %13375 = vmatprep.subr.bf16.mxu0 %v19767_v1 }
0x1d48   :  { %17644 = vmatmul.mubr.msk.bf16.vlgmr.msra.gmra.mrb[132].mxu0 %vm24735_vm1, %v13235_v24  ;;  %v19583_v24 = vld [vmem:[%s24647_s11 + $0x20] sm:$0xff]   ;;  %vm24742_vm1 = vmmov %vm24741_vm0 }
0x1d49   :  { %13376 = vmatpush1.bf16.msra.mxu0 %v19568_v25  ;;  %v19584_v25 = vld [vmem:[%s24647_s11 + $0x28] sm:$0xff]  }
0x1d4a   :  { %13377 = vmatprep.subr.bf16.mxu0 %v19767_v1 }
0x1d4d   :  { %13378 = vmatpush1.bf16.msra.mxu0 %v19569_v23  ;;  %v19585_v23 = vld [vmem:[%s24647_s11 + $0x30] sm:$0xff]  }
0x1d4e   :  { %13379 = vmatprep.subr.bf16.mxu0 %v19767_v1 }
0x1d51   :  { %13380 = vmatpush1.bf16.msra.mxu0 %v19570_v26  ;;  %v19586_v26 = vld [vmem:[%s24647_s11 + $0x38] sm:$0xff]  }
0x1d52   :  { %13381 = vmatprep.subr.bf16.mxu0 %v19767_v1 }
0x1d55   :  { %13382 = vmatpush1.bf16.msra.mxu0 %v19571_v27  ;;  %v19587_v27 = vld [vmem:[%s24647_s11 + $0x40] sm:$0xff]  }
0x1d56   :  { %13383 = vmatprep.subr.bf16.mxu0 %v19767_v1 }
0x1d59   :  { %13384 = vmatpush1.bf16.msra.mxu0 %v19572_v28  ;;  %v19588_v28 = vld [vmem:[%s24647_s11 + $0x48] sm:$0xff]  }
0x1d5a   :  { %13385 = vmatprep.subr.bf16.mxu0 %v19767_v1 }
0x1d5d   :  { %13386 = vmatpush1.bf16.msra.mxu0 %v19573_v30  ;;  %v19589_v30 = vld [vmem:[%s24647_s11 + $0x50] sm:$0xff]  }
0x1d5e   :  { %13387 = vmatprep.subr.bf16.mxu0 %v19767_v1 }
0x1d61   :  { %13388 = vmatpush1.bf16.msra.mxu0 %v19574_v31 }
0x1d62   :  { %13389 = vmatprep.subr.bf16.mxu0 %v19767_v1 }
0x1d65   :  { %13390 = vmatpush1.bf16.msra.mxu0 %v19575_v32  ;;  %v19590_v32 = vld [vmem:[%s24686_s0] sm:$0xff]  }
0x1d66   :  { %13391 = vmatprep.subr.bf16.mxu0 %v19767_v1 }
0x1d69   :  { %13392 = vmatpush1.bf16.msra.mxu0 %v19576_v3 }
0x1d6a   :  { %13393 = vmatprep.subr.bf16.mxu0 %v19767_v1 }
0x1d6d   :  { %13394 = vmatpush1.bf16.msra.mxu0 %v19577_v46 }
0x1d6e   :  { %13395 = vmatprep.subr.bf16.mxu0 %v19767_v1 }
0x1d71   :  { %13396 = vmatpush1.bf16.msra.mxu0 %v19578_v4 }
0x1d72   :  { %13503 = vmatprep.subr.bf16.mxu0 %v19767_v1 }
0x1d7c   :  { %v14045_v13 = vpop.f32.mrb[164].mxu1 }
0x1d7d   :  { %v14084_v42 = vadd.f32 %v14077_v34, %v14045_v13  ;;  %v14047_v44 = vpop.f32.mrb[165].mxu1  ;;  %v19594_v13 = vld [vmem:[%s24688_s26 + $0x8] sm:$0xff]  }
0x1d7e   :  { %v14085_v35 = vadd.f32 %v14081_v36, %v14047_v44  ;;  %v14049_v40 = vpop.f32.mrb[166].mxu1  ;;  %v19596_v44 = vld [vmem:[%s24688_s26 + $0x10] sm:$0xff]  }
0x1d7f   :  { %v14092_v21 = vmax.f32 %v14084_v42, 0.0  ;;  %v14086_v43 = vadd.f32 %v14077_v34, %v14049_v40  ;;  %v14051_v41 = vpop.f32.mrb[167].mxu1  ;;  %v19595_v42 = vld [vmem:[%s24642_s7 + $0x8] sm:$0xff]   ;;  %v19598_v40 = vld [vmem:[%s24688_s26 + $0x18] sm:$0xff]  }
0x1d80   :  { %v14093_v45 = vmax.f32 %v14085_v35, 0.0  ;;  %v14087_v47 = vadd.f32 %v14081_v36, %v14051_v41  ;;  %v19597_v35 = vld [vmem:[%s24642_s7 + $0x10] sm:$0xff]   ;;  %v19601_v41 = vld [vmem:[%s24642_s7 + $0x20] sm:$0xff]  }
0x1d81   :  { %v14094_v49 = vmax.f32 %v14086_v43, 0.0  ;;  %v19600_v43 = vld [vmem:[%s24688_s26 + $0x20] sm:$0xff]  }
0x1d82   :  { %v14095_v37 = vmax.f32 %v14087_v47, 0.0  ;;  %v19603_v47 = vld [vmem:[%s24642_s7 + $0x28] sm:$0xff]  }
0x1d83   :  { %v23948_v50 = vpack.c.bf16 %v14094_v49, %v14092_v21  ;;  %v19599_v21 = vld [vmem:[%s24642_s7 + $0x18] sm:$0xff]   ;;  %v19604_v49 = vld [vmem:[%s24688_s26 + $0x30] sm:$0xff]  }
0x1d84   :  { %v23950_v38 = vpack.c.bf16 %v14095_v37, %v14093_v45  ;;  %v14055_v51 = vpop.f32.mrb[168].mxu1  ;;  %v19602_v45 = vld [vmem:[%s24688_s26 + $0x28] sm:$0xff]   ;;  %v19605_v37 = vld [vmem:[%s24642_s7 + $0x30] sm:$0xff]  }
0x1d85   :  { %v14088_v56 = vadd.f32 %v14077_v34, %v14055_v51  ;;  %v14057_v52 = vpop.f32.mrb[169].mxu1  ;;  %v19608_v51 = vld [vmem:[%s24688_s26 + $0x40] sm:$0xff]  }
0x1d86   :  { %v14089_v58 = vadd.f32 %v14081_v36, %v14057_v52  ;;  %v14059_v53 = vpop.f32.mrb[170].mxu1  ;;  %v19610_v52 = vld [vmem:[%s24688_s26 + $0x48] sm:$0x3f]  }
0x1d87   :  { %v14096_v55 = vmax.f32 %v14088_v56, 0.0  ;;  %v14090_v33 = vadd.f32 %v14077_v34, %v14059_v53  ;;  %v14061_v57 = vpop.f32.mrb[171].mxu1  ;;  %v19592_v34 = vld [vmem:[%s24688_s26] sm:$0xff]   ;;  %v14305_v53 = vsel %vm474_vm3, %v19610_v52, 0 }
0x1d88   :  { %v14097_v59 = vmax.f32 %v14089_v58, 0.0  ;;  %v14091_v60 = vadd.f32 %v14081_v36, %v14061_v57  ;;  %v19593_v36 = vld [vmem:[%s24642_s7] sm:$0xff]   ;;  %v19611_v58 = vld [vmem:[%s24642_s7 + $0x48] sm:$0x3f]  }
0x1d89   :  { %v14098_v62 = vmax.f32 %v14090_v33, 0.0  ;;  %14431 = vmatpush1.bf16.msra.mxu1 %v19593_v36  ;;  %v19609_v56 = vld [vmem:[%s24642_s7 + $0x40] sm:$0xff]  }
0x1d8a   :  { %v14099_v0 = vmax.f32 %v14091_v60, 0.0  ;;  %14432 = vmatprep.subr.bf16.mxu1 %v19767_v1  ;;  %v19626_v36 = vld [vmem:[%s24643_s3 + $0xa4] ss:$8 sps:$4 sm:$0xff]  }
0x1d8b   :  { %v23952_v2 = vpack.c.bf16 %v14098_v62, %v14096_v55  ;;  %v14428_v55 = vsel %vm474_vm3, %v19611_v58, 0  ;;  %vm24740_vm3 = vcmask 647168  }
0x1d8c   :  { %v23954_v63 = vpack.c.bf16 %v14099_v0, %v14097_v59  ;;  %v24117_v0 = vld [vmem:[%s24648_s13] ss:$0 sm:$0xff] }
0x1d8d   :  { %v14115_v31 = vsel %vm612_vm5, %v23952_v2, 0  ;;  %14433 = vmatpush1.bf16.msra.mxu1 %v19595_v42  ;;  %v19627_v42 = vld [vmem:[%s24643_s3 + $0xb4] ss:$8 sps:$4 sm:$0x1f]  }
0x1d8e   :  { %14434 = vmatprep.subr.bf16.mxu1 %v19767_v1 }
0x1d91   :  { %14435 = vmatpush1.bf16.msra.mxu1 %v19597_v35  ;;  %v19632_v35 = vld [vmem:[%s24643_s3 + $0x4] ss:$8 sps:$4 sm:$0xff]  }
0x1d92   :  { %14436 = vmatprep.subr.bf16.mxu1 %v19767_v1 }
0x1d95   :  { %14437 = vmatpush1.bf16.msra.mxu1 %v19599_v21 }
0x1d96   :  { %14438 = vmatprep.subr.bf16.mxu1 %v19767_v1 }
0x1d99   :  { %14439 = vmatpush1.bf16.msra.mxu1 %v19601_v41 }
0x1d9a   :  { %14440 = vmatprep.subr.bf16.mxu1 %v19767_v1 }
0x1d9d   :  { %14441 = vmatpush1.bf16.msra.mxu1 %v19603_v47 }
0x1d9e   :  { %14442 = vmatprep.subr.bf16.mxu1 %v19767_v1 }
0x1da1   :  { %14443 = vmatpush1.bf16.msra.mxu1 %v19605_v37 }
0x1da2   :  { %14444 = vmatprep.subr.bf16.mxu1 %v19767_v1 }
0x1e13   :  { %v13228_v5 = vpop.f32.mrb[128].mxu0 }
0x1e14   :  { %v13230_v6 = vpop.f32.mrb[129].mxu0 }
0x1e15   :  { %v13232_v8 = vpop.f32.mrb[130].mxu0 }
0x1e16   :  { %v13233_v10 = vpop.f32.mrb[131].mxu0 }
0x1e1b   :  { %v13273_v11 = vpop.f32.mrb[132].mxu0 }
0x1e1c   :  { %v13280_v9 = vmax.f32 %v13228_v5, %v13273_v11  ;;  %v13275_v12 = vpop.f32.mrb[133].mxu0 }
0x1e1d   :  { %v13281_v14 = vmax.f32 %v13230_v6, %v13275_v12  ;;  %v13277_v15 = vpop.f32.mrb[134].mxu0 }
0x1e1e   :  { %v13278_v16 = vpop.f32.mrb[135].mxu0  ;;  %v13282_v19 = vpack.c.bf16 %v13280_v9, %v13280_v9 }
0x1e1f   :  { %v13283_v61 = vpack.c.bf16 %v13281_v14, %v13281_v14  ;;  %v19614_v14 = vld [vmem:[%s24643_s3 + $0x64] ss:$8 sps:$4 sm:$0xff]  }
0x1e21   :  { %17656 = vmatprep.mubr.msk.bf16.mxu0 %vm24736_vm2, %v13283_v61 }
0x1e22   :  { %13408 = vmatmul.mubr.bf16.vlgmr.msra.gmra.mrb[136].mxu0 %v13282_v19 }
0x1e23   :  { %13504 = vmatpush1.bf16.msra.mxu0 %v19579_v18  ;;  %17668 = vmatprep.mubr.msk.bf16.mxu0 %vm24737_vm4, %v13283_v61  ;;  %vm24745_vm4 = vmmov %vm24736_vm2 }
0x1e24   :  { %13505 = vmatprep.subr.bf16.mxu0 %v19767_v1 }
0x1e27   :  { %13506 = vmatpush1.bf16.msra.mxu0 %v19580_v22 }
0x1e28   :  { %13507 = vmatprep.subr.bf16.mxu0 %v19767_v1 }
0x1e2b   :  { %13508 = vmatpush1.bf16.msra.mxu0 %v19581_v17 }
0x1e2c   :  { %13509 = vmatprep.subr.bf16.mxu0 %v19767_v1 }
0x1e2f   :  { %13510 = vmatpush1.bf16.msra.mxu0 %v19582_v20 }
0x1e30   :  { %13511 = vmatprep.subr.bf16.mxu0 %v19767_v1 }
0x1e33   :  { %13512 = vmatpush1.bf16.msra.mxu0 %v19583_v24  ;;  %v9720_v24 = vrot.slane %v22966_v48, 4  ;;  %v19615_v48 = vld [vmem:[%s24643_s3 + $0x70] ss:$8 sps:$4 sm:$0xff]  }
0x1e34   :  { %13513 = vmatprep.subr.bf16.mxu0 %v19767_v1 }
0x1e37   :  { %13514 = vmatpush1.bf16.msra.mxu0 %v19584_v25 }
0x1e38   :  { %13515 = vmatprep.subr.bf16.mxu0 %v19767_v1 }
0x1e3b   :  { %13516 = vmatpush1.bf16.msra.mxu0 %v19585_v23 }
0x1e3c   :  { %13517 = vmatprep.subr.bf16.mxu0 %v19767_v1 }
0x1e3f   :  { %13518 = vmatpush1.bf16.msra.mxu0 %v19586_v26 }
0x1e40   :  { %13519 = vmatprep.subr.bf16.mxu0 %v19767_v1 }
0x1e43   :  { %13520 = vmatpush1.bf16.msra.mxu0 %v19587_v27  ;;  %v19612_v27 = vld [vmem:[%s24643_s3 + $0x60] ss:$8 sps:$4 sm:$0xff]  }
0x1e44   :  { %13521 = vmatprep.subr.bf16.mxu0 %v19767_v1 }
0x1e47   :  { %13522 = vmatpush1.bf16.msra.mxu0 %v19588_v28 }
0x1e48   :  { %13523 = vmatprep.subr.bf16.mxu0 %v19767_v1 }
0x1e4b   :  { %13524 = vmatpush1.bf16.msra.mxu0 %v19589_v30  ;;  %v19617_v30 = vld [vmem:[%s24643_s3 + $0x74] ss:$8 sps:$4 sm:$0xff]  }
0x1e4c   :  { %14120 = vmatprep.subr.bf16.mxu0 %v23950_v38 }
0x1e4e   :  { %13536 = vmatmul.mubr.bf16.vlgmr.msra.gmra.mrb[140].mxu0 %v13282_v19 }
0x1e4f   :  { %14121 = vmatpush1.bf16.msra.mxu0 %v23948_v50  ;;  %14152 = vmatprep.mubr.bf16.mxu0 %v19767_v1 }
0x1e50   :  { %17726 = vmatprep.subr.msk.bf16.mxu0 %vm612_vm5, %v23954_v63 }
0x1e53   :  { %14123 = vmatpush1.bf16.msra.mxu0 %v14115_v31 }
0x1e54   :  { %14173 = vmatprep.subr.bf16.mxu0 %v23950_v38  ;;  %v19607_v38 = vld [vmem:[%s24642_s7 + $0x38] sm:$0xff]   ;;  %s24748_s7 = sld [smem:[#allocation9_spill]] }
0x1e55   :  { %14445 = vmatpush1.bf16.msra.mxu1 %v19607_v38 }
0x1e56   :  { %17727 = vmatmul.mubr.msk.bf16.vlgmr.msra.gmra.mrb[144].mxu0 %vm24738_vm10, %v19590_v32  ;;  %14446 = vmatprep.subr.bf16.mxu1 %v19767_v1  ;;  %v19618_v32 = vld [vmem:[%s24643_s3 + $0x80] ss:$8 sps:$4 sm:$0xff]   ;;  %vm24746_vm10 = vmmov %vm24740_vm3 }
0x1e57   :  { %14174 = vmatpush1.bf16.msra.mxu0 %v23948_v50  ;;  %14205 = vmatprep.mubr.bf16.mxu0 %v19767_v1  ;;  %v19606_v50 = vld [vmem:[%s24688_s26 + $0x38] sm:$0xff]  }
0x1e58   :  { %17729 = vmatprep.subr.msk.bf16.mxu0 %vm612_vm5, %v23954_v63 }
0x1e59   :  { %14447 = vmatpush1.bf16.msra.mxu1 %v19609_v56 }
0x1e5a   :  { %14448 = vmatprep.subr.bf16.mxu1 %v19767_v1 }
0x1e5b   :  { %14176 = vmatpush1.bf16.msra.mxu0 %v14115_v31  ;;  %v19620_v31 = vld [vmem:[%s24643_s3 + $0x84] ss:$8 sps:$4 sm:$0xff]  }
0x1e5c   :  { %14307 = vmatprep.subr.bf16.mxu0 %v19767_v1 }
0x1e5d   :  { %14449 = vmatpush1.bf16.msra.mxu1 %v14428_v55 }
0x1e5e   :  { %17730 = vmatmul.mubr.msk.bf16.vlgmr.msra.gmra.mrb[148].mxu0 %vm24739_vm9, %v19591_v29  ;;  %v19623_v29 = vld [vmem:[%s24643_s3 + $0x94] ss:$8 sps:$4 sm:$0xff]  }
0x1e5f   :  { %14308 = vmatpush1.bf16.msra.mxu0 %v19592_v34  ;;  %v19621_v34 = vld [vmem:[%s24643_s3 + $0x90] ss:$8 sps:$4 sm:$0xff]  }
0x1e60   :  { %14309 = vmatprep.subr.bf16.mxu0 %v19767_v1 }
0x1e63   :  { %14310 = vmatpush1.bf16.msra.mxu0 %v19594_v13  ;;  %v19624_v13 = vld [vmem:[%s24643_s3 + $0xa0] ss:$8 sps:$4 sm:$0xff]  }
0x1e64   :  { %14311 = vmatprep.subr.bf16.mxu0 %v19767_v1 }
0x1e67   :  { %14312 = vmatpush1.bf16.msra.mxu0 %v19596_v44  ;;  %v19629_v44 = vld [vmem:[%s24643_s3 + $0xb0] ss:$8 sps:$4 sm:$0x1f]  }
0x1e68   :  { %14313 = vmatprep.subr.bf16.mxu0 %v19767_v1 }
0x1e6b   :  { %14314 = vmatpush1.bf16.msra.mxu0 %v19598_v40  ;;  %v14567_v40 = vsel %vm612_vm5, %v19629_v44, 0  ;;  %v19675_v44 = vld [vmem:[%s24643_s3 + $0x150] ss:$8 sps:$4 sm:$0xff]  }
0x1e6c   :  { %14315 = vmatprep.subr.bf16.mxu0 %v19767_v1 }
0x1e6f   :  { %14316 = vmatpush1.bf16.msra.mxu0 %v19600_v43 }
0x1e70   :  { %14317 = vmatprep.subr.bf16.mxu0 %v19767_v1 }
0x1e73   :  { %14318 = vmatpush1.bf16.msra.mxu0 %v19602_v45 }
0x1e74   :  { %14319 = vmatprep.subr.bf16.mxu0 %v19767_v1 }
0x1e77   :  { %14320 = vmatpush1.bf16.msra.mxu0 %v19604_v49 }
0x1e78   :  { %14321 = vmatprep.subr.bf16.mxu0 %v19767_v1 }
0x1e7b   :  { %14322 = vmatpush1.bf16.msra.mxu0 %v19606_v50 }
0x1e7c   :  { %14323 = vmatprep.subr.bf16.mxu0 %v19767_v1 }
0x1e7f   :  { %14324 = vmatpush1.bf16.msra.mxu0 %v19608_v51 }
0x1e80   :  { %14325 = vmatprep.subr.bf16.mxu0 %v19767_v1 }
0x1e83   :  { %14326 = vmatpush1.bf16.msra.mxu0 %v14305_v53 }
0x1e84   :  { %14572 = vmatprep.subr.bf16.mxu0 %v19614_v14  ;;  %v19645_v14 = vld [vmem:[%s24643_s3 + $0x54] ss:$8 sps:$4 sm:$0x1f]  }
0x1ef5   :  { %v13409_v33 = vpop.f32.mrb[136].mxu0 }
0x1ef6   :  { %v13411_v57 = vpop.f32.mrb[137].mxu0 }
0x1ef7   :  { %v13412_v59 = vpop.f32.mrb[138].mxu0 }
0x1ef8   :  { %v13413_v60 = vpop.f32.mrb[139].mxu0 }
0x1f21   :  { %v13537_v62 = vpop.f32.mrb[140].mxu0 }
0x1f22   :  { %v13543_v2 = vmax.f32 %v13409_v33, %v13537_v62  ;;  %v13539_v63 = vpop.f32.mrb[141].mxu0 }
0x1f23   :  { %v13540_v3 = vpop.f32.mrb[142].mxu0  ;;  %v19630_v63 = vld [vmem:[%s24643_s3] ss:$8 sps:$4 sm:$0xff]  }
0x1f24   :  { %v13551_v46 = vadd.f32 %v24117_v0, %v13543_v2  ;;  %v13541_v4 = vpop.f32.mrb[143].mxu0 }
0x1f26   :  { %v13552_v5 = vmax.f32 %v13551_v46, 0.0  ;;  %v19635_v46 = vld [vmem:[%s24643_s3 + $0x14] ss:$8 sps:$4 sm:$0xff]  }
0x1f28   :  { %13553 = vst.msk [vmem:[#allocation2 + $0x6] sm:$0x1] %vm24740_vm3, %v13552_v5  ;;  %v13555_v6 = vrot.slane %v13552_v5, 1  ;;  %v13561_v12 = vrot.slane %v13552_v5, 2  ;;  %v13566_v15 = vrot.slane %v13552_v5, 3  ;;  %v13572_v28 = vrot.slane %v13552_v5, 4 }
0x1f29   :  { %v14154_v8 = vpop.f32.mrb[144].mxu0  ;;  %v19633_v5 = vld [vmem:[%s24643_s3 + $0x10] ss:$8 sps:$4 sm:$0xff]  }
0x1f2a   :  { %13556 = vrot.lane.b32.xlu0 %v13555_v6, %s24693_s6  ;;  %v14156_v10 = vpop.f32.mrb[145].mxu0  ;;  %v19638_v6 = vld [vmem:[%s24643_s3 + $0x24] ss:$8 sps:$4 sm:$0xff]  }
0x1f2b   :  { %v14158_v11 = vpop.f32.mrb[146].mxu0 }
0x1f2c   :  { %v14160_v9 = vpop.f32.mrb[147].mxu0 }
0x1f2e   :  { %13562 = vrot.lane.b32.xlu0 %v13561_v12, %s24692_s5  ;;  %v19642_v12 = vld [vmem:[%s24643_s3 + $0x40] ss:$8 sps:$4 sm:$0xff]  }
0x1f31   :  { %v14207_v16 = vpop.f32.mrb[148].mxu0 }
0x1f32   :  { %v14216_v61 = vmax.f32 %v14154_v8, %v14207_v16  ;;  %13567 = vrot.lane.b32.xlu0 %v13566_v15, %s24694_s30  ;;  %v14209_v18 = vpop.f32.mrb[149].mxu0  ;;  %v19636_v8 = vld [vmem:[%s24643_s3 + $0x20] ss:$8 sps:$4 sm:$0xff]   ;;  %v19647_v15 = vld [vmem:[%s24643_s3 + $0x50] ss:$8 sps:$4 sm:$0x1f]  }
0x1f33   :  { %v14217_v19 = vmax.f32 %v14156_v10, %v14209_v18  ;;  %v14211_v22 = vpop.f32.mrb[150].mxu0  ;;  %v19641_v10 = vld [vmem:[%s24643_s3 + $0x34] ss:$8 sps:$4 sm:$0xff]   ;;  %v14676_v16 = vsel %vm612_vm5, %v19647_v15, 0  ;;  %v19648_v18 = vld [vmem:[%s24643_s3 + $0xc0] ss:$8 sps:$4 sm:$0xff]  }
0x1f34   :  { %v14218_v17 = vmax.f32 %v14158_v11, %v14211_v22  ;;  %v14213_v20 = vpop.f32.mrb[151].mxu0  ;;  %v19639_v11 = vld [vmem:[%s24643_s3 + $0x30] ss:$8 sps:$4 sm:$0xff]  }
0x1f35   :  { %v14219_v25 = vmax.f32 %v14160_v9, %v14213_v20  ;;  %v19644_v9 = vld [vmem:[%s24643_s3 + $0x44] ss:$8 sps:$4 sm:$0xff]   ;;  %v19651_v22 = vld [vmem:[%s24643_s3 + $0xd0] ss:$8 sps:$4 sm:$0xff]   ;;  %v19654_v20 = vld [vmem:[%s24643_s3 + $0xe0] ss:$8 sps:$4 sm:$0xff]  }
0x1f36   :  { %v14220_v23 = vpack.c.bf16 %v14218_v17, %v14216_v61  ;;  %9721 = vrot.lane.b32.xlu0 %v9720_v24, %s24695_s27  ;;  %v19650_v61 = vld [vmem:[%s24643_s3 + $0xc4] ss:$8 sps:$4 sm:$0xff]   ;;  %v19659_v24 = vld [vmem:[%s24643_s3 + $0xf4] ss:$8 sps:$4 sm:$0xff]  }
0x1f37   :  { %v14221_v26 = vpack.c.bf16 %v14219_v25, %v14217_v19  ;;  %v19653_v19 = vld [vmem:[%s24643_s3 + $0xd4] ss:$8 sps:$4 sm:$0xff]   ;;  %v19656_v17 = vld [vmem:[%s24643_s3 + $0xe4] ss:$8 sps:$4 sm:$0xff]   ;;  %v19657_v25 = vld [vmem:[%s24643_s3 + $0xf0] ss:$8 sps:$4 sm:$0xff]  }
0x1f38   :  { %v19709_v15 = vld [vmem:[%s24644_s10 + $0x38] sm:$0xff]  }
0x1f39   :  { %17741 = vmatprep.mubr.msk.bf16.mxu0 %vm24741_vm0, %v14221_v26  ;;  %17752 = vmatprep.mubr.msk.bf16.mxu1 %vm24742_vm1, %v14221_v26  ;;  %v19660_v26 = vld [vmem:[%s24643_s3 + $0x100] ss:$8 sps:$4 sm:$0xff]  }
0x1f3a   :  { %13573 = vrot.lane.b32.xlu0 %v13572_v28, %s24695_s27  ;;  %14340 = vmatmul.mubr.bf16.vlgmr.msra.gmra.mrb[152].mxu0 %v14220_v23  ;;  %v19665_v28 = vld [vmem:[%s24643_s3 + $0x110] ss:$8 sps:$4 sm:$0x1f]  }
0x1f3b   :  { %14463 = vmatmul.mubr.bf16.vlgmr.msra.gmra.mrb[172].mxu1 %v14220_v23  ;;  %14573 = vmatpush1.bf16.msra.mxu0 %v19612_v27  ;;  %v19662_v23 = vld [vmem:[%s24643_s3 + $0x104] ss:$8 sps:$4 sm:$0xff]   ;;  %v19663_v27 = vld [vmem:[%s24643_s3 + $0x114] ss:$8 sps:$4 sm:$0x1f]  }
0x1f3c   :  { %14574 = vmatprep.subr.bf16.mxu0 %v19617_v30  ;;  %14604 = vmatprep.mubr.bf16.mxu0 %v19767_v1  ;;  %v14800_v30 = vsel %vm612_vm5, %v19665_v28, 0 }
0x1f3d   :  { %15152 = vmatprep.mubr.bf16.mxu1 %v19767_v1 }
0x1f3f   :  { %14575 = vmatpush1.bf16.msra.mxu0 %v19615_v48  ;;  %v19668_v48 = vld [vmem:[%s24643_s3 + $0x124] ss:$8 sps:$4 sm:$0xff]  }
0x1f40   :  { %14576 = vmatprep.subr.bf16.mxu0 %v19620_v31  ;;  %v19666_v31 = vld [vmem:[%s24643_s3 + $0x120] ss:$8 sps:$4 sm:$0xff]  }
0x1f43   :  { %14577 = vmatpush1.bf16.msra.mxu0 %v19618_v32 }
0x1f44   :  { %14578 = vmatprep.subr.bf16.mxu0 %v19623_v29  ;;  %v19671_v29 = vld [vmem:[%s24643_s3 + $0x134] ss:$8 sps:$4 sm:$0xff]  }
0x1f47   :  { %14579 = vmatpush1.bf16.msra.mxu0 %v19621_v34  ;;  %v19669_v34 = vld [vmem:[%s24643_s3 + $0x130] ss:$8 sps:$4 sm:$0xff]  }
0x1f48   :  { %14580 = vmatprep.subr.bf16.mxu0 %v19626_v36  ;;  %v19674_v36 = vld [vmem:[%s24643_s3 + $0x144] ss:$8 sps:$4 sm:$0xff]  }
0x1f4b   :  { %14581 = vmatpush1.bf16.msra.mxu0 %v19624_v13  ;;  %v19672_v13 = vld [vmem:[%s24643_s3 + $0x140] ss:$8 sps:$4 sm:$0xff]  }
0x1f4c   :  { %17777 = vmatprep.subr.msk.bf16.mxu0 %vm612_vm5, %v19627_v42  ;;  %v19677_v42 = vld [vmem:[%s24643_s3 + $0x154] ss:$8 sps:$4 sm:$0xff]  }
0x1f4f   :  { %14583 = vmatpush1.bf16.msra.mxu0 %v14567_v40  ;;  %v19678_v40 = vld [vmem:[%s24643_s3 + $0x160] ss:$8 sps:$4 sm:$0xff]  }
0x1f50   :  { %14681 = vmatprep.subr.bf16.mxu0 %v19632_v35  ;;  %v19680_v35 = vld [vmem:[%s24643_s3 + $0x164] ss:$8 sps:$4 sm:$0xff]  }
0x1f9c   :  { %v13557_v21 = vpop.permute.xlu0 %13556 }
0x1f9d   :  { %13559 = vst.msk [vmem:[#allocation2 + $0x6] sm:$0x1] %vm1996_vm12, %v13557_v21 }
0x1f9e   :  { %13560 = vst.msk [vmem:[#allocation2 + $0xe] sm:$0x1] %vm1998_vm13, %v13557_v21  ;;  %v19681_v21 = vld [vmem:[%s24643_s3 + $0x174] ss:$8 sps:$4 sm:$0x1f]  }
0x1fa0   :  { %v13563_v43 = vpop.permute.xlu0 %13562 }
0x1fa1   :  { %13565 = vst.msk [vmem:[#allocation2 + $0xe] sm:$0x1] %vm2004_vm14, %v13563_v43  ;;  %v19683_v43 = vld [vmem:[%s24643_s3 + $0x170] ss:$8 sps:$4 sm:$0x1f]  }
0x1fa4   :  { %v13568_v41 = vpop.permute.xlu0 %13567 }
0x1fa5   :  { %13570 = vst.msk [vmem:[#allocation2 + $0xe] sm:$0x1] %vm2010_vm15, %v13568_v41 }
0x1fa6   :  { %13571 = vst.msk [vmem:[#allocation2 + $0x16] sm:$0x1] %vm2012_vm7, %v13568_v41  ;;  %v14929_v41 = vsel %vm612_vm5, %v19683_v43, 0  ;;  %v19724_v43 = vld [vmem:[%s24649_s14 + $0x40] sm:$0xff]  }
0x1fa8   :  { %v9722_v45 = vpop.permute.xlu0 %9721 }
0x1fa9   :  { %9724 = vst.msk [vmem:[#allocation2 + $0x14] sm:$0x1] %vm2018_vm11, %v9722_v45 }
0x1faa   :  { %9725 = vst.msk [vmem:[#allocation2 + $0x1c] sm:$0x1] %vm2020_vm6, %v9722_v45  ;;  %v19686_v45 = vld [vmem:[%s24643_s3 + $0x184] ss:$8 sps:$4 sm:$0xff]  }
0x1fac   :  { %v13574_v47 = vpop.permute.xlu0 %13573 }
0x1fad   :  { %13576 = vst.msk [vmem:[#allocation2 + $0x16] sm:$0x1] %vm2018_vm11, %v13574_v47 }
0x1fae   :  { %13577 = vst.msk [vmem:[#allocation2 + $0x1e] sm:$0x1] %vm2020_vm6, %v13574_v47  ;;  %v19684_v47 = vld [vmem:[%s24643_s3 + $0x180] ss:$8 sps:$4 sm:$0xff]  }
0x200d   :  { %v14341_v49 = vpop.f32.mrb[152].mxu0 }
0x200e   :  { %v14464_v37 = vpop.f32.mrb[172].mxu1  ;;  %v14343_v50 = vpop.f32.mrb[153].mxu0 }
0x200f   :  { %v14471_v38 = vmax.f32 %v14341_v49, %v14464_v37  ;;  %v14466_v51 = vpop.f32.mrb[173].mxu1  ;;  %v14344_v56 = vpop.f32.mrb[154].mxu0  ;;  %v19689_v49 = vld [vmem:[%s24643_s3 + $0x194] ss:$8 sps:$4 sm:$0xff]   ;;  %v19687_v37 = vld [vmem:[%s24643_s3 + $0x190] ss:$8 sps:$4 sm:$0xff]  }
0x2010   :  { %v14467_v52 = vpop.f32.mrb[174].mxu1  ;;  %v14346_v58 = vpop.f32.mrb[155].mxu0  ;;  %v19692_v50 = vld [vmem:[%s24643_s3 + $0x1a4] ss:$8 sps:$4 sm:$0xff]   ;;  %v19695_v51 = vld [vmem:[%s24643_s3 + $0x1b4] ss:$8 sps:$4 sm:$0xff]  }
0x2011   :  { %v14472_v53 = vmax.f32 %v14344_v56, %v14467_v52  ;;  %v14469_v55 = vpop.f32.mrb[175].mxu1  ;;  %v19693_v56 = vld [vmem:[%s24643_s3 + $0x1b0] ss:$8 sps:$4 sm:$0xff]   ;;  %v19698_v52 = vld [vmem:[%s24643_s3 + $0x1c4] ss:$8 sps:$4 sm:$0xff]  }
0x2012   :  { %v19696_v58 = vld [vmem:[%s24643_s3 + $0x1c0] ss:$8 sps:$4 sm:$0xff]   ;;  %v19701_v55 = vld [vmem:[%s24643_s3 + $0x1d0] ss:$8 sps:$4 sm:$0x1f]  }
0x2013   :  { %v24181_v33 = vpack.c.bf16 %v14472_v53, %v14471_v38  ;;  %v19690_v38 = vld [vmem:[%s24643_s3 + $0x1a0] ss:$8 sps:$4 sm:$0xff]   ;;  %v19699_v53 = vld [vmem:[%s24643_s3 + $0x1d4] ss:$8 sps:$4 sm:$0x1f]  }
0x2015   :  { %v14501_v57 = vshll.u32 %v24181_v33, 16  ;;  %v14499_v59 = vshrl.u32 %v24181_v33, 16  ;;  %v14737_v32 = vrot.slane %v24181_v33, 1 }
0x2017   :  { %v14503_v60 = vrot.slane %v14501_v57, 1  ;;  %v24185_v62 = vrot.slane %v14499_v59, 1  ;;  %v24187_v2 = vrot.slane %v14501_v57, 2  ;;  %v15056_v57 = vsel %vm612_vm5, %v19701_v55, 0  ;;  %v19733_v55 = vld [vmem:[%s24649_s14 + $0x18] sm:$0xff]  }
0x2019   :  { %v14504_v3 = vor.u32 %v14503_v60, %v14499_v59  ;;  %v14866_v4 = vor.u32 %v24187_v2, %v24185_v62  ;;  %v14993_v59 = vrot.slane %v24181_v33, 2 }
0x201b   :  { %17778 = vmatmul.mubr.msk.bf16.vlgmr.msra.gmra.mrb[156].mxu0 %vm1065_vm8, %v14504_v3 }
0x201c   :  { %14682 = vmatpush1.bf16.msra.mxu0 %v19630_v63  ;;  %14713 = vmatprep.mubr.bf16.mxu0 %v19767_v1 }
0x201d   :  { %14683 = vmatprep.subr.bf16.mxu0 %v19635_v46 }
0x2020   :  { %14684 = vmatpush1.bf16.msra.mxu0 %v19633_v5 }
0x2021   :  { %14685 = vmatprep.subr.bf16.mxu0 %v19638_v6  ;;  %v15110_v6 = vld [vmem:[%s24645_s8] sm:$0x7] }
0x2024   :  { %14686 = vmatpush1.bf16.msra.mxu0 %v19636_v8  ;;  %v19703_v8 = vld [vmem:[%s24644_s10 + $0x8] sm:$0xff]  }
0x2025   :  { %14687 = vmatprep.subr.bf16.mxu0 %v19641_v10  ;;  %v19704_v10 = vld [vmem:[%s24644_s10 + $0x10] sm:$0xff]  }
0x2028   :  { %14688 = vmatpush1.bf16.msra.mxu0 %v19639_v11  ;;  %v19705_v11 = vld [vmem:[%s24644_s10 + $0x18] sm:$0xff]  }
0x2029   :  { %14689 = vmatprep.subr.bf16.mxu0 %v19644_v9  ;;  %v19706_v9 = vld [vmem:[%s24644_s10 + $0x20] sm:$0xff]  }
0x202c   :  { %14690 = vmatpush1.bf16.msra.mxu0 %v19642_v12  ;;  %v19707_v12 = vld [vmem:[%s24644_s10 + $0x28] sm:$0xff]  }
0x202d   :  { %17791 = vmatprep.subr.msk.bf16.mxu0 %vm612_vm5, %v19645_v14  ;;  %v19708_v14 = vld [vmem:[%s24644_s10 + $0x30] sm:$0xff]  }
0x2030   :  { %14692 = vmatpush1.bf16.msra.mxu0 %v14676_v16  ;;  %v19710_v16 = vld [vmem:[%s24644_s10 + $0x40] sm:$0xff]  }
0x2031   :  { %14805 = vmatprep.subr.bf16.mxu0 %v19650_v61  ;;  %v19711_v61 = vld [vmem:[%s24644_s10 + $0x48] sm:$0xff]  }
0x2033   :  { %17792 = vmatmul.mubr.msk.bf16.vlgmr.msra.gmra.mrb[156].mxu0 %vm1065_vm8, %v24181_v33  ;;  %v15161_v33 = vld [vmem:[%s24646_s9] sm:$0x7]  ;;  %s19775_s9 = smov 1  }
0x2034   :  { %14806 = vmatpush1.bf16.msra.mxu0 %v19648_v18  ;;  %14837 = vmatprep.mubr.bf16.mxu0 %v19767_v1  ;;  %v19712_v18 = vld [vmem:[%s24644_s10 + $0x50] sm:$0xff]  }
0x2035   :  { %14807 = vmatprep.subr.bf16.mxu0 %v19653_v19 }
0x2038   :  { %14808 = vmatpush1.bf16.msra.mxu0 %v19651_v22 }
0x2039   :  { %14809 = vmatprep.subr.bf16.mxu0 %v19656_v17 }
0x203c   :  { %14810 = vmatpush1.bf16.msra.mxu0 %v19654_v20 }
0x203d   :  { %14811 = vmatprep.subr.bf16.mxu0 %v19659_v24 }
0x2040   :  { %14812 = vmatpush1.bf16.msra.mxu0 %v19657_v25 }
0x2041   :  { %14813 = vmatprep.subr.bf16.mxu0 %v19662_v23 }
0x2044   :  { %14814 = vmatpush1.bf16.msra.mxu0 %v19660_v26 }
0x2045   :  { %17817 = vmatprep.subr.msk.bf16.mxu0 %vm612_vm5, %v19663_v27 }
0x2048   :  { %14816 = vmatpush1.bf16.msra.mxu0 %v14800_v30 }
0x2049   :  { %14934 = vmatprep.subr.bf16.mxu0 %v19668_v48  ;;  %v19713_v48 = vld [vmem:[%s24647_s11] sm:$0xff]  }
0x204b   :  { %17818 = vmatmul.mubr.msk.bf16.vlgmr.msra.gmra.mrb[156].mxu0 %vm1065_vm8, %v14737_v32  ;;  %v19714_v32 = vld [vmem:[%s24647_s11 + $0x8] sm:$0xff]  }
0x204c   :  { %14935 = vmatpush1.bf16.msra.mxu0 %v19666_v31  ;;  %14966 = vmatprep.mubr.bf16.mxu0 %v19767_v1 }
0x204d   :  { %14936 = vmatprep.subr.bf16.mxu0 %v19671_v29  ;;  %v19715_v29 = vld [vmem:[%s24647_s11 + $0x10] sm:$0xff]  }
0x2050   :  { %14937 = vmatpush1.bf16.msra.mxu0 %v19669_v34  ;;  %v19716_v34 = vld [vmem:[%s24647_s11 + $0x18] sm:$0xff]  }
0x2051   :  { %14938 = vmatprep.subr.bf16.mxu0 %v19674_v36  ;;  %v19717_v36 = vld [vmem:[%s24647_s11 + $0x20] sm:$0xff]  }
0x2054   :  { %14939 = vmatpush1.bf16.msra.mxu0 %v19672_v13  ;;  %v19718_v13 = vld [vmem:[%s24647_s11 + $0x28] sm:$0xff]  }
0x2055   :  { %14940 = vmatprep.subr.bf16.mxu0 %v19677_v42  ;;  %v19719_v42 = vld [vmem:[%s24647_s11 + $0x30] sm:$0xff]  }
0x2058   :  { %14941 = vmatpush1.bf16.msra.mxu0 %v19675_v44  ;;  %v19720_v44 = vld [vmem:[%s24647_s11 + $0x38] sm:$0xff]  }
0x2059   :  { %14942 = vmatprep.subr.bf16.mxu0 %v19680_v35  ;;  %v19721_v35 = vld [vmem:[%s24647_s11 + $0x40] sm:$0xff]  }
0x205c   :  { %14943 = vmatpush1.bf16.msra.mxu0 %v19678_v40  ;;  %v19722_v40 = vld [vmem:[%s24647_s11 + $0x48] sm:$0xff]  }
0x205d   :  { %17843 = vmatprep.subr.msk.bf16.mxu0 %vm612_vm5, %v19681_v21  ;;  %v19723_v21 = vld [vmem:[%s24647_s11 + $0x50] sm:$0xff]   ;;  %s24749_s11 = sld [smem:[#allocation10_spill]] }
0x2060   :  { %14945 = vmatpush1.bf16.msra.mxu0 %v14929_v41  ;;  %v19725_v41 = vld [vmem:[%s24649_s14] sm:$0xff]  }
0x2061   :  { %15061 = vmatprep.subr.bf16.mxu0 %v19686_v45  ;;  %v19726_v45 = vld [vmem:[%s24649_s14 + $0x48] sm:$0xff]  }
0x2063   :  { %17844 = vmatmul.mubr.msk.bf16.vlgmr.msra.gmra.mrb[156].mxu0 %vm1065_vm8, %v14866_v4 }
0x2064   :  { %15062 = vmatpush1.bf16.msra.mxu0 %v19684_v47  ;;  %15093 = vmatprep.mubr.bf16.mxu0 %v19767_v1  ;;  %v19727_v47 = vld [vmem:[%s24649_s14 + $0x8] sm:$0xff]  }
0x2065   :  { %15063 = vmatprep.subr.bf16.mxu0 %v19689_v49  ;;  %v19728_v49 = vld [vmem:[%s24649_s14 + $0x80] sm:$0xff]  }
0x2068   :  { %15064 = vmatpush1.bf16.msra.mxu0 %v19687_v37  ;;  %v19729_v37 = vld [vmem:[%s24649_s14 + $0x50] sm:$0xff]  }
0x2069   :  { %15065 = vmatprep.subr.bf16.mxu0 %v19692_v50  ;;  %v19730_v50 = vld [vmem:[%s24649_s14 + $0x10] sm:$0xff]  }
0x206c   :  { %15066 = vmatpush1.bf16.msra.mxu0 %v19690_v38  ;;  %v19731_v38 = vld [vmem:[%s24649_s14 + $0x88] sm:$0xff]  }
0x206d   :  { %15067 = vmatprep.subr.bf16.mxu0 %v19695_v51  ;;  %v19732_v51 = vld [vmem:[%s24649_s14 + $0x58] sm:$0xff]  }
0x2070   :  { %15068 = vmatpush1.bf16.msra.mxu0 %v19693_v56 }
0x2071   :  { %15069 = vmatprep.subr.bf16.mxu0 %v19698_v52 }
0x2074   :  { %15070 = vmatpush1.bf16.msra.mxu0 %v19696_v58 }
0x2075   :  { %17869 = vmatprep.subr.msk.bf16.mxu0 %vm612_vm5, %v19699_v53  ;;  %vm24743_vm5 = vcmask 89088  }
0x2078   :  { %15072 = vmatpush1.bf16.msra.mxu0 %v15056_v57  ;;  %v19734_v57 = vld [vmem:[%s24649_s14 + $0x90] sm:$0xff]  }
0x2079   :  { %17944 = vmatprep.subr.bf16.mxu0 %v19724_v43 }
0x207b   :  { %17870 = vmatmul.mubr.msk.bf16.vlgmr.msra.gmra.mrb[156].mxu0 %vm1065_vm8, %v14993_v59  ;;  %vm24744_vm8 = vmmov %vm24743_vm5  ;;  %v19735_v59 = vld [vmem:[%s24649_s14 + $0x60] sm:$0xff]  }
0x207c   :  { %17945 = vmatpush3.bf16.msra.mxu0 %v19725_v41  ;;  %v19757_v41 = vld [vmem:[%s24651_s18] sm:$0xff]  }
0x207d   :  { %17946 = vmatprep.subr.bf16.mxu0 %v19726_v45  ;;  %v19758_v45 = vld [vmem:[%s24651_s18 + $0x8] sm:$0xff]  }
0x2080   :  { %17947 = vmatpush3.bf16.msra.mxu0 %v19727_v47  ;;  %v19759_v47 = vld [vmem:[%s24651_s18 + $0x10] sm:$0xff]  }
0x2081   :  { %17948 = vmatprep.subr.bf16.mxu0 %v19729_v37 }
0x2084   :  { %17949 = vmatpush3.bf16.msra.mxu0 %v19730_v50 }
0x2085   :  { %17950 = vmatprep.subr.bf16.mxu0 %v19732_v51 }
0x2088   :  { %17951 = vmatpush3.bf16.msra.mxu0 %v19733_v55 }
0x2089   :  { %17952 = vmatprep.subr.bf16.mxu0 %v19735_v59 }
0x214e   :  { %v15095_v60 = vpop.f32.mrb[156].mxu0 }
0x214f   :  { %v15097_v62 = vpop.f32.mrb[157].mxu0 }
0x2150   :  { %v15099_v2 = vpop.f32.mrb[158].mxu0 }
0x2151   :  { %v15108_v63 = vpack.c.bf16 %v15099_v2, %v15095_v60  ;;  %v15101_v3 = vpop.f32.mrb[159].mxu0  ;;  %v19736_v60 = vld [vmem:[%s24649_s14 + $0x20] sm:$0xff]  }
0x2152   :  { %v15109_v46 = vpack.c.bf16 %v15101_v3, %v15097_v62  ;;  %v19737_v62 = vld [vmem:[%s24649_s14 + $0x98] sm:$0xff]   ;;  %17953 = vmatpush3.bf16.msra.mxu0 %v19736_v60 }
0x2153   :  { %v15115_v5 = vand.u32 %v15108_v63, %v20345_v39  ;;  %v19738_v63 = vld [vmem:[%s24649_s14 + $0x68] sm:$0xff]  }
0x2154   :  { %v15118_v4 = vand.u32 %v15109_v46, %v20345_v39  ;;  %v19702_v39 = vld [vmem:[%s24644_s10] sm:$0xff]   ;;  %17954 = vmatprep.subr.bf16.mxu0 %v19738_v63 }
0x2155   :  { %v19761_v63 = vld [vmem:[%s24651_s18 + $0x20] sm:$0xff]  }
0x2156   :  { %15120 = vmatprep.subr.bf16.mxu1 %v15118_v4 }
0x2157   :  { %15121 = vmatpush1.bf16.msra.mxu1 %v15115_v5 }
0x2158   :  { %15165 = vmatprep.subr.bf16.mxu1 %v15118_v4 }
0x215a   :  { %17871 = vmatmul.mubr.msk.bf16.vlgmr.msra.gmra.mrb[176].mxu1 %vm24743_vm5, %v15110_v6  ;;  %v19740_v6 = vld [vmem:[%s24649_s14 + $0xa0] sm:$0xff]   ;;  %vm16070_vm5 = vcmask 7168  }
0x215b   :  { %15166 = vmatpush1.bf16.msra.mxu1 %v15115_v5  ;;  %15197 = vmatprep.mubr.bf16.mxu1 %v19767_v1  ;;  %v19739_v5 = vld [vmem:[%s24649_s14 + $0x28] sm:$0xff]  }
0x215c   :  { %15301 = vmatprep.subr.bf16.mxu1 %v19767_v1  ;;  %17955 = vmatpush3.bf16.msra.mxu0 %v19739_v5 }
0x2162   :  { %17872 = vmatmul.mubr.msk.bf16.vlgmr.msra.gmra.mrb[180].mxu1 %vm24744_vm8, %v15161_v33  ;;  %vm16072_vm8 = vcmask 15360  }
0x2163   :  { %15302 = vmatpush1.bf16.msra.mxu1 %v19702_v39 }
0x2164   :  { %15303 = vmatprep.subr.bf16.mxu1 %v19767_v1 }
0x2167   :  { %15304 = vmatpush1.bf16.msra.mxu1 %v19703_v8  ;;  %v19741_v8 = vld [vmem:[%s24649_s14 + $0x70] sm:$0xff]  }
0x2168   :  { %15305 = vmatprep.subr.bf16.mxu1 %v19767_v1  ;;  %17956 = vmatprep.subr.bf16.mxu0 %v19741_v8 }
0x216b   :  { %15306 = vmatpush1.bf16.msra.mxu1 %v19704_v10 }
0x216c   :  { %15307 = vmatprep.subr.bf16.mxu1 %v19767_v1 }
0x216f   :  { %15308 = vmatpush1.bf16.msra.mxu1 %v19705_v11  ;;  %v19742_v11 = vld [vmem:[%s24649_s14 + $0x30] sm:$0xff]  }
0x2170   :  { %15309 = vmatprep.subr.bf16.mxu1 %v19767_v1  ;;  %17957 = vmatpush3.bf16.msra.mxu0 %v19742_v11 }
0x2173   :  { %15310 = vmatpush1.bf16.msra.mxu1 %v19706_v9  ;;  %v19743_v9 = vld [vmem:[%s24649_s14 + $0xa8] sm:$0xff]  }
0x2174   :  { %15311 = vmatprep.subr.bf16.mxu1 %v19767_v1 }
0x2177   :  { %15312 = vmatpush1.bf16.msra.mxu1 %v19707_v12  ;;  %v19744_v12 = vld [vmem:[%s24649_s14 + $0x78] sm:$0xff]  }
0x2178   :  { %15313 = vmatprep.subr.bf16.mxu1 %v19767_v1  ;;  %17958 = vmatprep.subr.bf16.mxu0 %v19744_v12 }
0x217b   :  { %15314 = vmatpush1.bf16.msra.mxu1 %v19708_v14  ;;  %v19745_v14 = vld [vmem:[%s24649_s14 + $0x38] sm:$0xff]  }
0x217c   :  { %15315 = vmatprep.subr.bf16.mxu1 %v19767_v1  ;;  %17959 = vmatpush3.bf16.msra.mxu0 %v19745_v14 }
0x217f   :  { %15316 = vmatpush1.bf16.msra.mxu1 %v19709_v15  ;;  %v19746_v15 = vld [vmem:[%s24649_s14 + $0xb0] sm:$0xff]  }
0x2180   :  { %15317 = vmatprep.subr.bf16.mxu1 %v19767_v1 }
0x2183   :  { %15318 = vmatpush1.bf16.msra.mxu1 %v19710_v16 }
0x2184   :  { %15319 = vmatprep.subr.bf16.mxu1 %v19767_v1 }
0x2187   :  { %15320 = vmatpush1.bf16.msra.mxu1 %v19711_v61  ;;  %v19747_v61 = vld [vmem:[%s24649_s14 + $0xb8] sm:$0xff]  }
0x2188   :  { %15321 = vmatprep.subr.bf16.mxu1 %v19767_v1 }
0x218b   :  { %15322 = vmatpush1.bf16.msra.mxu1 %v19712_v18 }
0x218c   :  { %15429 = vmatprep.subr.bf16.mxu1 %v19767_v1 }
0x222d   :  { %v15154_v19 = vpop.f32.mrb[176].mxu1 }
0x222e   :  { %v15156_v22 = vpop.f32.mrb[177].mxu1 }
0x222f   :  { %v15158_v17 = vpop.f32.mrb[178].mxu1 }
0x2230   :  { %v15159_v20 = vpop.f32.mrb[179].mxu1 }
0x2231   :  { %v19773_v20 = vmov 0.0  }
0x2232   :  { %17982 = vmatprep.subr.bf16.mxu0 %v19773_v20 }
0x2235   :  { %v15199_v24 = vpop.f32.mrb[180].mxu1 }
0x2236   :  { %v15206_v25 = vmax.f32 %v15154_v19, %v15199_v24  ;;  %v15201_v23 = vpop.f32.mrb[181].mxu1  ;;  %v19748_v19 = vld [vmem:[%s24649_s14 + $0xc0] sm:$0xff]  }
0x2237   :  { %v15207_v26 = vmax.f32 %v15156_v22, %v15201_v23  ;;  %v15203_v27 = vpop.f32.mrb[182].mxu1  ;;  %v11646_v22 = vrot.slane %v23543_v7, 4 }
0x2238   :  { %v15204_v28 = vpop.f32.mrb[183].mxu1  ;;  %v15208_v31 = vpack.c.bf16 %v15206_v25, %v15206_v25 }
0x2239   :  { %v15209_v30 = vpack.c.bf16 %v15207_v26, %v15207_v26 }
0x223b   :  { %17884 = vmatprep.mubr.msk.bf16.mxu1 %vm24736_vm2, %v15209_v30 }
0x223c   :  { %15334 = vmatmul.mubr.bf16.vlgmr.msra.gmra.mrb[184].mxu1 %v15208_v31 }
0x223d   :  { %15430 = vmatpush1.bf16.msra.mxu1 %v19713_v48  ;;  %17896 = vmatprep.mubr.msk.bf16.mxu1 %vm24745_vm4, %v15209_v30  ;;  %v19749_v30 = vld [vmem:[%s24650_s16] sm:$0xff]  }
0x223e   :  { %15431 = vmatprep.subr.bf16.mxu1 %v19767_v1 }
0x2241   :  { %15432 = vmatpush1.bf16.msra.mxu1 %v19714_v32 }
0x2242   :  { %15433 = vmatprep.subr.bf16.mxu1 %v19767_v1 }
0x2245   :  { %15434 = vmatpush1.bf16.msra.mxu1 %v19715_v29 }
0x2246   :  { %15435 = vmatprep.subr.bf16.mxu1 %v19767_v1 }
0x2249   :  { %15436 = vmatpush1.bf16.msra.mxu1 %v19716_v34 }
0x224a   :  { %15437 = vmatprep.subr.bf16.mxu1 %v19767_v1 }
0x224d   :  { %15438 = vmatpush1.bf16.msra.mxu1 %v19717_v36 }
0x224e   :  { %15439 = vmatprep.subr.bf16.mxu1 %v19767_v1 }
0x2251   :  { %15440 = vmatpush1.bf16.msra.mxu1 %v19718_v13  ;;  %v19751_v13 = vld [vmem:[%s24650_s16 + $0x10] sm:$0xff]  }
0x2252   :  { %15441 = vmatprep.subr.bf16.mxu1 %v19767_v1 }
0x2255   :  { %15442 = vmatpush1.bf16.msra.mxu1 %v19719_v42  ;;  %v19752_v42 = vld [vmem:[%s24650_s16 + $0x18] sm:$0xff]  }
0x2256   :  { %15443 = vmatprep.subr.bf16.mxu1 %v19767_v1 }
0x2259   :  { %15444 = vmatpush1.bf16.msra.mxu1 %v19720_v44  ;;  %v19753_v44 = vld [vmem:[%s24650_s16 + $0x20] sm:$0xff]  }
0x225a   :  { %15445 = vmatprep.subr.bf16.mxu1 %v19767_v1 }
0x225d   :  { %15446 = vmatpush1.bf16.msra.mxu1 %v19721_v35  ;;  %v19754_v35 = vld [vmem:[%s24650_s16 + $0x28] sm:$0xff]  }
0x225e   :  { %15447 = vmatprep.subr.bf16.mxu1 %v19767_v1 }
0x2261   :  { %15448 = vmatpush1.bf16.msra.mxu1 %v19722_v40  ;;  %v19755_v40 = vld [vmem:[%s24650_s16 + $0x30] sm:$0xff]  }
0x2262   :  { %15449 = vmatprep.subr.bf16.mxu1 %v19767_v1 }
0x2265   :  { %15450 = vmatpush1.bf16.msra.mxu1 %v19723_v21  ;;  %v19756_v21 = vld [vmem:[%s24650_s16 + $0x38] ss:$0 sps:$4 sm:$0xff]  }
0x2266   :  { %15763 = vmatprep.subr.bf16.mxu1 %v19767_v1 }
0x2268   :  { %15462 = vmatmul.mubr.bf16.vlgmr.msra.gmra.mrb[188].mxu1 %v15208_v31  ;;  %v19750_v31 = vld [vmem:[%s24650_s16 + $0x8] sm:$0xff]  }
0x2269   :  { %15764 = vmatpush1.bf16.msra.mxu1 %v19728_v49  ;;  %v19760_v49 = vld [vmem:[%s24651_s18 + $0x18] sm:$0xff]  }
0x226a   :  { %15765 = vmatprep.subr.bf16.mxu1 %v19767_v1 }
0x226d   :  { %15766 = vmatpush1.bf16.msra.mxu1 %v19731_v38 }
0x226e   :  { %15767 = vmatprep.subr.bf16.mxu1 %v19767_v1 }
0x2271   :  { %15768 = vmatpush1.bf16.msra.mxu1 %v19734_v57 }
0x2272   :  { %15769 = vmatprep.subr.bf16.mxu1 %v19767_v1 }
0x2275   :  { %15770 = vmatpush1.bf16.msra.mxu1 %v19737_v62 }
0x2276   :  { %15771 = vmatprep.subr.bf16.mxu1 %v19767_v1 }
0x2279   :  { %15772 = vmatpush1.bf16.msra.mxu1 %v19740_v6 }
0x227a   :  { %15773 = vmatprep.subr.bf16.mxu1 %v19767_v1 }
0x227d   :  { %15774 = vmatpush1.bf16.msra.mxu1 %v19743_v9  ;;  %v17935_v9 = vld [vmem:[%s24748_s7] ss:$0 sm:$0xff] }
0x227e   :  { %15775 = vmatprep.subr.bf16.mxu1 %v19767_v1 }
0x2281   :  { %15776 = vmatpush1.bf16.msra.mxu1 %v19746_v15 }
0x2282   :  { %15777 = vmatprep.subr.bf16.mxu1 %v19767_v1 }
0x2285   :  { %15778 = vmatpush1.bf16.msra.mxu1 %v19747_v61 }
0x2286   :  { %15779 = vmatprep.subr.bf16.mxu1 %v19767_v1 }
0x2289   :  { %15780 = vmatpush1.bf16.msra.mxu1 %v19748_v19  ;;  %v16036_v19 = vand.u32 127, %v571_v54 }
0x228a   :  { %18002 = vmatprep.subr.bf16.mxu1 %v19773_v20 }
0x230f   :  { %v15335_v56 = vpop.f32.mrb[184].mxu1 }
0x2310   :  { %v15337_v52 = vpop.f32.mrb[185].mxu1 }
0x2311   :  { %v15338_v58 = vpop.f32.mrb[186].mxu1  ;;  %v17898_v52 = vld [vmem:[%s24652_s15] ss:$0 sm:$0xff] }
0x2312   :  { %v15339_v53 = vpop.f32.mrb[187].mxu1 }
0x233b   :  { %v15463_v2 = vpop.f32.mrb[188].mxu1 }
0x233c   :  { %v15469_v3 = vmax.f32 %v15335_v56, %v15463_v2  ;;  %v15465_v46 = vpop.f32.mrb[189].mxu1 }
0x233d   :  { %v15466_v4 = vpop.f32.mrb[190].mxu1 }
0x233e   :  { %v15477_v33 = vadd.f32 %v24117_v0, %v15469_v3  ;;  %v15467_v39 = vpop.f32.mrb[191].mxu1  ;;  %v19762_v3 = vld [vmem:[%s24651_s18 + $0x28] ss:$0 sps:$4 sm:$0x33]  }
0x2340   :  { %v15478_v10 = vmax.f32 %v15477_v33, 0.0 }
0x2342   :  { %15479 = vst.msk [vmem:[#allocation2 + $0x7] sm:$0x1] %vm24746_vm10, %v15478_v10  ;;  %v15481_v0 = vrot.slane %v15478_v10, 1  ;;  %v15487_v16 = vrot.slane %v15478_v10, 2  ;;  %v15492_v18 = vrot.slane %v15478_v10, 3  ;;  %v15498_v17 = vrot.slane %v15478_v10, 4 }
0x2344   :  { %15482 = vrot.lane.b32.xlu1 %v15481_v0, %s24693_s6 }
0x2348   :  { %15488 = vrot.lane.b32.xlu1 %v15487_v16, %s24692_s5 }
0x234c   :  { %15493 = vrot.lane.b32.xlu1 %v15492_v18, %s24694_s30  ;;  %s24747_s30 = sld [smem:[#allocation8_spill]]  ;;  %v16021_v18 = vld [vmem:[%s24749_s11] sm:$0xff] }
0x2350   :  { %11647 = vrot.lane.b32.xlu1 %v11646_v22, %s24695_s27 }
0x2352   :  { %v17925_v4 = vld [vmem:[%s24747_s30] ss:$0 sm:$0xff] }
0x2354   :  { %15499 = vrot.lane.b32.xlu1 %v15498_v17, %s24695_s27 }
0x23b6   :  { %v15483_v24 = vpop.permute.xlu1 %15482 }
0x23b7   :  { %15485 = vst.msk [vmem:[#allocation2 + $0x7] sm:$0x1] %vm1996_vm12, %v15483_v24  ;;  %vm15872_vm12 = vcmask 982016  }
0x23b8   :  { %15486 = vst.msk [vmem:[#allocation2 + $0xf] sm:$0x1] %vm1998_vm13, %v15483_v24  ;;  %vm15977_vm13 = vcmask 1041408  }
0x23b9   :  { %v15979_v46 = vsel %vm15977_vm13, %v19762_v3, 0 }
0x23ba   :  { %v15489_v25 = vpop.permute.xlu1 %15488 }
0x23bb   :  { %15491 = vst.msk [vmem:[#allocation2 + $0xf] sm:$0x1] %vm2004_vm14, %v15489_v25  ;;  %vm15973_vm14 = vcmask 687104  }
0x23be   :  { %v15494_v1 = vpop.permute.xlu1 %15493  ;;  %v15504_v23 = vld [vmem:[#allocation2] sm:$0xff] }
0x23bf   :  { %15496 = vst.msk [vmem:[#allocation2 + $0xf] sm:$0x1] %vm2010_vm15, %v15494_v1  ;;  %v15508_v48 = vpack.c.bf16 %v15504_v23, %v15504_v23  ;;  %vm16022_vm15 = vcmask 80896  }
0x23c0   :  { %15497 = vst.msk [vmem:[#allocation2 + $0x17] sm:$0x1] %vm2012_vm7, %v15494_v1  ;;  %vm15719_vm7 = vcmask 130048  }
0x23c2   :  { %v11648_v7 = vpop.permute.xlu1 %11647 }
0x23c3   :  { %11650 = vst.msk [vmem:[#allocation2 + $0x15] sm:$0x1] %vm2018_vm11, %v11648_v7 }
0x23c4   :  { %11651 = vst.msk [vmem:[#allocation2 + $0x1d] sm:$0x1] %vm2020_vm6, %v11648_v7 }
0x23c6   :  { %v15500_v26 = vpop.permute.xlu1 %15499  ;;  %v15505_v27 = vld [vmem:[#allocation2 + $0x8] sm:$0xff] }
0x23c7   :  { %15502 = vst.msk [vmem:[#allocation2 + $0x17] sm:$0x1] %vm2018_vm11, %v15500_v26  ;;  %v15509_v28 = vpack.c.bf16 %v15505_v27, %v15505_v27  ;;  %vm19774_vm11 = vmmov 0  }
0x23c8   :  { %15503 = vst.msk [vmem:[#allocation2 + $0x1f] sm:$0x1] %vm2020_vm6, %v15500_v26  ;;  %vm15876_vm6 = vcmask 1043456  }
0x23c9   :  { %15755 = vmatprep.mubr.bf16.mxu0 %v15509_v28  ;;  %v15878_v43 = vsel %vm15876_vm6, %v19756_v21, 0 }
0x23ca   :  { %15756 = vmatmul.mubr.bf16.vlgmr.msra.gmra.mrb[160].mxu0 %v15508_v48 }
0x23cb   :  { %17983 = vmatpush3.bf16.msra.mxu0 %v19749_v30  ;;  %17998 = vmatprep.mubr.msk.bf16.mxu0 %vm19774_vm11, %v19773_v20 }
0x23cc   :  { %17984 = vmatprep.subr.bf16.mxu0 %v19773_v20 }
0x23ce   :  { %v15506_v29 = vld [vmem:[#allocation2 + $0x10] sm:$0xff] }
0x23cf   :  { %v15507_v32 = vld [vmem:[#allocation2 + $0x18] sm:$0xff]  ;;  %v15510_v36 = vpack.c.bf16 %v15506_v29, %v15506_v29  ;;  %17985 = vmatpush3.bf16.msra.mxu0 %v19750_v31 }
0x23d0   :  { %v15511_v34 = vpack.c.bf16 %v15507_v32, %v15507_v32  ;;  %17986 = vmatprep.subr.bf16.mxu0 %v19773_v20 }
0x23d2   :  { %17924 = vmatprep.mubr.msk.bf16.mxu1 %vm15719_vm7, %v15511_v34 }
0x23d3   :  { %15796 = vmatmul.mubr.bf16.vlgmr.msra.gmra.mrb[192].mxu1 %v15510_v36  ;;  %17987 = vmatpush3.bf16.msra.mxu0 %v19751_v13 }
0x23d4   :  { %17988 = vmatprep.subr.bf16.mxu0 %v19773_v20  ;;  %18014 = vmatprep.mubr.msk.bf16.mxu1 %vm19774_vm11, %v19773_v20 }
0x23d5   :  { %18003 = vmatpush3.bf16.msra.mxu1 %v19757_v41 }
0x23d6   :  { %18004 = vmatprep.subr.bf16.mxu1 %v19773_v20 }
0x23d7   :  { %17989 = vmatpush3.bf16.msra.mxu0 %v19752_v42 }
0x23d8   :  { %17990 = vmatprep.subr.bf16.mxu0 %v19773_v20 }
0x23d9   :  { %18005 = vmatpush3.bf16.msra.mxu1 %v19758_v45 }
0x23da   :  { %18006 = vmatprep.subr.bf16.mxu1 %v19773_v20 }
0x23db   :  { %17991 = vmatpush3.bf16.msra.mxu0 %v19753_v44 }
0x23dc   :  { %17992 = vmatprep.subr.bf16.mxu0 %v19773_v20 }
0x23dd   :  { %18007 = vmatpush3.bf16.msra.mxu1 %v19759_v47 }
0x23de   :  { %18008 = vmatprep.subr.bf16.mxu1 %v19773_v20 }
0x23df   :  { %17993 = vmatpush3.bf16.msra.mxu0 %v19754_v35 }
0x23e0   :  { %17994 = vmatprep.subr.bf16.mxu0 %v19773_v20 }
0x23e1   :  { %18009 = vmatpush3.bf16.msra.mxu1 %v19760_v49 }
0x23e2   :  { %18010 = vmatprep.subr.bf16.mxu1 %v19773_v20 }
0x23e3   :  { %17995 = vmatpush3.bf16.msra.mxu0 %v19755_v40 }
0x23e4   :  { %17996 = vmatprep.subr.bf16.mxu0 %v19773_v20 }
0x23e5   :  { %18011 = vmatpush3.bf16.msra.mxu1 %v19761_v63 }
0x23e6   :  { %18012 = vmatprep.subr.bf16.mxu1 %v19773_v20 }
0x23e7   :  { %17997 = vmatpush3.bf16.msra.mxu0 %v15878_v43 }
0x23e9   :  { %18013 = vmatpush3.bf16.msra.mxu1 %v15979_v46 }
0x249d   :  { %v17960_v37 = vpop.f32.mrb[160].mxu0 }
0x249e   :  { %v17961_v50 = vpop.f32.mrb[161].mxu0 }
0x249f   :  { %v17962_v38 = vadd.f32 %v17961_v50, %v17960_v37  ;;  %v17963_v51 = vpop.f32.mrb[162].mxu0 }
0x24a0   :  { %v17964_v56 = vpop.f32.mrb[163].mxu0 }
0x24a1   :  { %v15758_v58 = vadd.f32 %v17962_v38, %v17898_v52 }
0x24a6   :  { %v15797_v53 = vpop.f32.mrb[192].mxu1 }
0x24a7   :  { %v15798_v55 = vadd.f32 %v15797_v53, %v15758_v58  ;;  %v15799_v57 = vpop.f32.mrb[193].mxu1 }
0x24a8   :  { %v15800_v59 = vpop.f32.mrb[194].mxu1 }
0x24a9   :  { %v15803_v60 = vmax.f32 %v15798_v55, 0.0  ;;  %v15801_v62 = vpop.f32.mrb[195].mxu1 }
0x24ab   :  { %v15804_v2 = vpack.c.bf16 %v15803_v60, %v15803_v60 }
0x24ad   :  { %17999 = vmatmul.mubr.msk.bf16.vlgmr.msra.gmra.mrb[164].mxu0 %vm15872_vm12, %v15804_v2 }
0x2580   :  { %v15914_v5 = vpop.f32.mrb[164].mxu0 }
0x2581   :  { %v15915_v6 = vadd.f32 %v17925_v4, %v15914_v5  ;;  %v18000_v33 = vpop.f32.mrb[165].mxu0 }
0x2582   :  { %v15917_v39 = vpop.f32.mrb[166].mxu0 }
0x2583   :  { %v15920_v8 = vmax.f32 %v15915_v6, 0.0  ;;  %v18001_v10 = vpop.f32.mrb[167].mxu0 }
0x2585   :  { %v15921_v11 = vpack.c.bf16 %v15920_v8, %v15920_v8 }
0x2587   :  { %18015 = vmatmul.mubr.msk.bf16.vlgmr.msra.gmra.mrb[196].mxu1 %vm15973_vm14, %v15921_v11 }
0x265a   :  { %v16015_v0 = vpop.f32.mrb[196].mxu1 }
0x265b   :  { %v16016_v12 = vadd.f32 %v17935_v9, %v16015_v0  ;;  %v18016_v14 = vpop.f32.mrb[197].mxu1 }
0x265c   :  { %v16018_v15 = vpop.f32.mrb[198].mxu1 }
0x265d   :  { %v18017_v16 = vpop.f32.mrb[199].mxu1  ;;  %v16023_v61 = vsel %vm16022_vm15, %v16016_v12, -inf }
0x265e   :  { %16024 = vmax.xlane.f32.xlu0 %v16023_v61 }
0x2674   :  { %16038 = vperm.xlu0 %18411, %v16021_v18  }
0x26eb   :  { %v16025_v22 = vpop.xlane.xlu0 %16024 }
0x26ec   :  { %vm16045_vm9 = vcmp.eq.f32.partialorder %v16016_v12, %v16025_v22  ;;  %v16026_v7 = vsub.f32 %v16016_v12, %v16025_v22 }
0x26ed   :  { %v16046_v17 = vsel %vm16045_vm9, %v16036_v19, 10 }
0x26ee   :  { %v16047_v24 = vsel %vm16022_vm15, %v16046_v17, 2147483647  ;;  %v16027_v23 = vmul.f32 1.442695, %v16026_v7 }
0x26ef   :  { %v16049_v25 = vshra.s32 %v16047_v24, 16  ;;  %v16048_v26 = vand.u32 65535, %v16047_v24 }
0x26f0   :  { %19763 = vpow2.f32 %v16027_v23 }
0x26f1   :  { %v16051_v1 = vcvt.s32.f32 %v16049_v25  ;;  %v16050_v28 = vcvt.s32.f32 %v16048_v26 }
0x26f3   :  { %16052 = vmin.xlane.f32.xlu1 %v16051_v1  ;;  %v16039_v30 = vpop.permute.xlu0 %16038 }
0x26f4   :  { %vm16040_vm0 = vcmp.eq.s32.totalorder %v16036_v19, %v16039_v30 }
0x26f5   :  { %v16041_v32 = vsel %vm16040_vm0, %v16016_v12, 0.0 }
0x26f6   :  { %v16042_v29 = vsel %vm16022_vm15, %v16041_v32, 0.0 }
0x26fa   :  { %v19764_v31 = vpop.eup %19763 }
0x26fb   :  { %v16029_v54 = vsel %vm16022_vm15, %v19764_v31, 0.0 }
0x2780   :  { %v16053_v27 = vpop.xlane.xlu1 %16052 }
0x2781   :  { %vm16054_vm3 = vcmp.eq.f32.partialorder %v16051_v1, %v16053_v27  ;;  %v16059_v34 = vcvt.f32.s32 %v16053_v27 }
0x2782   :  { %v16055_v48 = vsel %vm16054_vm3, %v16050_v28, inf }
0x2783   :  { %16056 = vmin.xlane.f32.xlu1 %v16055_v48  ;;  %v16060_v13 = vshll.u32 %v16059_v34, 16 }
0x2787   :  { %16030 = vadd.xlane.f32.xlu1 %v16029_v54 }
0x278b   :  { %16043 = vadd.xlane.f32.xlu1 %v16042_v29 }
0x2810   :  { %v16057_v36 = vpop.xlane.xlu1 %16056 }
0x2811   :  { %v16058_v42 = vcvt.f32.s32 %v16057_v36 }
0x2813   :  { %v16061_v44 = vadd.s32 %v16060_v13, %v16058_v42 }
0x2814   :  { %v16031_v40 = vpop.xlane.xlu1 %16030 }
0x2815   :  { %vm16063_vm1 = vcmp.eq.s32.totalorder %v16061_v44, %v16021_v18  ;;  %19765 = vlog2.f32 %v16031_v40 }
0x2816   :  { %v17943_v35 = vsel %vm16063_vm1, 1.0, %v19773_v20 }
0x2817   :  { %16067 = vrot.lane.b32.xlu1 %v17943_v35, %s19775_s9 }
0x2818   :  { %v16044_v45 = vpop.xlane.xlu1 %16043 }
0x281f   :  { %v19766_v21 = vpop.eup %19765 }
0x2820   :  { %v16033_v43 = vmul.f32 0.6931472, %v19766_v21 }
0x2822   :  { %v16034_v41 = vadd.f32 %v16033_v43, %v16025_v22 }
0x2824   :  { %v16062_v47 = vsub.f32 %v16034_v41, %v16044_v45 }
0x2889   :  { %v16068_v49 = vpop.permute.xlu1 %16067 }
0x288a   :  { %v16071_v37 = vsel %vm16070_vm5, %v16062_v47, %v16068_v49 }
0x288b   :  { %16073 = vst.msk [vmem:[%s24750_s22] sm:$0xff] %vm16072_vm8, %v16071_v37 }

</bundles_post_ra>
